<compile_context>
chip_gen: v6e
topology: v6e:2x2x1
jax: 0.10.0
libtpu: 0.0.40
codegen_flags: <defaults>
</compile_context>

<pallas_src>
import math

import jax
import jax.numpy as jnp
from jax.experimental import pallas as pl
from jax.experimental.pallas import tpu as pltpu

# ---------------- small hyperparameters (DETR structure, scaled down) ----------
NUM_CLASSES = 6      # DETRModel.__init__(num_classes=...)
NUM_QUERIES = 8      # DETRModel.__init__(num_queries=...)
HIDDEN      = 32     # transformer d_model (256 in real DETR)
NHEADS      = 8      # DETR uses 8 heads
HEAD_DIM    = HIDDEN // NHEADS
FFN         = 64     # dim_feedforward (2048 in real DETR)
BACKBONE_C  = 64     # backbone output channels (2048 in ResNet-50)
PATCH       = 8      # backbone total stride (32 in ResNet-50)
NUM_ENC     = 6      # DETR: 6 encoder layers
NUM_DEC     = 6      # DETR: 6 decoder layers
EPS_LN      = 1e-5
ATTN_SCALE  = 1.0 / math.sqrt(HEAD_DIM)


# ---------------- in-kernel helpers (all f32 elementwise) -----------------------
def _ln(x, g, b):
    mu = jnp.mean(x, axis=-1, keepdims=True)
    var = jnp.mean(jnp.square(x - mu), axis=-1, keepdims=True)
    return (x - mu) * jax.lax.rsqrt(var + EPS_LN) * g + b


def _mha_core(q, k, v):
    """q: (B, Lq, E), k/v: (B, Lk, E) -> (B, Lq, E).

    Heads handled with a static python loop over contiguous feature chunks
    (same split as nn.MultiheadAttention); each head is a batched 3-D einsum
    over the whole batch, softmax in f32.
    """
    outs = []
    for h in range(NHEADS):
        lo, hi = h * HEAD_DIM, (h + 1) * HEAD_DIM
        qh = q[:, :, lo:hi]
        kh = k[:, :, lo:hi]
        vh = v[:, :, lo:hi]
        s = jnp.einsum("bqd,bkd->bqk", qh, kh,
                       preferred_element_type=jnp.float32) * ATTN_SCALE
        s = s - jnp.max(s, axis=-1, keepdims=True)
        p = jnp.exp(s)
        p = p / jnp.sum(p, axis=-1, keepdims=True)
        outs.append(jnp.einsum("bqk,bkd->bqd", p, vh,
                               preferred_element_type=jnp.float32))
    return jnp.concatenate(outs, axis=-1)


# ---------------- Pallas kernels ------------------------------------------------
def _backbone_kernel(x_ref, wb_ref, bb_ref, wp_ref, bp_ref, o_ref):
    """patchify-conv (as matmul) + ReLU + 1x1 input_proj, fused."""
    f = jnp.dot(x_ref[...], wb_ref[...],
                preferred_element_type=jnp.float32) + bb_ref[...]
    f = jnp.maximum(f, 0.0)
    o_ref[...] = jnp.dot(f, wp_ref[...],
                         preferred_element_type=jnp.float32) + bp_ref[...]


def _encoder_stack_kernel(src0_ref, pos_ref,
                          wqk_ref, bqk_ref, wv_ref, bv_ref, wo_ref, bo_ref,
                          w1_ref, b1_ref, w2_ref, b2_ref,
                          n1g_ref, n1b_ref, n2g_ref, n2b_ref,
                          out_ref, state_ref):
    """One full post-norm DETR encoder layer per grid step (layer = program_id)."""
    B, L, E = out_ref.shape

    @pl.when(pl.program_id(0) == 0)
    def _():
        state_ref[...] = src0_ref[...]

    src = state_ref[...]                         # (B, L, E)
    pos = pos_ref[...]
    src2d = src.reshape(B * L, E)
    qin2d = (src + pos).reshape(B * L, E)        # q,k use src+pos; v uses src

    # --- self-attention (fused q|k projection) ---
    qk = jnp.dot(qin2d, wqk_ref[...],
                 preferred_element_type=jnp.float32) + bqk_ref[...]
    v = jnp.dot(src2d, wv_ref[...],
                preferred_element_type=jnp.float32) + bv_ref[...]
    a = _mha_core(qk[:, :E].reshape(B, L, E),
                  qk[:, E:].reshape(B, L, E),
                  v.reshape(B, L, E)).reshape(B * L, E)
    o = jnp.dot(a, wo_ref[...],
                preferred_element_type=jnp.float32) + bo_ref[...]
    x = _ln(src2d + o, n1g_ref[...], n1b_ref[...])

    # --- FFN ---
    h = jnp.maximum(jnp.dot(x, w1_ref[...],
                            preferred_element_type=jnp.float32) + b1_ref[...], 0.0)
    y = jnp.dot(h, w2_ref[...],
                preferred_element_type=jnp.float32) + b2_ref[...]
    x = _ln(x + y, n2g_ref[...], n2b_ref[...])

    x3 = x.reshape(B, L, E)
    state_ref[...] = x3
    out_ref[...] = x3


def _decoder_stack_kernel(mem_ref, pos_ref, qpos_ref,
                          wqk_s_ref, bqk_s_ref, wv_s_ref, bv_s_ref,
                          wo_s_ref, bo_s_ref,
                          wq_c_ref, bq_c_ref, wk_c_ref, bk_c_ref,
                          wv_c_ref, bv_c_ref, wo_c_ref, bo_c_ref,
                          w1_ref, b1_ref, w2_ref, b2_ref,
                          n1g_ref, n1b_ref, n2g_ref, n2b_ref, n3g_ref, n3b_ref,
                          out_ref, state_ref):
    """One full post-norm DETR decoder layer per grid step (layer = program_id)."""
    B, Q, E = out_ref.shape
    L = mem_ref.shape[1]

    @pl.when(pl.program_id(0) == 0)
    def _():
        state_ref[...] = jnp.zeros_like(state_ref)   # DETR: tgt starts at zeros

    tgt = state_ref[...]                         # (B, Q, E)
    mem = mem_ref[...]                           # (B, L, E)
    pos = pos_ref[...]
    qpos = qpos_ref[...]                         # (B, Q, E)

    tgt2d = tgt.reshape(B * Q, E)
    qin2d = (tgt + qpos).reshape(B * Q, E)

    # --- self-attention (q,k from tgt+query_pos, v from tgt) ---
    qk = jnp.dot(qin2d, wqk_s_ref[...],
                 preferred_element_type=jnp.float32) + bqk_s_ref[...]
    v = jnp.dot(tgt2d, wv_s_ref[...],
                preferred_element_type=jnp.float32) + bv_s_ref[...]
    a = _mha_core(qk[:, :E].reshape(B, Q, E),
                  qk[:, E:].reshape(B, Q, E),
                  v.reshape(B, Q, E)).reshape(B * Q, E)
    o = jnp.dot(a, wo_s_ref[...],
                preferred_element_type=jnp.float32) + bo_s_ref[...]
    x = _ln(tgt2d + o, n1g_ref[...], n1b_ref[...])            # (B*Q, E)

    # --- cross-attention (q from tgt+query_pos, k from memory+pos, v from memory)
    qc_in = (x.reshape(B, Q, E) + qpos).reshape(B * Q, E)
    qc = jnp.dot(qc_in, wq_c_ref[...],
                 preferred_element_type=jnp.float32) + bq_c_ref[...]
    kc = jnp.dot((mem + pos).reshape(B * L, E), wk_c_ref[...],
                 preferred_element_type=jnp.float32) + bk_c_ref[...]
    vc = jnp.dot(mem.reshape(B * L, E), wv_c_ref[...],
                 preferred_element_type=jnp.float32) + bv_c_ref[...]
    a = _mha_core(qc.reshape(B, Q, E),
                  kc.reshape(B, L, E),
                  vc.reshape(B, L, E)).reshape(B * Q, E)
    o = jnp.dot(a, wo_c_ref[...],
                preferred_element_type=jnp.float32) + bo_c_ref[...]
    x = _ln(x + o, n2g_ref[...], n2b_ref[...])

    # --- FFN ---
    h = jnp.maximum(jnp.dot(x, w1_ref[...],
                            preferred_element_type=jnp.float32) + b1_ref[...], 0.0)
    y = jnp.dot(h, w2_ref[...],
                preferred_element_type=jnp.float32) + b2_ref[...]
    x = _ln(x + y, n3g_ref[...], n3b_ref[...])

    x3 = x.reshape(B, Q, E)
    state_ref[...] = x3
    out_ref[...] = x3


def _head_kernel(hs_ref, ng_ref, nb_ref, cw_ref, cb_ref,
                 w1_ref, b1_ref, w2_ref, b2_ref, w3_ref, b3_ref, o_ref):
    """Final decoder LayerNorm + class head + 3-layer bbox MLP, packed output."""
    x = _ln(hs_ref[...], ng_ref[...], nb_ref[...])
    logits = jnp.dot(x, cw_ref[...],
                     preferred_element_type=jnp.float32) + cb_ref[...]
    h = jnp.maximum(jnp.dot(x, w1_ref[...],
                            preferred_element_type=jnp.float32) + b1_ref[...], 0.0)
    h = jnp.maximum(jnp.dot(h, w2_ref[...],
                            preferred_element_type=jnp.float32) + b2_ref[...], 0.0)
    boxes = jax.nn.sigmoid(jnp.dot(h, w3_ref[...],
                                   preferred_element_type=jnp.float32) + b3_ref[...])
    o_ref[...] = jnp.concatenate([logits, boxes], axis=-1)


# ---------------- pallas_call wrappers ------------------------------------------
def _const_spec(shape):
    nd = len(shape)
    return pl.BlockSpec(shape, lambda l: (0,) * nd)


def _layer_spec(arr):
    trailing = tuple(arr.shape[1:])
    nt = len(trailing)
    return pl.BlockSpec((None,) + trailing, lambda l: (l,) + (0,) * nt)


_ENC_W = ["wqk", "bqk", "wv", "bv", "wo", "bo",
          "w1", "b1", "w2", "b2", "n1g", "n1b", "n2g", "n2b"]
_DEC_W = ["wqk_s", "bqk_s", "wv_s", "bv_s", "wo_s", "bo_s",
          "wq_c", "bq_c", "wk_c", "bk_c", "wv_c", "bv_c", "wo_c", "bo_c",
          "w1", "b1", "w2", "b2",
          "n1g", "n1b", "n2g", "n2b", "n3g", "n3b"]


def encoder_stack(src, pos, p):
    B, L, E = src.shape
    weights = [p[n] for n in _ENC_W]
    return pl.pallas_call(
        _encoder_stack_kernel,
        grid=(NUM_ENC,),
        in_specs=[_const_spec((B, L, E)), _const_spec((B, L, E))]
        + [_layer_spec(a) for a in weights],
        out_specs=_const_spec((B, L, E)),
        out_shape=jax.ShapeDtypeStruct((B, L, E), jnp.float32),
        scratch_shapes=[pltpu.VMEM((B, L, E), jnp.float32)],
        compiler_params=pltpu.CompilerParams(dimension_semantics=("arbitrary",)),
    )(src, pos, *weights)


def decoder_stack(memory, pos, query_pos, p):
    B, L, E = memory.shape
    Q = query_pos.shape[1]
    weights = [p[n] for n in _DEC_W]
    return pl.pallas_call(
        _decoder_stack_kernel,
        grid=(NUM_DEC,),
        in_specs=[_const_spec((B, L, E)), _const_spec((B, L, E)),
                  _const_spec((B, Q, E))]
        + [_layer_spec(a) for a in weights],
        out_specs=_const_spec((B, Q, E)),
        out_shape=jax.ShapeDtypeStruct((B, Q, E), jnp.float32),
        scratch_shapes=[pltpu.VMEM((B, Q, E), jnp.float32)],
        compiler_params=pltpu.CompilerParams(dimension_semantics=("arbitrary",)),
    )(memory, pos, query_pos, *weights)


# ---------------- model glue ------------------------------------------------------
def position_embedding_sine(B, H, W, hidden_dim):
    """DETR PositionEmbeddingSine (normalize=True), all-valid mask."""
    num_pos_feats = hidden_dim // 2
    temperature = 10000.0
    eps = 1e-6
    not_mask = jnp.ones((B, H, W), jnp.float32)
    y_embed = jnp.cumsum(not_mask, axis=1)
    x_embed = jnp.cumsum(not_mask, axis=2)
    scale = 2 * math.pi
    y_embed = y_embed / (y_embed[:, -1:, :] + eps) * scale
    x_embed = x_embed / (x_embed[:, :, -1:] + eps) * scale
    dim_t = jnp.arange(num_pos_feats, dtype=jnp.float32)
    dim_t = temperature ** (2 * jnp.floor(dim_t / 2) / num_pos_feats)
    pos_x = x_embed[:, :, :, None] / dim_t
    pos_y = y_embed[:, :, :, None] / dim_t
    pos_x = jnp.stack([jnp.sin(pos_x[:, :, :, 0::2]),
                       jnp.cos(pos_x[:, :, :, 1::2])], axis=4).reshape(B, H, W, -1)
    pos_y = jnp.stack([jnp.sin(pos_y[:, :, :, 0::2]),
                       jnp.cos(pos_y[:, :, :, 1::2])], axis=4).reshape(B, H, W, -1)
    pos = jnp.concatenate([pos_y, pos_x], axis=3)          # (B, H, W, hidden)
    return pos.reshape(B, H * W, hidden_dim)


def detr_forward(params, images):
    """images: (B, 3, H, W) NCHW, float32 -> dict(pred_logits, pred_boxes)."""
    B, C, H, W = images.shape
    Hp, Wp = H // PATCH, W // PATCH
    L = Hp * Wp

    # patchify layout in the wrapper (pure data movement); compute in Pallas.
    x = images.reshape(B, C, Hp, PATCH, Wp, PATCH)
    x = x.transpose(0, 2, 4, 1, 3, 5).reshape(B * L, C * PATCH * PATCH)

    # launch 1: backbone conv (as matmul) + ReLU + input_proj
    src = pl.pallas_call(
        _backbone_kernel,
        out_shape=jax.ShapeDtypeStruct((B * L, HIDDEN), jnp.float32),
    )(x, params["backbone_w"], params["backbone_b"],
      params["input_proj_w"], params["input_proj_b"])
    src = src.reshape(B, L, HIDDEN)

    pos = position_embedding_sine(B, Hp, Wp, HIDDEN)

    # launch 2: whole encoder stack
    memory = encoder_stack(src, pos, params["enc"])

    # launch 3: whole decoder stack (tgt initialized to zeros inside the kernel)
    query_pos = jnp.broadcast_to(params["query_embed"][None],
                                 (B, NUM_QUERIES, HIDDEN))
    tgt = decoder_stack(memory, pos, query_pos, params["dec"])

    # launch 4: fused final-norm + class/bbox heads, packed output
    packed = pl.pallas_call(
        _head_kernel,
        out_shape=jax.ShapeDtypeStruct((B * NUM_QUERIES, NUM_CLASSES + 4),
                                       jnp.float32),
    )(tgt.reshape(B * NUM_QUERIES, HIDDEN),
      params["dec_norm_g"], params["dec_norm_b"],
      params["class_w"], params["class_b"],
      params["bbox_w1"], params["bbox_b1"],
      params["bbox_w2"], params["bbox_b2"],
      params["bbox_w3"], params["bbox_b3"])

    pred_logits = packed[:, :NUM_CLASSES].reshape(B, NUM_QUERIES, NUM_CLASSES)
    pred_boxes = packed[:, NUM_CLASSES:].reshape(B, NUM_QUERIES, 4)
    return {"pred_logits": pred_logits, "pred_boxes": pred_boxes}


# ---------------- deterministic parameter init -----------------------------------
def init_params(key):
    keys = iter(jax.random.split(key, 64))

    def w(shape, scale=0.02):
        return scale * jax.random.normal(next(keys), shape, jnp.float32)

    def zeros(shape):
        return jnp.zeros(shape, jnp.float32)

    def ones(shape):
        return jnp.ones(shape, jnp.float32)

    NE, ND, E, F = NUM_ENC, NUM_DEC, HIDDEN, FFN

    enc = dict(
        wqk=w((NE, E, 2 * E)), bqk=zeros((NE, 1, 2 * E)),
        wv=w((NE, E, E)), bv=zeros((NE, 1, E)),
        wo=w((NE, E, E)), bo=zeros((NE, 1, E)),
        w1=w((NE, E, F)), b1=zeros((NE, 1, F)),
        w2=w((NE, F, E)), b2=zeros((NE, 1, E)),
        n1g=ones((NE, 1, E)), n1b=zeros((NE, 1, E)),
        n2g=ones((NE, 1, E)), n2b=zeros((NE, 1, E)),
    )
    dec = dict(
        wqk_s=w((ND, E, 2 * E)), bqk_s=zeros((ND, 1, 2 * E)),
        wv_s=w((ND, E, E)), bv_s=zeros((ND, 1, E)),
        wo_s=w((ND, E, E)), bo_s=zeros((ND, 1, E)),
        wq_c=w((ND, E, E)), bq_c=zeros((ND, 1, E)),
        wk_c=w((ND, E, E)), bk_c=zeros((ND, 1, E)),
        wv_c=w((ND, E, E)), bv_c=zeros((ND, 1, E)),
        wo_c=w((ND, E, E)), bo_c=zeros((ND, 1, E)),
        w1=w((ND, E, F)), b1=zeros((ND, 1, F)),
        w2=w((ND, F, E)), b2=zeros((ND, 1, E)),
        n1g=ones((ND, 1, E)), n1b=zeros((ND, 1, E)),
        n2g=ones((ND, 1, E)), n2b=zeros((ND, 1, E)),
        n3g=ones((ND, 1, E)), n3b=zeros((ND, 1, E)),
    )
    params = dict(
        backbone_w=w((3 * PATCH * PATCH, BACKBONE_C)),
        backbone_b=zeros((1, BACKBONE_C)),
        input_proj_w=w((BACKBONE_C, E)),
        input_proj_b=zeros((1, E)),
        query_embed=w((NUM_QUERIES, E), scale=1.0),
        dec_norm_g=ones((1, E)), dec_norm_b=zeros((1, E)),
        class_w=w((E, NUM_CLASSES)), class_b=zeros((1, NUM_CLASSES)),
        bbox_w1=w((E, E)), bbox_b1=zeros((1, E)),
        bbox_w2=w((E, E)), bbox_b2=zeros((1, E)),
        bbox_w3=w((E, 4)), bbox_b3=zeros((1, 4)),
        enc=enc, dec=dec,
    )
    return params


# ---------------- main ------------------------------------------------------------
if __name__ == "__main__":
    key = jax.random.PRNGKey(0)
    pkey, xkey = jax.random.split(key)
    params = init_params(pkey)

    # NCHW images, like the PyTorch module's `images` argument
    images = jax.random.normal(xkey, (2, 3, 32, 32), jnp.float32)

    fwd = jax.jit(detr_forward)
    out = fwd(params, images)
    out = jax.block_until_ready(out)

    assert out["pred_logits"].shape == (2, NUM_QUERIES, NUM_CLASSES)
    assert out["pred_boxes"].shape == (2, NUM_QUERIES, 4)
    assert bool(jnp.all(jnp.isfinite(out["pred_logits"])))
    assert bool(jnp.all((out["pred_boxes"] >= 0.0) & (out["pred_boxes"] <= 1.0)))

    print("KERNEL_OK")
</pallas_src>

<mosaic_0001>
module attributes {stable_mosaic.version = 11 : i64} {
  func.func @_backbone_kernel(%arg0: memref<32x192xf32, #tpu.memory_space<vmem>>, %arg1: memref<192x64xf32, #tpu.memory_space<vmem>>, %arg2: memref<1x64xf32, #tpu.memory_space<vmem>>, %arg3: memref<64x32xf32, #tpu.memory_space<vmem>>, %arg4: memref<1x32xf32, #tpu.memory_space<vmem>>, %arg5: memref<32x32xf32, #tpu.memory_space<vmem>>) attributes {dimension_semantics = [], scalar_prefetch = 0 : i64, scratch_operands = 0 : i64, tpu.core_type = #tpu.core_type<tc>} {
    %c0 = arith.constant 0 : index
    %c0_0 = arith.constant 0 : index
    %0 = vector.load %arg0[%c0, %c0_0] : memref<32x192xf32, #tpu.memory_space<vmem>>, vector<32x192xf32>
    %c0_1 = arith.constant 0 : index
    %c0_2 = arith.constant 0 : index
    %1 = vector.load %arg1[%c0_1, %c0_2] : memref<192x64xf32, #tpu.memory_space<vmem>>, vector<192x64xf32>
    %cst = arith.constant dense<0.000000e+00> : vector<32x64xf32>
    %2 = tpu.matmul %0, %1, %cst {dimension_numbers = #tpu.dot_dimension_numbers<[1], [0], [0], [1], [0, 0, 1, 1], [], []>} : vector<32x192xf32>, vector<192x64xf32>, vector<32x64xf32> -> vector<32x64xf32>
    %c0_3 = arith.constant 0 : index
    %c0_4 = arith.constant 0 : index
    %3 = vector.load %arg2[%c0_3, %c0_4] : memref<1x64xf32, #tpu.memory_space<vmem>>, vector<1x64xf32>
    %4 = vector.broadcast %3 : vector<1x64xf32> to vector<32x64xf32>
    %5 = arith.addf %2, %4 : vector<32x64xf32>
    %cst_5 = arith.constant 0.000000e+00 : f32
    %6 = vector.broadcast %cst_5 : f32 to vector<32x64xf32>
    %7 = arith.maximumf %5, %6 : vector<32x64xf32>
    %c0_6 = arith.constant 0 : index
    %c0_7 = arith.constant 0 : index
    %8 = vector.load %arg3[%c0_6, %c0_7] : memref<64x32xf32, #tpu.memory_space<vmem>>, vector<64x32xf32>
    %cst_8 = arith.constant dense<0.000000e+00> : vector<32x32xf32>
    %9 = tpu.matmul %7, %8, %cst_8 {dimension_numbers = #tpu.dot_dimension_numbers<[1], [0], [0], [1], [0, 0, 1, 1], [], []>} : vector<32x64xf32>, vector<64x32xf32>, vector<32x32xf32> -> vector<32x32xf32>
    %c0_9 = arith.constant 0 : index
    %c0_10 = arith.constant 0 : index
    %10 = vector.load %arg4[%c0_9, %c0_10] : memref<1x32xf32, #tpu.memory_space<vmem>>, vector<1x32xf32>
    %11 = vector.broadcast %10 : vector<1x32xf32> to vector<32x32xf32>
    %12 = arith.addf %9, %11 : vector<32x32xf32>
    %c0_11 = arith.constant 0 : index
    %c0_12 = arith.constant 0 : index
    %13 = vector.load %arg5[%c0_11, %c0_12] : memref<32x32xf32, #tpu.memory_space<vmem>>, vector<32x32xf32>
    tpu.vector_store %arg5[%c0_11, %c0_12], %12 {strides = array<i32>} : memref<32x32xf32, #tpu.memory_space<vmem>>, vector<32x32xf32>,
    return
  }
}

module attributes {stable_mosaic.version = 11 : i64} {
  func.func @_encoder_stack_kernel(%arg0: i32, %arg1: memref<2x16x32xf32, #tpu.memory_space<vmem>>, %arg2: memref<2x16x32xf32, #tpu.memory_space<vmem>>, %arg3: memref<1x32x64xf32, #tpu.memory_space<vmem>>, %arg4: memref<1x1x64xf32, #tpu.memory_space<vmem>>, %arg5: memref<1x32x32xf32, #tpu.memory_space<vmem>>, %arg6: memref<1x1x32xf32, #tpu.memory_space<vmem>>, %arg7: memref<1x32x32xf32, #tpu.memory_space<vmem>>, %arg8: memref<1x1x32xf32, #tpu.memory_space<vmem>>, %arg9: memref<1x32x64xf32, #tpu.memory_space<vmem>>, %arg10: memref<1x1x64xf32, #tpu.memory_space<vmem>>, %arg11: memref<1x64x32xf32, #tpu.memory_space<vmem>>, %arg12: memref<1x1x32xf32, #tpu.memory_space<vmem>>, %arg13: memref<1x1x32xf32, #tpu.memory_space<vmem>>, %arg14: memref<1x1x32xf32, #tpu.memory_space<vmem>>, %arg15: memref<1x1x32xf32, #tpu.memory_space<vmem>>, %arg16: memref<1x1x32xf32, #tpu.memory_space<vmem>>, %arg17: memref<2x16x32xf32, #tpu.memory_space<vmem>>, %arg18: memref<2x16x32xf32, #tpu.memory_space<vmem>>) attributes {dimension_semantics = [#tpu.dimension_semantics<arbitrary>], iteration_bounds = array<i64: 6>, scalar_prefetch = 0 : i64, scratch_operands = 1 : i64, tpu.core_type = #tpu.core_type<tc>, window_params = [{pipeline_mode = #tpu.pipeline_mode<synchronous>, transform_indices = @transform_0, window_bounds = array<i64: 2, 16, 32>}, {pipeline_mode = #tpu.pipeline_mode<synchronous>, transform_indices = @transform_1, window_bounds = array<i64: 2, 16, 32>}, {transform_indices = @transform_2, window_bounds = array<i64: 1, 32, 64>}, {transform_indices = @transform_3, window_bounds = array<i64: 1, 1, 64>}, {transform_indices = @transform_4, window_bounds = array<i64: 1, 32, 32>}, {transform_indices = @transform_5, window_bounds = array<i64: 1, 1, 32>}, {transform_indices = @transform_6, window_bounds = array<i64: 1, 32, 32>}, {transform_indices = @transform_7, window_bounds = array<i64: 1, 1, 32>}, {transform_indices = @transform_8, window_bounds = array<i64: 1, 32, 64>}, {transform_indices = @transform_9, window_bounds = array<i64: 1, 1, 64>}, {transform_indices = @transform_10, window_bounds = array<i64: 1, 64, 32>}, {transform_indices = @transform_11, window_bounds = array<i64: 1, 1, 32>}, {transform_indices = @transform_12, window_bounds = array<i64: 1, 1, 32>}, {transform_indices = @transform_13, window_bounds = array<i64: 1, 1, 32>}, {transform_indices = @transform_14, window_bounds = array<i64: 1, 1, 32>}, {transform_indices = @transform_15, window_bounds = array<i64: 1, 1, 32>}, {pipeline_mode = #tpu.pipeline_mode<synchronous>, transform_indices = @transform_16, window_bounds = array<i64: 2, 16, 32>}]} {
    %c0_i32 = arith.constant 0 : i32
    %0 = arith.cmpi eq, %arg0, %c0_i32 : i32
    %1 = arith.extui %0 : i1 to i32
    %c0_i32_0 = arith.constant 0 : i32
    %2 = arith.cmpi ne, %1, %c0_i32_0 : i32
    scf.if %2 {
      %c0_109 = arith.constant 0 : index
      %c0_110 = arith.constant 0 : index
      %c0_111 = arith.constant 0 : index
      %237 = vector.load %arg1[%c0_109, %c0_110, %c0_111] : memref<2x16x32xf32, #tpu.memory_space<vmem>>, vector<2x16x32xf32>
      %c0_112 = arith.constant 0 : index
      %c0_113 = arith.constant 0 : index
      %c0_114 = arith.constant 0 : index
      %238 = vector.load %arg18[%c0_112, %c0_113, %c0_114] : memref<2x16x32xf32, #tpu.memory_space<vmem>>, vector<2x16x32xf32>
      tpu.vector_store %arg18[%c0_112, %c0_113, %c0_114], %237 {strides = array<i32>} : memref<2x16x32xf32, #tpu.memory_space<vmem>>, vector<2x16x32xf32>,
    } else {
    }
    %c0 = arith.constant 0 : index
    %c0_1 = arith.constant 0 : index
    %c0_2 = arith.constant 0 : index
    %3 = vector.load %arg18[%c0, %c0_1, %c0_2] : memref<2x16x32xf32, #tpu.memory_space<vmem>>, vector<2x16x32xf32>
    %c0_3 = arith.constant 0 : index
    %c0_4 = arith.constant 0 : index
    %c0_5 = arith.constant 0 : index
    %4 = vector.load %arg2[%c0_3, %c0_4, %c0_5] : memref<2x16x32xf32, #tpu.memory_space<vmem>>, vector<2x16x32xf32>
    %5 = vector.shape_cast %3 : vector<2x16x32xf32> to vector<32x32xf32>
    %6 = arith.addf %3, %4 : vector<2x16x32xf32>
    %7 = vector.shape_cast %6 : vector<2x16x32xf32> to vector<32x32xf32>
    %c0_6 = arith.constant 0 : index
    %c0_7 = arith.constant 0 : index
    %c0_8 = arith.constant 0 : index
    %8 = vector.load %arg3[%c0_6, %c0_7, %c0_8] : memref<1x32x64xf32, #tpu.memory_space<vmem>>, vector<1x32x64xf32>
    %9 = vector.shape_cast %8 : vector<1x32x64xf32> to vector<32x64xf32>
    %cst = arith.constant dense<0.000000e+00> : vector<32x64xf32>
    %10 = tpu.matmul %7, %9, %cst {dimension_numbers = #tpu.dot_dimension_numbers<[1], [0], [0], [1], [0, 0, 1, 1], [], []>} : vector<32x32xf32>, vector<32x64xf32>, vector<32x64xf32> -> vector<32x64xf32>
    %c0_9 = arith.constant 0 : index
    %c0_10 = arith.constant 0 : index
    %c0_11 = arith.constant 0 : index
    %11 = vector.load %arg4[%c0_9, %c0_10, %c0_11] : memref<1x1x64xf32, #tpu.memory_space<vmem>>, vector<1x1x64xf32>
    %12 = vector.shape_cast %11 : vector<1x1x64xf32> to vector<1x64xf32>
    %13 = vector.broadcast %12 : vector<1x64xf32> to vector<32x64xf32>
    %14 = arith.addf %10, %13 : vector<32x64xf32>
    %c0_12 = arith.constant 0 : index
    %c0_13 = arith.constant 0 : index
    %c0_14 = arith.constant 0 : index
    %15 = vector.load %arg5[%c0_12, %c0_13, %c0_14] : memref<1x32x32xf32, #tpu.memory_space<vmem>>, vector<1x32x32xf32>
    %16 = vector.shape_cast %15 : vector<1x32x32xf32> to vector<32x32xf32>
    %cst_15 = arith.constant dense<0.000000e+00> : vector<32x32xf32>
    %17 = tpu.matmul %5, %16, %cst_15 {dimension_numbers = #tpu.dot_dimension_numbers<[1], [0], [0], [1], [0, 0, 1, 1], [], []>} : vector<32x32xf32>, vector<32x32xf32>, vector<32x32xf32> -> vector<32x32xf32>
    %c0_16 = arith.constant 0 : index
    %c0_17 = arith.constant 0 : index
    %c0_18 = arith.constant 0 : index
    %18 = vector.load %arg6[%c0_16, %c0_17, %c0_18] : memref<1x1x32xf32, #tpu.memory_space<vmem>>, vector<1x1x32xf32>
    %19 = vector.shape_cast %18 : vector<1x1x32xf32> to vector<1x32xf32>
    %20 = vector.broadcast %19 : vector<1x32xf32> to vector<32x32xf32>
    %21 = arith.addf %17, %20 : vector<32x32xf32>
    %22 = vector.extract_strided_slice %14 {offsets = [0, 0], sizes = [32, 32], strides = [1, 1]} : vector<32x64xf32> to vector<32x32xf32>
    %23 = vector.shape_cast %22 : vector<32x32xf32> to vector<2x16x32xf32>
    %24 = vector.extract_strided_slice %14 {offsets = [0, 32], sizes = [32, 32], strides = [1, 1]} : vector<32x64xf32> to vector<32x32xf32>
    %25 = vector.shape_cast %24 : vector<32x32xf32> to vector<2x16x32xf32>
    %26 = vector.shape_cast %21 : vector<32x32xf32> to vector<2x16x32xf32>
    %27 = vector.extract_strided_slice %23 {offsets = [0, 0, 0], sizes = [2, 16, 4], strides = [1, 1, 1]} : vector<2x16x32xf32> to vector<2x16x4xf32>
    %28 = vector.extract_strided_slice %25 {offsets = [0, 0, 0], sizes = [2, 16, 4], strides = [1, 1, 1]} : vector<2x16x32xf32> to vector<2x16x4xf32>
    %29 = vector.extract_strided_slice %26 {offsets = [0, 0, 0], sizes = [2, 16, 4], strides = [1, 1, 1]} : vector<2x16x32xf32> to vector<2x16x4xf32>
    "tpu.trace_start"() <{level = 10 : i32, message = "bqd,bkd->bqk"}> : () -> ()
    %cst_19 = arith.constant dense<0.000000e+00> : vector<2x16x16xf32>
    %30 = tpu.matmul %27, %28, %cst_19 {dimension_numbers = #tpu.dot_dimension_numbers<[2], [2], [1], [1], [0, 0, 0, 1, 1, 1], [0], [0]>} : vector<2x16x4xf32>, vector<2x16x4xf32>, vector<2x16x16xf32> -> vector<2x16x16xf32>
    "tpu.trace_stop"() : () -> ()
    %cst_20 = arith.constant 5.000000e-01 : f32
    %31 = vector.broadcast %cst_20 : f32 to vector<2x16x16xf32>
    %32 = arith.mulf %30, %31 : vector<2x16x16xf32>
    %cst_21 = arith.constant dense<0xFF800000> : vector<2x16xf32>
    %33 = vector.multi_reduction <maximumf>, %32, %cst_21 [2] : vector<2x16x16xf32> to vector<2x16xf32>
    %34 = vector.shape_cast %33 : vector<2x16xf32> to vector<2x16x1xf32>
    %35 = vector.broadcast %34 : vector<2x16x1xf32> to vector<2x16x16xf32>
    %36 = arith.subf %32, %35 : vector<2x16x16xf32>
    %37 = math.exp %36 : vector<2x16x16xf32>
    %cst_22 = arith.constant dense<0.000000e+00> : vector<2x16xf32>
    %38 = vector.multi_reduction <add>, %37, %cst_22 [2] : vector<2x16x16xf32> to vector<2x16xf32>
    %39 = vector.shape_cast %38 : vector<2x16xf32> to vector<2x16x1xf32>
    %40 = vector.broadcast %39 : vector<2x16x1xf32> to vector<2x16x16xf32>
    %41 = arith.divf %37, %40 : vector<2x16x16xf32>
    "tpu.trace_start"() <{level = 10 : i32, message = "bqk,bkd->bqd"}> : () -> ()
    %cst_23 = arith.constant dense<0.000000e+00> : vector<2x16x4xf32>
    %42 = tpu.matmul %41, %29, %cst_23 {dimension_numbers = #tpu.dot_dimension_numbers<[2], [1], [1], [2], [0, 0, 0, 1, 1, 2], [0], [0]>} : vector<2x16x16xf32>, vector<2x16x4xf32>, vector<2x16x4xf32> -> vector<2x16x4xf32>
    "tpu.trace_stop"() : () -> ()
    %43 = vector.extract_strided_slice %23 {offsets = [0, 0, 4], sizes = [2, 16, 4], strides = [1, 1, 1]} : vector<2x16x32xf32> to vector<2x16x4xf32>
    %44 = vector.extract_strided_slice %25 {offsets = [0, 0, 4], sizes = [2, 16, 4], strides = [1, 1, 1]} : vector<2x16x32xf32> to vector<2x16x4xf32>
    %45 = vector.extract_strided_slice %26 {offsets = [0, 0, 4], sizes = [2, 16, 4], strides = [1, 1, 1]} : vector<2x16x32xf32> to vector<2x16x4xf32>
    "tpu.trace_start"() <{level = 10 : i32, message = "bqd,bkd->bqk"}> : () -> ()
    %cst_24 = arith.constant dense<0.000000e+00> : vector<2x16x16xf32>
    %46 = tpu.matmul %43, %44, %cst_24 {dimension_numbers = #tpu.dot_dimension_numbers<[2], [2], [1], [1], [0, 0, 0, 1, 1, 1], [0], [0]>} : vector<2x16x4xf32>, vector<2x16x4xf32>, vector<2x16x16xf32> -> vector<2x16x16xf32>
    "tpu.trace_stop"() : () -> ()
    %cst_25 = arith.constant 5.000000e-01 : f32
    %47 = vector.broadcast %cst_25 : f32 to vector<2x16x16xf32>
    %48 = arith.mulf %46, %47 : vector<2x16x16xf32>
    %cst_26 = arith.constant dense<0xFF800000> : vector<2x16xf32>
    %49 = vector.multi_reduction <maximumf>, %48, %cst_26 [2] : vector<2x16x16xf32> to vector<2x16xf32>
    %50 = vector.shape_cast %49 : vector<2x16xf32> to vector<2x16x1xf32>
    %51 = vector.broadcast %50 : vector<2x16x1xf32> to vector<2x16x16xf32>
    %52 = arith.subf %48, %51 : vector<2x16x16xf32>
    %53 = math.exp %52 : vector<2x16x16xf32>
    %cst_27 = arith.constant dense<0.000000e+00> : vector<2x16xf32>
    %54 = vector.multi_reduction <add>, %53, %cst_27 [2] : vector<2x16x16xf32> to vector<2x16xf32>
    %55 = vector.shape_cast %54 : vector<2x16xf32> to vector<2x16x1xf32>
    %56 = vector.broadcast %55 : vector<2x16x1xf32> to vector<2x16x16xf32>
    %57 = arith.divf %53, %56 : vector<2x16x16xf32>
    "tpu.trace_start"() <{level = 10 : i32, message = "bqk,bkd->bqd"}> : () -> ()
    %cst_28 = arith.constant dense<0.000000e+00> : vector<2x16x4xf32>
    %58 = tpu.matmul %57, %45, %cst_28 {dimension_numbers = #tpu.dot_dimension_numbers<[2], [1], [1], [2], [0, 0, 0, 1, 1, 2], [0], [0]>} : vector<2x16x16xf32>, vector<2x16x4xf32>, vector<2x16x4xf32> -> vector<2x16x4xf32>
    "tpu.trace_stop"() : () -> ()
    %59 = vector.extract_strided_slice %23 {offsets = [0, 0, 8], sizes = [2, 16, 4], strides = [1, 1, 1]} : vector<2x16x32xf32> to vector<2x16x4xf32>
    %60 = vector.extract_strided_slice %25 {offsets = [0, 0, 8], sizes = [2, 16, 4], strides = [1, 1, 1]} : vector<2x16x32xf32> to vector<2x16x4xf32>
    %61 = vector.extract_strided_slice %26 {offsets = [0, 0, 8], sizes = [2, 16, 4], strides = [1, 1, 1]} : vector<2x16x32xf32> to vector<2x16x4xf32>
    "tpu.trace_start"() <{level = 10 : i32, message = "bqd,bkd->bqk"}> : () -> ()
    %cst_29 = arith.constant dense<0.000000e+00> : vector<2x16x16xf32>
    %62 = tpu.matmul %59, %60, %cst_29 {dimension_numbers = #tpu.dot_dimension_numbers<[2], [2], [1], [1], [0, 0, 0, 1, 1, 1], [0], [0]>} : vector<2x16x4xf32>, vector<2x16x4xf32>, vector<2x16x16xf32> -> vector<2x16x16xf32>
    "tpu.trace_stop"() : () -> ()
    %cst_30 = arith.constant 5.000000e-01 : f32
    %63 = vector.broadcast %cst_30 : f32 to vector<2x16x16xf32>
    %64 = arith.mulf %62, %63 : vector<2x16x16xf32>
    %cst_31 = arith.constant dense<0xFF800000> : vector<2x16xf32>
    %65 = vector.multi_reduction <maximumf>, %64, %cst_31 [2] : vector<2x16x16xf32> to vector<2x16xf32>
    %66 = vector.shape_cast %65 : vector<2x16xf32> to vector<2x16x1xf32>
    %67 = vector.broadcast %66 : vector<2x16x1xf32> to vector<2x16x16xf32>
    %68 = arith.subf %64, %67 : vector<2x16x16xf32>
    %69 = math.exp %68 : vector<2x16x16xf32>
    %cst_32 = arith.constant dense<0.000000e+00> : vector<2x16xf32>
    %70 = vector.multi_reduction <add>, %69, %cst_32 [2] : vector<2x16x16xf32> to vector<2x16xf32>
    %71 = vector.shape_cast %70 : vector<2x16xf32> to vector<2x16x1xf32>
    %72 = vector.broadcast %71 : vector<2x16x1xf32> to vector<2x16x16xf32>
    %73 = arith.divf %69, %72 : vector<2x16x16xf32>
    "tpu.trace_start"() <{level = 10 : i32, message = "bqk,bkd->bqd"}> : () -> ()
    %cst_33 = arith.constant dense<0.000000e+00> : vector<2x16x4xf32>
    %74 = tpu.matmul %73, %61, %cst_33 {dimension_numbers = #tpu.dot_dimension_numbers<[2], [1], [1], [2], [0, 0, 0, 1, 1, 2], [0], [0]>} : vector<2x16x16xf32>, vector<2x16x4xf32>, vector<2x16x4xf32> -> vector<2x16x4xf32>
    "tpu.trace_stop"() : () -> ()
    %75 = vector.extract_strided_slice %23 {offsets = [0, 0, 12], sizes = [2, 16, 4], strides = [1, 1, 1]} : vector<2x16x32xf32> to vector<2x16x4xf32>
    %76 = vector.extract_strided_slice %25 {offsets = [0, 0, 12], sizes = [2, 16, 4], strides = [1, 1, 1]} : vector<2x16x32xf32> to vector<2x16x4xf32>
    %77 = vector.extract_strided_slice %26 {offsets = [0, 0, 12], sizes = [2, 16, 4], strides = [1, 1, 1]} : vector<2x16x32xf32> to vector<2x16x4xf32>
    "tpu.trace_start"() <{level = 10 : i32, message = "bqd,bkd->bqk"}> : () -> ()
    %cst_34 = arith.constant dense<0.000000e+00> : vector<2x16x16xf32>
    %78 = tpu.matmul %75, %76, %cst_34 {dimension_numbers = #tpu.dot_dimension_numbers<[2], [2], [1], [1], [0, 0, 0, 1, 1, 1], [0], [0]>} : vector<2x16x4xf32>, vector<2x16x4xf32>, vector<2x16x16xf32> -> vector<2x16x16xf32>
    "tpu.trace_stop"() : () -> ()
    %cst_35 = arith.constant 5.000000e-01 : f32
    %79 = vector.broadcast %cst_35 : f32 to vector<2x16x16xf32>
    %80 = arith.mulf %78, %79 : vector<2x16x16xf32>
    %cst_36 = arith.constant dense<0xFF800000> : vector<2x16xf32>
    %81 = vector.multi_reduction <maximumf>, %80, %cst_36 [2] : vector<2x16x16xf32> to vector<2x16xf32>
    %82 = vector.shape_cast %81 : vector<2x16xf32> to vector<2x16x1xf32>
    %83 = vector.broadcast %82 : vector<2x16x1xf32> to vector<2x16x16xf32>
    %84 = arith.subf %80, %83 : vector<2x16x16xf32>
    %85 = math.exp %84 : vector<2x16x16xf32>
    %cst_37 = arith.constant dense<0.000000e+00> : vector<2x16xf32>
    %86 = vector.multi_reduction <add>, %85, %cst_37 [2] : vector<2x16x16xf32> to vector<2x16xf32>
    %87 = vector.shape_cast %86 : vector<2x16xf32> to vector<2x16x1xf32>
    %88 = vector.broadcast %87 : vector<2x16x1xf32> to vector<2x16x16xf32>
    %89 = arith.divf %85, %88 : vector<2x16x16xf32>
    "tpu.trace_start"() <{level = 10 : i32, message = "bqk,bkd->bqd"}> : () -> ()
    %cst_38 = arith.constant dense<0.000000e+00> : vector<2x16x4xf32>
    %90 = tpu.matmul %89, %77, %cst_38 {dimension_numbers = #tpu.dot_dimension_numbers<[2], [1], [1], [2], [0, 0, 0, 1, 1, 2], [0], [0]>} : vector<2x16x16xf32>, vector<2x16x4xf32>, vector<2x16x4xf32> -> vector<2x16x4xf32>
    "tpu.trace_stop"() : () -> ()
    %91 = vector.extract_strided_slice %23 {offsets = [0, 0, 16], sizes = [2, 16, 4], strides = [1, 1, 1]} : vector<2x16x32xf32> to vector<2x16x4xf32>
    %92 = vector.extract_strided_slice %25 {offsets = [0, 0, 16], sizes = [2, 16, 4], strides = [1, 1, 1]} : vector<2x16x32xf32> to vector<2x16x4xf32>
    %93 = vector.extract_strided_slice %26 {offsets = [0, 0, 16], sizes = [2, 16, 4], strides = [1, 1, 1]} : vector<2x16x32xf32> to vector<2x16x4xf32>
    "tpu.trace_start"() <{level = 10 : i32, message = "bqd,bkd->bqk"}> : () -> ()
    %cst_39 = arith.constant dense<0.000000e+00> : vector<2x16x16xf32>
    %94 = tpu.matmul %91, %92, %cst_39 {dimension_numbers = #tpu.dot_dimension_numbers<[2], [2], [1], [1], [0, 0, 0, 1, 1, 1], [0], [0]>} : vector<2x16x4xf32>, vector<2x16x4xf32>, vector<2x16x16xf32> -> vector<2x16x16xf32>
    "tpu.trace_stop"() : () -> ()
    %cst_40 = arith.constant 5.000000e-01 : f32
    %95 = vector.broadcast %cst_40 : f32 to vector<2x16x16xf32>
    %96 = arith.mulf %94, %95 : vector<2x16x16xf32>
    %cst_41 = arith.constant dense<0xFF800000> : vector<2x16xf32>
    %97 = vector.multi_reduction <maximumf>, %96, %cst_41 [2] : vector<2x16x16xf32> to vector<2x16xf32>
    %98 = vector.shape_cast %97 : vector<2x16xf32> to vector<2x16x1xf32>
    %99 = vector.broadcast %98 : vector<2x16x1xf32> to vector<2x16x16xf32>
    %100 = arith.subf %96, %99 : vector<2x16x16xf32>
    %101 = math.exp %100 : vector<2x16x16xf32>
    %cst_42 = arith.constant dense<0.000000e+00> : vector<2x16xf32>
    %102 = vector.multi_reduction <add>, %101, %cst_42 [2] : vector<2x16x16xf32> to vector<2x16xf32>
    %103 = vector.shape_cast %102 : vector<2x16xf32> to vector<2x16x1xf32>
    %104 = vector.broadcast %103 : vector<2x16x1xf32> to vector<2x16x16xf32>
    %105 = arith.divf %101, %104 : vector<2x16x16xf32>
    "tpu.trace_start"() <{level = 10 : i32, message = "bqk,bkd->bqd"}> : () -> ()
    %cst_43 = arith.constant dense<0.000000e+00> : vector<2x16x4xf32>
    %106 = tpu.matmul %105, %93, %cst_43 {dimension_numbers = #tpu.dot_dimension_numbers<[2], [1], [1], [2], [0, 0, 0, 1, 1, 2], [0], [0]>} : vector<2x16x16xf32>, vector<2x16x4xf32>, vector<2x16x4xf32> -> vector<2x16x4xf32>
    "tpu.trace_stop"() : () -> ()
    %107 = vector.extract_strided_slice %23 {offsets = [0, 0, 20], sizes = [2, 16, 4], strides = [1, 1, 1]} : vector<2x16x32xf32> to vector<2x16x4xf32>
    %108 = vector.extract_strided_slice %25 {offsets = [0, 0, 20], sizes = [2, 16, 4], strides = [1, 1, 1]} : vector<2x16x32xf32> to vector<2x16x4xf32>
    %109 = vector.extract_strided_slice %26 {offsets = [0, 0, 20], sizes = [2, 16, 4], strides = [1, 1, 1]} : vector<2x16x32xf32> to vector<2x16x4xf32>
    "tpu.trace_start"() <{level = 10 : i32, message = "bqd,bkd->bqk"}> : () -> ()
    %cst_44 = arith.constant dense<0.000000e+00> : vector<2x16x16xf32>
    %110 = tpu.matmul %107, %108, %cst_44 {dimension_numbers = #tpu.dot_dimension_numbers<[2], [2], [1], [1], [0, 0, 0, 1, 1, 1], [0], [0]>} : vector<2x16x4xf32>, vector<2x16x4xf32>, vector<2x16x16xf32> -> vector<2x16x16xf32>
    "tpu.trace_stop"() : () -> ()
    %cst_45 = arith.constant 5.000000e-01 : f32
    %111 = vector.broadcast %cst_45 : f32 to vector<2x16x16xf32>
    %112 = arith.mulf %110, %111 : vector<2x16x16xf32>
    %cst_46 = arith.constant dense<0xFF800000> : vector<2x16xf32>
    %113 = vector.multi_reduction <maximumf>, %112, %cst_46 [2] : vector<2x16x16xf32> to vector<2x16xf32>
    %114 = vector.shape_cast %113 : vector<2x16xf32> to vector<2x16x1xf32>
    %115 = vector.broadcast %114 : vector<2x16x1xf32> to vector<2x16x16xf32>
    %116 = arith.subf %112, %115 : vector<2x16x16xf32>
    %117 = math.exp %116 : vector<2x16x16xf32>
    %cst_47 = arith.constant dense<0.000000e+00> : vector<2x16xf32>
    %118 = vector.multi_reduction <add>, %117, %cst_47 [2] : vector<2x16x16xf32> to vector<2x16xf32>
    %119 = vector.shape_cast %118 : vector<2x16xf32> to vector<2x16x1xf32>
    %120 = vector.broadcast %119 : vector<2x16x1xf32> to vector<2x16x16xf32>
    %121 = arith.divf %117, %120 : vector<2x16x16xf32>
    "tpu.trace_start"() <{level = 10 : i32, message = "bqk,bkd->bqd"}> : () -> ()
    %cst_48 = arith.constant dense<0.000000e+00> : vector<2x16x4xf32>
    %122 = tpu.matmul %121, %109, %cst_48 {dimension_numbers = #tpu.dot_dimension_numbers<[2], [1], [1], [2], [0, 0, 0, 1, 1, 2], [0], [0]>} : vector<2x16x16xf32>, vector<2x16x4xf32>, vector<2x16x4xf32> -> vector<2x16x4xf32>
    "tpu.trace_stop"() : () -> ()
    %123 = vector.extract_strided_slice %23 {offsets = [0, 0, 24], sizes = [2, 16, 4], strides = [1, 1, 1]} : vector<2x16x32xf32> to vector<2x16x4xf32>
    %124 = vector.extract_strided_slice %25 {offsets = [0, 0, 24], sizes = [2, 16, 4], strides = [1, 1, 1]} : vector<2x16x32xf32> to vector<2x16x4xf32>
    %125 = vector.extract_strided_slice %26 {offsets = [0, 0, 24], sizes = [2, 16, 4], strides = [1, 1, 1]} : vector<2x16x32xf32> to vector<2x16x4xf32>
    "tpu.trace_start"() <{level = 10 : i32, message = "bqd,bkd->bqk"}> : () -> ()
    %cst_49 = arith.constant dense<0.000000e+00> : vector<2x16x16xf32>
    %126 = tpu.matmul %123, %124, %cst_49 {dimension_numbers = #tpu.dot_dimension_numbers<[2], [2], [1], [1], [0, 0, 0, 1, 1, 1], [0], [0]>} : vector<2x16x4xf32>, vector<2x16x4xf32>, vector<2x16x16xf32> -> vector<2x16x16xf32>
    "tpu.trace_stop"() : () -> ()
    %cst_50 = arith.constant 5.000000e-01 : f32
    %127 = vector.broadcast %cst_50 : f32 to vector<2x16x16xf32>
    %128 = arith.mulf %126, %127 : vector<2x16x16xf32>
    %cst_51 = arith.constant dense<0xFF800000> : vector<2x16xf32>
    %129 = vector.multi_reduction <maximumf>, %128, %cst_51 [2] : vector<2x16x16xf32> to vector<2x16xf32>
    %130 = vector.shape_cast %129 : vector<2x16xf32> to vector<2x16x1xf32>
    %131 = vector.broadcast %130 : vector<2x16x1xf32> to vector<2x16x16xf32>
    %132 = arith.subf %128, %131 : vector<2x16x16xf32>
    %133 = math.exp %132 : vector<2x16x16xf32>
    %cst_52 = arith.constant dense<0.000000e+00> : vector<2x16xf32>
    %134 = vector.multi_reduction <add>, %133, %cst_52 [2] : vector<2x16x16xf32> to vector<2x16xf32>
    %135 = vector.shape_cast %134 : vector<2x16xf32> to vector<2x16x1xf32>
    %136 = vector.broadcast %135 : vector<2x16x1xf32> to vector<2x16x16xf32>
    %137 = arith.divf %133, %136 : vector<2x16x16xf32>
    "tpu.trace_start"() <{level = 10 : i32, message = "bqk,bkd->bqd"}> : () -> ()
    %cst_53 = arith.constant dense<0.000000e+00> : vector<2x16x4xf32>
    %138 = tpu.matmul %137, %125, %cst_53 {dimension_numbers = #tpu.dot_dimension_numbers<[2], [1], [1], [2], [0, 0, 0, 1, 1, 2], [0], [0]>} : vector<2x16x16xf32>, vector<2x16x4xf32>, vector<2x16x4xf32> -> vector<2x16x4xf32>
    "tpu.trace_stop"() : () -> ()
    %139 = vector.extract_strided_slice %23 {offsets = [0, 0, 28], sizes = [2, 16, 4], strides = [1, 1, 1]} : vector<2x16x32xf32> to vector<2x16x4xf32>
    %140 = vector.extract_strided_slice %25 {offsets = [0, 0, 28], sizes = [2, 16, 4], strides = [1, 1, 1]} : vector<2x16x32xf32> to vector<2x16x4xf32>
    %141 = vector.extract_strided_slice %26 {offsets = [0, 0, 28], sizes = [2, 16, 4], strides = [1, 1, 1]} : vector<2x16x32xf32> to vector<2x16x4xf32>
    "tpu.trace_start"() <{level = 10 : i32, message = "bqd,bkd->bqk"}> : () -> ()
    %cst_54 = arith.constant dense<0.000000e+00> : vector<2x16x16xf32>
    %142 = tpu.matmul %139, %140, %cst_54 {dimension_numbers = #tpu.dot_dimension_numbers<[2], [2], [1], [1], [0, 0, 0, 1, 1, 1], [0], [0]>} : vector<2x16x4xf32>, vector<2x16x4xf32>, vector<2x16x16xf32> -> vector<2x16x16xf32>
    "tpu.trace_stop"() : () -> ()
    %cst_55 = arith.constant 5.000000e-01 : f32
    %143 = vector.broadcast %cst_55 : f32 to vector<2x16x16xf32>
    %144 = arith.mulf %142, %143 : vector<2x16x16xf32>
    %cst_56 = arith.constant dense<0xFF800000> : vector<2x16xf32>
    %145 = vector.multi_reduction <maximumf>, %144, %cst_56 [2] : vector<2x16x16xf32> to vector<2x16xf32>
    %146 = vector.shape_cast %145 : vector<2x16xf32> to vector<2x16x1xf32>
    %147 = vector.broadcast %146 : vector<2x16x1xf32> to vector<2x16x16xf32>
    %148 = arith.subf %144, %147 : vector<2x16x16xf32>
    %149 = math.exp %148 : vector<2x16x16xf32>
    %cst_57 = arith.constant dense<0.000000e+00> : vector<2x16xf32>
    %150 = vector.multi_reduction <add>, %149, %cst_57 [2] : vector<2x16x16xf32> to vector<2x16xf32>
    %151 = vector.shape_cast %150 : vector<2x16xf32> to vector<2x16x1xf32>
    %152 = vector.broadcast %151 : vector<2x16x1xf32> to vector<2x16x16xf32>
    %153 = arith.divf %149, %152 : vector<2x16x16xf32>
    "tpu.trace_start"() <{level = 10 : i32, message = "bqk,bkd->bqd"}> : () -> ()
    %cst_58 = arith.constant dense<0.000000e+00> : vector<2x16x4xf32>
    %154 = tpu.matmul %153, %141, %cst_58 {dimension_numbers = #tpu.dot_dimension_numbers<[2], [1], [1], [2], [0, 0, 0, 1, 1, 2], [0], [0]>} : vector<2x16x16xf32>, vector<2x16x4xf32>, vector<2x16x4xf32> -> vector<2x16x4xf32>
    "tpu.trace_stop"() : () -> ()
    %155 = tpu.concatenate %42, %58, %74, %90, %106, %122, %138, %154 in 2 : vector<2x16x4xf32>, vector<2x16x4xf32>, vector<2x16x4xf32>, vector<2x16x4xf32>, vector<2x16x4xf32>, vector<2x16x4xf32>, vector<2x16x4xf32>, vector<2x16x4xf32> -> vector<2x16x32xf32>
    %156 = vector.shape_cast %155 : vector<2x16x32xf32> to vector<32x32xf32>
    %c0_59 = arith.constant 0 : index
    %c0_60 = arith.constant 0 : index
    %c0_61 = arith.constant 0 : index
    %157 = vector.load %arg7[%c0_59, %c0_60, %c0_61] : memref<1x32x32xf32, #tpu.memory_space<vmem>>, vector<1x32x32xf32>
    %158 = vector.shape_cast %157 : vector<1x32x32xf32> to vector<32x32xf32>
    %cst_62 = arith.constant dense<0.000000e+00> : vector<32x32xf32>
    %159 = tpu.matmul %156, %158, %cst_62 {dimension_numbers = #tpu.dot_dimension_numbers<[1], [0], [0], [1], [0, 0, 1, 1], [], []>} : vector<32x32xf32>, vector<32x32xf32>, vector<32x32xf32> -> vector<32x32xf32>
    %c0_63 = arith.constant 0 : index
    %c0_64 = arith.constant 0 : index
    %c0_65 = arith.constant 0 : index
    %160 = vector.load %arg8[%c0_63, %c0_64, %c0_65] : memref<1x1x32xf32, #tpu.memory_space<vmem>>, vector<1x1x32xf32>
    %161 = vector.shape_cast %160 : vector<1x1x32xf32> to vector<1x32xf32>
    %162 = vector.broadcast %161 : vector<1x32xf32> to vector<32x32xf32>
    %163 = arith.addf %159, %162 : vector<32x32xf32>
    %164 = arith.addf %5, %163 : vector<32x32xf32>
    %c0_66 = arith.constant 0 : index
    %c0_67 = arith.constant 0 : index
    %c0_68 = arith.constant 0 : index
    %165 = vector.load %arg13[%c0_66, %c0_67, %c0_68] : memref<1x1x32xf32, #tpu.memory_space<vmem>>, vector<1x1x32xf32>
    %166 = vector.shape_cast %165 : vector<1x1x32xf32> to vector<1x32xf32>
    %c0_69 = arith.constant 0 : index
    %c0_70 = arith.constant 0 : index
    %c0_71 = arith.constant 0 : index
    %167 = vector.load %arg14[%c0_69, %c0_70, %c0_71] : memref<1x1x32xf32, #tpu.memory_space<vmem>>, vector<1x1x32xf32>
    %168 = vector.shape_cast %167 : vector<1x1x32xf32> to vector<1x32xf32>
    %cst_72 = arith.constant dense<0.000000e+00> : vector<32xf32>
    %169 = vector.multi_reduction <add>, %164, %cst_72 [1] : vector<32x32xf32> to vector<32xf32>
    %170 = vector.shape_cast %169 : vector<32xf32> to vector<32x1xf32>
    %cst_73 = arith.constant 3.200000e+01 : f32
    %171 = vector.broadcast %cst_73 : f32 to vector<32x1xf32>
    %172 = arith.divf %170, %171 : vector<32x1xf32>
    %173 = vector.broadcast %172 : vector<32x1xf32> to vector<32x32xf32>
    %174 = arith.subf %164, %173 : vector<32x32xf32>
    %175 = arith.mulf %174, %174 : vector<32x32xf32>
    %cst_74 = arith.constant dense<0.000000e+00> : vector<32xf32>
    %176 = vector.multi_reduction <add>, %175, %cst_74 [1] : vector<32x32xf32> to vector<32xf32>
    %177 = vector.shape_cast %176 : vector<32xf32> to vector<32x1xf32>
    %cst_75 = arith.constant 3.200000e+01 : f32
    %178 = vector.broadcast %cst_75 : f32 to vector<32x1xf32>
    %179 = arith.divf %177, %178 : vector<32x1xf32>
    %180 = vector.broadcast %172 : vector<32x1xf32> to vector<32x32xf32>
    %181 = arith.subf %164, %180 : vector<32x32xf32>
    %cst_76 = arith.constant 9.99999974E-6 : f32
    %182 = vector.broadcast %cst_76 : f32 to vector<32x1xf32>
    %183 = arith.addf %179, %182 : vector<32x1xf32>
    %184 = math.rsqrt %183 : vector<32x1xf32>
    %185 = vector.broadcast %184 : vector<32x1xf32> to vector<32x32xf32>
    %186 = arith.mulf %181, %185 : vector<32x32xf32>
    %187 = vector.broadcast %166 : vector<1x32xf32> to vector<32x32xf32>
    %188 = arith.mulf %186, %187 : vector<32x32xf32>
    %189 = vector.broadcast %168 : vector<1x32xf32> to vector<32x32xf32>
    %190 = arith.addf %188, %189 : vector<32x32xf32>
    %c0_77 = arith.constant 0 : index
    %c0_78 = arith.constant 0 : index
    %c0_79 = arith.constant 0 : index
    %191 = vector.load %arg9[%c0_77, %c0_78, %c0_79] : memref<1x32x64xf32, #tpu.memory_space<vmem>>, vector<1x32x64xf32>
    %192 = vector.shape_cast %191 : vector<1x32x64xf32> to vector<32x64xf32>
    %cst_80 = arith.constant dense<0.000000e+00> : vector<32x64xf32>
    %193 = tpu.matmul %190, %192, %cst_80 {dimension_numbers = #tpu.dot_dimension_numbers<[1], [0], [0], [1], [0, 0, 1, 1], [], []>} : vector<32x32xf32>, vector<32x64xf32>, vector<32x64xf32> -> vector<32x64xf32>
    %c0_81 = arith.constant 0 : index
    %c0_82 = arith.constant 0 : index
    %c0_83 = arith.constant 0 : index
    %194 = vector.load %arg10[%c0_81, %c0_82, %c0_83] : memref<1x1x64xf32, #tpu.memory_space<vmem>>, vector<1x1x64xf32>
    %195 = vector.shape_cast %194 : vector<1x1x64xf32> to vector<1x64xf32>
    %196 = vector.broadcast %195 : vector<1x64xf32> to vector<32x64xf32>
    %197 = arith.addf %193, %196 : vector<32x64xf32>
    %cst_84 = arith.constant 0.000000e+00 : f32
    %198 = vector.broadcast %cst_84 : f32 to vector<32x64xf32>
    %199 = arith.maximumf %197, %198 : vector<32x64xf32>
    %c0_85 = arith.constant 0 : index
    %c0_86 = arith.constant 0 : index
    %c0_87 = arith.constant 0 : index
    %200 = vector.load %arg11[%c0_85, %c0_86, %c0_87] : memref<1x64x32xf32, #tpu.memory_space<vmem>>, vector<1x64x32xf32>
    %201 = vector.shape_cast %200 : vector<1x64x32xf32> to vector<64x32xf32>
    %cst_88 = arith.constant dense<0.000000e+00> : vector<32x32xf32>
    %202 = tpu.matmul %199, %201, %cst_88 {dimension_numbers = #tpu.dot_dimension_numbers<[1], [0], [0], [1], [0, 0, 1, 1], [], []>} : vector<32x64xf32>, vector<64x32xf32>, vector<32x32xf32> -> vector<32x32xf32>
    %c0_89 = arith.constant 0 : index
    %c0_90 = arith.constant 0 : index
    %c0_91 = arith.constant 0 : index
    %203 = vector.load %arg12[%c0_89, %c0_90, %c0_91] : memref<1x1x32xf32, #tpu.memory_space<vmem>>, vector<1x1x32xf32>
    %204 = vector.shape_cast %203 : vector<1x1x32xf32> to vector<1x32xf32>
    %205 = vector.broadcast %204 : vector<1x32xf32> to vector<32x32xf32>
    %206 = arith.addf %202, %205 : vector<32x32xf32>
    %207 = arith.addf %190, %206 : vector<32x32xf32>
    %c0_92 = arith.constant 0 : index
    %c0_93 = arith.constant 0 : index
    %c0_94 = arith.constant 0 : index
    %208 = vector.load %arg15[%c0_92, %c0_93, %c0_94] : memref<1x1x32xf32, #tpu.memory_space<vmem>>, vector<1x1x32xf32>
    %209 = vector.shape_cast %208 : vector<1x1x32xf32> to vector<1x32xf32>
    %c0_95 = arith.constant 0 : index
    %c0_96 = arith.constant 0 : index
    %c0_97 = arith.constant 0 : index
    %210 = vector.load %arg16[%c0_95, %c0_96, %c0_97] : memref<1x1x32xf32, #tpu.memory_space<vmem>>, vector<1x1x32xf32>
    %211 = vector.shape_cast %210 : vector<1x1x32xf32> to vector<1x32xf32>
    %cst_98 = arith.constant dense<0.000000e+00> : vector<32xf32>
    %212 = vector.multi_reduction <add>, %207, %cst_98 [1] : vector<32x32xf32> to vector<32xf32>
    %213 = vector.shape_cast %212 : vector<32xf32> to vector<32x1xf32>
    %cst_99 = arith.constant 3.200000e+01 : f32
    %214 = vector.broadcast %cst_99 : f32 to vector<32x1xf32>
    %215 = arith.divf %213, %214 : vector<32x1xf32>
    %216 = vector.broadcast %215 : vector<32x1xf32> to vector<32x32xf32>
    %217 = arith.subf %207, %216 : vector<32x32xf32>
    %218 = arith.mulf %217, %217 : vector<32x32xf32>
    %cst_100 = arith.constant dense<0.000000e+00> : vector<32xf32>
    %219 = vector.multi_reduction <add>, %218, %cst_100 [1] : vector<32x32xf32> to vector<32xf32>
    %220 = vector.shape_cast %219 : vector<32xf32> to vector<32x1xf32>
    %cst_101 = arith.constant 3.200000e+01 : f32
    %221 = vector.broadcast %cst_101 : f32 to vector<32x1xf32>
    %222 = arith.divf %220, %221 : vector<32x1xf32>
    %223 = vector.broadcast %215 : vector<32x1xf32> to vector<32x32xf32>
    %224 = arith.subf %207, %223 : vector<32x32xf32>
    %cst_102 = arith.constant 9.99999974E-6 : f32
    %225 = vector.broadcast %cst_102 : f32 to vector<32x1xf32>
    %226 = arith.addf %222, %225 : vector<32x1xf32>
    %227 = math.rsqrt %226 : vector<32x1xf32>
    %228 = vector.broadcast %227 : vector<32x1xf32> to vector<32x32xf32>
    %229 = arith.mulf %224, %228 : vector<32x32xf32>
    %230 = vector.broadcast %209 : vector<1x32xf32> to vector<32x32xf32>
    %231 = arith.mulf %229, %230 : vector<32x32xf32>
    %232 = vector.broadcast %211 : vector<1x32xf32> to vector<32x32xf32>
    %233 = arith.addf %231, %232 : vector<32x32xf32>
    %234 = vector.shape_cast %233 : vector<32x32xf32> to vector<2x16x32xf32>
    %c0_103 = arith.constant 0 : index
    %c0_104 = arith.constant 0 : index
    %c0_105 = arith.constant 0 : index
    %235 = vector.load %arg18[%c0_103, %c0_104, %c0_105] : memref<2x16x32xf32, #tpu.memory_space<vmem>>, vector<2x16x32xf32>
    tpu.vector_store %arg18[%c0_103, %c0_104, %c0_105], %234 {strides = array<i32>} : memref<2x16x32xf32, #tpu.memory_space<vmem>>, vector<2x16x32xf32>,
    %c0_106 = arith.constant 0 : index
    %c0_107 = arith.constant 0 : index
    %c0_108 = arith.constant 0 : index
    %236 = vector.load %arg17[%c0_106, %c0_107, %c0_108] : memref<2x16x32xf32, #tpu.memory_space<vmem>>, vector<2x16x32xf32>
    tpu.vector_store %arg17[%c0_106, %c0_107, %c0_108], %234 {strides = array<i32>} : memref<2x16x32xf32, #tpu.memory_space<vmem>>, vector<2x16x32xf32>,
    return
  }
  func.func @transform_0(%arg0: i32) -> (i32, i32, i32) {
    %c0_i32 = arith.constant 0 : i32
    %c0_i32_0 = arith.constant 0 : i32
    %c0_i32_1 = arith.constant 0 : i32
    %c0_i32_2 = arith.constant 0 : i32
    return %c0_i32, %c0_i32_0, %c0_i32_1 : i32, i32, i32
  }
  func.func @transform_1(%arg0: i32) -> (i32, i32, i32) {
    %c0_i32 = arith.constant 0 : i32
    %c0_i32_0 = arith.constant 0 : i32
    %c0_i32_1 = arith.constant 0 : i32
    %c0_i32_2 = arith.constant 0 : i32
    return %c0_i32, %c0_i32_0, %c0_i32_1 : i32, i32, i32
  }
  func.func @transform_2(%arg0: i32) -> (i32, i32, i32) {
    %c0_i32 = arith.constant 0 : i32
    %c0_i32_0 = arith.constant 0 : i32
    %c0_i32_1 = arith.constant 0 : i32
    return %arg0, %c0_i32, %c0_i32_0 : i32, i32, i32
  }
  func.func @transform_3(%arg0: i32) -> (i32, i32, i32) {
    %c0_i32 = arith.constant 0 : i32
    %c0_i32_0 = arith.constant 0 : i32
    %c0_i32_1 = arith.constant 0 : i32
    return %arg0, %c0_i32, %c0_i32_0 : i32, i32, i32
  }
  func.func @transform_4(%arg0: i32) -> (i32, i32, i32) {
    %c0_i32 = arith.constant 0 : i32
    %c0_i32_0 = arith.constant 0 : i32
    %c0_i32_1 = arith.constant 0 : i32
    return %arg0, %c0_i32, %c0_i32_0 : i32, i32, i32
  }
  func.func @transform_5(%arg0: i32) -> (i32, i32, i32) {
    %c0_i32 = arith.constant 0 : i32
    %c0_i32_0 = arith.constant 0 : i32
    %c0_i32_1 = arith.constant 0 : i32
    return %arg0, %c0_i32, %c0_i32_0 : i32, i32, i32
  }
  func.func @transform_6(%arg0: i32) -> (i32, i32, i32) {
    %c0_i32 = arith.constant 0 : i32
    %c0_i32_0 = arith.constant 0 : i32
    %c0_i32_1 = arith.constant 0 : i32
    return %arg0, %c0_i32, %c0_i32_0 : i32, i32, i32
  }
  func.func @transform_7(%arg0: i32) -> (i32, i32, i32) {
    %c0_i32 = arith.constant 0 : i32
    %c0_i32_0 = arith.constant 0 : i32
    %c0_i32_1 = arith.constant 0 : i32
    return %arg0, %c0_i32, %c0_i32_0 : i32, i32, i32
  }
  func.func @transform_8(%arg0: i32) -> (i32, i32, i32) {
    %c0_i32 = arith.constant 0 : i32
    %c0_i32_0 = arith.constant 0 : i32
    %c0_i32_1 = arith.constant 0 : i32
    return %arg0, %c0_i32, %c0_i32_0 : i32, i32, i32
  }
  func.func @transform_9(%arg0: i32) -> (i32, i32, i32) {
    %c0_i32 = arith.constant 0 : i32
    %c0_i32_0 = arith.constant 0 : i32
    %c0_i32_1 = arith.constant 0 : i32
    return %arg0, %c0_i32, %c0_i32_0 : i32, i32, i32
  }
  func.func @transform_10(%arg0: i32) -> (i32, i32, i32) {
    %c0_i32 = arith.constant 0 : i32
    %c0_i32_0 = arith.constant 0 : i32
    %c0_i32_1 = arith.constant 0 : i32
    return %arg0, %c0_i32, %c0_i32_0 : i32, i32, i32
  }
  func.func @transform_11(%arg0: i32) -> (i32, i32, i32) {
    %c0_i32 = arith.constant 0 : i32
    %c0_i32_0 = arith.constant 0 : i32
    %c0_i32_1 = arith.constant 0 : i32
    return %arg0, %c0_i32, %c0_i32_0 : i32, i32, i32
  }
  func.func @transform_12(%arg0: i32) -> (i32, i32, i32) {
    %c0_i32 = arith.constant 0 : i32
    %c0_i32_0 = arith.constant 0 : i32
    %c0_i32_1 = arith.constant 0 : i32
    return %arg0, %c0_i32, %c0_i32_0 : i32, i32, i32
  }
  func.func @transform_13(%arg0: i32) -> (i32, i32, i32) {
    %c0_i32 = arith.constant 0 : i32
    %c0_i32_0 = arith.constant 0 : i32
    %c0_i32_1 = arith.constant 0 : i32
    return %arg0, %c0_i32, %c0_i32_0 : i32, i32, i32
  }
  func.func @transform_14(%arg0: i32) -> (i32, i32, i32) {
    %c0_i32 = arith.constant 0 : i32
    %c0_i32_0 = arith.constant 0 : i32
    %c0_i32_1 = arith.constant 0 : i32
    return %arg0, %c0_i32, %c0_i32_0 : i32, i32, i32
  }
  func.func @transform_15(%arg0: i32) -> (i32, i32, i32) {
    %c0_i32 = arith.constant 0 : i32
    %c0_i32_0 = arith.constant 0 : i32
    %c0_i32_1 = arith.constant 0 : i32
    return %arg0, %c0_i32, %c0_i32_0 : i32, i32, i32
  }
  func.func @transform_16(%arg0: i32) -> (i32, i32, i32) {
    %c0_i32 = arith.constant 0 : i32
    %c0_i32_0 = arith.constant 0 : i32
    %c0_i32_1 = arith.constant 0 : i32
    %c0_i32_2 = arith.constant 0 : i32
    return %c0_i32, %c0_i32_0, %c0_i32_1 : i32, i32, i32
  }
}

module attributes {stable_mosaic.version = 11 : i64} {
  func.func @_decoder_stack_kernel(%arg0: i32, %arg1: memref<2x16x32xf32, #tpu.memory_space<vmem>>, %arg2: memref<2x16x32xf32, #tpu.memory_space<vmem>>, %arg3: memref<2x8x32xf32, #tpu.memory_space<vmem>>, %arg4: memref<1x32x64xf32, #tpu.memory_space<vmem>>, %arg5: memref<1x1x64xf32, #tpu.memory_space<vmem>>, %arg6: memref<1x32x32xf32, #tpu.memory_space<vmem>>, %arg7: memref<1x1x32xf32, #tpu.memory_space<vmem>>, %arg8: memref<1x32x32xf32, #tpu.memory_space<vmem>>, %arg9: memref<1x1x32xf32, #tpu.memory_space<vmem>>, %arg10: memref<1x32x32xf32, #tpu.memory_space<vmem>>, %arg11: memref<1x1x32xf32, #tpu.memory_space<vmem>>, %arg12: memref<1x32x32xf32, #tpu.memory_space<vmem>>, %arg13: memref<1x1x32xf32, #tpu.memory_space<vmem>>, %arg14: memref<1x32x32xf32, #tpu.memory_space<vmem>>, %arg15: memref<1x1x32xf32, #tpu.memory_space<vmem>>, %arg16: memref<1x32x32xf32, #tpu.memory_space<vmem>>, %arg17: memref<1x1x32xf32, #tpu.memory_space<vmem>>, %arg18: memref<1x32x64xf32, #tpu.memory_space<vmem>>, %arg19: memref<1x1x64xf32, #tpu.memory_space<vmem>>, %arg20: memref<1x64x32xf32, #tpu.memory_space<vmem>>, %arg21: memref<1x1x32xf32, #tpu.memory_space<vmem>>, %arg22: memref<1x1x32xf32, #tpu.memory_space<vmem>>, %arg23: memref<1x1x32xf32, #tpu.memory_space<vmem>>, %arg24: memref<1x1x32xf32, #tpu.memory_space<vmem>>, %arg25: memref<1x1x32xf32, #tpu.memory_space<vmem>>, %arg26: memref<1x1x32xf32, #tpu.memory_space<vmem>>, %arg27: memref<1x1x32xf32, #tpu.memory_space<vmem>>, %arg28: memref<2x8x32xf32, #tpu.memory_space<vmem>>, %arg29: memref<2x8x32xf32, #tpu.memory_space<vmem>>) attributes {dimension_semantics = [#tpu.dimension_semantics<arbitrary>], iteration_bounds = array<i64: 6>, scalar_prefetch = 0 : i64, scratch_operands = 1 : i64, tpu.core_type = #tpu.core_type<tc>, window_params = [{pipeline_mode = #tpu.pipeline_mode<synchronous>, transform_indices = @transform_0, window_bounds = array<i64: 2, 16, 32>}, {pipeline_mode = #tpu.pipeline_mode<synchronous>, transform_indices = @transform_1, window_bounds = array<i64: 2, 16, 32>}, {pipeline_mode = #tpu.pipeline_mode<synchronous>, transform_indices = @transform_2, window_bounds = array<i64: 2, 8, 32>}, {transform_indices = @transform_3, window_bounds = array<i64: 1, 32, 64>}, {transform_indices = @transform_4, window_bounds = array<i64: 1, 1, 64>}, {transform_indices = @transform_5, window_bounds = array<i64: 1, 32, 32>}, {transform_indices = @transform_6, window_bounds = array<i64: 1, 1, 32>}, {transform_indices = @transform_7, window_bounds = array<i64: 1, 32, 32>}, {transform_indices = @transform_8, window_bounds = array<i64: 1, 1, 32>}, {transform_indices = @transform_9, window_bounds = array<i64: 1, 32, 32>}, {transform_indices = @transform_10, window_bounds = array<i64: 1, 1, 32>}, {transform_indices = @transform_11, window_bounds = array<i64: 1, 32, 32>}, {transform_indices = @transform_12, window_bounds = array<i64: 1, 1, 32>}, {transform_indices = @transform_13, window_bounds = array<i64: 1, 32, 32>}, {transform_indices = @transform_14, window_bounds = array<i64: 1, 1, 32>}, {transform_indices = @transform_15, window_bounds = array<i64: 1, 32, 32>}, {transform_indices = @transform_16, window_bounds = array<i64: 1, 1, 32>}, {transform_indices = @transform_17, window_bounds = array<i64: 1, 32, 64>}, {transform_indices = @transform_18, window_bounds = array<i64: 1, 1, 64>}, {transform_indices = @transform_19, window_bounds = array<i64: 1, 64, 32>}, {transform_indices = @transform_20, window_bounds = array<i64: 1, 1, 32>}, {transform_indices = @transform_21, window_bounds = array<i64: 1, 1, 32>}, {transform_indices = @transform_22, window_bounds = array<i64: 1, 1, 32>}, {transform_indices = @transform_23, window_bounds = array<i64: 1, 1, 32>}, {transform_indices = @transform_24, window_bounds = array<i64: 1, 1, 32>}, {transform_indices = @transform_25, window_bounds = array<i64: 1, 1, 32>}, {transform_indices = @transform_26, window_bounds = array<i64: 1, 1, 32>}, {pipeline_mode = #tpu.pipeline_mode<synchronous>, transform_indices = @transform_27, window_bounds = array<i64: 2, 8, 32>}]} {
    %c0_i32 = arith.constant 0 : i32
    %0 = arith.cmpi eq, %arg0, %c0_i32 : i32
    %1 = arith.extui %0 : i1 to i32
    %c0_i32_0 = arith.constant 0 : i32
    %2 = arith.cmpi ne, %1, %c0_i32_0 : i32
    scf.if %2 {
      %cst_194 = arith.constant 0.000000e+00 : f32
      %433 = vector.broadcast %cst_194 : f32 to vector<2x8x32xf32>
      %c0_195 = arith.constant 0 : index
      %c0_196 = arith.constant 0 : index
      %c0_197 = arith.constant 0 : index
      %434 = vector.load %arg29[%c0_195, %c0_196, %c0_197] : memref<2x8x32xf32, #tpu.memory_space<vmem>>, vector<2x8x32xf32>
      tpu.vector_store %arg29[%c0_195, %c0_196, %c0_197], %433 {strides = array<i32>} : memref<2x8x32xf32, #tpu.memory_space<vmem>>, vector<2x8x32xf32>,
    } else {
    }
    %c0 = arith.constant 0 : index
    %c0_1 = arith.constant 0 : index
    %c0_2 = arith.constant 0 : index
    %3 = vector.load %arg29[%c0, %c0_1, %c0_2] : memref<2x8x32xf32, #tpu.memory_space<vmem>>, vector<2x8x32xf32>
    %c0_3 = arith.constant 0 : index
    %c0_4 = arith.constant 0 : index
    %c0_5 = arith.constant 0 : index
    %4 = vector.load %arg1[%c0_3, %c0_4, %c0_5] : memref<2x16x32xf32, #tpu.memory_space<vmem>>, vector<2x16x32xf32>
    %c0_6 = arith.constant 0 : index
    %c0_7 = arith.constant 0 : index
    %c0_8 = arith.constant 0 : index
    %5 = vector.load %arg2[%c0_6, %c0_7, %c0_8] : memref<2x16x32xf32, #tpu.memory_space<vmem>>, vector<2x16x32xf32>
    %c0_9 = arith.constant 0 : index
    %c0_10 = arith.constant 0 : index
    %c0_11 = arith.constant 0 : index
    %6 = vector.load %arg3[%c0_9, %c0_10, %c0_11] : memref<2x8x32xf32, #tpu.memory_space<vmem>>, vector<2x8x32xf32>
    %7 = vector.shape_cast %3 : vector<2x8x32xf32> to vector<16x32xf32>
    %8 = arith.addf %3, %6 : vector<2x8x32xf32>
    %9 = vector.shape_cast %8 : vector<2x8x32xf32> to vector<16x32xf32>
    %c0_12 = arith.constant 0 : index
    %c0_13 = arith.constant 0 : index
    %c0_14 = arith.constant 0 : index
    %10 = vector.load %arg4[%c0_12, %c0_13, %c0_14] : memref<1x32x64xf32, #tpu.memory_space<vmem>>, vector<1x32x64xf32>
    %11 = vector.shape_cast %10 : vector<1x32x64xf32> to vector<32x64xf32>
    %cst = arith.constant dense<0.000000e+00> : vector<16x64xf32>
    %12 = tpu.matmul %9, %11, %cst {dimension_numbers = #tpu.dot_dimension_numbers<[1], [0], [0], [1], [0, 0, 1, 1], [], []>} : vector<16x32xf32>, vector<32x64xf32>, vector<16x64xf32> -> vector<16x64xf32>
    %c0_15 = arith.constant 0 : index
    %c0_16 = arith.constant 0 : index
    %c0_17 = arith.constant 0 : index
    %13 = vector.load %arg5[%c0_15, %c0_16, %c0_17] : memref<1x1x64xf32, #tpu.memory_space<vmem>>, vector<1x1x64xf32>
    %14 = vector.shape_cast %13 : vector<1x1x64xf32> to vector<1x64xf32>
    %15 = vector.broadcast %14 : vector<1x64xf32> to vector<16x64xf32>
    %16 = arith.addf %12, %15 : vector<16x64xf32>
    %c0_18 = arith.constant 0 : index
    %c0_19 = arith.constant 0 : index
    %c0_20 = arith.constant 0 : index
    %17 = vector.load %arg6[%c0_18, %c0_19, %c0_20] : memref<1x32x32xf32, #tpu.memory_space<vmem>>, vector<1x32x32xf32>
    %18 = vector.shape_cast %17 : vector<1x32x32xf32> to vector<32x32xf32>
    %cst_21 = arith.constant dense<0.000000e+00> : vector<16x32xf32>
    %19 = tpu.matmul %7, %18, %cst_21 {dimension_numbers = #tpu.dot_dimension_numbers<[1], [0], [0], [1], [0, 0, 1, 1], [], []>} : vector<16x32xf32>, vector<32x32xf32>, vector<16x32xf32> -> vector<16x32xf32>
    %c0_22 = arith.constant 0 : index
    %c0_23 = arith.constant 0 : index
    %c0_24 = arith.constant 0 : index
    %20 = vector.load %arg7[%c0_22, %c0_23, %c0_24] : memref<1x1x32xf32, #tpu.memory_space<vmem>>, vector<1x1x32xf32>
    %21 = vector.shape_cast %20 : vector<1x1x32xf32> to vector<1x32xf32>
    %22 = vector.broadcast %21 : vector<1x32xf32> to vector<16x32xf32>
    %23 = arith.addf %19, %22 : vector<16x32xf32>
    %24 = vector.extract_strided_slice %16 {offsets = [0, 0], sizes = [16, 32], strides = [1, 1]} : vector<16x64xf32> to vector<16x32xf32>
    %25 = vector.shape_cast %24 : vector<16x32xf32> to vector<2x8x32xf32>
    %26 = vector.extract_strided_slice %16 {offsets = [0, 32], sizes = [16, 32], strides = [1, 1]} : vector<16x64xf32> to vector<16x32xf32>
    %27 = vector.shape_cast %26 : vector<16x32xf32> to vector<2x8x32xf32>
    %28 = vector.shape_cast %23 : vector<16x32xf32> to vector<2x8x32xf32>
    %29 = vector.extract_strided_slice %25 {offsets = [0, 0, 0], sizes = [2, 8, 4], strides = [1, 1, 1]} : vector<2x8x32xf32> to vector<2x8x4xf32>
    %30 = vector.extract_strided_slice %27 {offsets = [0, 0, 0], sizes = [2, 8, 4], strides = [1, 1, 1]} : vector<2x8x32xf32> to vector<2x8x4xf32>
    %31 = vector.extract_strided_slice %28 {offsets = [0, 0, 0], sizes = [2, 8, 4], strides = [1, 1, 1]} : vector<2x8x32xf32> to vector<2x8x4xf32>
    "tpu.trace_start"() <{level = 10 : i32, message = "bqd,bkd->bqk"}> : () -> ()
    %cst_25 = arith.constant dense<0.000000e+00> : vector<2x8x8xf32>
    %32 = tpu.matmul %29, %30, %cst_25 {dimension_numbers = #tpu.dot_dimension_numbers<[2], [2], [1], [1], [0, 0, 0, 1, 1, 1], [0], [0]>} : vector<2x8x4xf32>, vector<2x8x4xf32>, vector<2x8x8xf32> -> vector<2x8x8xf32>
    "tpu.trace_stop"() : () -> ()
    %cst_26 = arith.constant 5.000000e-01 : f32
    %33 = vector.broadcast %cst_26 : f32 to vector<2x8x8xf32>
    %34 = arith.mulf %32, %33 : vector<2x8x8xf32>
    %cst_27 = arith.constant dense<0xFF800000> : vector<2x8xf32>
    %35 = vector.multi_reduction <maximumf>, %34, %cst_27 [2] : vector<2x8x8xf32> to vector<2x8xf32>
    %36 = vector.shape_cast %35 : vector<2x8xf32> to vector<2x8x1xf32>
    %37 = vector.broadcast %36 : vector<2x8x1xf32> to vector<2x8x8xf32>
    %38 = arith.subf %34, %37 : vector<2x8x8xf32>
    %39 = math.exp %38 : vector<2x8x8xf32>
    %cst_28 = arith.constant dense<0.000000e+00> : vector<2x8xf32>
    %40 = vector.multi_reduction <add>, %39, %cst_28 [2] : vector<2x8x8xf32> to vector<2x8xf32>
    %41 = vector.shape_cast %40 : vector<2x8xf32> to vector<2x8x1xf32>
    %42 = vector.broadcast %41 : vector<2x8x1xf32> to vector<2x8x8xf32>
    %43 = arith.divf %39, %42 : vector<2x8x8xf32>
    "tpu.trace_start"() <{level = 10 : i32, message = "bqk,bkd->bqd"}> : () -> ()
    %cst_29 = arith.constant dense<0.000000e+00> : vector<2x8x4xf32>
    %44 = tpu.matmul %43, %31, %cst_29 {dimension_numbers = #tpu.dot_dimension_numbers<[2], [1], [1], [2], [0, 0, 0, 1, 1, 2], [0], [0]>} : vector<2x8x8xf32>, vector<2x8x4xf32>, vector<2x8x4xf32> -> vector<2x8x4xf32>
    "tpu.trace_stop"() : () -> ()
    %45 = vector.extract_strided_slice %25 {offsets = [0, 0, 4], sizes = [2, 8, 4], strides = [1, 1, 1]} : vector<2x8x32xf32> to vector<2x8x4xf32>
    %46 = vector.extract_strided_slice %27 {offsets = [0, 0, 4], sizes = [2, 8, 4], strides = [1, 1, 1]} : vector<2x8x32xf32> to vector<2x8x4xf32>
    %47 = vector.extract_strided_slice %28 {offsets = [0, 0, 4], sizes = [2, 8, 4], strides = [1, 1, 1]} : vector<2x8x32xf32> to vector<2x8x4xf32>
    "tpu.trace_start"() <{level = 10 : i32, message = "bqd,bkd->bqk"}> : () -> ()
    %cst_30 = arith.constant dense<0.000000e+00> : vector<2x8x8xf32>
    %48 = tpu.matmul %45, %46, %cst_30 {dimension_numbers = #tpu.dot_dimension_numbers<[2], [2], [1], [1], [0, 0, 0, 1, 1, 1], [0], [0]>} : vector<2x8x4xf32>, vector<2x8x4xf32>, vector<2x8x8xf32> -> vector<2x8x8xf32>
    "tpu.trace_stop"() : () -> ()
    %cst_31 = arith.constant 5.000000e-01 : f32
    %49 = vector.broadcast %cst_31 : f32 to vector<2x8x8xf32>
    %50 = arith.mulf %48, %49 : vector<2x8x8xf32>
    %cst_32 = arith.constant dense<0xFF800000> : vector<2x8xf32>
    %51 = vector.multi_reduction <maximumf>, %50, %cst_32 [2] : vector<2x8x8xf32> to vector<2x8xf32>
    %52 = vector.shape_cast %51 : vector<2x8xf32> to vector<2x8x1xf32>
    %53 = vector.broadcast %52 : vector<2x8x1xf32> to vector<2x8x8xf32>
    %54 = arith.subf %50, %53 : vector<2x8x8xf32>
    %55 = math.exp %54 : vector<2x8x8xf32>
    %cst_33 = arith.constant dense<0.000000e+00> : vector<2x8xf32>
    %56 = vector.multi_reduction <add>, %55, %cst_33 [2] : vector<2x8x8xf32> to vector<2x8xf32>
    %57 = vector.shape_cast %56 : vector<2x8xf32> to vector<2x8x1xf32>
    %58 = vector.broadcast %57 : vector<2x8x1xf32> to vector<2x8x8xf32>
    %59 = arith.divf %55, %58 : vector<2x8x8xf32>
    "tpu.trace_start"() <{level = 10 : i32, message = "bqk,bkd->bqd"}> : () -> ()
    %cst_34 = arith.constant dense<0.000000e+00> : vector<2x8x4xf32>
    %60 = tpu.matmul %59, %47, %cst_34 {dimension_numbers = #tpu.dot_dimension_numbers<[2], [1], [1], [2], [0, 0, 0, 1, 1, 2], [0], [0]>} : vector<2x8x8xf32>, vector<2x8x4xf32>, vector<2x8x4xf32> -> vector<2x8x4xf32>
    "tpu.trace_stop"() : () -> ()
    %61 = vector.extract_strided_slice %25 {offsets = [0, 0, 8], sizes = [2, 8, 4], strides = [1, 1, 1]} : vector<2x8x32xf32> to vector<2x8x4xf32>
    %62 = vector.extract_strided_slice %27 {offsets = [0, 0, 8], sizes = [2, 8, 4], strides = [1, 1, 1]} : vector<2x8x32xf32> to vector<2x8x4xf32>
    %63 = vector.extract_strided_slice %28 {offsets = [0, 0, 8], sizes = [2, 8, 4], strides = [1, 1, 1]} : vector<2x8x32xf32> to vector<2x8x4xf32>
    "tpu.trace_start"() <{level = 10 : i32, message = "bqd,bkd->bqk"}> : () -> ()
    %cst_35 = arith.constant dense<0.000000e+00> : vector<2x8x8xf32>
    %64 = tpu.matmul %61, %62, %cst_35 {dimension_numbers = #tpu.dot_dimension_numbers<[2], [2], [1], [1], [0, 0, 0, 1, 1, 1], [0], [0]>} : vector<2x8x4xf32>, vector<2x8x4xf32>, vector<2x8x8xf32> -> vector<2x8x8xf32>
    "tpu.trace_stop"() : () -> ()
    %cst_36 = arith.constant 5.000000e-01 : f32
    %65 = vector.broadcast %cst_36 : f32 to vector<2x8x8xf32>
    %66 = arith.mulf %64, %65 : vector<2x8x8xf32>
    %cst_37 = arith.constant dense<0xFF800000> : vector<2x8xf32>
    %67 = vector.multi_reduction <maximumf>, %66, %cst_37 [2] : vector<2x8x8xf32> to vector<2x8xf32>
    %68 = vector.shape_cast %67 : vector<2x8xf32> to vector<2x8x1xf32>
    %69 = vector.broadcast %68 : vector<2x8x1xf32> to vector<2x8x8xf32>
    %70 = arith.subf %66, %69 : vector<2x8x8xf32>
    %71 = math.exp %70 : vector<2x8x8xf32>
    %cst_38 = arith.constant dense<0.000000e+00> : vector<2x8xf32>
    %72 = vector.multi_reduction <add>, %71, %cst_38 [2] : vector<2x8x8xf32> to vector<2x8xf32>
    %73 = vector.shape_cast %72 : vector<2x8xf32> to vector<2x8x1xf32>
    %74 = vector.broadcast %73 : vector<2x8x1xf32> to vector<2x8x8xf32>
    %75 = arith.divf %71, %74 : vector<2x8x8xf32>
    "tpu.trace_start"() <{level = 10 : i32, message = "bqk,bkd->bqd"}> : () -> ()
    %cst_39 = arith.constant dense<0.000000e+00> : vector<2x8x4xf32>
    %76 = tpu.matmul %75, %63, %cst_39 {dimension_numbers = #tpu.dot_dimension_numbers<[2], [1], [1], [2], [0, 0, 0, 1, 1, 2], [0], [0]>} : vector<2x8x8xf32>, vector<2x8x4xf32>, vector<2x8x4xf32> -> vector<2x8x4xf32>
    "tpu.trace_stop"() : () -> ()
    %77 = vector.extract_strided_slice %25 {offsets = [0, 0, 12], sizes = [2, 8, 4], strides = [1, 1, 1]} : vector<2x8x32xf32> to vector<2x8x4xf32>
    %78 = vector.extract_strided_slice %27 {offsets = [0, 0, 12], sizes = [2, 8, 4], strides = [1, 1, 1]} : vector<2x8x32xf32> to vector<2x8x4xf32>
    %79 = vector.extract_strided_slice %28 {offsets = [0, 0, 12], sizes = [2, 8, 4], strides = [1, 1, 1]} : vector<2x8x32xf32> to vector<2x8x4xf32>
    "tpu.trace_start"() <{level = 10 : i32, message = "bqd,bkd->bqk"}> : () -> ()
    %cst_40 = arith.constant dense<0.000000e+00> : vector<2x8x8xf32>
    %80 = tpu.matmul %77, %78, %cst_40 {dimension_numbers = #tpu.dot_dimension_numbers<[2], [2], [1], [1], [0, 0, 0, 1, 1, 1], [0], [0]>} : vector<2x8x4xf32>, vector<2x8x4xf32>, vector<2x8x8xf32> -> vector<2x8x8xf32>
    "tpu.trace_stop"() : () -> ()
    %cst_41 = arith.constant 5.000000e-01 : f32
    %81 = vector.broadcast %cst_41 : f32 to vector<2x8x8xf32>
    %82 = arith.mulf %80, %81 : vector<2x8x8xf32>
    %cst_42 = arith.constant dense<0xFF800000> : vector<2x8xf32>
    %83 = vector.multi_reduction <maximumf>, %82, %cst_42 [2] : vector<2x8x8xf32> to vector<2x8xf32>
    %84 = vector.shape_cast %83 : vector<2x8xf32> to vector<2x8x1xf32>
    %85 = vector.broadcast %84 : vector<2x8x1xf32> to vector<2x8x8xf32>
    %86 = arith.subf %82, %85 : vector<2x8x8xf32>
    %87 = math.exp %86 : vector<2x8x8xf32>
    %cst_43 = arith.constant dense<0.000000e+00> : vector<2x8xf32>
    %88 = vector.multi_reduction <add>, %87, %cst_43 [2] : vector<2x8x8xf32> to vector<2x8xf32>
    %89 = vector.shape_cast %88 : vector<2x8xf32> to vector<2x8x1xf32>
    %90 = vector.broadcast %89 : vector<2x8x1xf32> to vector<2x8x8xf32>
    %91 = arith.divf %87, %90 : vector<2x8x8xf32>
    "tpu.trace_start"() <{level = 10 : i32, message = "bqk,bkd->bqd"}> : () -> ()
    %cst_44 = arith.constant dense<0.000000e+00> : vector<2x8x4xf32>
    %92 = tpu.matmul %91, %79, %cst_44 {dimension_numbers = #tpu.dot_dimension_numbers<[2], [1], [1], [2], [0, 0, 0, 1, 1, 2], [0], [0]>} : vector<2x8x8xf32>, vector<2x8x4xf32>, vector<2x8x4xf32> -> vector<2x8x4xf32>
    "tpu.trace_stop"() : () -> ()
    %93 = vector.extract_strided_slice %25 {offsets = [0, 0, 16], sizes = [2, 8, 4], strides = [1, 1, 1]} : vector<2x8x32xf32> to vector<2x8x4xf32>
    %94 = vector.extract_strided_slice %27 {offsets = [0, 0, 16], sizes = [2, 8, 4], strides = [1, 1, 1]} : vector<2x8x32xf32> to vector<2x8x4xf32>
    %95 = vector.extract_strided_slice %28 {offsets = [0, 0, 16], sizes = [2, 8, 4], strides = [1, 1, 1]} : vector<2x8x32xf32> to vector<2x8x4xf32>
    "tpu.trace_start"() <{level = 10 : i32, message = "bqd,bkd->bqk"}> : () -> ()
    %cst_45 = arith.constant dense<0.000000e+00> : vector<2x8x8xf32>
    %96 = tpu.matmul %93, %94, %cst_45 {dimension_numbers = #tpu.dot_dimension_numbers<[2], [2], [1], [1], [0, 0, 0, 1, 1, 1], [0], [0]>} : vector<2x8x4xf32>, vector<2x8x4xf32>, vector<2x8x8xf32> -> vector<2x8x8xf32>
    "tpu.trace_stop"() : () -> ()
    %cst_46 = arith.constant 5.000000e-01 : f32
    %97 = vector.broadcast %cst_46 : f32 to vector<2x8x8xf32>
    %98 = arith.mulf %96, %97 : vector<2x8x8xf32>
    %cst_47 = arith.constant dense<0xFF800000> : vector<2x8xf32>
    %99 = vector.multi_reduction <maximumf>, %98, %cst_47 [2] : vector<2x8x8xf32> to vector<2x8xf32>
    %100 = vector.shape_cast %99 : vector<2x8xf32> to vector<2x8x1xf32>
    %101 = vector.broadcast %100 : vector<2x8x1xf32> to vector<2x8x8xf32>
    %102 = arith.subf %98, %101 : vector<2x8x8xf32>
    %103 = math.exp %102 : vector<2x8x8xf32>
    %cst_48 = arith.constant dense<0.000000e+00> : vector<2x8xf32>
    %104 = vector.multi_reduction <add>, %103, %cst_48 [2] : vector<2x8x8xf32> to vector<2x8xf32>
    %105 = vector.shape_cast %104 : vector<2x8xf32> to vector<2x8x1xf32>
    %106 = vector.broadcast %105 : vector<2x8x1xf32> to vector<2x8x8xf32>
    %107 = arith.divf %103, %106 : vector<2x8x8xf32>
    "tpu.trace_start"() <{level = 10 : i32, message = "bqk,bkd->bqd"}> : () -> ()
    %cst_49 = arith.constant dense<0.000000e+00> : vector<2x8x4xf32>
    %108 = tpu.matmul %107, %95, %cst_49 {dimension_numbers = #tpu.dot_dimension_numbers<[2], [1], [1], [2], [0, 0, 0, 1, 1, 2], [0], [0]>} : vector<2x8x8xf32>, vector<2x8x4xf32>, vector<2x8x4xf32> -> vector<2x8x4xf32>
    "tpu.trace_stop"() : () -> ()
    %109 = vector.extract_strided_slice %25 {offsets = [0, 0, 20], sizes = [2, 8, 4], strides = [1, 1, 1]} : vector<2x8x32xf32> to vector<2x8x4xf32>
    %110 = vector.extract_strided_slice %27 {offsets = [0, 0, 20], sizes = [2, 8, 4], strides = [1, 1, 1]} : vector<2x8x32xf32> to vector<2x8x4xf32>
    %111 = vector.extract_strided_slice %28 {offsets = [0, 0, 20], sizes = [2, 8, 4], strides = [1, 1, 1]} : vector<2x8x32xf32> to vector<2x8x4xf32>
    "tpu.trace_start"() <{level = 10 : i32, message = "bqd,bkd->bqk"}> : () -> ()
    %cst_50 = arith.constant dense<0.000000e+00> : vector<2x8x8xf32>
    %112 = tpu.matmul %109, %110, %cst_50 {dimension_numbers = #tpu.dot_dimension_numbers<[2], [2], [1], [1], [0, 0, 0, 1, 1, 1], [0], [0]>} : vector<2x8x4xf32>, vector<2x8x4xf32>, vector<2x8x8xf32> -> vector<2x8x8xf32>
    "tpu.trace_stop"() : () -> ()
    %cst_51 = arith.constant 5.000000e-01 : f32
    %113 = vector.broadcast %cst_51 : f32 to vector<2x8x8xf32>
    %114 = arith.mulf %112, %113 : vector<2x8x8xf32>
    %cst_52 = arith.constant dense<0xFF800000> : vector<2x8xf32>
    %115 = vector.multi_reduction <maximumf>, %114, %cst_52 [2] : vector<2x8x8xf32> to vector<2x8xf32>
    %116 = vector.shape_cast %115 : vector<2x8xf32> to vector<2x8x1xf32>
    %117 = vector.broadcast %116 : vector<2x8x1xf32> to vector<2x8x8xf32>
    %118 = arith.subf %114, %117 : vector<2x8x8xf32>
    %119 = math.exp %118 : vector<2x8x8xf32>
    %cst_53 = arith.constant dense<0.000000e+00> : vector<2x8xf32>
    %120 = vector.multi_reduction <add>, %119, %cst_53 [2] : vector<2x8x8xf32> to vector<2x8xf32>
    %121 = vector.shape_cast %120 : vector<2x8xf32> to vector<2x8x1xf32>
    %122 = vector.broadcast %121 : vector<2x8x1xf32> to vector<2x8x8xf32>
    %123 = arith.divf %119, %122 : vector<2x8x8xf32>
    "tpu.trace_start"() <{level = 10 : i32, message = "bqk,bkd->bqd"}> : () -> ()
    %cst_54 = arith.constant dense<0.000000e+00> : vector<2x8x4xf32>
    %124 = tpu.matmul %123, %111, %cst_54 {dimension_numbers = #tpu.dot_dimension_numbers<[2], [1], [1], [2], [0, 0, 0, 1, 1, 2], [0], [0]>} : vector<2x8x8xf32>, vector<2x8x4xf32>, vector<2x8x4xf32> -> vector<2x8x4xf32>
    "tpu.trace_stop"() : () -> ()
    %125 = vector.extract_strided_slice %25 {offsets = [0, 0, 24], sizes = [2, 8, 4], strides = [1, 1, 1]} : vector<2x8x32xf32> to vector<2x8x4xf32>
    %126 = vector.extract_strided_slice %27 {offsets = [0, 0, 24], sizes = [2, 8, 4], strides = [1, 1, 1]} : vector<2x8x32xf32> to vector<2x8x4xf32>
    %127 = vector.extract_strided_slice %28 {offsets = [0, 0, 24], sizes = [2, 8, 4], strides = [1, 1, 1]} : vector<2x8x32xf32> to vector<2x8x4xf32>
    "tpu.trace_start"() <{level = 10 : i32, message = "bqd,bkd->bqk"}> : () -> ()
    %cst_55 = arith.constant dense<0.000000e+00> : vector<2x8x8xf32>
    %128 = tpu.matmul %125, %126, %cst_55 {dimension_numbers = #tpu.dot_dimension_numbers<[2], [2], [1], [1], [0, 0, 0, 1, 1, 1], [0], [0]>} : vector<2x8x4xf32>, vector<2x8x4xf32>, vector<2x8x8xf32> -> vector<2x8x8xf32>
    "tpu.trace_stop"() : () -> ()
    %cst_56 = arith.constant 5.000000e-01 : f32
    %129 = vector.broadcast %cst_56 : f32 to vector<2x8x8xf32>
    %130 = arith.mulf %128, %129 : vector<2x8x8xf32>
    %cst_57 = arith.constant dense<0xFF800000> : vector<2x8xf32>
    %131 = vector.multi_reduction <maximumf>, %130, %cst_57 [2] : vector<2x8x8xf32> to vector<2x8xf32>
    %132 = vector.shape_cast %131 : vector<2x8xf32> to vector<2x8x1xf32>
    %133 = vector.broadcast %132 : vector<2x8x1xf32> to vector<2x8x8xf32>
    %134 = arith.subf %130, %133 : vector<2x8x8xf32>
    %135 = math.exp %134 : vector<2x8x8xf32>
    %cst_58 = arith.constant dense<0.000000e+00> : vector<2x8xf32>
    %136 = vector.multi_reduction <add>, %135, %cst_58 [2] : vector<2x8x8xf32> to vector<2x8xf32>
    %137 = vector.shape_cast %136 : vector<2x8xf32> to vector<2x8x1xf32>
    %138 = vector.broadcast %137 : vector<2x8x1xf32> to vector<2x8x8xf32>
    %139 = arith.divf %135, %138 : vector<2x8x8xf32>
    "tpu.trace_start"() <{level = 10 : i32, message = "bqk,bkd->bqd"}> : () -> ()
    %cst_59 = arith.constant dense<0.000000e+00> : vector<2x8x4xf32>
    %140 = tpu.matmul %139, %127, %cst_59 {dimension_numbers = #tpu.dot_dimension_numbers<[2], [1], [1], [2], [0, 0, 0, 1, 1, 2], [0], [0]>} : vector<2x8x8xf32>, vector<2x8x4xf32>, vector<2x8x4xf32> -> vector<2x8x4xf32>
    "tpu.trace_stop"() : () -> ()
    %141 = vector.extract_strided_slice %25 {offsets = [0, 0, 28], sizes = [2, 8, 4], strides = [1, 1, 1]} : vector<2x8x32xf32> to vector<2x8x4xf32>
    %142 = vector.extract_strided_slice %27 {offsets = [0, 0, 28], sizes = [2, 8, 4], strides = [1, 1, 1]} : vector<2x8x32xf32> to vector<2x8x4xf32>
    %143 = vector.extract_strided_slice %28 {offsets = [0, 0, 28], sizes = [2, 8, 4], strides = [1, 1, 1]} : vector<2x8x32xf32> to vector<2x8x4xf32>
    "tpu.trace_start"() <{level = 10 : i32, message = "bqd,bkd->bqk"}> : () -> ()
    %cst_60 = arith.constant dense<0.000000e+00> : vector<2x8x8xf32>
    %144 = tpu.matmul %141, %142, %cst_60 {dimension_numbers = #tpu.dot_dimension_numbers<[2], [2], [1], [1], [0, 0, 0, 1, 1, 1], [0], [0]>} : vector<2x8x4xf32>, vector<2x8x4xf32>, vector<2x8x8xf32> -> vector<2x8x8xf32>
    "tpu.trace_stop"() : () -> ()
    %cst_61 = arith.constant 5.000000e-01 : f32
    %145 = vector.broadcast %cst_61 : f32 to vector<2x8x8xf32>
    %146 = arith.mulf %144, %145 : vector<2x8x8xf32>
    %cst_62 = arith.constant dense<0xFF800000> : vector<2x8xf32>
    %147 = vector.multi_reduction <maximumf>, %146, %cst_62 [2] : vector<2x8x8xf32> to vector<2x8xf32>
    %148 = vector.shape_cast %147 : vector<2x8xf32> to vector<2x8x1xf32>
    %149 = vector.broadcast %148 : vector<2x8x1xf32> to vector<2x8x8xf32>
    %150 = arith.subf %146, %149 : vector<2x8x8xf32>
    %151 = math.exp %150 : vector<2x8x8xf32>
    %cst_63 = arith.constant dense<0.000000e+00> : vector<2x8xf32>
    %152 = vector.multi_reduction <add>, %151, %cst_63 [2] : vector<2x8x8xf32> to vector<2x8xf32>
    %153 = vector.shape_cast %152 : vector<2x8xf32> to vector<2x8x1xf32>
    %154 = vector.broadcast %153 : vector<2x8x1xf32> to vector<2x8x8xf32>
    %155 = arith.divf %151, %154 : vector<2x8x8xf32>
    "tpu.trace_start"() <{level = 10 : i32, message = "bqk,bkd->bqd"}> : () -> ()
    %cst_64 = arith.constant dense<0.000000e+00> : vector<2x8x4xf32>
    %156 = tpu.matmul %155, %143, %cst_64 {dimension_numbers = #tpu.dot_dimension_numbers<[2], [1], [1], [2], [0, 0, 0, 1, 1, 2], [0], [0]>} : vector<2x8x8xf32>, vector<2x8x4xf32>, vector<2x8x4xf32> -> vector<2x8x4xf32>
    "tpu.trace_stop"() : () -> ()
    %157 = tpu.concatenate %44, %60, %76, %92, %108, %124, %140, %156 in 2 : vector<2x8x4xf32>, vector<2x8x4xf32>, vector<2x8x4xf32>, vector<2x8x4xf32>, vector<2x8x4xf32>, vector<2x8x4xf32>, vector<2x8x4xf32>, vector<2x8x4xf32> -> vector<2x8x32xf32>
    %158 = vector.shape_cast %157 : vector<2x8x32xf32> to vector<16x32xf32>
    %c0_65 = arith.constant 0 : index
    %c0_66 = arith.constant 0 : index
    %c0_67 = arith.constant 0 : index
    %159 = vector.load %arg8[%c0_65, %c0_66, %c0_67] : memref<1x32x32xf32, #tpu.memory_space<vmem>>, vector<1x32x32xf32>
    %160 = vector.shape_cast %159 : vector<1x32x32xf32> to vector<32x32xf32>
    %cst_68 = arith.constant dense<0.000000e+00> : vector<16x32xf32>
    %161 = tpu.matmul %158, %160, %cst_68 {dimension_numbers = #tpu.dot_dimension_numbers<[1], [0], [0], [1], [0, 0, 1, 1], [], []>} : vector<16x32xf32>, vector<32x32xf32>, vector<16x32xf32> -> vector<16x32xf32>
    %c0_69 = arith.constant 0 : index
    %c0_70 = arith.constant 0 : index
    %c0_71 = arith.constant 0 : index
    %162 = vector.load %arg9[%c0_69, %c0_70, %c0_71] : memref<1x1x32xf32, #tpu.memory_space<vmem>>, vector<1x1x32xf32>
    %163 = vector.shape_cast %162 : vector<1x1x32xf32> to vector<1x32xf32>
    %164 = vector.broadcast %163 : vector<1x32xf32> to vector<16x32xf32>
    %165 = arith.addf %161, %164 : vector<16x32xf32>
    %166 = arith.addf %7, %165 : vector<16x32xf32>
    %c0_72 = arith.constant 0 : index
    %c0_73 = arith.constant 0 : index
    %c0_74 = arith.constant 0 : index
    %167 = vector.load %arg22[%c0_72, %c0_73, %c0_74] : memref<1x1x32xf32, #tpu.memory_space<vmem>>, vector<1x1x32xf32>
    %168 = vector.shape_cast %167 : vector<1x1x32xf32> to vector<1x32xf32>
    %c0_75 = arith.constant 0 : index
    %c0_76 = arith.constant 0 : index
    %c0_77 = arith.constant 0 : index
    %169 = vector.load %arg23[%c0_75, %c0_76, %c0_77] : memref<1x1x32xf32, #tpu.memory_space<vmem>>, vector<1x1x32xf32>
    %170 = vector.shape_cast %169 : vector<1x1x32xf32> to vector<1x32xf32>
    %cst_78 = arith.constant dense<0.000000e+00> : vector<16xf32>
    %171 = vector.multi_reduction <add>, %166, %cst_78 [1] : vector<16x32xf32> to vector<16xf32>
    %172 = vector.shape_cast %171 : vector<16xf32> to vector<16x1xf32>
    %cst_79 = arith.constant 3.200000e+01 : f32
    %173 = vector.broadcast %cst_79 : f32 to vector<16x1xf32>
    %174 = arith.divf %172, %173 : vector<16x1xf32>
    %175 = vector.broadcast %174 : vector<16x1xf32> to vector<16x32xf32>
    %176 = arith.subf %166, %175 : vector<16x32xf32>
    %177 = arith.mulf %176, %176 : vector<16x32xf32>
    %cst_80 = arith.constant dense<0.000000e+00> : vector<16xf32>
    %178 = vector.multi_reduction <add>, %177, %cst_80 [1] : vector<16x32xf32> to vector<16xf32>
    %179 = vector.shape_cast %178 : vector<16xf32> to vector<16x1xf32>
    %cst_81 = arith.constant 3.200000e+01 : f32
    %180 = vector.broadcast %cst_81 : f32 to vector<16x1xf32>
    %181 = arith.divf %179, %180 : vector<16x1xf32>
    %182 = vector.broadcast %174 : vector<16x1xf32> to vector<16x32xf32>
    %183 = arith.subf %166, %182 : vector<16x32xf32>
    %cst_82 = arith.constant 9.99999974E-6 : f32
    %184 = vector.broadcast %cst_82 : f32 to vector<16x1xf32>
    %185 = arith.addf %181, %184 : vector<16x1xf32>
    %186 = math.rsqrt %185 : vector<16x1xf32>
    %187 = vector.broadcast %186 : vector<16x1xf32> to vector<16x32xf32>
    %188 = arith.mulf %183, %187 : vector<16x32xf32>
    %189 = vector.broadcast %168 : vector<1x32xf32> to vector<16x32xf32>
    %190 = arith.mulf %188, %189 : vector<16x32xf32>
    %191 = vector.broadcast %170 : vector<1x32xf32> to vector<16x32xf32>
    %192 = arith.addf %190, %191 : vector<16x32xf32>
    %193 = vector.shape_cast %192 : vector<16x32xf32> to vector<2x8x32xf32>
    %194 = arith.addf %193, %6 : vector<2x8x32xf32>
    %195 = vector.shape_cast %194 : vector<2x8x32xf32> to vector<16x32xf32>
    %c0_83 = arith.constant 0 : index
    %c0_84 = arith.constant 0 : index
    %c0_85 = arith.constant 0 : index
    %196 = vector.load %arg10[%c0_83, %c0_84, %c0_85] : memref<1x32x32xf32, #tpu.memory_space<vmem>>, vector<1x32x32xf32>
    %197 = vector.shape_cast %196 : vector<1x32x32xf32> to vector<32x32xf32>
    %cst_86 = arith.constant dense<0.000000e+00> : vector<16x32xf32>
    %198 = tpu.matmul %195, %197, %cst_86 {dimension_numbers = #tpu.dot_dimension_numbers<[1], [0], [0], [1], [0, 0, 1, 1], [], []>} : vector<16x32xf32>, vector<32x32xf32>, vector<16x32xf32> -> vector<16x32xf32>
    %c0_87 = arith.constant 0 : index
    %c0_88 = arith.constant 0 : index
    %c0_89 = arith.constant 0 : index
    %199 = vector.load %arg11[%c0_87, %c0_88, %c0_89] : memref<1x1x32xf32, #tpu.memory_space<vmem>>, vector<1x1x32xf32>
    %200 = vector.shape_cast %199 : vector<1x1x32xf32> to vector<1x32xf32>
    %201 = vector.broadcast %200 : vector<1x32xf32> to vector<16x32xf32>
    %202 = arith.addf %198, %201 : vector<16x32xf32>
    %203 = arith.addf %4, %5 : vector<2x16x32xf32>
    %204 = vector.shape_cast %203 : vector<2x16x32xf32> to vector<32x32xf32>
    %c0_90 = arith.constant 0 : index
    %c0_91 = arith.constant 0 : index
    %c0_92 = arith.constant 0 : index
    %205 = vector.load %arg12[%c0_90, %c0_91, %c0_92] : memref<1x32x32xf32, #tpu.memory_space<vmem>>, vector<1x32x32xf32>
    %206 = vector.shape_cast %205 : vector<1x32x32xf32> to vector<32x32xf32>
    %cst_93 = arith.constant dense<0.000000e+00> : vector<32x32xf32>
    %207 = tpu.matmul %204, %206, %cst_93 {dimension_numbers = #tpu.dot_dimension_numbers<[1], [0], [0], [1], [0, 0, 1, 1], [], []>} : vector<32x32xf32>, vector<32x32xf32>, vector<32x32xf32> -> vector<32x32xf32>
    %c0_94 = arith.constant 0 : index
    %c0_95 = arith.constant 0 : index
    %c0_96 = arith.constant 0 : index
    %208 = vector.load %arg13[%c0_94, %c0_95, %c0_96] : memref<1x1x32xf32, #tpu.memory_space<vmem>>, vector<1x1x32xf32>
    %209 = vector.shape_cast %208 : vector<1x1x32xf32> to vector<1x32xf32>
    %210 = vector.broadcast %209 : vector<1x32xf32> to vector<32x32xf32>
    %211 = arith.addf %207, %210 : vector<32x32xf32>
    %212 = vector.shape_cast %4 : vector<2x16x32xf32> to vector<32x32xf32>
    %c0_97 = arith.constant 0 : index
    %c0_98 = arith.constant 0 : index
    %c0_99 = arith.constant 0 : index
    %213 = vector.load %arg14[%c0_97, %c0_98, %c0_99] : memref<1x32x32xf32, #tpu.memory_space<vmem>>, vector<1x32x32xf32>
    %214 = vector.shape_cast %213 : vector<1x32x32xf32> to vector<32x32xf32>
    %cst_100 = arith.constant dense<0.000000e+00> : vector<32x32xf32>
    %215 = tpu.matmul %212, %214, %cst_100 {dimension_numbers = #tpu.dot_dimension_numbers<[1], [0], [0], [1], [0, 0, 1, 1], [], []>} : vector<32x32xf32>, vector<32x32xf32>, vector<32x32xf32> -> vector<32x32xf32>
    %c0_101 = arith.constant 0 : index
    %c0_102 = arith.constant 0 : index
    %c0_103 = arith.constant 0 : index
    %216 = vector.load %arg15[%c0_101, %c0_102, %c0_103] : memref<1x1x32xf32, #tpu.memory_space<vmem>>, vector<1x1x32xf32>
    %217 = vector.shape_cast %216 : vector<1x1x32xf32> to vector<1x32xf32>
    %218 = vector.broadcast %217 : vector<1x32xf32> to vector<32x32xf32>
    %219 = arith.addf %215, %218 : vector<32x32xf32>
    %220 = vector.shape_cast %202 : vector<16x32xf32> to vector<2x8x32xf32>
    %221 = vector.shape_cast %211 : vector<32x32xf32> to vector<2x16x32xf32>
    %222 = vector.shape_cast %219 : vector<32x32xf32> to vector<2x16x32xf32>
    %223 = vector.extract_strided_slice %220 {offsets = [0, 0, 0], sizes = [2, 8, 4], strides = [1, 1, 1]} : vector<2x8x32xf32> to vector<2x8x4xf32>
    %224 = vector.extract_strided_slice %221 {offsets = [0, 0, 0], sizes = [2, 16, 4], strides = [1, 1, 1]} : vector<2x16x32xf32> to vector<2x16x4xf32>
    %225 = vector.extract_strided_slice %222 {offsets = [0, 0, 0], sizes = [2, 16, 4], strides = [1, 1, 1]} : vector<2x16x32xf32> to vector<2x16x4xf32>
    "tpu.trace_start"() <{level = 10 : i32, message = "bqd,bkd->bqk"}> : () -> ()
    %cst_104 = arith.constant dense<0.000000e+00> : vector<2x8x16xf32>
    %226 = tpu.matmul %223, %224, %cst_104 {dimension_numbers = #tpu.dot_dimension_numbers<[2], [2], [1], [1], [0, 0, 0, 1, 1, 1], [0], [0]>} : vector<2x8x4xf32>, vector<2x16x4xf32>, vector<2x8x16xf32> -> vector<2x8x16xf32>
    "tpu.trace_stop"() : () -> ()
    %cst_105 = arith.constant 5.000000e-01 : f32
    %227 = vector.broadcast %cst_105 : f32 to vector<2x8x16xf32>
    %228 = arith.mulf %226, %227 : vector<2x8x16xf32>
    %cst_106 = arith.constant dense<0xFF800000> : vector<2x8xf32>
    %229 = vector.multi_reduction <maximumf>, %228, %cst_106 [2] : vector<2x8x16xf32> to vector<2x8xf32>
    %230 = vector.shape_cast %229 : vector<2x8xf32> to vector<2x8x1xf32>
    %231 = vector.broadcast %230 : vector<2x8x1xf32> to vector<2x8x16xf32>
    %232 = arith.subf %228, %231 : vector<2x8x16xf32>
    %233 = math.exp %232 : vector<2x8x16xf32>
    %cst_107 = arith.constant dense<0.000000e+00> : vector<2x8xf32>
    %234 = vector.multi_reduction <add>, %233, %cst_107 [2] : vector<2x8x16xf32> to vector<2x8xf32>
    %235 = vector.shape_cast %234 : vector<2x8xf32> to vector<2x8x1xf32>
    %236 = vector.broadcast %235 : vector<2x8x1xf32> to vector<2x8x16xf32>
    %237 = arith.divf %233, %236 : vector<2x8x16xf32>
    "tpu.trace_start"() <{level = 10 : i32, message = "bqk,bkd->bqd"}> : () -> ()
    %cst_108 = arith.constant dense<0.000000e+00> : vector<2x8x4xf32>
    %238 = tpu.matmul %237, %225, %cst_108 {dimension_numbers = #tpu.dot_dimension_numbers<[2], [1], [1], [2], [0, 0, 0, 1, 1, 2], [0], [0]>} : vector<2x8x16xf32>, vector<2x16x4xf32>, vector<2x8x4xf32> -> vector<2x8x4xf32>
    "tpu.trace_stop"() : () -> ()
    %239 = vector.extract_strided_slice %220 {offsets = [0, 0, 4], sizes = [2, 8, 4], strides = [1, 1, 1]} : vector<2x8x32xf32> to vector<2x8x4xf32>
    %240 = vector.extract_strided_slice %221 {offsets = [0, 0, 4], sizes = [2, 16, 4], strides = [1, 1, 1]} : vector<2x16x32xf32> to vector<2x16x4xf32>
    %241 = vector.extract_strided_slice %222 {offsets = [0, 0, 4], sizes = [2, 16, 4], strides = [1, 1, 1]} : vector<2x16x32xf32> to vector<2x16x4xf32>
    "tpu.trace_start"() <{level = 10 : i32, message = "bqd,bkd->bqk"}> : () -> ()
    %cst_109 = arith.constant dense<0.000000e+00> : vector<2x8x16xf32>
    %242 = tpu.matmul %239, %240, %cst_109 {dimension_numbers = #tpu.dot_dimension_numbers<[2], [2], [1], [1], [0, 0, 0, 1, 1, 1], [0], [0]>} : vector<2x8x4xf32>, vector<2x16x4xf32>, vector<2x8x16xf32> -> vector<2x8x16xf32>
    "tpu.trace_stop"() : () -> ()
    %cst_110 = arith.constant 5.000000e-01 : f32
    %243 = vector.broadcast %cst_110 : f32 to vector<2x8x16xf32>
    %244 = arith.mulf %242, %243 : vector<2x8x16xf32>
    %cst_111 = arith.constant dense<0xFF800000> : vector<2x8xf32>
    %245 = vector.multi_reduction <maximumf>, %244, %cst_111 [2] : vector<2x8x16xf32> to vector<2x8xf32>
    %246 = vector.shape_cast %245 : vector<2x8xf32> to vector<2x8x1xf32>
    %247 = vector.broadcast %246 : vector<2x8x1xf32> to vector<2x8x16xf32>
    %248 = arith.subf %244, %247 : vector<2x8x16xf32>
    %249 = math.exp %248 : vector<2x8x16xf32>
    %cst_112 = arith.constant dense<0.000000e+00> : vector<2x8xf32>
    %250 = vector.multi_reduction <add>, %249, %cst_112 [2] : vector<2x8x16xf32> to vector<2x8xf32>
    %251 = vector.shape_cast %250 : vector<2x8xf32> to vector<2x8x1xf32>
    %252 = vector.broadcast %251 : vector<2x8x1xf32> to vector<2x8x16xf32>
    %253 = arith.divf %249, %252 : vector<2x8x16xf32>
    "tpu.trace_start"() <{level = 10 : i32, message = "bqk,bkd->bqd"}> : () -> ()
    %cst_113 = arith.constant dense<0.000000e+00> : vector<2x8x4xf32>
    %254 = tpu.matmul %253, %241, %cst_113 {dimension_numbers = #tpu.dot_dimension_numbers<[2], [1], [1], [2], [0, 0, 0, 1, 1, 2], [0], [0]>} : vector<2x8x16xf32>, vector<2x16x4xf32>, vector<2x8x4xf32> -> vector<2x8x4xf32>
    "tpu.trace_stop"() : () -> ()
    %255 = vector.extract_strided_slice %220 {offsets = [0, 0, 8], sizes = [2, 8, 4], strides = [1, 1, 1]} : vector<2x8x32xf32> to vector<2x8x4xf32>
    %256 = vector.extract_strided_slice %221 {offsets = [0, 0, 8], sizes = [2, 16, 4], strides = [1, 1, 1]} : vector<2x16x32xf32> to vector<2x16x4xf32>
    %257 = vector.extract_strided_slice %222 {offsets = [0, 0, 8], sizes = [2, 16, 4], strides = [1, 1, 1]} : vector<2x16x32xf32> to vector<2x16x4xf32>
    "tpu.trace_start"() <{level = 10 : i32, message = "bqd,bkd->bqk"}> : () -> ()
    %cst_114 = arith.constant dense<0.000000e+00> : vector<2x8x16xf32>
    %258 = tpu.matmul %255, %256, %cst_114 {dimension_numbers = #tpu.dot_dimension_numbers<[2], [2], [1], [1], [0, 0, 0, 1, 1, 1], [0], [0]>} : vector<2x8x4xf32>, vector<2x16x4xf32>, vector<2x8x16xf32> -> vector<2x8x16xf32>
    "tpu.trace_stop"() : () -> ()
    %cst_115 = arith.constant 5.000000e-01 : f32
    %259 = vector.broadcast %cst_115 : f32 to vector<2x8x16xf32>
    %260 = arith.mulf %258, %259 : vector<2x8x16xf32>
    %cst_116 = arith.constant dense<0xFF800000> : vector<2x8xf32>
    %261 = vector.multi_reduction <maximumf>, %260, %cst_116 [2] : vector<2x8x16xf32> to vector<2x8xf32>
    %262 = vector.shape_cast %261 : vector<2x8xf32> to vector<2x8x1xf32>
    %263 = vector.broadcast %262 : vector<2x8x1xf32> to vector<2x8x16xf32>
    %264 = arith.subf %260, %263 : vector<2x8x16xf32>
    %265 = math.exp %264 : vector<2x8x16xf32>
    %cst_117 = arith.constant dense<0.000000e+00> : vector<2x8xf32>
    %266 = vector.multi_reduction <add>, %265, %cst_117 [2] : vector<2x8x16xf32> to vector<2x8xf32>
    %267 = vector.shape_cast %266 : vector<2x8xf32> to vector<2x8x1xf32>
    %268 = vector.broadcast %267 : vector<2x8x1xf32> to vector<2x8x16xf32>
    %269 = arith.divf %265, %268 : vector<2x8x16xf32>
    "tpu.trace_start"() <{level = 10 : i32, message = "bqk,bkd->bqd"}> : () -> ()
    %cst_118 = arith.constant dense<0.000000e+00> : vector<2x8x4xf32>
    %270 = tpu.matmul %269, %257, %cst_118 {dimension_numbers = #tpu.dot_dimension_numbers<[2], [1], [1], [2], [0, 0, 0, 1, 1, 2], [0], [0]>} : vector<2x8x16xf32>, vector<2x16x4xf32>, vector<2x8x4xf32> -> vector<2x8x4xf32>
    "tpu.trace_stop"() : () -> ()
    %271 = vector.extract_strided_slice %220 {offsets = [0, 0, 12], sizes = [2, 8, 4], strides = [1, 1, 1]} : vector<2x8x32xf32> to vector<2x8x4xf32>
    %272 = vector.extract_strided_slice %221 {offsets = [0, 0, 12], sizes = [2, 16, 4], strides = [1, 1, 1]} : vector<2x16x32xf32> to vector<2x16x4xf32>
    %273 = vector.extract_strided_slice %222 {offsets = [0, 0, 12], sizes = [2, 16, 4], strides = [1, 1, 1]} : vector<2x16x32xf32> to vector<2x16x4xf32>
    "tpu.trace_start"() <{level = 10 : i32, message = "bqd,bkd->bqk"}> : () -> ()
    %cst_119 = arith.constant dense<0.000000e+00> : vector<2x8x16xf32>
    %274 = tpu.matmul %271, %272, %cst_119 {dimension_numbers = #tpu.dot_dimension_numbers<[2], [2], [1], [1], [0, 0, 0, 1, 1, 1], [0], [0]>} : vector<2x8x4xf32>, vector<2x16x4xf32>, vector<2x8x16xf32> -> vector<2x8x16xf32>
    "tpu.trace_stop"() : () -> ()
    %cst_120 = arith.constant 5.000000e-01 : f32
    %275 = vector.broadcast %cst_120 : f32 to vector<2x8x16xf32>
    %276 = arith.mulf %274, %275 : vector<2x8x16xf32>
    %cst_121 = arith.constant dense<0xFF800000> : vector<2x8xf32>
    %277 = vector.multi_reduction <maximumf>, %276, %cst_121 [2] : vector<2x8x16xf32> to vector<2x8xf32>
    %278 = vector.shape_cast %277 : vector<2x8xf32> to vector<2x8x1xf32>
    %279 = vector.broadcast %278 : vector<2x8x1xf32> to vector<2x8x16xf32>
    %280 = arith.subf %276, %279 : vector<2x8x16xf32>
    %281 = math.exp %280 : vector<2x8x16xf32>
    %cst_122 = arith.constant dense<0.000000e+00> : vector<2x8xf32>
    %282 = vector.multi_reduction <add>, %281, %cst_122 [2] : vector<2x8x16xf32> to vector<2x8xf32>
    %283 = vector.shape_cast %282 : vector<2x8xf32> to vector<2x8x1xf32>
    %284 = vector.broadcast %283 : vector<2x8x1xf32> to vector<2x8x16xf32>
    %285 = arith.divf %281, %284 : vector<2x8x16xf32>
    "tpu.trace_start"() <{level = 10 : i32, message = "bqk,bkd->bqd"}> : () -> ()
    %cst_123 = arith.constant dense<0.000000e+00> : vector<2x8x4xf32>
    %286 = tpu.matmul %285, %273, %cst_123 {dimension_numbers = #tpu.dot_dimension_numbers<[2], [1], [1], [2], [0, 0, 0, 1, 1, 2], [0], [0]>} : vector<2x8x16xf32>, vector<2x16x4xf32>, vector<2x8x4xf32> -> vector<2x8x4xf32>
    "tpu.trace_stop"() : () -> ()
    %287 = vector.extract_strided_slice %220 {offsets = [0, 0, 16], sizes = [2, 8, 4], strides = [1, 1, 1]} : vector<2x8x32xf32> to vector<2x8x4xf32>
    %288 = vector.extract_strided_slice %221 {offsets = [0, 0, 16], sizes = [2, 16, 4], strides = [1, 1, 1]} : vector<2x16x32xf32> to vector<2x16x4xf32>
    %289 = vector.extract_strided_slice %222 {offsets = [0, 0, 16], sizes = [2, 16, 4], strides = [1, 1, 1]} : vector<2x16x32xf32> to vector<2x16x4xf32>
    "tpu.trace_start"() <{level = 10 : i32, message = "bqd,bkd->bqk"}> : () -> ()
    %cst_124 = arith.constant dense<0.000000e+00> : vector<2x8x16xf32>
    %290 = tpu.matmul %287, %288, %cst_124 {dimension_numbers = #tpu.dot_dimension_numbers<[2], [2], [1], [1], [0, 0, 0, 1, 1, 1], [0], [0]>} : vector<2x8x4xf32>, vector<2x16x4xf32>, vector<2x8x16xf32> -> vector<2x8x16xf32>
    "tpu.trace_stop"() : () -> ()
    %cst_125 = arith.constant 5.000000e-01 : f32
    %291 = vector.broadcast %cst_125 : f32 to vector<2x8x16xf32>
    %292 = arith.mulf %290, %291 : vector<2x8x16xf32>
    %cst_126 = arith.constant dense<0xFF800000> : vector<2x8xf32>
    %293 = vector.multi_reduction <maximumf>, %292, %cst_126 [2] : vector<2x8x16xf32> to vector<2x8xf32>
    %294 = vector.shape_cast %293 : vector<2x8xf32> to vector<2x8x1xf32>
    %295 = vector.broadcast %294 : vector<2x8x1xf32> to vector<2x8x16xf32>
    %296 = arith.subf %292, %295 : vector<2x8x16xf32>
    %297 = math.exp %296 : vector<2x8x16xf32>
    %cst_127 = arith.constant dense<0.000000e+00> : vector<2x8xf32>
    %298 = vector.multi_reduction <add>, %297, %cst_127 [2] : vector<2x8x16xf32> to vector<2x8xf32>
    %299 = vector.shape_cast %298 : vector<2x8xf32> to vector<2x8x1xf32>
    %300 = vector.broadcast %299 : vector<2x8x1xf32> to vector<2x8x16xf32>
    %301 = arith.divf %297, %300 : vector<2x8x16xf32>
    "tpu.trace_start"() <{level = 10 : i32, message = "bqk,bkd->bqd"}> : () -> ()
    %cst_128 = arith.constant dense<0.000000e+00> : vector<2x8x4xf32>
    %302 = tpu.matmul %301, %289, %cst_128 {dimension_numbers = #tpu.dot_dimension_numbers<[2], [1], [1], [2], [0, 0, 0, 1, 1, 2], [0], [0]>} : vector<2x8x16xf32>, vector<2x16x4xf32>, vector<2x8x4xf32> -> vector<2x8x4xf32>
    "tpu.trace_stop"() : () -> ()
    %303 = vector.extract_strided_slice %220 {offsets = [0, 0, 20], sizes = [2, 8, 4], strides = [1, 1, 1]} : vector<2x8x32xf32> to vector<2x8x4xf32>
    %304 = vector.extract_strided_slice %221 {offsets = [0, 0, 20], sizes = [2, 16, 4], strides = [1, 1, 1]} : vector<2x16x32xf32> to vector<2x16x4xf32>
    %305 = vector.extract_strided_slice %222 {offsets = [0, 0, 20], sizes = [2, 16, 4], strides = [1, 1, 1]} : vector<2x16x32xf32> to vector<2x16x4xf32>
    "tpu.trace_start"() <{level = 10 : i32, message = "bqd,bkd->bqk"}> : () -> ()
    %cst_129 = arith.constant dense<0.000000e+00> : vector<2x8x16xf32>
    %306 = tpu.matmul %303, %304, %cst_129 {dimension_numbers = #tpu.dot_dimension_numbers<[2], [2], [1], [1], [0, 0, 0, 1, 1, 1], [0], [0]>} : vector<2x8x4xf32>, vector<2x16x4xf32>, vector<2x8x16xf32> -> vector<2x8x16xf32>
    "tpu.trace_stop"() : () -> ()
    %cst_130 = arith.constant 5.000000e-01 : f32
    %307 = vector.broadcast %cst_130 : f32 to vector<2x8x16xf32>
    %308 = arith.mulf %306, %307 : vector<2x8x16xf32>
    %cst_131 = arith.constant dense<0xFF800000> : vector<2x8xf32>
    %309 = vector.multi_reduction <maximumf>, %308, %cst_131 [2] : vector<2x8x16xf32> to vector<2x8xf32>
    %310 = vector.shape_cast %309 : vector<2x8xf32> to vector<2x8x1xf32>
    %311 = vector.broadcast %310 : vector<2x8x1xf32> to vector<2x8x16xf32>
    %312 = arith.subf %308, %311 : vector<2x8x16xf32>
    %313 = math.exp %312 : vector<2x8x16xf32>
    %cst_132 = arith.constant dense<0.000000e+00> : vector<2x8xf32>
    %314 = vector.multi_reduction <add>, %313, %cst_132 [2] : vector<2x8x16xf32> to vector<2x8xf32>
    %315 = vector.shape_cast %314 : vector<2x8xf32> to vector<2x8x1xf32>
    %316 = vector.broadcast %315 : vector<2x8x1xf32> to vector<2x8x16xf32>
    %317 = arith.divf %313, %316 : vector<2x8x16xf32>
    "tpu.trace_start"() <{level = 10 : i32, message = "bqk,bkd->bqd"}> : () -> ()
    %cst_133 = arith.constant dense<0.000000e+00> : vector<2x8x4xf32>
    %318 = tpu.matmul %317, %305, %cst_133 {dimension_numbers = #tpu.dot_dimension_numbers<[2], [1], [1], [2], [0, 0, 0, 1, 1, 2], [0], [0]>} : vector<2x8x16xf32>, vector<2x16x4xf32>, vector<2x8x4xf32> -> vector<2x8x4xf32>
    "tpu.trace_stop"() : () -> ()
    %319 = vector.extract_strided_slice %220 {offsets = [0, 0, 24], sizes = [2, 8, 4], strides = [1, 1, 1]} : vector<2x8x32xf32> to vector<2x8x4xf32>
    %320 = vector.extract_strided_slice %221 {offsets = [0, 0, 24], sizes = [2, 16, 4], strides = [1, 1, 1]} : vector<2x16x32xf32> to vector<2x16x4xf32>
    %321 = vector.extract_strided_slice %222 {offsets = [0, 0, 24], sizes = [2, 16, 4], strides = [1, 1, 1]} : vector<2x16x32xf32> to vector<2x16x4xf32>
    "tpu.trace_start"() <{level = 10 : i32, message = "bqd,bkd->bqk"}> : () -> ()
    %cst_134 = arith.constant dense<0.000000e+00> : vector<2x8x16xf32>
    %322 = tpu.matmul %319, %320, %cst_134 {dimension_numbers = #tpu.dot_dimension_numbers<[2], [2], [1], [1], [0, 0, 0, 1, 1, 1], [0], [0]>} : vector<2x8x4xf32>, vector<2x16x4xf32>, vector<2x8x16xf32> -> vector<2x8x16xf32>
    "tpu.trace_stop"() : () -> ()
    %cst_135 = arith.constant 5.000000e-01 : f32
    %323 = vector.broadcast %cst_135 : f32 to vector<2x8x16xf32>
    %324 = arith.mulf %322, %323 : vector<2x8x16xf32>
    %cst_136 = arith.constant dense<0xFF800000> : vector<2x8xf32>
    %325 = vector.multi_reduction <maximumf>, %324, %cst_136 [2] : vector<2x8x16xf32> to vector<2x8xf32>
    %326 = vector.shape_cast %325 : vector<2x8xf32> to vector<2x8x1xf32>
    %327 = vector.broadcast %326 : vector<2x8x1xf32> to vector<2x8x16xf32>
    %328 = arith.subf %324, %327 : vector<2x8x16xf32>
    %329 = math.exp %328 : vector<2x8x16xf32>
    %cst_137 = arith.constant dense<0.000000e+00> : vector<2x8xf32>
    %330 = vector.multi_reduction <add>, %329, %cst_137 [2] : vector<2x8x16xf32> to vector<2x8xf32>
    %331 = vector.shape_cast %330 : vector<2x8xf32> to vector<2x8x1xf32>
    %332 = vector.broadcast %331 : vector<2x8x1xf32> to vector<2x8x16xf32>
    %333 = arith.divf %329, %332 : vector<2x8x16xf32>
    "tpu.trace_start"() <{level = 10 : i32, message = "bqk,bkd->bqd"}> : () -> ()
    %cst_138 = arith.constant dense<0.000000e+00> : vector<2x8x4xf32>
    %334 = tpu.matmul %333, %321, %cst_138 {dimension_numbers = #tpu.dot_dimension_numbers<[2], [1], [1], [2], [0, 0, 0, 1, 1, 2], [0], [0]>} : vector<2x8x16xf32>, vector<2x16x4xf32>, vector<2x8x4xf32> -> vector<2x8x4xf32>
    "tpu.trace_stop"() : () -> ()
    %335 = vector.extract_strided_slice %220 {offsets = [0, 0, 28], sizes = [2, 8, 4], strides = [1, 1, 1]} : vector<2x8x32xf32> to vector<2x8x4xf32>
    %336 = vector.extract_strided_slice %221 {offsets = [0, 0, 28], sizes = [2, 16, 4], strides = [1, 1, 1]} : vector<2x16x32xf32> to vector<2x16x4xf32>
    %337 = vector.extract_strided_slice %222 {offsets = [0, 0, 28], sizes = [2, 16, 4], strides = [1, 1, 1]} : vector<2x16x32xf32> to vector<2x16x4xf32>
    "tpu.trace_start"() <{level = 10 : i32, message = "bqd,bkd->bqk"}> : () -> ()
    %cst_139 = arith.constant dense<0.000000e+00> : vector<2x8x16xf32>
    %338 = tpu.matmul %335, %336, %cst_139 {dimension_numbers = #tpu.dot_dimension_numbers<[2], [2], [1], [1], [0, 0, 0, 1, 1, 1], [0], [0]>} : vector<2x8x4xf32>, vector<2x16x4xf32>, vector<2x8x16xf32> -> vector<2x8x16xf32>
    "tpu.trace_stop"() : () -> ()
    %cst_140 = arith.constant 5.000000e-01 : f32
    %339 = vector.broadcast %cst_140 : f32 to vector<2x8x16xf32>
    %340 = arith.mulf %338, %339 : vector<2x8x16xf32>
    %cst_141 = arith.constant dense<0xFF800000> : vector<2x8xf32>
    %341 = vector.multi_reduction <maximumf>, %340, %cst_141 [2] : vector<2x8x16xf32> to vector<2x8xf32>
    %342 = vector.shape_cast %341 : vector<2x8xf32> to vector<2x8x1xf32>
    %343 = vector.broadcast %342 : vector<2x8x1xf32> to vector<2x8x16xf32>
    %344 = arith.subf %340, %343 : vector<2x8x16xf32>
    %345 = math.exp %344 : vector<2x8x16xf32>
    %cst_142 = arith.constant dense<0.000000e+00> : vector<2x8xf32>
    %346 = vector.multi_reduction <add>, %345, %cst_142 [2] : vector<2x8x16xf32> to vector<2x8xf32>
    %347 = vector.shape_cast %346 : vector<2x8xf32> to vector<2x8x1xf32>
    %348 = vector.broadcast %347 : vector<2x8x1xf32> to vector<2x8x16xf32>
    %349 = arith.divf %345, %348 : vector<2x8x16xf32>
    "tpu.trace_start"() <{level = 10 : i32, message = "bqk,bkd->bqd"}> : () -> ()
    %cst_143 = arith.constant dense<0.000000e+00> : vector<2x8x4xf32>
    %350 = tpu.matmul %349, %337, %cst_143 {dimension_numbers = #tpu.dot_dimension_numbers<[2], [1], [1], [2], [0, 0, 0, 1, 1, 2], [0], [0]>} : vector<2x8x16xf32>, vector<2x16x4xf32>, vector<2x8x4xf32> -> vector<2x8x4xf32>
    "tpu.trace_stop"() : () -> ()
    %351 = tpu.concatenate %238, %254, %270, %286, %302, %318, %334, %350 in 2 : vector<2x8x4xf32>, vector<2x8x4xf32>, vector<2x8x4xf32>, vector<2x8x4xf32>, vector<2x8x4xf32>, vector<2x8x4xf32>, vector<2x8x4xf32>, vector<2x8x4xf32> -> vector<2x8x32xf32>
    %352 = vector.shape_cast %351 : vector<2x8x32xf32> to vector<16x32xf32>
    %c0_144 = arith.constant 0 : index
    %c0_145 = arith.constant 0 : index
    %c0_146 = arith.constant 0 : index
    %353 = vector.load %arg16[%c0_144, %c0_145, %c0_146] : memref<1x32x32xf32, #tpu.memory_space<vmem>>, vector<1x32x32xf32>
    %354 = vector.shape_cast %353 : vector<1x32x32xf32> to vector<32x32xf32>
    %cst_147 = arith.constant dense<0.000000e+00> : vector<16x32xf32>
    %355 = tpu.matmul %352, %354, %cst_147 {dimension_numbers = #tpu.dot_dimension_numbers<[1], [0], [0], [1], [0, 0, 1, 1], [], []>} : vector<16x32xf32>, vector<32x32xf32>, vector<16x32xf32> -> vector<16x32xf32>
    %c0_148 = arith.constant 0 : index
    %c0_149 = arith.constant 0 : index
    %c0_150 = arith.constant 0 : index
    %356 = vector.load %arg17[%c0_148, %c0_149, %c0_150] : memref<1x1x32xf32, #tpu.memory_space<vmem>>, vector<1x1x32xf32>
    %357 = vector.shape_cast %356 : vector<1x1x32xf32> to vector<1x32xf32>
    %358 = vector.broadcast %357 : vector<1x32xf32> to vector<16x32xf32>
    %359 = arith.addf %355, %358 : vector<16x32xf32>
    %360 = arith.addf %192, %359 : vector<16x32xf32>
    %c0_151 = arith.constant 0 : index
    %c0_152 = arith.constant 0 : index
    %c0_153 = arith.constant 0 : index
    %361 = vector.load %arg24[%c0_151, %c0_152, %c0_153] : memref<1x1x32xf32, #tpu.memory_space<vmem>>, vector<1x1x32xf32>
    %362 = vector.shape_cast %361 : vector<1x1x32xf32> to vector<1x32xf32>
    %c0_154 = arith.constant 0 : index
    %c0_155 = arith.constant 0 : index
    %c0_156 = arith.constant 0 : index
    %363 = vector.load %arg25[%c0_154, %c0_155, %c0_156] : memref<1x1x32xf32, #tpu.memory_space<vmem>>, vector<1x1x32xf32>
    %364 = vector.shape_cast %363 : vector<1x1x32xf32> to vector<1x32xf32>
    %cst_157 = arith.constant dense<0.000000e+00> : vector<16xf32>
    %365 = vector.multi_reduction <add>, %360, %cst_157 [1] : vector<16x32xf32> to vector<16xf32>
    %366 = vector.shape_cast %365 : vector<16xf32> to vector<16x1xf32>
    %cst_158 = arith.constant 3.200000e+01 : f32
    %367 = vector.broadcast %cst_158 : f32 to vector<16x1xf32>
    %368 = arith.divf %366, %367 : vector<16x1xf32>
    %369 = vector.broadcast %368 : vector<16x1xf32> to vector<16x32xf32>
    %370 = arith.subf %360, %369 : vector<16x32xf32>
    %371 = arith.mulf %370, %370 : vector<16x32xf32>
    %cst_159 = arith.constant dense<0.000000e+00> : vector<16xf32>
    %372 = vector.multi_reduction <add>, %371, %cst_159 [1] : vector<16x32xf32> to vector<16xf32>
    %373 = vector.shape_cast %372 : vector<16xf32> to vector<16x1xf32>
    %cst_160 = arith.constant 3.200000e+01 : f32
    %374 = vector.broadcast %cst_160 : f32 to vector<16x1xf32>
    %375 = arith.divf %373, %374 : vector<16x1xf32>
    %376 = vector.broadcast %368 : vector<16x1xf32> to vector<16x32xf32>
    %377 = arith.subf %360, %376 : vector<16x32xf32>
    %cst_161 = arith.constant 9.99999974E-6 : f32
    %378 = vector.broadcast %cst_161 : f32 to vector<16x1xf32>
    %379 = arith.addf %375, %378 : vector<16x1xf32>
    %380 = math.rsqrt %379 : vector<16x1xf32>
    %381 = vector.broadcast %380 : vector<16x1xf32> to vector<16x32xf32>
    %382 = arith.mulf %377, %381 : vector<16x32xf32>
    %383 = vector.broadcast %362 : vector<1x32xf32> to vector<16x32xf32>
    %384 = arith.mulf %382, %383 : vector<16x32xf32>
    %385 = vector.broadcast %364 : vector<1x32xf32> to vector<16x32xf32>
    %386 = arith.addf %384, %385 : vector<16x32xf32>
    %c0_162 = arith.constant 0 : index
    %c0_163 = arith.constant 0 : index
    %c0_164 = arith.constant 0 : index
    %387 = vector.load %arg18[%c0_162, %c0_163, %c0_164] : memref<1x32x64xf32, #tpu.memory_space<vmem>>, vector<1x32x64xf32>
    %388 = vector.shape_cast %387 : vector<1x32x64xf32> to vector<32x64xf32>
    %cst_165 = arith.constant dense<0.000000e+00> : vector<16x64xf32>
    %389 = tpu.matmul %386, %388, %cst_165 {dimension_numbers = #tpu.dot_dimension_numbers<[1], [0], [0], [1], [0, 0, 1, 1], [], []>} : vector<16x32xf32>, vector<32x64xf32>, vector<16x64xf32> -> vector<16x64xf32>
    %c0_166 = arith.constant 0 : index
    %c0_167 = arith.constant 0 : index
    %c0_168 = arith.constant 0 : index
    %390 = vector.load %arg19[%c0_166, %c0_167, %c0_168] : memref<1x1x64xf32, #tpu.memory_space<vmem>>, vector<1x1x64xf32>
    %391 = vector.shape_cast %390 : vector<1x1x64xf32> to vector<1x64xf32>
    %392 = vector.broadcast %391 : vector<1x64xf32> to vector<16x64xf32>
    %393 = arith.addf %389, %392 : vector<16x64xf32>
    %cst_169 = arith.constant 0.000000e+00 : f32
    %394 = vector.broadcast %cst_169 : f32 to vector<16x64xf32>
    %395 = arith.maximumf %393, %394 : vector<16x64xf32>
    %c0_170 = arith.constant 0 : index
    %c0_171 = arith.constant 0 : index
    %c0_172 = arith.constant 0 : index
    %396 = vector.load %arg20[%c0_170, %c0_171, %c0_172] : memref<1x64x32xf32, #tpu.memory_space<vmem>>, vector<1x64x32xf32>
    %397 = vector.shape_cast %396 : vector<1x64x32xf32> to vector<64x32xf32>
    %cst_173 = arith.constant dense<0.000000e+00> : vector<16x32xf32>
    %398 = tpu.matmul %395, %397, %cst_173 {dimension_numbers = #tpu.dot_dimension_numbers<[1], [0], [0], [1], [0, 0, 1, 1], [], []>} : vector<16x64xf32>, vector<64x32xf32>, vector<16x32xf32> -> vector<16x32xf32>
    %c0_174 = arith.constant 0 : index
    %c0_175 = arith.constant 0 : index
    %c0_176 = arith.constant 0 : index
    %399 = vector.load %arg21[%c0_174, %c0_175, %c0_176] : memref<1x1x32xf32, #tpu.memory_space<vmem>>, vector<1x1x32xf32>
    %400 = vector.shape_cast %399 : vector<1x1x32xf32> to vector<1x32xf32>
    %401 = vector.broadcast %400 : vector<1x32xf32> to vector<16x32xf32>
    %402 = arith.addf %398, %401 : vector<16x32xf32>
    %403 = arith.addf %386, %402 : vector<16x32xf32>
    %c0_177 = arith.constant 0 : index
    %c0_178 = arith.constant 0 : index
    %c0_179 = arith.constant 0 : index
    %404 = vector.load %arg26[%c0_177, %c0_178, %c0_179] : memref<1x1x32xf32, #tpu.memory_space<vmem>>, vector<1x1x32xf32>
    %405 = vector.shape_cast %404 : vector<1x1x32xf32> to vector<1x32xf32>
    %c0_180 = arith.constant 0 : index
    %c0_181 = arith.constant 0 : index
    %c0_182 = arith.constant 0 : index
    %406 = vector.load %arg27[%c0_180, %c0_181, %c0_182] : memref<1x1x32xf32, #tpu.memory_space<vmem>>, vector<1x1x32xf32>
    %407 = vector.shape_cast %406 : vector<1x1x32xf32> to vector<1x32xf32>
    %cst_183 = arith.constant dense<0.000000e+00> : vector<16xf32>
    %408 = vector.multi_reduction <add>, %403, %cst_183 [1] : vector<16x32xf32> to vector<16xf32>
    %409 = vector.shape_cast %408 : vector<16xf32> to vector<16x1xf32>
    %cst_184 = arith.constant 3.200000e+01 : f32
    %410 = vector.broadcast %cst_184 : f32 to vector<16x1xf32>
    %411 = arith.divf %409, %410 : vector<16x1xf32>
    %412 = vector.broadcast %411 : vector<16x1xf32> to vector<16x32xf32>
    %413 = arith.subf %403, %412 : vector<16x32xf32>
    %414 = arith.mulf %413, %413 : vector<16x32xf32>
    %cst_185 = arith.constant dense<0.000000e+00> : vector<16xf32>
    %415 = vector.multi_reduction <add>, %414, %cst_185 [1] : vector<16x32xf32> to vector<16xf32>
    %416 = vector.shape_cast %415 : vector<16xf32> to vector<16x1xf32>
    %cst_186 = arith.constant 3.200000e+01 : f32
    %417 = vector.broadcast %cst_186 : f32 to vector<16x1xf32>
    %418 = arith.divf %416, %417 : vector<16x1xf32>
    %419 = vector.broadcast %411 : vector<16x1xf32> to vector<16x32xf32>
    %420 = arith.subf %403, %419 : vector<16x32xf32>
    %cst_187 = arith.constant 9.99999974E-6 : f32
    %421 = vector.broadcast %cst_187 : f32 to vector<16x1xf32>
    %422 = arith.addf %418, %421 : vector<16x1xf32>
    %423 = math.rsqrt %422 : vector<16x1xf32>
    %424 = vector.broadcast %423 : vector<16x1xf32> to vector<16x32xf32>
    %425 = arith.mulf %420, %424 : vector<16x32xf32>
    %426 = vector.broadcast %405 : vector<1x32xf32> to vector<16x32xf32>
    %427 = arith.mulf %425, %426 : vector<16x32xf32>
    %428 = vector.broadcast %407 : vector<1x32xf32> to vector<16x32xf32>
    %429 = arith.addf %427, %428 : vector<16x32xf32>
    %430 = vector.shape_cast %429 : vector<16x32xf32> to vector<2x8x32xf32>
    %c0_188 = arith.constant 0 : index
    %c0_189 = arith.constant 0 : index
    %c0_190 = arith.constant 0 : index
    %431 = vector.load %arg29[%c0_188, %c0_189, %c0_190] : memref<2x8x32xf32, #tpu.memory_space<vmem>>, vector<2x8x32xf32>
    tpu.vector_store %arg29[%c0_188, %c0_189, %c0_190], %430 {strides = array<i32>} : memref<2x8x32xf32, #tpu.memory_space<vmem>>, vector<2x8x32xf32>,
    %c0_191 = arith.constant 0 : index
    %c0_192 = arith.constant 0 : index
    %c0_193 = arith.constant 0 : index
    %432 = vector.load %arg28[%c0_191, %c0_192, %c0_193] : memref<2x8x32xf32, #tpu.memory_space<vmem>>, vector<2x8x32xf32>
    tpu.vector_store %arg28[%c0_191, %c0_192, %c0_193], %430 {strides = array<i32>} : memref<2x8x32xf32, #tpu.memory_space<vmem>>, vector<2x8x32xf32>,
    return
  }
  func.func @transform_0(%arg0: i32) -> (i32, i32, i32) {
    %c0_i32 = arith.constant 0 : i32
    %c0_i32_0 = arith.constant 0 : i32
    %c0_i32_1 = arith.constant 0 : i32
    %c0_i32_2 = arith.constant 0 : i32
    return %c0_i32, %c0_i32_0, %c0_i32_1 : i32, i32, i32
  }
  func.func @transform_1(%arg0: i32) -> (i32, i32, i32) {
    %c0_i32 = arith.constant 0 : i32
    %c0_i32_0 = arith.constant 0 : i32
    %c0_i32_1 = arith.constant 0 : i32
    %c0_i32_2 = arith.constant 0 : i32
    return %c0_i32, %c0_i32_0, %c0_i32_1 : i32, i32, i32
  }
  func.func @transform_2(%arg0: i32) -> (i32, i32, i32) {
    %c0_i32 = arith.constant 0 : i32
    %c0_i32_0 = arith.constant 0 : i32
    %c0_i32_1 = arith.constant 0 : i32
    %c0_i32_2 = arith.constant 0 : i32
    return %c0_i32, %c0_i32_0, %c0_i32_1 : i32, i32, i32
  }
  func.func @transform_3(%arg0: i32) -> (i32, i32, i32) {
    %c0_i32 = arith.constant 0 : i32
    %c0_i32_0 = arith.constant 0 : i32
    %c0_i32_1 = arith.constant 0 : i32
    return %arg0, %c0_i32, %c0_i32_0 : i32, i32, i32
  }
  func.func @transform_4(%arg0: i32) -> (i32, i32, i32) {
    %c0_i32 = arith.constant 0 : i32
    %c0_i32_0 = arith.constant 0 : i32
    %c0_i32_1 = arith.constant 0 : i32
    return %arg0, %c0_i32, %c0_i32_0 : i32, i32, i32
  }
  func.func @transform_5(%arg0: i32) -> (i32, i32, i32) {
    %c0_i32 = arith.constant 0 : i32
    %c0_i32_0 = arith.constant 0 : i32
    %c0_i32_1 = arith.constant 0 : i32
    return %arg0, %c0_i32, %c0_i32_0 : i32, i32, i32
  }
  func.func @transform_6(%arg0: i32) -> (i32, i32, i32) {
    %c0_i32 = arith.constant 0 : i32
    %c0_i32_0 = arith.constant 0 : i32
    %c0_i32_1 = arith.constant 0 : i32
    return %arg0, %c0_i32, %c0_i32_0 : i32, i32, i32
  }
  func.func @transform_7(%arg0: i32) -> (i32, i32, i32) {
    %c0_i32 = arith.constant 0 : i32
    %c0_i32_0 = arith.constant 0 : i32
    %c0_i32_1 = arith.constant 0 : i32
    return %arg0, %c0_i32, %c0_i32_0 : i32, i32, i32
  }
  func.func @transform_8(%arg0: i32) -> (i32, i32, i32) {
    %c0_i32 = arith.constant 0 : i32
    %c0_i32_0 = arith.constant 0 : i32
    %c0_i32_1 = arith.constant 0 : i32
    return %arg0, %c0_i32, %c0_i32_0 : i32, i32, i32
  }
  func.func @transform_9(%arg0: i32) -> (i32, i32, i32) {
    %c0_i32 = arith.constant 0 : i32
    %c0_i32_0 = arith.constant 0 : i32
    %c0_i32_1 = arith.constant 0 : i32
    return %arg0, %c0_i32, %c0_i32_0 : i32, i32, i32
  }
  func.func @transform_10(%arg0: i32) -> (i32, i32, i32) {
    %c0_i32 = arith.constant 0 : i32
    %c0_i32_0 = arith.constant 0 : i32
    %c0_i32_1 = arith.constant 0 : i32
    return %arg0, %c0_i32, %c0_i32_0 : i32, i32, i32
  }
  func.func @transform_11(%arg0: i32) -> (i32, i32, i32) {
    %c0_i32 = arith.constant 0 : i32
    %c0_i32_0 = arith.constant 0 : i32
    %c0_i32_1 = arith.constant 0 : i32
    return %arg0, %c0_i32, %c0_i32_0 : i32, i32, i32
  }
  func.func @transform_12(%arg0: i32) -> (i32, i32, i32) {
    %c0_i32 = arith.constant 0 : i32
    %c0_i32_0 = arith.constant 0 : i32
    %c0_i32_1 = arith.constant 0 : i32
    return %arg0, %c0_i32, %c0_i32_0 : i32, i32, i32
  }
  func.func @transform_13(%arg0: i32) -> (i32, i32, i32) {
    %c0_i32 = arith.constant 0 : i32
    %c0_i32_0 = arith.constant 0 : i32
    %c0_i32_1 = arith.constant 0 : i32
    return %arg0, %c0_i32, %c0_i32_0 : i32, i32, i32
  }
  func.func @transform_14(%arg0: i32) -> (i32, i32, i32) {
    %c0_i32 = arith.constant 0 : i32
    %c0_i32_0 = arith.constant 0 : i32
    %c0_i32_1 = arith.constant 0 : i32
    return %arg0, %c0_i32, %c0_i32_0 : i32, i32, i32
  }
  func.func @transform_15(%arg0: i32) -> (i32, i32, i32) {
    %c0_i32 = arith.constant 0 : i32
    %c0_i32_0 = arith.constant 0 : i32
    %c0_i32_1 = arith.constant 0 : i32
    return %arg0, %c0_i32, %c0_i32_0 : i32, i32, i32
  }
  func.func @transform_16(%arg0: i32) -> (i32, i32, i32) {
    %c0_i32 = arith.constant 0 : i32
    %c0_i32_0 = arith.constant 0 : i32
    %c0_i32_1 = arith.constant 0 : i32
    return %arg0, %c0_i32, %c0_i32_0 : i32, i32, i32
  }
  func.func @transform_17(%arg0: i32) -> (i32, i32, i32) {
    %c0_i32 = arith.constant 0 : i32
    %c0_i32_0 = arith.constant 0 : i32
    %c0_i32_1 = arith.constant 0 : i32
    return %arg0, %c0_i32, %c0_i32_0 : i32, i32, i32
  }
  func.func @transform_18(%arg0: i32) -> (i32, i32, i32) {
    %c0_i32 = arith.constant 0 : i32
    %c0_i32_0 = arith.constant 0 : i32
    %c0_i32_1 = arith.constant 0 : i32
    return %arg0, %c0_i32, %c0_i32_0 : i32, i32, i32
  }
  func.func @transform_19(%arg0: i32) -> (i32, i32, i32) {
    %c0_i32 = arith.constant 0 : i32
    %c0_i32_0 = arith.constant 0 : i32
    %c0_i32_1 = arith.constant 0 : i32
    return %arg0, %c0_i32, %c0_i32_0 : i32, i32, i32
  }
  func.func @transform_20(%arg0: i32) -> (i32, i32, i32) {
    %c0_i32 = arith.constant 0 : i32
    %c0_i32_0 = arith.constant 0 : i32
    %c0_i32_1 = arith.constant 0 : i32
    return %arg0, %c0_i32, %c0_i32_0 : i32, i32, i32
  }
  func.func @transform_21(%arg0: i32) -> (i32, i32, i32) {
    %c0_i32 = arith.constant 0 : i32
    %c0_i32_0 = arith.constant 0 : i32
    %c0_i32_1 = arith.constant 0 : i32
    return %arg0, %c0_i32, %c0_i32_0 : i32, i32, i32
  }
  func.func @transform_22(%arg0: i32) -> (i32, i32, i32) {
    %c0_i32 = arith.constant 0 : i32
    %c0_i32_0 = arith.constant 0 : i32
    %c0_i32_1 = arith.constant 0 : i32
    return %arg0, %c0_i32, %c0_i32_0 : i32, i32, i32
  }
  func.func @transform_23(%arg0: i32) -> (i32, i32, i32) {
    %c0_i32 = arith.constant 0 : i32
    %c0_i32_0 = arith.constant 0 : i32
    %c0_i32_1 = arith.constant 0 : i32
    return %arg0, %c0_i32, %c0_i32_0 : i32, i32, i32
  }
  func.func @transform_24(%arg0: i32) -> (i32, i32, i32) {
    %c0_i32 = arith.constant 0 : i32
    %c0_i32_0 = arith.constant 0 : i32
    %c0_i32_1 = arith.constant 0 : i32
    return %arg0, %c0_i32, %c0_i32_0 : i32, i32, i32
  }
  func.func @transform_25(%arg0: i32) -> (i32, i32, i32) {
    %c0_i32 = arith.constant 0 : i32
    %c0_i32_0 = arith.constant 0 : i32
    %c0_i32_1 = arith.constant 0 : i32
    return %arg0, %c0_i32, %c0_i32_0 : i32, i32, i32
  }
  func.func @transform_26(%arg0: i32) -> (i32, i32, i32) {
    %c0_i32 = arith.constant 0 : i32
    %c0_i32_0 = arith.constant 0 : i32
    %c0_i32_1 = arith.constant 0 : i32
    return %arg0, %c0_i32, %c0_i32_0 : i32, i32, i32
  }
  func.func @transform_27(%arg0: i32) -> (i32, i32, i32) {
    %c0_i32 = arith.constant 0 : i32
    %c0_i32_0 = arith.constant 0 : i32
    %c0_i32_1 = arith.constant 0 : i32
    %c0_i32_2 = arith.constant 0 : i32
    return %c0_i32, %c0_i32_0, %c0_i32_1 : i32, i32, i32
  }
}

module attributes {stable_mosaic.version = 11 : i64} {
  func.func @_head_kernel(%arg0: memref<16x32xf32, #tpu.memory_space<vmem>>, %arg1: memref<1x32xf32, #tpu.memory_space<vmem>>, %arg2: memref<1x32xf32, #tpu.memory_space<vmem>>, %arg3: memref<32x6xf32, #tpu.memory_space<vmem>>, %arg4: memref<1x6xf32, #tpu.memory_space<vmem>>, %arg5: memref<32x32xf32, #tpu.memory_space<vmem>>, %arg6: memref<1x32xf32, #tpu.memory_space<vmem>>, %arg7: memref<32x32xf32, #tpu.memory_space<vmem>>, %arg8: memref<1x32xf32, #tpu.memory_space<vmem>>, %arg9: memref<32x4xf32, #tpu.memory_space<vmem>>, %arg10: memref<1x4xf32, #tpu.memory_space<vmem>>, %arg11: memref<16x10xf32, #tpu.memory_space<vmem>>) attributes {dimension_semantics = [], scalar_prefetch = 0 : i64, scratch_operands = 0 : i64, tpu.core_type = #tpu.core_type<tc>} {
    %c0 = arith.constant 0 : index
    %c0_0 = arith.constant 0 : index
    %0 = vector.load %arg0[%c0, %c0_0] : memref<16x32xf32, #tpu.memory_space<vmem>>, vector<16x32xf32>
    %c0_1 = arith.constant 0 : index
    %c0_2 = arith.constant 0 : index
    %1 = vector.load %arg1[%c0_1, %c0_2] : memref<1x32xf32, #tpu.memory_space<vmem>>, vector<1x32xf32>
    %c0_3 = arith.constant 0 : index
    %c0_4 = arith.constant 0 : index
    %2 = vector.load %arg2[%c0_3, %c0_4] : memref<1x32xf32, #tpu.memory_space<vmem>>, vector<1x32xf32>
    %cst = arith.constant dense<0.000000e+00> : vector<16xf32>
    %3 = vector.multi_reduction <add>, %0, %cst [1] : vector<16x32xf32> to vector<16xf32>
    %4 = vector.shape_cast %3 : vector<16xf32> to vector<16x1xf32>
    %cst_5 = arith.constant 3.200000e+01 : f32
    %5 = vector.broadcast %cst_5 : f32 to vector<16x1xf32>
    %6 = arith.divf %4, %5 : vector<16x1xf32>
    %7 = vector.broadcast %6 : vector<16x1xf32> to vector<16x32xf32>
    %8 = arith.subf %0, %7 : vector<16x32xf32>
    %9 = arith.mulf %8, %8 : vector<16x32xf32>
    %cst_6 = arith.constant dense<0.000000e+00> : vector<16xf32>
    %10 = vector.multi_reduction <add>, %9, %cst_6 [1] : vector<16x32xf32> to vector<16xf32>
    %11 = vector.shape_cast %10 : vector<16xf32> to vector<16x1xf32>
    %cst_7 = arith.constant 3.200000e+01 : f32
    %12 = vector.broadcast %cst_7 : f32 to vector<16x1xf32>
    %13 = arith.divf %11, %12 : vector<16x1xf32>
    %14 = vector.broadcast %6 : vector<16x1xf32> to vector<16x32xf32>
    %15 = arith.subf %0, %14 : vector<16x32xf32>
    %cst_8 = arith.constant 9.99999974E-6 : f32
    %16 = vector.broadcast %cst_8 : f32 to vector<16x1xf32>
    %17 = arith.addf %13, %16 : vector<16x1xf32>
    %18 = math.rsqrt %17 : vector<16x1xf32>
    %19 = vector.broadcast %18 : vector<16x1xf32> to vector<16x32xf32>
    %20 = arith.mulf %15, %19 : vector<16x32xf32>
    %21 = vector.broadcast %1 : vector<1x32xf32> to vector<16x32xf32>
    %22 = arith.mulf %20, %21 : vector<16x32xf32>
    %23 = vector.broadcast %2 : vector<1x32xf32> to vector<16x32xf32>
    %24 = arith.addf %22, %23 : vector<16x32xf32>
    %c0_9 = arith.constant 0 : index
    %c0_10 = arith.constant 0 : index
    %25 = vector.load %arg3[%c0_9, %c0_10] : memref<32x6xf32, #tpu.memory_space<vmem>>, vector<32x6xf32>
    %cst_11 = arith.constant dense<0.000000e+00> : vector<16x6xf32>
    %26 = tpu.matmul %24, %25, %cst_11 {dimension_numbers = #tpu.dot_dimension_numbers<[1], [0], [0], [1], [0, 0, 1, 1], [], []>} : vector<16x32xf32>, vector<32x6xf32>, vector<16x6xf32> -> vector<16x6xf32>
    %c0_12 = arith.constant 0 : index
    %c0_13 = arith.constant 0 : index
    %27 = vector.load %arg4[%c0_12, %c0_13] : memref<1x6xf32, #tpu.memory_space<vmem>>, vector<1x6xf32>
    %28 = vector.broadcast %27 : vector<1x6xf32> to vector<16x6xf32>
    %29 = arith.addf %26, %28 : vector<16x6xf32>
    %c0_14 = arith.constant 0 : index
    %c0_15 = arith.constant 0 : index
    %30 = vector.load %arg5[%c0_14, %c0_15] : memref<32x32xf32, #tpu.memory_space<vmem>>, vector<32x32xf32>
    %cst_16 = arith.constant dense<0.000000e+00> : vector<16x32xf32>
    %31 = tpu.matmul %24, %30, %cst_16 {dimension_numbers = #tpu.dot_dimension_numbers<[1], [0], [0], [1], [0, 0, 1, 1], [], []>} : vector<16x32xf32>, vector<32x32xf32>, vector<16x32xf32> -> vector<16x32xf32>
    %c0_17 = arith.constant 0 : index
    %c0_18 = arith.constant 0 : index
    %32 = vector.load %arg6[%c0_17, %c0_18] : memref<1x32xf32, #tpu.memory_space<vmem>>, vector<1x32xf32>
    %33 = vector.broadcast %32 : vector<1x32xf32> to vector<16x32xf32>
    %34 = arith.addf %31, %33 : vector<16x32xf32>
    %cst_19 = arith.constant 0.000000e+00 : f32
    %35 = vector.broadcast %cst_19 : f32 to vector<16x32xf32>
    %36 = arith.maximumf %34, %35 : vector<16x32xf32>
    %c0_20 = arith.constant 0 : index
    %c0_21 = arith.constant 0 : index
    %37 = vector.load %arg7[%c0_20, %c0_21] : memref<32x32xf32, #tpu.memory_space<vmem>>, vector<32x32xf32>
    %cst_22 = arith.constant dense<0.000000e+00> : vector<16x32xf32>
    %38 = tpu.matmul %36, %37, %cst_22 {dimension_numbers = #tpu.dot_dimension_numbers<[1], [0], [0], [1], [0, 0, 1, 1], [], []>} : vector<16x32xf32>, vector<32x32xf32>, vector<16x32xf32> -> vector<16x32xf32>
    %c0_23 = arith.constant 0 : index
    %c0_24 = arith.constant 0 : index
    %39 = vector.load %arg8[%c0_23, %c0_24] : memref<1x32xf32, #tpu.memory_space<vmem>>, vector<1x32xf32>
    %40 = vector.broadcast %39 : vector<1x32xf32> to vector<16x32xf32>
    %41 = arith.addf %38, %40 : vector<16x32xf32>
    %cst_25 = arith.constant 0.000000e+00 : f32
    %42 = vector.broadcast %cst_25 : f32 to vector<16x32xf32>
    %43 = arith.maximumf %41, %42 : vector<16x32xf32>
    %c0_26 = arith.constant 0 : index
    %c0_27 = arith.constant 0 : index
    %44 = vector.load %arg9[%c0_26, %c0_27] : memref<32x4xf32, #tpu.memory_space<vmem>>, vector<32x4xf32>
    %cst_28 = arith.constant dense<0.000000e+00> : vector<16x4xf32>
    %45 = tpu.matmul %43, %44, %cst_28 {dimension_numbers = #tpu.dot_dimension_numbers<[1], [0], [0], [1], [0, 0, 1, 1], [], []>} : vector<16x32xf32>, vector<32x4xf32>, vector<16x4xf32> -> vector<16x4xf32>
    %c0_29 = arith.constant 0 : index
    %c0_30 = arith.constant 0 : index
    %46 = vector.load %arg10[%c0_29, %c0_30] : memref<1x4xf32, #tpu.memory_space<vmem>>, vector<1x4xf32>
    %47 = vector.broadcast %46 : vector<1x4xf32> to vector<16x4xf32>
    %48 = arith.addf %45, %47 : vector<16x4xf32>
    %49 = arith.negf %48 : vector<16x4xf32>
    %50 = math.exp %49 : vector<16x4xf32>
    %cst_31 = arith.constant 1.000000e+00 : f32
    %51 = vector.broadcast %cst_31 : f32 to vector<16x4xf32>
    %52 = arith.addf %51, %50 : vector<16x4xf32>
    %53 = arith.divf %51, %52 : vector<16x4xf32>
    %54 = tpu.concatenate %29, %53 in 1 : vector<16x6xf32>, vector<16x4xf32> -> vector<16x10xf32>
    %c0_32 = arith.constant 0 : index
    %c0_33 = arith.constant 0 : index
    %55 = vector.load %arg11[%c0_32, %c0_33] : memref<16x10xf32, #tpu.memory_space<vmem>>, vector<16x10xf32>
    tpu.vector_store %arg11[%c0_32, %c0_33], %54 {strides = array<i32>} : memref<16x10xf32, #tpu.memory_space<vmem>>, vector<16x10xf32>,
    return
  }
}

</mosaic_0001>

<bundles_post_ra>
// kernel: detr_forward.4
= control target key start
LH: loop header
LB: loop body
LE: loop exit
PB: predicated region body
PF: predicated region fallthrough
CT: control target
= control target key end

     0   :  { %v327_v0 = vmov 0.0   ;;  %vm59_vm0 = vcmask 523264   ;;  %vm273_vm1 = vcmask 261120   ;;  %s528_s1 = inlined_call_operand.vmem [shape: f32[192,64], index: 1, kind: input, shape index: {}]   ;;  %s529_s0 = inlined_call_operand.vmem [shape: f32[32,192], index: 0, kind: input, shape index: {}]   ;;  %s530_s3 = inlined_call_operand.vmem [shape: f32[64,32], index: 3, kind: input, shape index: {}]   ;;  %s531_s2 = inlined_call_operand.vmem [shape: f32[1,64], index: 2, kind: input, shape index: {}]   ;;  %s532_s4 = inlined_call_operand.vmem [shape: f32[1,32], index: 4, kind: input, shape index: {}]   ;;  %s533_s5 = inlined_call_operand.vmem [shape: f32[32,32], index: 5, kind: output, shape index: {}]  }
   0x1   :  { %72 = vmatprep.subr.mxu0 %v327_v0  ;;  %v43_v1 = vld [vmem:[%s528_s1 + $0x78] sm:$0xff]  ;;  %v42_v2 = vld [vmem:[%s528_s1 + $0x70] sm:$0xff]  ;;  %v41_v3 = vld [vmem:[%s528_s1 + $0x68] sm:$0xff] }
   0x2   :  { %73 = vmatpush1.msra.mxu0 %v43_v1  ;;  %v40_v4 = vld [vmem:[%s528_s1 + $0x60] sm:$0xff]  ;;  %v39_v5 = vld [vmem:[%s528_s1 + $0x58] sm:$0xff]  ;;  %v38_v6 = vld [vmem:[%s528_s1 + $0x50] sm:$0xff] }
   0x3   :  { %74 = vmatprep.subr.mxu0 %v327_v0  ;;  %v21_v7 = vld [vmem:[%s529_s0 + $0x8] sm:$0xff]  ;;  %v168_v9 = vld [vmem:[%s530_s3 + $0x38] sm:$0xff]  ;;  %v167_v10 = vld [vmem:[%s530_s3 + $0x30] sm:$0xff] }
   0x4   :  { %75 = vmatpush1.msra.mxu0 %v42_v2  ;;  %283 = vmatprep.mubr.msk.f32.mxu0 %vm59_vm0, %v21_v7  ;;  %v37_v8 = vld [vmem:[%s528_s1 + $0x48] sm:$0xff]  ;;  %v36_v11 = vld [vmem:[%s528_s1 + $0x40] sm:$0xff]  ;;  %v35_v13 = vld [vmem:[%s528_s1 + $0x38] sm:$0xff] }
   0x5   :  { %76 = vmatprep.subr.mxu0 %v327_v0  ;;  %304 = vmatprep.subr.mxu1 %v168_v9  ;;  %v166_v12 = vld [vmem:[%s530_s3 + $0x28] sm:$0xff]  ;;  %v165_v14 = vld [vmem:[%s530_s3 + $0x20] sm:$0xff]  ;;  %v34_v15 = vld [vmem:[%s528_s1 + $0x30] sm:$0xff] }
   0x6   :  { %77 = vmatpush1.msra.mxu0 %v41_v3  ;;  %305 = vmatpush3.msra.mxu1 %v168_v9  ;;  %v33_v16 = vld [vmem:[%s528_s1 + $0x28] sm:$0xff]  ;;  %v32_v17 = vld [vmem:[%s528_s1 + $0x20] sm:$0xff]  ;;  %v31_v18 = vld [vmem:[%s528_s1 + $0x18] sm:$0xff] }
   0x7   :  { %78 = vmatprep.subr.mxu0 %v327_v0  ;;  %306 = vmatprep.subr.mxu1 %v167_v10  ;;  %v30_v19 = vld [vmem:[%s528_s1 + $0x10] sm:$0xff]  ;;  %v29_v20 = vld [vmem:[%s528_s1 + $0x8] sm:$0xff]  ;;  %v28_v21 = vld [vmem:[%s528_s1] sm:$0xff] }
   0x8   :  { %79 = vmatpush1.msra.mxu0 %v40_v4  ;;  %307 = vmatpush3.msra.mxu1 %v167_v10  ;;  %v51_v22 = vld [vmem:[%s528_s1 + $0xb8] sm:$0xff]  ;;  %v50_v23 = vld [vmem:[%s528_s1 + $0xb0] sm:$0xff]  ;;  %v49_v24 = vld [vmem:[%s528_s1 + $0xa8] sm:$0xff] }
   0x9   :  { %80 = vmatprep.subr.mxu0 %v327_v0  ;;  %308 = vmatprep.subr.mxu1 %v166_v12  ;;  %v48_v25 = vld [vmem:[%s528_s1 + $0xa0] sm:$0xff]  ;;  %v47_v26 = vld [vmem:[%s528_s1 + $0x98] sm:$0xff]  ;;  %v46_v27 = vld [vmem:[%s528_s1 + $0x90] sm:$0xff] }
   0xa   :  { %81 = vmatpush1.msra.mxu0 %v39_v5  ;;  %309 = vmatpush3.msra.mxu1 %v166_v12  ;;  %v45_v28 = vld [vmem:[%s528_s1 + $0x88] sm:$0xff]  ;;  %v44_v29 = vld [vmem:[%s528_s1 + $0x80] sm:$0xff]  ;;  %v23_v31 = vld [vmem:[%s529_s0 + $0x18] sm:$0xff] }
   0xb   :  { %82 = vmatprep.subr.mxu0 %v327_v0  ;;  %310 = vmatprep.subr.mxu1 %v165_v14  ;;  %v20_v30 = vld [vmem:[%s529_s0] sm:$0xff]  ;;  %v22_v32 = vld [vmem:[%s529_s0 + $0x10] sm:$0xff]  ;;  %v25_v33 = vld [vmem:[%s529_s0 + $0x28] sm:$0xff] }
   0xc   :  { %83 = vmatpush1.msra.mxu0 %v38_v6  ;;  %311 = vmatpush3.msra.mxu1 %v165_v14  ;;  %v24_v34 = vld [vmem:[%s529_s0 + $0x20] sm:$0xff]  ;;  %v27_v35 = vld [vmem:[%s529_s0 + $0x38] sm:$0xff]  ;;  %v26_v36 = vld [vmem:[%s529_s0 + $0x30] sm:$0xff] }
   0xd   :  { %84 = vmatprep.subr.mxu0 %v327_v0  ;;  %v164_v37 = vld [vmem:[%s530_s3 + $0x18] sm:$0xff]  ;;  %v163_v38 = vld [vmem:[%s530_s3 + $0x10] sm:$0xff]  ;;  %v162_v39 = vld [vmem:[%s530_s3 + $0x8] sm:$0xff] }
   0xe   :  { %85 = vmatpush1.msra.mxu0 %v37_v8  ;;  %312 = vmatprep.subr.mxu1 %v164_v37  ;;  %v161_v40 = vld [vmem:[%s530_s3] sm:$0xff] }
   0xf   :  { %86 = vmatprep.subr.mxu0 %v327_v0  ;;  %313 = vmatpush3.msra.mxu1 %v164_v37  ;;  %v282_v41 = vld [vmem:[%s531_s2] ss:$0 sm:$0xff] }
  0x10   :  { %87 = vmatpush1.msra.mxu0 %v36_v11  ;;  %314 = vmatprep.subr.mxu1 %v163_v38  ;;  %v287_v58 = vld [vmem:[%s532_s4] ss:$0 sm:$0xff] }
  0x11   :  { %88 = vmatprep.subr.mxu0 %v327_v0  ;;  %315 = vmatpush3.msra.mxu1 %v163_v38 }
  0x12   :  { %89 = vmatpush1.msra.mxu0 %v35_v13  ;;  %316 = vmatprep.subr.mxu1 %v162_v39 }
  0x13   :  { %90 = vmatprep.subr.mxu0 %v327_v0  ;;  %317 = vmatpush3.msra.mxu1 %v162_v39 }
  0x14   :  { %91 = vmatpush1.msra.mxu0 %v34_v15  ;;  %318 = vmatprep.subr.mxu1 %v161_v40 }
  0x15   :  { %92 = vmatprep.subr.mxu0 %v327_v0  ;;  %319 = vmatpush3.msra.mxu1 %v161_v40 }
  0x16   :  { %93 = vmatpush1.msra.mxu0 %v33_v16 }
  0x17   :  { %94 = vmatprep.subr.mxu0 %v327_v0 }
  0x18   :  { %95 = vmatpush1.msra.mxu0 %v32_v17 }
  0x19   :  { %96 = vmatprep.subr.mxu0 %v327_v0 }
  0x1a   :  { %97 = vmatpush1.msra.mxu0 %v31_v18 }
  0x1b   :  { %98 = vmatprep.subr.mxu0 %v327_v0 }
  0x1c   :  { %99 = vmatpush1.msra.mxu0 %v30_v19 }
  0x1d   :  { %100 = vmatprep.subr.mxu0 %v327_v0 }
  0x1e   :  { %101 = vmatpush1.msra.mxu0 %v29_v20 }
  0x1f   :  { %102 = vmatprep.subr.mxu0 %v327_v0 }
  0x20   :  { %103 = vmatpush1.msra.mxu0 %v28_v21 }
  0x21   :  { %120 = vmatprep.subr.mxu0 %v327_v0 }
  0x22   :  { %121 = vmatpush2.msra.mxu0 %v51_v22 }
  0x23   :  { %122 = vmatprep.subr.mxu0 %v327_v0 }
  0x24   :  { %123 = vmatpush2.msra.mxu0 %v50_v23 }
  0x25   :  { %124 = vmatprep.subr.mxu0 %v327_v0 }
  0x26   :  { %125 = vmatpush2.msra.mxu0 %v49_v24 }
  0x27   :  { %126 = vmatprep.subr.mxu0 %v327_v0 }
  0x28   :  { %127 = vmatpush2.msra.mxu0 %v48_v25 }
  0x29   :  { %128 = vmatprep.subr.mxu0 %v327_v0 }
  0x2a   :  { %129 = vmatpush2.msra.mxu0 %v47_v26 }
  0x2b   :  { %130 = vmatprep.subr.mxu0 %v327_v0 }
  0x2c   :  { %131 = vmatpush2.msra.mxu0 %v46_v27 }
  0x2d   :  { %132 = vmatprep.subr.mxu0 %v327_v0 }
  0x2e   :  { %133 = vmatpush2.msra.mxu0 %v45_v28 }
  0x2f   :  { %134 = vmatprep.subr.mxu0 %v327_v0 }
  0x30   :  { %135 = vmatpush2.msra.mxu0 %v44_v29 }
  0x31   :  { %137 = vmatmul.mubr.f32.vlgmr.msra.gmra.mxu0 %v20_v30 }
  0x32   :  { %284 = vmatprep.mubr.msk.f32.mxu0 %vm59_vm0, %v23_v31 }
  0x35   :  { %142 = vmatmul.mubr.f32.gmra.mxu0 %v22_v32 }
  0x36   :  { %285 = vmatprep.mubr.msk.f32.mxu0 %vm59_vm0, %v25_v33 }
  0x39   :  { %147 = vmatmul.mubr.f32.gmra.mxu0 %v24_v34 }
  0x3a   :  { %286 = vmatprep.mubr.msk.f32.mxu0 %vm59_vm0, %v27_v35 }
  0x3d   :  { %152 = vmatmul.mubr.f32.gmra.mxu0 %v26_v36 }
  0xf1   :  { %v138_v42 = vpop.f32.mrf.mxu0 }
  0xf2   :  { %v139_v43 = vadd.f32 %v282_v41, %v138_v42 }
  0xf3   :  { %v140_v44 = vpop.f32.mrf.mxu0 }
  0xf4   :  { %v157_v45 = vmax.f32 %v139_v43, 0.0 }
  0xf5   :  { %v143_v46 = vpop.f32.mrf.mxu0 }
  0xf6   :  { %v144_v47 = vadd.f32 %v282_v41, %v143_v46  ;;  %320 = vmatprep.mubr.msk.f32.mxu1 %vm59_vm0, %v157_v45 }
  0xf7   :  { %v145_v48 = vpop.f32.mrf.mxu0 }
  0xf8   :  { %v158_v49 = vmax.f32 %v144_v47, 0.0 }
  0xf9   :  { %v148_v50 = vpop.f32.mrf.mxu0 }
  0xfa   :  { %v149_v51 = vadd.f32 %v282_v41, %v148_v50  ;;  %321 = vmatmul.mubr.msk.f32.vlgmr.msra.gmra.mxu1 %vm59_vm0, %v158_v49 }
  0xfb   :  { %v150_v52 = vpop.f32.mrf.mxu0 }
  0xfc   :  { %v159_v53 = vmax.f32 %v149_v51, 0.0 }
  0xfd   :  { %v153_v54 = vpop.f32.mrf.mxu0 }
  0xfe   :  { %v154_v55 = vadd.f32 %v282_v41, %v153_v54  ;;  %323 = vmatprep.mubr.msk.f32.mxu1 %vm59_vm0, %v159_v53 }
  0xff   :  { %v155_v56 = vpop.f32.mrf.mxu0 }
 0x100   :  { %v160_v57 = vmax.f32 %v154_v55, 0.0 }
 0x102   :  { %324 = vmatmul.mubr.msk.f32.gmra.mxu1 %vm59_vm0, %v160_v57 }
 0x1ba   :  { %v322_v59 = vpop.f32.mrf.mxu1 }
 0x1bb   :  { %v260_v60 = vadd.f32 %v322_v59, %v287_v58 }
 0x1bc   :  { %v254_v61 = vpop.f32.mrf.mxu1 }
 0x1bd   :  { %275 = vst.msk [vmem:[%s533_s5 + $0x8] sm:$0xff] %vm273_vm1, %v260_v60  ;;  %v255_v62 = vadd.f32 %v287_v58, %v254_v61 }
 0x1bf   :  { %274 = vst.msk [vmem:[%s533_s5] sm:$0xff] %vm273_vm1, %v255_v62 }
 0x1c2   :  { %v325_v63 = vpop.f32.mrf.mxu1 }
 0x1c3   :  { %v270_v0 = vadd.f32 %v325_v63, %v287_v58 }
 0x1c4   :  { %v264_v1 = vpop.f32.mrf.mxu1 }
 0x1c5   :  { %277 = vst.msk [vmem:[%s533_s5 + $0x18] sm:$0xff] %vm273_vm1, %v270_v0  ;;  %v265_v2 = vadd.f32 %v287_v58, %v264_v1 }
 0x1c7   :  { %276 = vst.msk [vmem:[%s533_s5 + $0x10] sm:$0xff] %vm273_vm1, %v265_v2 }

// kernel: detr_forward.7
= control target key start
LH: loop header
LB: loop body
LE: loop exit
PB: predicated region body
PF: predicated region fallthrough
CT: control target
= control target key end

     0   :  { %vm42_vm0 = vcmask 261120   ;;  %vm472_vm1 = vcmask 48128   ;;  %vm475_vm2 = vcmask 80896   ;;  %s730_s0 = inlined_call_operand.vmem [shape: f32[16,32], index: 0, kind: input, shape index: {}]   ;;  %s731_s3 = inlined_call_operand.vmem [shape: f32[32,6], index: 3, kind: input, shape index: {}]   ;;  %s732_s5 = inlined_call_operand.vmem [shape: f32[32,32], index: 5, kind: input, shape index: {}]   ;;  %s733_s1 = inlined_call_operand.vmem [shape: f32[1,32], index: 1, kind: input, shape index: {}]   ;;  %s734_s2 = inlined_call_operand.vmem [shape: f32[1,32], index: 2, kind: input, shape index: {}]   ;;  %s735_s7 = inlined_call_operand.vmem [shape: f32[32,32], index: 7, kind: input, shape index: {}]   ;;  %s736_s6 = inlined_call_operand.vmem [shape: f32[1,32], index: 6, kind: input, shape index: {}]   ;;  %s737_s9 = inlined_call_operand.vmem [shape: f32[32,4], index: 9, kind: input, shape index: {}]   ;;  %s738_s8 = inlined_call_operand.vmem [shape: f32[1,32], index: 8, kind: input, shape index: {}]   ;;  %s739_s10 = inlined_call_operand.vmem [shape: f32[1,4], index: 10, kind: input, shape index: {}]   ;;  %s740_s4 = inlined_call_operand.vmem [shape: f32[1,6], index: 4, kind: input, shape index: {}]   ;;  %s741_s11 = inlined_call_operand.vmem [shape: f32[16,10], index: 11, kind: output, shape index: {}]  }
   0x1   :  { %v38_v0 = vld [vmem:[%s730_s0] sm:$0xff]  ;;  %v39_v1 = vld [vmem:[%s730_s0 + $0x8] sm:$0xff]  ;;  %v89_v14 = vld [vmem:[%s731_s3 + $0x18] sm:$0xff] }
   0x2   :  { %v43_v2 = vsel %vm42_vm0, %v38_v0, 0.0  ;;  %v46_v3 = vsel %vm42_vm0, %v39_v1, 0.0  ;;  %v181_v15 = vld [vmem:[%s732_s5 + $0x18] sm:$0xff]  ;;  %v88_v16 = vld [vmem:[%s731_s3 + $0x10] sm:$0xff]  ;;  %522 = vmatprep.subr.mxu0 %v89_v14  ;;  %v87_v18 = vld [vmem:[%s731_s3 + $0x8] sm:$0xff] }
   0x3   :  { %44 = vadd.xlane.f32.xlu0 %v43_v2  ;;  %533 = vmatprep.subr.mxu1 %v181_v15  ;;  %v180_v17 = vld [vmem:[%s732_s5 + $0x10] sm:$0xff]  ;;  %v179_v19 = vld [vmem:[%s732_s5 + $0x8] sm:$0xff]  ;;  %v86_v20 = vld [vmem:[%s731_s3] sm:$0xff] }
   0x4   :  { %523 = vmatpush3.msra.mxu0 %v89_v14  ;;  %534 = vmatpush3.msra.mxu1 %v181_v15  ;;  %v178_v21 = vld [vmem:[%s732_s5] sm:$0xff]  ;;  %v269_v38 = vld [vmem:[%s735_s7 + $0x18] sm:$0xff]  ;;  %v268_v39 = vld [vmem:[%s735_s7 + $0x10] sm:$0xff] }
   0x5   :  { %524 = vmatprep.subr.mxu0 %v88_v16  ;;  %535 = vmatprep.subr.mxu1 %v180_v17  ;;  %v482_v29 = vld [vmem:[%s733_s1] ss:$0 sm:$0xff]  ;;  %v267_v40 = vld [vmem:[%s735_s7 + $0x8] sm:$0xff]  ;;  %v363_v49 = vld [vmem:[%s737_s9 + $0x18] sm:$0xff] }
   0x6   :  { %525 = vmatpush3.msra.mxu0 %v88_v16  ;;  %536 = vmatpush3.msra.mxu1 %v180_v17  ;;  %v483_v31 = vld [vmem:[%s734_s2] ss:$0 sm:$0xff]  ;;  %v362_v50 = vld [vmem:[%s737_s9 + $0x10] sm:$0xff]  ;;  %v361_v51 = vld [vmem:[%s737_s9 + $0x8] sm:$0xff] }
   0x7   :  { %47 = vadd.xlane.f32.xlu0 %v46_v3  ;;  %526 = vmatprep.subr.mxu0 %v87_v18  ;;  %v266_v41 = vld [vmem:[%s735_s7] sm:$0xff] }
   0x8   :  { %527 = vmatpush3.msra.mxu0 %v87_v18  ;;  %537 = vmatprep.subr.mxu1 %v179_v19  ;;  %v487_v42 = vld [vmem:[%s736_s6] ss:$0 sm:$0xff] }
   0x9   :  { %538 = vmatpush3.msra.mxu1 %v179_v19  ;;  %528 = vmatprep.subr.mxu0 %v86_v20  ;;  %v360_v52 = vld [vmem:[%s737_s9] sm:$0xff] }
   0xa   :  { %539 = vmatprep.subr.mxu1 %v178_v21  ;;  %529 = vmatpush3.msra.mxu0 %v86_v20  ;;  %v490_v55 = vld [vmem:[%s738_s8] ss:$0 sm:$0xff]  ;;  %s579_s8 = smov 6  }
   0xb   :  { %540 = vmatpush3.msra.mxu1 %v178_v21  ;;  %544 = vmatprep.subr.mxu0 %v269_v38  ;;  %v493_v62 = vld [vmem:[%s739_s10] ss:$0 sm:$0xff] }
   0xc   :  { %555 = vmatprep.subr.mxu1 %v363_v49 }
  0x8c   :  { %v45_v4 = vpop.xlane.xlu0 %44 }
  0x8d   :  { %v50_v5 = vmul.f32 0.03125, %v45_v4 }
  0x8f   :  { %v52_v6 = vsub.f32 %v38_v0, %v50_v5 }
  0x90   :  { %v48_v7 = vpop.xlane.xlu0 %47 }
  0x91   :  { %v51_v8 = vmul.f32 0.03125, %v48_v7  ;;  %v54_v9 = vmul.f32 %v52_v6, %v52_v6 }
  0x93   :  { %v53_v10 = vsub.f32 %v39_v1, %v51_v8  ;;  %v56_v11 = vsel %vm42_vm0, %v54_v9, 0.0 }
  0x94   :  { %57 = vadd.xlane.f32.xlu1 %v56_v11  ;;  %v484_v11 = vld [vmem:[%s740_s4] ss:$0 sm:$0xff] }
  0x95   :  { %v55_v12 = vmul.f32 %v53_v10, %v53_v10 }
  0x97   :  { %v59_v13 = vsel %vm42_vm0, %v55_v12, 0.0 }
  0x98   :  { %60 = vadd.xlane.f32.xlu1 %v59_v13 }
 0x11d   :  { %v58_v22 = vpop.xlane.xlu1 %57 }
 0x11e   :  { %v62_v23 = vmul.f32 0.03125, %v58_v22 }
 0x120   :  { %v64_v24 = vadd.f32 1e-05, %v62_v23 }
 0x121   :  { %v61_v25 = vpop.xlane.xlu1 %60 }
 0x122   :  { %567 = vrsqrt.f32 %v64_v24  ;;  %v63_v26 = vmul.f32 0.03125, %v61_v25 }
 0x124   :  { %v65_v27 = vadd.f32 1e-05, %v63_v26 }
 0x126   :  { %569 = vrsqrt.f32 %v65_v27 }
 0x12f   :  { %v568_v28 = vpop.eup %567 }
 0x130   :  { %v68_v30 = vmul.f32 %v568_v28, %v52_v6 }
 0x132   :  { %v76_v32 = vmul.f32 %v482_v29, %v68_v30 }
 0x133   :  { %v570_v33 = vpop.eup %569 }
 0x134   :  { %v69_v34 = vmul.f32 %v570_v33, %v53_v10  ;;  %v84_v35 = vadd.f32 %v483_v31, %v76_v32 }
 0x136   :  { %v77_v36 = vmul.f32 %v482_v29, %v69_v34  ;;  %530 = vmatprep.mubr.msk.f32.mxu0 %vm42_vm0, %v84_v35  ;;  %541 = vmatprep.mubr.msk.f32.mxu1 %vm42_vm0, %v84_v35 }
 0x138   :  { %v85_v37 = vadd.f32 %v483_v31, %v77_v36 }
 0x13a   :  { %531 = vmatmul.mubr.msk.f32.vlgmr.msra.gmra.mxu0 %vm42_vm0, %v85_v37  ;;  %542 = vmatmul.mubr.msk.f32.vlgmr.msra.gmra.mxu1 %vm42_vm0, %v85_v37 }
 0x13b   :  { %545 = vmatpush3.msra.mxu0 %v269_v38  ;;  %556 = vmatpush3.msra.mxu1 %v363_v49 }
 0x13c   :  { %546 = vmatprep.subr.mxu0 %v268_v39  ;;  %557 = vmatprep.subr.mxu1 %v362_v50 }
 0x13d   :  { %547 = vmatpush3.msra.mxu0 %v268_v39  ;;  %558 = vmatpush3.msra.mxu1 %v362_v50 }
 0x13e   :  { %548 = vmatprep.subr.mxu0 %v267_v40  ;;  %559 = vmatprep.subr.mxu1 %v361_v51 }
 0x13f   :  { %549 = vmatpush3.msra.mxu0 %v267_v40  ;;  %560 = vmatpush3.msra.mxu1 %v361_v51 }
 0x140   :  { %550 = vmatprep.subr.mxu0 %v266_v41  ;;  %561 = vmatprep.subr.mxu1 %v360_v52 }
 0x141   :  { %551 = vmatpush3.msra.mxu0 %v266_v41  ;;  %562 = vmatpush3.msra.mxu1 %v360_v52 }
 0x1fa   :  { %v543_v43 = vpop.f32.mrf.mxu1  ;;  %v532_v53 = vpop.f32.mrf.mxu0 }
 0x1fb   :  { %v261_v44 = vadd.f32 %v543_v43, %v487_v42  ;;  %v175_v12 = vadd.f32 %v532_v53, %v484_v11 }
 0x1fc   :  { %v255_v45 = vpop.f32.mrf.mxu1  ;;  %v169_v54 = vpop.f32.mrf.mxu0 }
 0x1fd   :  { %v256_v46 = vadd.f32 %v487_v42, %v255_v45  ;;  %v265_v48 = vmax.f32 %v261_v44, 0.0  ;;  %v170_v14 = vadd.f32 %v484_v11, %v169_v54 }
 0x1ff   :  { %v264_v47 = vmax.f32 %v256_v46, 0.0 }
 0x201   :  { %552 = vmatprep.mubr.msk.f32.mxu0 %vm42_vm0, %v264_v47 }
 0x202   :  { %553 = vmatmul.mubr.msk.f32.vlgmr.msra.gmra.mxu0 %vm42_vm0, %v265_v48 }
 0x2c2   :  { %v554_v56 = vpop.f32.mrf.mxu0 }
 0x2c3   :  { %v355_v57 = vadd.f32 %v554_v56, %v490_v55 }
 0x2c4   :  { %v349_v58 = vpop.f32.mrf.mxu0 }
 0x2c5   :  { %v350_v59 = vadd.f32 %v490_v55, %v349_v58  ;;  %v359_v61 = vmax.f32 %v355_v57, 0.0 }
 0x2c7   :  { %v358_v60 = vmax.f32 %v350_v59, 0.0 }
 0x2c9   :  { %563 = vmatprep.mubr.msk.f32.mxu1 %vm42_vm0, %v358_v60 }
 0x2ca   :  { %564 = vmatmul.mubr.msk.f32.vlgmr.msra.gmra.mxu1 %vm42_vm0, %v359_v61 }
 0x38a   :  { %v565_v63 = vpop.f32.mrf.mxu1 }
 0x38b   :  { %v449_v0 = vadd.f32 %v565_v63, %v493_v62 }
 0x38c   :  { %v443_v1 = vpop.f32.mrf.mxu1 }
 0x38d   :  { %v497_v2 = vmul.f32 -1.442695, %v449_v0  ;;  %v444_v3 = vadd.f32 %v493_v62, %v443_v1 }
 0x38f   :  { %571 = vpow2.f32 %v497_v2  ;;  %v496_v4 = vmul.f32 -1.442695, %v444_v3 }
 0x391   :  { %573 = vpow2.f32 %v496_v4 }
 0x39c   :  { %v572_v5 = vpop.eup %571 }
 0x39d   :  { %v459_v6 = vadd.f32 1.0, %v572_v5 }
 0x39e   :  { %v574_v7 = vpop.eup %573 }
 0x39f   :  { %575 = vrcp.f32 %v459_v6  ;;  %v458_v8 = vadd.f32 1.0, %v574_v7 }
 0x3a1   :  { %577 = vrcp.f32 %v458_v8 }
 0x3ac   :  { %v576_v9 = vpop.eup %575 }
 0x3ad   :  { %468 = vrot.lane.b32.xlu1 %v576_v9, %s579_s8 }
 0x3ae   :  { %v578_v10 = vpop.eup %577 }
 0x3af   :  { %466 = vrot.lane.b32.xlu0 %v578_v10, %s579_s8 }
 0x41f   :  { %v469_v13 = vpop.permute.xlu1 %468 }
 0x420   :  { %v474_v15 = vsel %vm472_vm1, %v175_v12, %v469_v13 }
 0x421   :  { %477 = vst.msk [vmem:[%s741_s11 + $0x8] sm:$0xff] %vm475_vm2, %v474_v15  ;;  %v467_v16 = vpop.permute.xlu0 %466 }
 0x422   :  { %v473_v17 = vsel %vm472_vm1, %v170_v14, %v467_v16 }
 0x423   :  { %476 = vst.msk [vmem:[%s741_s11] sm:$0xff] %vm475_vm2, %v473_v17 }

// kernel: detr_forward.5
= control target key start
LH: loop header
LB: loop body
LE: loop exit
PB: predicated region body
PF: predicated region fallthrough
CT: control target
= control target key end

     0   :  { %s5891_s21 = smov 0   ;;  %s6639_s0 = inlined_call_operand.vmem [shape: f32[2,16,32], index: 0, kind: input, shape index: {}]   ;;  %s6640_s1 = inlined_call_operand.vmem [shape: f32[2,16,32], index: 1, kind: input, shape index: {}]   ;;  %s6641_s2 = inlined_call_operand.vmem [shape: f32[6,32,64], index: 2, kind: input, shape index: {}]   ;;  %s6642_s3 = inlined_call_operand.vmem [shape: f32[6,1,64], index: 3, kind: input, shape index: {}]   ;;  %s6643_s4 = inlined_call_operand.vmem [shape: f32[6,32,32], index: 4, kind: input, shape index: {}]   ;;  %s6644_s5 = inlined_call_operand.vmem [shape: f32[6,1,32], index: 5, kind: input, shape index: {}]   ;;  %s6645_s6 = inlined_call_operand.vmem [shape: f32[6,32,32], index: 6, kind: input, shape index: {}]   ;;  %s6646_s7 = inlined_call_operand.vmem [shape: f32[6,1,32], index: 7, kind: input, shape index: {}]   ;;  %s6647_s8 = inlined_call_operand.vmem [shape: f32[6,32,64], index: 8, kind: input, shape index: {}]   ;;  %s6648_s9 = inlined_call_operand.vmem [shape: f32[6,1,64], index: 9, kind: input, shape index: {}]   ;;  %s6649_s10 = inlined_call_operand.vmem [shape: f32[6,64,32], index: 10, kind: input, shape index: {}]   ;;  %s6650_s11 = inlined_call_operand.vmem [shape: f32[6,1,32], index: 11, kind: input, shape index: {}]   ;;  %s6651_s12 = inlined_call_operand.vmem [shape: f32[6,1,32], index: 12, kind: input, shape index: {}]   ;;  %s6652_s13 = inlined_call_operand.vmem [shape: f32[6,1,32], index: 13, kind: input, shape index: {}]   ;;  %s6653_s14 = inlined_call_operand.vmem [shape: f32[6,1,32], index: 14, kind: input, shape index: {}]   ;;  %s6654_s15 = inlined_call_operand.vmem [shape: f32[6,1,32], index: 15, kind: input, shape index: {}]   ;;  %s6655_s16 = inlined_call_operand.vmem [shape: f32[2,16,32], index: 16, kind: output, shape index: {}]  }
   0x1   :  { %6660 = sst [smem:[#allocation4_spill]] %s6639_s0 }
   0x2   :  { %6661 = sst [smem:[#allocation5_spill]] %s6640_s1 }
   0x3   :  { %6662 = sst [smem:[#allocation6_spill]] %s6641_s2 }
   0x4   :  { %6663 = sst [smem:[#allocation7_spill]] %s6643_s4 }
   0x5   :  { %6664 = sst [smem:[#allocation8_spill]] %s6645_s6 }
   0x6   :  { %6665 = sst [smem:[#allocation9_spill]] %s6647_s8 }
   0x7   :  { %6666 = sst [smem:[#allocation10_spill]] %s6648_s9 }
   0x8   :  { %6667 = sst [smem:[#allocation11_spill]] %s6654_s15 }
   0x9   :  { %6668 = sst [smem:[#allocation12_spill]] %s6655_s16 }
   0xa LB: > { %6669 = sst [smem:[#allocation3_spill]] %s5782_s21  ;;  %s4977_s22 = sadd.s32 4294967295, %s5782_s21   ;;  %s5782_s21 = sphi %s5891_s21, %s26_s21  }
   0xb   : > { %p4980_p0 = scmp.ge.s32.totalorder %s5782_s21, 1  ;;  %p569_p1 = scmp.lt.s32.totalorder %s5782_s21, 7 }
   0xd   : > { %p570_p2 = pnand %p4980_p0, %p569_p1 }
   0xe   : > { %p661_p3 = scmp.lt.s32.totalorder (!%p570_p2), %s4977_s22, 5  ;;  %s6670_s2 = sld [smem:[#allocation6_spill]] (!%p570_p2) }
   0xf   : > { %573 = sbr.rel (%p570_p2) target bundleno = 6196 (0x1834), region = 84  ;;  %s6671_s4 = sld [smem:[#allocation7_spill]] (!%p570_p2) }
  0x10   : > { %s6672_s6 = sld [smem:[#allocation8_spill]] (!%p570_p2)  ;;  %p4991_p4 = scmp.ne.s32.totalorder (!%p570_p2), %s4977_s22, 0 }
  0x11   : > { %s6673_s8 = sld [smem:[#allocation9_spill]] (!%p570_p2) }
  0x14   : > { %s5899_s23 = scalar_select %p661_p3, %s4977_s22, 5 }
  0x15   : > { %s6676_s25 = sld [smem:[#allocation4_spill]] (!%p4991_p4) }
  0x16   : > { %s5119_s24 = sshll.u32 %s5899_s23, 5  ;;  %s5123_s19 = sshll.u32 %s5899_s23, 6 }
  0x17   : > { %s5909_s30 = scalar_lea.vmem %s6670_s2, %s5119_s24  ;;  %s5914_s18 = scalar_lea.vmem %s6671_s4, %s5119_s24 }
  0x18   : > { %s5923_s15 = scalar_lea.vmem %s6672_s6, %s5119_s24  ;;  %s5932_s2 = scalar_lea.vmem %s6673_s8, %s5119_s24 }
  0x19   : > { %s5942_s1 = scalar_lea.vmem %s6649_s10, %s5123_s19  ;;  %s703_s27 = scalar_lea.vmem %s6651_s12, %s5899_s23 }
  0x1a   : > { %s706_s8 = scalar_lea.vmem %s6652_s13, %s5899_s23  ;;  %s709_s4 = scalar_lea.vmem %s6653_s14, %s5899_s23 }
  0x1b   : > { %s6675_s19 = sld [smem:[#allocation11_spill]] }
  0x1d   : > { %716 = sbr.rel (%p4991_p4) target bundleno = 37 (0x25), region = 88 }
  0x21   : > { %s712_s20 = scalar_lea.vmem %s6675_s19, %s5899_s23 }
  0x22   : > { %v717_v0 = vld [vmem:[%s6676_s25] sm:$0xff]  ;;  %vm721_vm0 = vcmask 261120   ;;  %v718_v1 = vld [vmem:[%s6676_s25 + $0x8] sm:$0xff]  ;;  %v719_v2 = vld [vmem:[%s6676_s25 + $0x10] sm:$0xff] }
  0x23   : > { %722 = vst.msk [vmem:[#allocation2] sm:$0xff] %vm721_vm0, %v717_v0  ;;  %723 = vst.msk [vmem:[#allocation2 + $0x8] sm:$0xff] %vm721_vm0, %v718_v1  ;;  %v720_v3 = vld [vmem:[%s6676_s25 + $0x18] sm:$0xff] }
  0x24   : > { %724 = vst.msk [vmem:[#allocation2 + $0x10] sm:$0xff] %vm721_vm0, %v719_v2  ;;  %725 = vst.msk [vmem:[#allocation2 + $0x18] sm:$0xff] %vm721_vm0, %v720_v3 }
  0x25 PF: > { %v741_v4 = vld [vmem:[%s5909_s30 + $0x18] sm:$0xff]  ;;  %v740_v5 = vld [vmem:[%s5909_s30 + $0x10] sm:$0xff]  ;;  %s6677_s21 = sld [smem:[#allocation5_spill]]  ;;  %vm749_vm1 = vcmask 261120   ;;  %v739_v8 = vld [vmem:[%s5909_s30 + $0x8] sm:$0xff]  ;;  %s6679_s0 = scalar_lea.vmem %s6642_s3, %s5899_s23  ;;  %vm961_vm2 = vcmask 31744  }
  0x26   : > { %5296 = vmatprep.subr.mxu1 %v741_v4  ;;  %v738_v14 = vld [vmem:[%s5909_s30] sm:$0xff]  ;;  %v850_v20 = vld [vmem:[%s5914_s18 + $0x18] sm:$0xff]  ;;  %v849_v21 = vld [vmem:[%s5914_s18 + $0x10] sm:$0xff]  ;;  %vm1138_vm3 = vcmask 130048   ;;  %s5785_s6 = smov 92   ;;  %s5786_s16 = smov 124  }
  0x27   : > { %5297 = vmatpush3.msra.mxu1 %v741_v4  ;;  %v848_v22 = vld [vmem:[%s5914_s18 + $0x8] sm:$0xff]  ;;  %v847_v23 = vld [vmem:[%s5914_s18] sm:$0xff]  ;;  %s5784_s18 = smov 96   ;;  %s5787_s28 = smov 88   ;;  %vm4293_vm4 = vcmask 64512   ;;  %vm4298_vm5 = vcmask 97280  }
  0x28   : > { %5298 = vmatprep.subr.mxu1 %v740_v5  ;;  %v4992_v24 = vld [vmem:[%s6679_s0] ss:$0 sm:$0xff]  ;;  %s5788_s26 = smov 120   ;;  %s5789_s24 = smov 84   ;;  %vm4307_vm6 = vcmask 162816   ;;  %vm4312_vm7 = vcmask 195584  }
  0x29   : > { %5299 = vmatpush3.msra.mxu1 %v740_v5  ;;  %s5790_s29 = smov 116   ;;  %s5791_s30 = smov 80   ;;  %vm4317_vm8 = vcmask 228352   ;;  %vm4636_vm9 = vcmask 523264  }
  0x2a   : > { %v726_v6 = vld [vmem:[#allocation2] sm:$0xff]  ;;  %v727_v10 = vld [vmem:[#allocation2 + $0x8] sm:$0xff]  ;;  %5300 = vmatprep.subr.mxu1 %v739_v8  ;;  %s5792_s9 = smov 112   ;;  %s5793_s0 = smov 76  }
  0x2b   : > { %s6678_s19 = smov %s6677_s21  ;;  %v730_v7 = vld [vmem:[%s6677_s21] sm:$0xff]  ;;  %v728_v12 = vld [vmem:[#allocation2 + $0x10] sm:$0xff]  ;;  %5301 = vmatpush3.msra.mxu1 %v739_v8  ;;  %v729_v17 = vld [vmem:[#allocation2 + $0x18] sm:$0xff]  ;;  %s6680_s21 = scalar_lea.vmem %s6644_s5, %s5899_s23 }
  0x2c   : > { %v734_v9 = vadd.f32 %v730_v7, %v726_v6  ;;  %v731_v11 = vld [vmem:[%s6678_s19 + $0x8] sm:$0xff]  ;;  %v732_v13 = vld [vmem:[%s6678_s19 + $0x10] sm:$0xff]  ;;  %v733_v18 = vld [vmem:[%s6678_s19 + $0x18] sm:$0xff]  ;;  %5302 = vmatprep.subr.mxu1 %v738_v14  ;;  %s5795_s22 = smov 72   ;;  %s5796_s17 = smov 104  }
  0x2d   : > { %v735_v15 = vadd.f32 %v731_v11, %v727_v10  ;;  %v736_v16 = vadd.f32 %v732_v13, %v728_v12  ;;  %5303 = vmatpush3.msra.mxu1 %v738_v14  ;;  %v737_v19 = vadd.f32 %v733_v18, %v729_v17  ;;  %v4997_v35 = vld [vmem:[%s6680_s21] ss:$0 sm:$0xff]  ;;  %s5797_s21 = smov 68  }
  0x2e   : > { %5304 = vmatprep.mubr.msk.f32.mxu1 %vm749_vm1, %v734_v9  ;;  %5310 = vmatprep.subr.mxu1 %v850_v20 }
  0x2f   : > { %5305 = vmatmul.mubr.msk.f32.vlgmr.msra.gmra.mxu1 %vm749_vm1, %v735_v15 }
  0x30   : > { %5307 = vmatprep.mubr.msk.f32.mxu1 %vm749_vm1, %v736_v16  ;;  %5311 = vmatpush3.msra.mxu1 %v850_v20 }
  0x31   : > { %5312 = vmatprep.subr.mxu1 %v849_v21 }
  0x32   : > { %5313 = vmatpush3.msra.mxu1 %v849_v21 }
  0x33   : > { %5308 = vmatmul.mubr.msk.f32.gmra.mxu1 %vm749_vm1, %v737_v19  ;;  %5314 = vmatprep.subr.mxu1 %v848_v22 }
  0x34   : > { %5318 = vmatprep.mubr.msk.f32.mxu1 %vm749_vm1, %v726_v6  ;;  %5315 = vmatpush3.msra.mxu1 %v848_v22 }
  0x35   : > { %5316 = vmatprep.subr.mxu1 %v847_v23 }
  0x36   : > { %5317 = vmatpush3.msra.mxu1 %v847_v23 }
  0x37   : > { %5319 = vmatmul.mubr.msk.f32.vlgmr.msra.gmra.mxu1 %vm749_vm1, %v727_v10 }
  0x38   : > { %5321 = vmatprep.mubr.msk.f32.mxu1 %vm749_vm1, %v728_v12 }
  0x3b   : > { %5322 = vmatmul.mubr.msk.f32.gmra.mxu1 %vm749_vm1, %v729_v17 }
  0xef   : > { %v5306_v25 = vpop.f32.mrf.mxu1 }
  0xf0   : > { %v6009_v26 = vadd.f32 %v5306_v25, %v4992_v24 }
  0xf1   : > { %v828_v27 = vpop.f32.mrf.mxu1 }
  0xf2   : > { %v6011_v28 = vadd.f32 %v4992_v24, %v828_v27  ;;  %959 = vrot.lane.b32.xlu0 %v6009_v26, %s5784_s18 }
  0xf3   : > { %v5309_v29 = vpop.f32.mrf.mxu1 }
  0xf4   : > { %v6014_v30 = vadd.f32 %v5309_v29, %v4992_v24  ;;  %5328 = vmatprep.mubr.msk.f32.mxu0 %vm961_vm2, %v6011_v28 }
  0xf5   : > { %v838_v31 = vpop.f32.mrf.mxu1 }
  0xf6   : > { %1049 = vrot.lane.b32.xlu1 %v6014_v30, %s5784_s18  ;;  %957 = vrot.lane.b32.xlu0 %v6011_v28, %s5784_s18  ;;  %v6020_v32 = vadd.f32 %v4992_v24, %v838_v31 }
  0xf7   : > { %v5320_v33 = vpop.f32.mrf.mxu1 }
  0xf8   : > { %5335 = vmatprep.mubr.msk.f32.mxu1 %vm961_vm2, %v6020_v32  ;;  %v6032_v37 = vadd.f32 %v5320_v33, %v4997_v35 }
  0xf9   : > { %v936_v36 = vpop.f32.mrf.mxu1 }
  0xfa   : > { %1047 = vrot.lane.b32.xlu1 %v6020_v32, %s5784_s18  ;;  %v6038_v41 = vadd.f32 %v4997_v35, %v936_v36  ;;  %s5794_s18 = smov 108  }
  0xfb   : > { %v5323_v40 = vpop.f32.mrf.mxu1 }
  0xfc   : > { %v6040_v42 = vadd.f32 %v5323_v40, %v4997_v35 }
  0xfd   : > { %v946_v44 = vpop.f32.mrf.mxu1 }
  0xfe   : > { %v6054_v45 = vadd.f32 %v4997_v35, %v946_v44 }
 0x164   : > { %v960_v34 = vpop.permute.xlu0 %959 }
 0x165   : > { %5324 = vmatprep.subr.msk.mxu0 %vm961_vm2, %v960_v34 }
 0x166   : > { %5325 = vmatpush3.xpose.msk.msra.mxu0 %vm961_vm2, %v960_v34 }
 0x168   : > { %v1050_v38 = vpop.permute.xlu1 %1049  ;;  %v958_v39 = vpop.permute.xlu0 %957 }
 0x169   : > { %5326 = vmatprep.subr.msk.mxu0 %vm961_vm2, %v958_v39  ;;  %5331 = vmatprep.subr.msk.mxu1 %vm961_vm2, %v1050_v38 }
 0x16a   : > { %5327 = vmatpush3.xpose.msk.msra.mxu0 %vm961_vm2, %v958_v39  ;;  %5332 = vmatpush3.xpose.msk.msra.mxu1 %vm961_vm2, %v1050_v38 }
 0x16b   : > { %5338 = vmatprep.subr.mxu0 %v6032_v37 }
 0x16c   : > { %v1048_v43 = vpop.permute.xlu1 %1047 }
 0x16d   : > { %5329 = vmatmul.mubr.msk.f32.vlgmr.msra.gmra.mxu0 %vm961_vm2, %v6009_v26  ;;  %5333 = vmatprep.subr.msk.mxu1 %vm961_vm2, %v1048_v43 }
 0x16e   : > { %5334 = vmatpush3.xpose.msk.msra.mxu1 %vm961_vm2, %v1048_v43  ;;  %5339 = vmatpush3.msra.mxu0 %v6032_v37 }
 0x16f   : > { %5340 = vmatprep.subr.mxu0 %v6038_v41  ;;  %5345 = vmatprep.subr.mxu1 %v6040_v42 }
 0x170   : > { %5341 = vmatpush3.msra.mxu0 %v6038_v41 }
 0x171   : > { %5336 = vmatmul.mubr.msk.f32.vlgmr.msra.gmra.mxu1 %vm961_vm2, %v6014_v30 }
 0x172   : > { %5346 = vmatpush3.msra.mxu1 %v6040_v42 }
 0x173   : > { %5347 = vmatprep.subr.mxu1 %v6054_v45 }
 0x174   : > { %5348 = vmatpush3.msra.mxu1 %v6054_v45 }
 0x22d   : > { %v5330_v46 = vpop.f32.mrf.mxu0 }
 0x22e   : > { %v1135_v47 = vmul.f32 0.5, %v5330_v46 }
 0x22f   : > { %v1036_v48 = vpop.f32.mrf.mxu0 }
 0x230   : > { %v1134_v49 = vmul.f32 0.5, %v1036_v48  ;;  %v1142_v50 = vsel %vm1138_vm3, %v1135_v47, -inf }
 0x231   : > { %v5337_v51 = vpop.f32.mrf.mxu1  ;;  %1143 = vmax.xlane.f32.xlu1 %v1142_v50 }
 0x232   : > { %v1139_v52 = vsel %vm1138_vm3, %v1134_v49, -inf  ;;  %v1137_v55 = vmul.f32 0.5, %v5337_v51 }
 0x233   : > { %v1125_v53 = vpop.f32.mrf.mxu1  ;;  %1140 = vmax.xlane.f32.xlu0 %v1139_v52 }
 0x234   : > { %v1136_v54 = vmul.f32 0.5, %v1125_v53  ;;  %v1148_v57 = vsel %vm1138_vm3, %v1137_v55, -inf }
 0x236   : > { %v1145_v56 = vsel %vm1138_vm3, %v1136_v54, -inf }
 0x237   : > { %1146 = vmax.xlane.f32.xlu0 %v1145_v56 }
 0x23b   : > { %1149 = vmax.xlane.f32.xlu0 %v1148_v57 }
 0x242   : > { %1351 = vrot.lane.b32.xlu1 %v6009_v26, %s5785_s6 }
 0x246   : > { %1442 = vrot.lane.b32.xlu1 %v6014_v30, %s5785_s6 }
 0x24a   : > { %1345 = vrot.lane.b32.xlu1 %v6011_v28, %s5786_s16 }
 0x251   : > { %1349 = vrot.lane.b32.xlu0 %v6011_v28, %s5785_s6 }
 0x2ba   : > { %v1144_v58 = vpop.xlane.xlu1 %1143 }
 0x2bb   : > { %v1152_v59 = vsub.f32 %v1135_v47, %v1144_v58 }
 0x2bc   : > { %v1141_v60 = vpop.xlane.xlu0 %1140 }
 0x2bd   : > { %v1157_v61 = vmul.f32 1.442695, %v1152_v59  ;;  %v1151_v62 = vsub.f32 %v1134_v49, %v1141_v60 }
 0x2be   : > { %v1352_v63 = vpop.permute.xlu1 %1351 }
 0x2bf   : > { %5628 = vpow2.f32 %v1157_v61  ;;  %v1155_v0 = vmul.f32 1.442695, %v1151_v62  ;;  %5352 = vmatprep.subr.msk.mxu0 %vm961_vm2, %v1352_v63 }
 0x2c0   : > { %v1147_v1 = vpop.xlane.xlu0 %1146 }
 0x2c1   : > { %5630 = vpow2.f32 %v1155_v0  ;;  %v1153_v12 = vsub.f32 %v1136_v54, %v1147_v1 }
 0x2c2   : > { %v1443_v2 = vpop.permute.xlu1 %1442 }
 0x2c3   : > { %5359 = vmatprep.subr.msk.mxu1 %vm961_vm2, %v1443_v2  ;;  %v1159_v13 = vmul.f32 1.442695, %v1153_v12 }
 0x2c4   : > { %v1150_v3 = vpop.xlane.xlu0 %1149 }
 0x2c5   : > { %v1154_v4 = vsub.f32 %v1137_v55, %v1150_v3 }
 0x2c6   : > { %v1346_v17 = vpop.permute.xlu1 %1345 }
 0x2c7   : > { %v1161_v5 = vmul.f32 1.442695, %v1154_v4 }
 0x2c8   : > { %v1350_v16 = vpop.permute.xlu0 %1349 }
 0x2c9   : > { %5632 = vpow2.f32 %v1161_v5 }
 0x2ca   : > { %5634 = vpow2.f32 %v1159_v13 }
 0x2cc   : > { %v5629_v6 = vpop.eup %5628 }
 0x2cd   : > { %v1166_v7 = vsel %vm1138_vm3, %v5629_v6, 0.0 }
 0x2ce   : > { %v5631_v8 = vpop.eup %5630  ;;  %1167 = vadd.xlane.f32.xlu0 %v1166_v7 }
 0x2cf   : > { %v1163_v9 = vsel %vm1138_vm3, %v5631_v8, 0.0 }
 0x2d0   : > { %1164 = vadd.xlane.f32.xlu1 %v1163_v9 }
 0x2d6   : > { %v5633_v10 = vpop.eup %5632 }
 0x2d7   : > { %v1172_v11 = vsel %vm1138_vm3, %v5633_v10, 0.0  ;;  %v5635_v14 = vpop.eup %5634 }
 0x2d8   : > { %1173 = vadd.xlane.f32.xlu0 %v1172_v11  ;;  %v1169_v15 = vsel %vm1138_vm3, %v5635_v14, 0.0 }
 0x2e1   : > { %1440 = vrot.lane.b32.xlu1 %v6020_v32, %s5785_s6  ;;  %s5798_s6 = smov 100  }
 0x2ee   : > { %1347 = vrot.lane.b32.xlu0 %v6009_v26, %s5786_s16 }
 0x2f2   : > { %1436 = vrot.lane.b32.xlu0 %v6020_v32, %s5786_s16 }
 0x305   : > { %1170 = vadd.xlane.f32.xlu1 %v1169_v15 }
 0x316   : > { %1438 = vrot.lane.b32.xlu1 %v6014_v30, %s5786_s16 }
 0x357   : > { %v1168_v18 = vpop.xlane.xlu0 %1167 }
 0x358   : > { %5636 = vrcp.f32 %v1168_v18 }
 0x359   : > { %v1165_v19 = vpop.xlane.xlu1 %1164 }
 0x35a   : > { %5638 = vrcp.f32 %v1165_v19 }
 0x35d   : > { %v1441_v27 = vpop.permute.xlu1 %1440 }
 0x361   : > { %v1174_v24 = vpop.xlane.xlu0 %1173 }
 0x362   : > { %5640 = vrcp.f32 %v1174_v24 }
 0x365   : > { %v5637_v20 = vpop.eup %5636  ;;  %v1348_v25 = vpop.permute.xlu0 %1347 }
 0x366   : > { %v1178_v23 = vmul.f32 %v5637_v20, %v5629_v6 }
 0x367   : > { %v5639_v21 = vpop.eup %5638 }
 0x368   : > { %v1176_v22 = vmul.f32 %v5639_v21, %v5631_v8 }
 0x369   : > { %v1437_v36 = vpop.permute.xlu0 %1436 }
 0x36a   : > { %5342 = vmatprep.mubr.msk.f32.mxu0 %vm1138_vm3, %v1176_v22 }
 0x36b   : > { %5343 = vmatmul.mubr.msk.f32.vlgmr.msra.gmra.mxu0 %vm1138_vm3, %v1178_v23 }
 0x36c   : > { %5353 = vmatpush3.xpose.msk.msra.mxu0 %vm961_vm2, %v1352_v63  ;;  %5356 = vmatprep.mubr.msk.f32.mxu0 %vm961_vm2, %v1346_v17 }
 0x36d   : > { %5354 = vmatprep.subr.msk.mxu0 %vm961_vm2, %v1350_v16 }
 0x36f   : > { %v5641_v31 = vpop.eup %5640 }
 0x370   : > { %5355 = vmatpush3.xpose.msk.msra.mxu0 %vm961_vm2, %v1350_v16  ;;  %v1182_v35 = vmul.f32 %v5641_v31, %v5633_v10 }
 0x373   : > { %5357 = vmatmul.mubr.msk.f32.vlgmr.msra.gmra.mxu0 %vm961_vm2, %v1348_v25 }
 0x38e   : > { %v1171_v29 = vpop.xlane.xlu1 %1170 }
 0x38f   : > { %5642 = vrcp.f32 %v1171_v29 }
 0x392   : > { %v1439_v38 = vpop.permute.xlu1 %1438 }
 0x39c   : > { %v5643_v33 = vpop.eup %5642 }
 0x39d   : > { %v1180_v34 = vmul.f32 %v5643_v33, %v5635_v14 }
 0x39f   : > { %5349 = vmatprep.mubr.msk.f32.mxu1 %vm1138_vm3, %v1180_v34 }
 0x3a0   : > { %5350 = vmatmul.mubr.msk.f32.vlgmr.msra.gmra.mxu1 %vm1138_vm3, %v1182_v35 }
 0x3a1   : > { %5360 = vmatpush3.xpose.msk.msra.mxu1 %vm961_vm2, %v1443_v2  ;;  %5363 = vmatprep.mubr.msk.f32.mxu1 %vm961_vm2, %v1437_v36 }
 0x3a2   : > { %5361 = vmatprep.subr.msk.mxu1 %vm961_vm2, %v1441_v27 }
 0x3a5   : > { %5362 = vmatpush3.xpose.msk.msra.mxu1 %vm961_vm2, %v1441_v27 }
 0x3a8   : > { %5364 = vmatmul.mubr.msk.f32.vlgmr.msra.gmra.mxu1 %vm961_vm2, %v1439_v38 }
 0x42b   : > { %v6098_v39 = vpop.f32.mrf.mxu0 }
 0x42d   : > { %v6100_v40 = vpop.f32.mrf.mxu0 }
 0x433   : > { %v5358_v43 = vpop.f32.mrf.mxu0 }
 0x434   : > { %v1528_v44 = vmul.f32 0.5, %v5358_v43 }
 0x435   : > { %v1427_v46 = vpop.f32.mrf.mxu0 }
 0x436   : > { %v1527_v47 = vmul.f32 0.5, %v1427_v46  ;;  %v1534_v48 = vsel %vm1138_vm3, %v1528_v44, -inf }
 0x437   : > { %1535 = vmax.xlane.f32.xlu1 %v1534_v48 }
 0x438   : > { %v1531_v49 = vsel %vm1138_vm3, %v1527_v47, -inf }
 0x439   : > { %1532 = vmax.xlane.f32.xlu0 %v1531_v49 }
 0x448   : > { %1579 = vrot.lane.b32.xlu1 %v6032_v37, %s5786_s16 }
 0x44c   : > { %1668 = vrot.lane.b32.xlu1 %v6040_v42, %s5786_s16 }
 0x450   : > { %1759 = vrot.lane.b32.xlu1 %v6009_v26, %s5787_s28 }
 0x454   : > { %1757 = vrot.lane.b32.xlu1 %v6011_v28, %s5787_s28 }
 0x458   : > { %1753 = vrot.lane.b32.xlu1 %v6011_v28, %s5788_s26 }
 0x460   : > { %v6114_v50 = vpop.f32.mrf.mxu1 }
 0x462   : > { %v6116_v51 = vpop.f32.mrf.mxu1 }
 0x468   : > { %v5365_v52 = vpop.f32.mrf.mxu1 }
 0x469   : > { %v1530_v55 = vmul.f32 0.5, %v5365_v52 }
 0x46a   : > { %v1518_v53 = vpop.f32.mrf.mxu1 }
 0x46b   : > { %v1529_v54 = vmul.f32 0.5, %v1518_v53  ;;  %v1540_v57 = vsel %vm1138_vm3, %v1530_v55, -inf }
 0x46d   : > { %v1537_v56 = vsel %vm1138_vm3, %v1529_v54, -inf }
 0x46e   : > { %1538 = vmax.xlane.f32.xlu0 %v1537_v56 }
 0x472   : > { %1541 = vmax.xlane.f32.xlu0 %v1540_v57 }
 0x488   : > { %1577 = vrot.lane.b32.xlu0 %v6038_v41, %s5786_s16 }
 0x48c   : > { %1666 = vrot.lane.b32.xlu0 %v6054_v45, %s5786_s16  ;;  %s5799_s16 = smov 4  }
 0x490   : > { %1850 = vrot.lane.b32.xlu0 %v6014_v30, %s5787_s28 }
 0x4c0   : > { %v1536_v58 = vpop.xlane.xlu1 %1535 }
 0x4c1   : > { %v1544_v59 = vsub.f32 %v1528_v44, %v1536_v58 }
 0x4c2   : > { %v1533_v60 = vpop.xlane.xlu0 %1532 }
 0x4c3   : > { %v1549_v61 = vmul.f32 1.442695, %v1544_v59  ;;  %v1543_v62 = vsub.f32 %v1527_v47, %v1533_v60 }
 0x4c4   : > { %v1580_v63 = vpop.permute.xlu1 %1579 }
 0x4c5   : > { %5644 = vpow2.f32 %v1549_v61  ;;  %v1547_v0 = vmul.f32 1.442695, %v1543_v62  ;;  %5366 = vmatprep.subr.mxu0 %v1580_v63 }
 0x4c6   : > { %5367 = vmatpush3.msra.mxu0 %v1580_v63 }
 0x4c7   : > { %5646 = vpow2.f32 %v1547_v0 }
 0x4c8   : > { %v1669_v1 = vpop.permute.xlu1 %1668 }
 0x4c9   : > { %5373 = vmatprep.subr.mxu1 %v1669_v1 }
 0x4ca   : > { %5374 = vmatpush3.msra.mxu1 %v1669_v1 }
 0x4cc   : > { %v1760_v13 = vpop.permute.xlu1 %1759 }
 0x4d0   : > { %v1758_v20 = vpop.permute.xlu1 %1757 }
 0x4d2   : > { %v5645_v2 = vpop.eup %5644 }
 0x4d3   : > { %v1558_v3 = vsel %vm1138_vm3, %v5645_v2, 0.0 }
 0x4d4   : > { %v5647_v4 = vpop.eup %5646  ;;  %1559 = vadd.xlane.f32.xlu0 %v1558_v3  ;;  %v1754_v21 = vpop.permute.xlu1 %1753 }
 0x4d5   : > { %v1555_v5 = vsel %vm1138_vm3, %v5647_v4, 0.0 }
 0x4d6   : > { %1556 = vadd.xlane.f32.xlu1 %v1555_v5 }
 0x4e7   : > { %1848 = vrot.lane.b32.xlu1 %v6020_v32, %s5787_s28  ;;  %s5800_s28 = smov 8  }
 0x4f7   : > { %v1539_v6 = vpop.xlane.xlu0 %1538 }
 0x4f8   : > { %v1545_v7 = vsub.f32 %v1529_v54, %v1539_v6 }
 0x4fa   : > { %v1551_v8 = vmul.f32 1.442695, %v1545_v7 }
 0x4fb   : > { %v1542_v9 = vpop.xlane.xlu0 %1541 }
 0x4fc   : > { %5648 = vpow2.f32 %v1551_v8  ;;  %v1546_v10 = vsub.f32 %v1530_v55, %v1542_v9 }
 0x4fe   : > { %v1553_v11 = vmul.f32 1.442695, %v1546_v10 }
 0x4ff   : > { %v1578_v12 = vpop.permute.xlu0 %1577 }
 0x500   : > { %5650 = vpow2.f32 %v1553_v11  ;;  %5368 = vmatprep.subr.mxu0 %v1578_v12 }
 0x501   : > { %5369 = vmatpush3.msra.mxu0 %v1578_v12 }
 0x502   : > { %5380 = vmatprep.subr.msk.mxu0 %vm961_vm2, %v1760_v13 }
 0x503   : > { %v1667_v14 = vpop.permute.xlu0 %1666 }
 0x504   : > { %5375 = vmatprep.subr.mxu1 %v1667_v14 }
 0x505   : > { %5376 = vmatpush3.msra.mxu1 %v1667_v14 }
 0x507   : > { %v1851_v15 = vpop.permute.xlu0 %1850 }
 0x508   : > { %5387 = vmatprep.subr.msk.mxu1 %vm961_vm2, %v1851_v15 }
 0x509   : > { %v5649_v16 = vpop.eup %5648 }
 0x50a   : > { %v1561_v17 = vsel %vm1138_vm3, %v5649_v16, 0.0 }
 0x50b   : > { %1562 = vadd.xlane.f32.xlu1 %v1561_v17 }
 0x50d   : > { %v5651_v18 = vpop.eup %5650 }
 0x50e   : > { %v1564_v19 = vsel %vm1138_vm3, %v5651_v18, 0.0 }
 0x50f   : > { %1565 = vadd.xlane.f32.xlu0 %v1564_v19 }
 0x51c   : > { %1846 = vrot.lane.b32.xlu1 %v6014_v30, %s5788_s26 }
 0x525   : > { %1755 = vrot.lane.b32.xlu0 %v6009_v26, %s5788_s26 }
 0x529   : > { %1844 = vrot.lane.b32.xlu0 %v6020_v32, %s5788_s26 }
 0x55d   : > { %v1560_v22 = vpop.xlane.xlu0 %1559 }
 0x55e   : > { %5652 = vrcp.f32 %v1560_v22 }
 0x55f   : > { %v1557_v23 = vpop.xlane.xlu1 %1556 }
 0x560   : > { %5654 = vrcp.f32 %v1557_v23 }
 0x563   : > { %v1849_v31 = vpop.permute.xlu1 %1848 }
 0x56b   : > { %v5653_v24 = vpop.eup %5652 }
 0x56c   : > { %v1570_v29 = vmul.f32 %v5653_v24, %v5645_v2 }
 0x56d   : > { %v5655_v25 = vpop.eup %5654 }
 0x56e   : > { %v1568_v27 = vmul.f32 %v5655_v25, %v5647_v4 }
 0x570   : > { %5370 = vmatprep.mubr.msk.f32.mxu0 %vm1138_vm3, %v1568_v27 }
 0x571   : > { %5371 = vmatmul.mubr.msk.f32.vlgmr.msra.gmra.mxu0 %vm1138_vm3, %v1570_v29 }
 0x572   : > { %5381 = vmatpush3.xpose.msk.msra.mxu0 %vm961_vm2, %v1760_v13  ;;  %5384 = vmatprep.mubr.msk.f32.mxu0 %vm961_vm2, %v1754_v21 }
 0x573   : > { %5382 = vmatprep.subr.msk.mxu0 %vm961_vm2, %v1758_v20 }
 0x576   : > { %5383 = vmatpush3.xpose.msk.msra.mxu0 %vm961_vm2, %v1758_v20 }
 0x594   : > { %v1563_v33 = vpop.xlane.xlu1 %1562 }
 0x595   : > { %5656 = vrcp.f32 %v1563_v33 }
 0x598   : > { %v1566_v34 = vpop.xlane.xlu0 %1565  ;;  %v1847_v47 = vpop.permute.xlu1 %1846 }
 0x599   : > { %5658 = vrcp.f32 %v1566_v34 }
 0x59c   : > { %v1756_v35 = vpop.permute.xlu0 %1755 }
 0x59d   : > { %5385 = vmatmul.mubr.msk.f32.vlgmr.msra.gmra.mxu0 %vm961_vm2, %v1756_v35 }
 0x5a0   : > { %v1845_v46 = vpop.permute.xlu0 %1844 }
 0x5a2   : > { %v5657_v36 = vpop.eup %5656 }
 0x5a3   : > { %v1572_v38 = vmul.f32 %v5657_v36, %v5649_v16 }
 0x5a5   : > { %5377 = vmatprep.mubr.msk.f32.mxu1 %vm1138_vm3, %v1572_v38 }
 0x5a6   : > { %v5659_v43 = vpop.eup %5658 }
 0x5a7   : > { %v1574_v44 = vmul.f32 %v5659_v43, %v5651_v18 }
 0x5a9   : > { %5378 = vmatmul.mubr.msk.f32.vlgmr.msra.gmra.mxu1 %vm1138_vm3, %v1574_v44 }
 0x5aa   : > { %5388 = vmatpush3.xpose.msk.msra.mxu1 %vm961_vm2, %v1851_v15  ;;  %5391 = vmatprep.mubr.msk.f32.mxu1 %vm961_vm2, %v1845_v46 }
 0x5ab   : > { %5389 = vmatprep.subr.msk.mxu1 %vm961_vm2, %v1849_v31 }
 0x5ae   : > { %5390 = vmatpush3.xpose.msk.msra.mxu1 %vm961_vm2, %v1849_v31 }
 0x5b1   : > { %5392 = vmatmul.mubr.msk.f32.vlgmr.msra.gmra.mxu1 %vm961_vm2, %v1847_v47 }
 0x631   : > { %v6154_v48 = vpop.f32.mrf.mxu0 }
 0x633   : > { %v6156_v49 = vpop.f32.mrf.mxu0 }
 0x65d   : > { %v5386_v52 = vpop.f32.mrf.mxu0 }
 0x65e   : > { %v1936_v53 = vmul.f32 0.5, %v5386_v52 }
 0x65f   : > { %v1835_v54 = vpop.f32.mrf.mxu0 }
 0x660   : > { %v1935_v55 = vmul.f32 0.5, %v1835_v54  ;;  %v1942_v56 = vsel %vm1138_vm3, %v1936_v53, -inf }
 0x661   : > { %1943 = vmax.xlane.f32.xlu1 %v1942_v56 }
 0x662   : > { %v1939_v57 = vsel %vm1138_vm3, %v1935_v55, -inf }
 0x663   : > { %1940 = vmax.xlane.f32.xlu0 %v1939_v57 }
 0x669   : > { %v6160_v58 = vpop.f32.mrf.mxu1 }
 0x66b   : > { %v6162_v59 = vpop.f32.mrf.mxu1 }
 0x671   : > { %v5393_v60 = vpop.f32.mrf.mxu1 }
 0x672   : > { %1985 = vrot.lane.b32.xlu1 %v6032_v37, %s5788_s26  ;;  %v1938_v63 = vmul.f32 0.5, %v5393_v60 }
 0x673   : > { %v1926_v61 = vpop.f32.mrf.mxu1 }
 0x674   : > { %v1937_v62 = vmul.f32 0.5, %v1926_v61  ;;  %v1948_v1 = vsel %vm1138_vm3, %v1938_v63, -inf }
 0x676   : > { %2072 = vrot.lane.b32.xlu1 %v6040_v42, %s5788_s26  ;;  %v1945_v0 = vsel %vm1138_vm3, %v1937_v62, -inf }
 0x677   : > { %1946 = vmax.xlane.f32.xlu0 %v1945_v0 }
 0x67a   : > { %2163 = vrot.lane.b32.xlu1 %v6009_v26, %s5789_s24 }
 0x67b   : > { %1949 = vmax.xlane.f32.xlu0 %v1948_v1 }
 0x67e   : > { %2161 = vrot.lane.b32.xlu1 %v6011_v28, %s5789_s24 }
 0x682   : > { %2157 = vrot.lane.b32.xlu1 %v6011_v28, %s5790_s29 }
 0x691   : > { %1983 = vrot.lane.b32.xlu0 %v6038_v41, %s5788_s26 }
 0x695   : > { %2070 = vrot.lane.b32.xlu0 %v6054_v45, %s5788_s26  ;;  %s5801_s26 = smov 12  }
 0x699   : > { %2254 = vrot.lane.b32.xlu0 %v6014_v30, %s5789_s24 }
 0x6ea   : > { %v1944_v2 = vpop.xlane.xlu1 %1943 }
 0x6eb   : > { %v1952_v3 = vsub.f32 %v1936_v53, %v1944_v2 }
 0x6ec   : > { %v1941_v4 = vpop.xlane.xlu0 %1940 }
 0x6ed   : > { %v1957_v5 = vmul.f32 1.442695, %v1952_v3  ;;  %v1951_v6 = vsub.f32 %v1935_v55, %v1941_v4 }
 0x6ee   : > { %v1986_v7 = vpop.permute.xlu1 %1985 }
 0x6ef   : > { %5660 = vpow2.f32 %v1957_v5  ;;  %v1955_v8 = vmul.f32 1.442695, %v1951_v6  ;;  %5394 = vmatprep.subr.mxu0 %v1986_v7 }
 0x6f0   : > { %5395 = vmatpush3.msra.mxu0 %v1986_v7 }
 0x6f1   : > { %5662 = vpow2.f32 %v1955_v8 }
 0x6f2   : > { %v2073_v9 = vpop.permute.xlu1 %2072 }
 0x6f3   : > { %5401 = vmatprep.subr.mxu1 %v2073_v9 }
 0x6f4   : > { %5402 = vmatpush3.msra.mxu1 %v2073_v9 }
 0x6f6   : > { %v2164_v19 = vpop.permute.xlu1 %2163 }
 0x6fa   : > { %v2162_v31 = vpop.permute.xlu1 %2161 }
 0x6fc   : > { %v5661_v10 = vpop.eup %5660 }
 0x6fd   : > { %v1966_v11 = vsel %vm1138_vm3, %v5661_v10, 0.0 }
 0x6fe   : > { %v5663_v12 = vpop.eup %5662  ;;  %1967 = vadd.xlane.f32.xlu0 %v1966_v11  ;;  %v2158_v33 = vpop.permute.xlu1 %2157 }
 0x6ff   : > { %v1963_v13 = vsel %vm1138_vm3, %v5663_v12, 0.0 }
 0x700   : > { %v1947_v14 = vpop.xlane.xlu0 %1946  ;;  %1964 = vadd.xlane.f32.xlu1 %v1963_v13 }
 0x701   : > { %v1953_v24 = vsub.f32 %v1937_v62, %v1947_v14 }
 0x703   : > { %v1959_v25 = vmul.f32 1.442695, %v1953_v24 }
 0x704   : > { %v1950_v15 = vpop.xlane.xlu0 %1949 }
 0x705   : > { %v1954_v16 = vsub.f32 %v1938_v63, %v1950_v15 }
 0x707   : > { %v1961_v17 = vmul.f32 1.442695, %v1954_v16 }
 0x708   : > { %v1984_v18 = vpop.permute.xlu0 %1983 }
 0x709   : > { %5664 = vpow2.f32 %v1961_v17  ;;  %5396 = vmatprep.subr.mxu0 %v1984_v18 }
 0x70a   : > { %5397 = vmatpush3.msra.mxu0 %v1984_v18  ;;  %5666 = vpow2.f32 %v1959_v25 }
 0x70b   : > { %5408 = vmatprep.subr.msk.mxu0 %vm961_vm2, %v2164_v19 }
 0x70c   : > { %v2071_v20 = vpop.permute.xlu0 %2070 }
 0x70d   : > { %5403 = vmatprep.subr.mxu1 %v2071_v20 }
 0x70e   : > { %5404 = vmatpush3.msra.mxu1 %v2071_v20 }
 0x710   : > { %v2255_v21 = vpop.permute.xlu0 %2254 }
 0x711   : > { %5415 = vmatprep.subr.msk.mxu1 %vm961_vm2, %v2255_v21  ;;  %2252 = vrot.lane.b32.xlu1 %v6020_v32, %s5789_s24  ;;  %s5802_s24 = smov 20  }
 0x716   : > { %v5665_v22 = vpop.eup %5664 }
 0x717   : > { %v1972_v23 = vsel %vm1138_vm3, %v5665_v22, 0.0  ;;  %v5667_v27 = vpop.eup %5666 }
 0x718   : > { %1973 = vadd.xlane.f32.xlu0 %v1972_v23  ;;  %v1969_v29 = vsel %vm1138_vm3, %v5667_v27, 0.0 }
 0x72e   : > { %2159 = vrot.lane.b32.xlu0 %v6009_v26, %s5790_s29 }
 0x732   : > { %2248 = vrot.lane.b32.xlu0 %v6020_v32, %s5790_s29 }
 0x735   : > { %1970 = vadd.xlane.f32.xlu1 %v1969_v29 }
 0x746   : > { %2250 = vrot.lane.b32.xlu1 %v6014_v30, %s5790_s29 }
 0x787   : > { %v1968_v34 = vpop.xlane.xlu0 %1967 }
 0x788   : > { %5668 = vrcp.f32 %v1968_v34 }
 0x789   : > { %v1965_v35 = vpop.xlane.xlu1 %1964 }
 0x78a   : > { %5670 = vrcp.f32 %v1965_v35 }
 0x78d   : > { %v2253_v52 = vpop.permute.xlu1 %2252 }
 0x795   : > { %v5669_v36 = vpop.eup %5668 }
 0x796   : > { %v1978_v44 = vmul.f32 %v5669_v36, %v5661_v10 }
 0x797   : > { %v5671_v38 = vpop.eup %5670 }
 0x798   : > { %v1976_v43 = vmul.f32 %v5671_v38, %v5663_v12 }
 0x79a   : > { %5398 = vmatprep.mubr.msk.f32.mxu0 %vm1138_vm3, %v1976_v43 }
 0x79b   : > { %5399 = vmatmul.mubr.msk.f32.vlgmr.msra.gmra.mxu0 %vm1138_vm3, %v1978_v44 }
 0x79c   : > { %5409 = vmatpush3.xpose.msk.msra.mxu0 %vm961_vm2, %v2164_v19  ;;  %5412 = vmatprep.mubr.msk.f32.mxu0 %vm961_vm2, %v2158_v33 }
 0x79d   : > { %5410 = vmatprep.subr.msk.mxu0 %vm961_vm2, %v2162_v31 }
 0x7a0   : > { %5411 = vmatpush3.xpose.msk.msra.mxu0 %vm961_vm2, %v2162_v31 }
 0x7a1   : > { %v1974_v46 = vpop.xlane.xlu0 %1973 }
 0x7a2   : > { %5672 = vrcp.f32 %v1974_v46 }
 0x7a5   : > { %v2160_v47 = vpop.permute.xlu0 %2159 }
 0x7a6   : > { %5413 = vmatmul.mubr.msk.f32.vlgmr.msra.gmra.mxu0 %vm961_vm2, %v2160_v47 }
 0x7a9   : > { %v2249_v60 = vpop.permute.xlu0 %2248 }
 0x7af   : > { %v5673_v54 = vpop.eup %5672 }
 0x7b0   : > { %v1982_v57 = vmul.f32 %v5673_v54, %v5665_v22 }
 0x7be   : > { %v1971_v53 = vpop.xlane.xlu1 %1970 }
 0x7bf   : > { %5674 = vrcp.f32 %v1971_v53 }
 0x7c2   : > { %v2251_v61 = vpop.permute.xlu1 %2250 }
 0x7cc   : > { %v5675_v55 = vpop.eup %5674 }
 0x7cd   : > { %v1980_v56 = vmul.f32 %v5675_v55, %v5667_v27 }
 0x7cf   : > { %5405 = vmatprep.mubr.msk.f32.mxu1 %vm1138_vm3, %v1980_v56 }
 0x7d0   : > { %5406 = vmatmul.mubr.msk.f32.vlgmr.msra.gmra.mxu1 %vm1138_vm3, %v1982_v57 }
 0x7d1   : > { %5416 = vmatpush3.xpose.msk.msra.mxu1 %vm961_vm2, %v2255_v21  ;;  %5419 = vmatprep.mubr.msk.f32.mxu1 %vm961_vm2, %v2249_v60 }
 0x7d2   : > { %5417 = vmatprep.subr.msk.mxu1 %vm961_vm2, %v2253_v52 }
 0x7d5   : > { %5418 = vmatpush3.xpose.msk.msra.mxu1 %vm961_vm2, %v2253_v52 }
 0x7d8   : > { %5420 = vmatmul.mubr.msk.f32.vlgmr.msra.gmra.mxu1 %vm961_vm2, %v2251_v61 }
 0x85b   : > { %v6210_v62 = vpop.f32.mrf.mxu0 }
 0x85d   : > { %v6212_v63 = vpop.f32.mrf.mxu0 }
 0x866   : > { %v5414_v0 = vpop.f32.mrf.mxu0 }
 0x867   : > { %v2340_v1 = vmul.f32 0.5, %v5414_v0 }
 0x868   : > { %v2239_v2 = vpop.f32.mrf.mxu0 }
 0x869   : > { %v2339_v3 = vmul.f32 0.5, %v2239_v2  ;;  %v2346_v4 = vsel %vm1138_vm3, %v2340_v1, -inf }
 0x86a   : > { %2347 = vmax.xlane.f32.xlu1 %v2346_v4 }
 0x86b   : > { %v2343_v5 = vsel %vm1138_vm3, %v2339_v3, -inf }
 0x86c   : > { %2344 = vmax.xlane.f32.xlu0 %v2343_v5 }
 0x87b   : > { %2389 = vrot.lane.b32.xlu1 %v6032_v37, %s5790_s29 }
 0x87f   : > { %2476 = vrot.lane.b32.xlu1 %v6040_v42, %s5790_s29 }
 0x883   : > { %2567 = vrot.lane.b32.xlu1 %v6009_v26, %s5791_s30 }
 0x887   : > { %2565 = vrot.lane.b32.xlu1 %v6011_v28, %s5791_s30 }
 0x88b   : > { %2561 = vrot.lane.b32.xlu1 %v6011_v28, %s5792_s9 }
 0x890   : > { %v6226_v6 = vpop.f32.mrf.mxu1 }
 0x892   : > { %v6228_v7 = vpop.f32.mrf.mxu1 }
 0x898   : > { %v5421_v8 = vpop.f32.mrf.mxu1 }
 0x899   : > { %v2342_v11 = vmul.f32 0.5, %v5421_v8 }
 0x89a   : > { %v2330_v9 = vpop.f32.mrf.mxu1 }
 0x89b   : > { %v2341_v10 = vmul.f32 0.5, %v2330_v9  ;;  %v2352_v13 = vsel %vm1138_vm3, %v2342_v11, -inf }
 0x89d   : > { %v2349_v12 = vsel %vm1138_vm3, %v2341_v10, -inf }
 0x89e   : > { %2350 = vmax.xlane.f32.xlu0 %v2349_v12 }
 0x8a2   : > { %2353 = vmax.xlane.f32.xlu0 %v2352_v13 }
 0x8b8   : > { %2387 = vrot.lane.b32.xlu0 %v6038_v41, %s5790_s29 }
 0x8bc   : > { %2474 = vrot.lane.b32.xlu0 %v6054_v45, %s5790_s29  ;;  %s5803_s29 = smov 16  }
 0x8c0   : > { %2658 = vrot.lane.b32.xlu0 %v6014_v30, %s5791_s30 }
 0x8f3   : > { %v2348_v14 = vpop.xlane.xlu1 %2347 }
 0x8f4   : > { %v2356_v15 = vsub.f32 %v2340_v1, %v2348_v14 }
 0x8f5   : > { %v2345_v16 = vpop.xlane.xlu0 %2344 }
 0x8f6   : > { %v2361_v17 = vmul.f32 1.442695, %v2356_v15  ;;  %v2355_v18 = vsub.f32 %v2339_v3, %v2345_v16 }
 0x8f7   : > { %v2390_v19 = vpop.permute.xlu1 %2389 }
 0x8f8   : > { %5676 = vpow2.f32 %v2361_v17  ;;  %v2359_v20 = vmul.f32 1.442695, %v2355_v18  ;;  %5422 = vmatprep.subr.mxu0 %v2390_v19 }
 0x8f9   : > { %5423 = vmatpush3.msra.mxu0 %v2390_v19 }
 0x8fa   : > { %5678 = vpow2.f32 %v2359_v20 }
 0x8fb   : > { %v2477_v21 = vpop.permute.xlu1 %2476 }
 0x8fc   : > { %5429 = vmatprep.subr.mxu1 %v2477_v21 }
 0x8fd   : > { %5430 = vmatpush3.msra.mxu1 %v2477_v21 }
 0x8ff   : > { %v2568_v38 = vpop.permute.xlu1 %2567 }
 0x903   : > { %v2566_v54 = vpop.permute.xlu1 %2565 }
 0x905   : > { %v5677_v22 = vpop.eup %5676 }
 0x906   : > { %v2370_v23 = vsel %vm1138_vm3, %v5677_v22, 0.0 }
 0x907   : > { %v5679_v24 = vpop.eup %5678  ;;  %2371 = vadd.xlane.f32.xlu0 %v2370_v23  ;;  %v2562_v55 = vpop.permute.xlu1 %2561 }
 0x908   : > { %v2367_v25 = vsel %vm1138_vm3, %v5679_v24, 0.0 }
 0x909   : > { %2368 = vadd.xlane.f32.xlu1 %v2367_v25 }
 0x91a   : > { %2656 = vrot.lane.b32.xlu1 %v6020_v32, %s5791_s30  ;;  %s5804_s30 = smov 24  }
 0x927   : > { %v2351_v27 = vpop.xlane.xlu0 %2350 }
 0x928   : > { %v2357_v29 = vsub.f32 %v2341_v10, %v2351_v27 }
 0x92a   : > { %v2363_v31 = vmul.f32 1.442695, %v2357_v29 }
 0x92b   : > { %v2354_v33 = vpop.xlane.xlu0 %2353 }
 0x92c   : > { %v2358_v34 = vsub.f32 %v2342_v11, %v2354_v33  ;;  %5680 = vpow2.f32 %v2363_v31 }
 0x92e   : > { %v2365_v35 = vmul.f32 1.442695, %v2358_v34 }
 0x92f   : > { %v2388_v36 = vpop.permute.xlu0 %2387 }
 0x930   : > { %5682 = vpow2.f32 %v2365_v35  ;;  %5424 = vmatprep.subr.mxu0 %v2388_v36 }
 0x931   : > { %5425 = vmatpush3.msra.mxu0 %v2388_v36 }
 0x932   : > { %5436 = vmatprep.subr.msk.mxu0 %vm961_vm2, %v2568_v38 }
 0x933   : > { %v2475_v43 = vpop.permute.xlu0 %2474 }
 0x934   : > { %5431 = vmatprep.subr.mxu1 %v2475_v43 }
 0x935   : > { %5432 = vmatpush3.msra.mxu1 %v2475_v43 }
 0x937   : > { %v2659_v44 = vpop.permute.xlu0 %2658 }
 0x938   : > { %5443 = vmatprep.subr.msk.mxu1 %vm961_vm2, %v2659_v44 }
 0x939   : > { %v5681_v46 = vpop.eup %5680 }
 0x93a   : > { %v2373_v52 = vsel %vm1138_vm3, %v5681_v46, 0.0 }
 0x93d   : > { %v5683_v47 = vpop.eup %5682 }
 0x93e   : > { %2374 = vadd.xlane.f32.xlu1 %v2373_v52  ;;  %v2376_v53 = vsel %vm1138_vm3, %v5683_v47, 0.0 }
 0x93f   : > { %2377 = vadd.xlane.f32.xlu0 %v2376_v53 }
 0x94f   : > { %2654 = vrot.lane.b32.xlu1 %v6014_v30, %s5792_s9 }
 0x955   : > { %2563 = vrot.lane.b32.xlu0 %v6009_v26, %s5792_s9 }
 0x959   : > { %2652 = vrot.lane.b32.xlu0 %v6020_v32, %s5792_s9 }
 0x990   : > { %v2372_v56 = vpop.xlane.xlu0 %2371 }
 0x991   : > { %5684 = vrcp.f32 %v2372_v56 }
 0x992   : > { %v2369_v57 = vpop.xlane.xlu1 %2368 }
 0x993   : > { %5686 = vrcp.f32 %v2369_v57 }
 0x996   : > { %v2657_v2 = vpop.permute.xlu1 %2656 }
 0x99e   : > { %v5685_v60 = vpop.eup %5684 }
 0x99f   : > { %v2382_v1 = vmul.f32 %v5685_v60, %v5677_v22 }
 0x9a0   : > { %v5687_v61 = vpop.eup %5686 }
 0x9a1   : > { %v2380_v0 = vmul.f32 %v5687_v61, %v5679_v24 }
 0x9a3   : > { %5426 = vmatprep.mubr.msk.f32.mxu0 %vm1138_vm3, %v2380_v0 }
 0x9a4   : > { %5427 = vmatmul.mubr.msk.f32.vlgmr.msra.gmra.mxu0 %vm1138_vm3, %v2382_v1 }
 0x9a5   : > { %5437 = vmatpush3.xpose.msk.msra.mxu0 %vm961_vm2, %v2568_v38  ;;  %5440 = vmatprep.mubr.msk.f32.mxu0 %vm961_vm2, %v2562_v55 }
 0x9a6   : > { %5438 = vmatprep.subr.msk.mxu0 %vm961_vm2, %v2566_v54 }
 0x9a9   : > { %5439 = vmatpush3.xpose.msk.msra.mxu0 %vm961_vm2, %v2566_v54 }
 0x9c7   : > { %v2375_v3 = vpop.xlane.xlu1 %2374 }
 0x9c8   : > { %5688 = vrcp.f32 %v2375_v3  ;;  %v2378_v4 = vpop.xlane.xlu0 %2377 }
 0x9c9   : > { %5690 = vrcp.f32 %v2378_v4 }
 0x9cb   : > { %v2655_v13 = vpop.permute.xlu1 %2654 }
 0x9cc   : > { %v2564_v5 = vpop.permute.xlu0 %2563 }
 0x9cd   : > { %5441 = vmatmul.mubr.msk.f32.vlgmr.msra.gmra.mxu0 %vm961_vm2, %v2564_v5 }
 0x9d0   : > { %v2653_v12 = vpop.permute.xlu0 %2652 }
 0x9d5   : > { %v5689_v8 = vpop.eup %5688 }
 0x9d6   : > { %v5691_v9 = vpop.eup %5690  ;;  %v2384_v10 = vmul.f32 %v5689_v8, %v5681_v46 }
 0x9d7   : > { %v2386_v11 = vmul.f32 %v5691_v9, %v5683_v47 }
 0x9d8   : > { %5433 = vmatprep.mubr.msk.f32.mxu1 %vm1138_vm3, %v2384_v10 }
 0x9d9   : > { %5434 = vmatmul.mubr.msk.f32.vlgmr.msra.gmra.mxu1 %vm1138_vm3, %v2386_v11 }
 0x9da   : > { %5444 = vmatpush3.xpose.msk.msra.mxu1 %vm961_vm2, %v2659_v44  ;;  %5447 = vmatprep.mubr.msk.f32.mxu1 %vm961_vm2, %v2653_v12 }
 0x9db   : > { %5445 = vmatprep.subr.msk.mxu1 %vm961_vm2, %v2657_v2 }
 0x9de   : > { %5446 = vmatpush3.xpose.msk.msra.mxu1 %vm961_vm2, %v2657_v2 }
 0x9e1   : > { %5448 = vmatmul.mubr.msk.f32.vlgmr.msra.gmra.mxu1 %vm961_vm2, %v2655_v13 }
 0xa64   : > { %v6266_v14 = vpop.f32.mrf.mxu0 }
 0xa66   : > { %v6268_v15 = vpop.f32.mrf.mxu0 }
 0xa8d   : > { %v5442_v16 = vpop.f32.mrf.mxu0 }
 0xa8e   : > { %v2744_v17 = vmul.f32 0.5, %v5442_v16 }
 0xa8f   : > { %v2643_v18 = vpop.f32.mrf.mxu0 }
 0xa90   : > { %v2743_v19 = vmul.f32 0.5, %v2643_v18  ;;  %v2750_v20 = vsel %vm1138_vm3, %v2744_v17, -inf }
 0xa91   : > { %2751 = vmax.xlane.f32.xlu1 %v2750_v20 }
 0xa92   : > { %v2747_v21 = vsel %vm1138_vm3, %v2743_v19, -inf }
 0xa93   : > { %2748 = vmax.xlane.f32.xlu0 %v2747_v21 }
 0xa99   : > { %v6272_v22 = vpop.f32.mrf.mxu1 }
 0xa9b   : > { %v6274_v23 = vpop.f32.mrf.mxu1 }
 0xaa1   : > { %v5449_v24 = vpop.f32.mrf.mxu1 }
 0xaa2   : > { %2793 = vrot.lane.b32.xlu1 %v6032_v37, %s5792_s9  ;;  %v2746_v29 = vmul.f32 0.5, %v5449_v24 }
 0xaa3   : > { %v2734_v25 = vpop.f32.mrf.mxu1 }
 0xaa4   : > { %v2745_v27 = vmul.f32 0.5, %v2734_v25  ;;  %v2756_v33 = vsel %vm1138_vm3, %v2746_v29, -inf }
 0xaa6   : > { %2880 = vrot.lane.b32.xlu1 %v6040_v42, %s5792_s9  ;;  %v2753_v31 = vsel %vm1138_vm3, %v2745_v27, -inf }
 0xaa7   : > { %2754 = vmax.xlane.f32.xlu0 %v2753_v31 }
 0xaaa   : > { %2971 = vrot.lane.b32.xlu1 %v6009_v26, %s5793_s0 }
 0xaab   : > { %2757 = vmax.xlane.f32.xlu0 %v2756_v33 }
 0xaae   : > { %2969 = vrot.lane.b32.xlu1 %v6011_v28, %s5793_s0 }
 0xab2   : > { %2965 = vrot.lane.b32.xlu1 %v6011_v28, %s5794_s18 }
 0xac1   : > { %2791 = vrot.lane.b32.xlu0 %v6038_v41, %s5792_s9 }
 0xac5   : > { %2878 = vrot.lane.b32.xlu0 %v6054_v45, %s5792_s9  ;;  %s5805_s9 = smov 28  }
 0xac9   : > { %3062 = vrot.lane.b32.xlu0 %v6014_v30, %s5793_s0 }
 0xb1a   : > { %v2752_v34 = vpop.xlane.xlu1 %2751 }
 0xb1b   : > { %v2760_v35 = vsub.f32 %v2744_v17, %v2752_v34 }
 0xb1c   : > { %v2749_v36 = vpop.xlane.xlu0 %2748 }
 0xb1d   : > { %v2765_v38 = vmul.f32 1.442695, %v2760_v35  ;;  %v2759_v43 = vsub.f32 %v2743_v19, %v2749_v36 }
 0xb1e   : > { %v2794_v44 = vpop.permute.xlu1 %2793 }
 0xb1f   : > { %5692 = vpow2.f32 %v2765_v38  ;;  %v2763_v46 = vmul.f32 1.442695, %v2759_v43  ;;  %5450 = vmatprep.subr.mxu0 %v2794_v44 }
 0xb20   : > { %5451 = vmatpush3.msra.mxu0 %v2794_v44 }
 0xb21   : > { %5694 = vpow2.f32 %v2763_v46 }
 0xb22   : > { %v2881_v47 = vpop.permute.xlu1 %2880 }
 0xb23   : > { %5457 = vmatprep.subr.mxu1 %v2881_v47 }
 0xb24   : > { %5458 = vmatpush3.msra.mxu1 %v2881_v47 }
 0xb26   : > { %v2972_v1 = vpop.permute.xlu1 %2971 }
 0xb2a   : > { %v2970_v12 = vpop.permute.xlu1 %2969 }
 0xb2c   : > { %v5693_v52 = vpop.eup %5692 }
 0xb2d   : > { %v2774_v53 = vsel %vm1138_vm3, %v5693_v52, 0.0 }
 0xb2e   : > { %v5695_v54 = vpop.eup %5694  ;;  %2775 = vadd.xlane.f32.xlu0 %v2774_v53  ;;  %v2966_v13 = vpop.permute.xlu1 %2965 }
 0xb2f   : > { %v2771_v55 = vsel %vm1138_vm3, %v5695_v54, 0.0 }
 0xb30   : > { %v2755_v56 = vpop.xlane.xlu0 %2754  ;;  %2772 = vadd.xlane.f32.xlu1 %v2771_v55 }
 0xb31   : > { %v2761_v8 = vsub.f32 %v2745_v27, %v2755_v56 }
 0xb33   : > { %v2767_v9 = vmul.f32 1.442695, %v2761_v8 }
 0xb34   : > { %v2758_v57 = vpop.xlane.xlu0 %2757 }
 0xb35   : > { %v2762_v60 = vsub.f32 %v2746_v29, %v2758_v57 }
 0xb37   : > { %v2769_v61 = vmul.f32 1.442695, %v2762_v60 }
 0xb38   : > { %v2792_v0 = vpop.permute.xlu0 %2791 }
 0xb39   : > { %5696 = vpow2.f32 %v2769_v61  ;;  %5452 = vmatprep.subr.mxu0 %v2792_v0 }
 0xb3a   : > { %5453 = vmatpush3.msra.mxu0 %v2792_v0  ;;  %5698 = vpow2.f32 %v2767_v9 }
 0xb3b   : > { %5464 = vmatprep.subr.msk.mxu0 %vm961_vm2, %v2972_v1 }
 0xb3c   : > { %v2879_v2 = vpop.permute.xlu0 %2878 }
 0xb3d   : > { %5459 = vmatprep.subr.mxu1 %v2879_v2 }
 0xb3e   : > { %5460 = vmatpush3.msra.mxu1 %v2879_v2 }
 0xb40   : > { %v3063_v3 = vpop.permute.xlu0 %3062 }
 0xb41   : > { %5471 = vmatprep.subr.msk.mxu1 %vm961_vm2, %v3063_v3  ;;  %3060 = vrot.lane.b32.xlu1 %v6020_v32, %s5793_s0 }
 0xb46   : > { %v5697_v4 = vpop.eup %5696 }
 0xb47   : > { %v2780_v5 = vsel %vm1138_vm3, %v5697_v4, 0.0  ;;  %v5699_v10 = vpop.eup %5698 }
 0xb48   : > { %2781 = vadd.xlane.f32.xlu0 %v2780_v5  ;;  %v2777_v11 = vsel %vm1138_vm3, %v5699_v10, 0.0 }
 0xb5e   : > { %2967 = vrot.lane.b32.xlu0 %v6009_v26, %s5794_s18 }
 0xb62   : > { %3056 = vrot.lane.b32.xlu0 %v6020_v32, %s5794_s18 }
 0xb65   : > { %2778 = vadd.xlane.f32.xlu1 %v2777_v11 }
 0xb76   : > { %3058 = vrot.lane.b32.xlu1 %v6014_v30, %s5794_s18 }
 0xbb7   : > { %v2776_v16 = vpop.xlane.xlu0 %2775 }
 0xbb8   : > { %5700 = vrcp.f32 %v2776_v16 }
 0xbb9   : > { %v2773_v17 = vpop.xlane.xlu1 %2772 }
 0xbba   : > { %5702 = vrcp.f32 %v2773_v17 }
 0xbbd   : > { %v3061_v27 = vpop.permute.xlu1 %3060 }
 0xbc5   : > { %v5701_v18 = vpop.eup %5700 }
 0xbc6   : > { %v2786_v21 = vmul.f32 %v5701_v18, %v5693_v52 }
 0xbc7   : > { %v5703_v19 = vpop.eup %5702 }
 0xbc8   : > { %v2784_v20 = vmul.f32 %v5703_v19, %v5695_v54 }
 0xbca   : > { %5454 = vmatprep.mubr.msk.f32.mxu0 %vm1138_vm3, %v2784_v20 }
 0xbcb   : > { %5455 = vmatmul.mubr.msk.f32.vlgmr.msra.gmra.mxu0 %vm1138_vm3, %v2786_v21 }
 0xbcc   : > { %5465 = vmatpush3.xpose.msk.msra.mxu0 %vm961_vm2, %v2972_v1  ;;  %5468 = vmatprep.mubr.msk.f32.mxu0 %vm961_vm2, %v2966_v13 }
 0xbcd   : > { %5466 = vmatprep.subr.msk.mxu0 %vm961_vm2, %v2970_v12 }
 0xbd0   : > { %5467 = vmatpush3.xpose.msk.msra.mxu0 %vm961_vm2, %v2970_v12 }
 0xbd1   : > { %v2782_v24 = vpop.xlane.xlu0 %2781 }
 0xbd2   : > { %5704 = vrcp.f32 %v2782_v24 }
 0xbd5   : > { %v2968_v25 = vpop.permute.xlu0 %2967 }
 0xbd6   : > { %5469 = vmatmul.mubr.msk.f32.vlgmr.msra.gmra.mxu0 %vm961_vm2, %v2968_v25 }
 0xbd9   : > { %v3057_v36 = vpop.permute.xlu0 %3056 }
 0xbdf   : > { %v5705_v31 = vpop.eup %5704 }
 0xbe0   : > { %v2790_v35 = vmul.f32 %v5705_v31, %v5697_v4 }
 0xbee   : > { %v2779_v29 = vpop.xlane.xlu1 %2778 }
 0xbef   : > { %5706 = vrcp.f32 %v2779_v29 }
 0xbf2   : > { %v3059_v38 = vpop.permute.xlu1 %3058 }
 0xbfc   : > { %v5707_v33 = vpop.eup %5706 }
 0xbfd   : > { %v2788_v34 = vmul.f32 %v5707_v33, %v5699_v10 }
 0xbff   : > { %5461 = vmatprep.mubr.msk.f32.mxu1 %vm1138_vm3, %v2788_v34 }
 0xc00   : > { %5462 = vmatmul.mubr.msk.f32.vlgmr.msra.gmra.mxu1 %vm1138_vm3, %v2790_v35 }
 0xc01   : > { %5472 = vmatpush3.xpose.msk.msra.mxu1 %vm961_vm2, %v3063_v3  ;;  %5475 = vmatprep.mubr.msk.f32.mxu1 %vm961_vm2, %v3057_v36 }
 0xc02   : > { %5473 = vmatprep.subr.msk.mxu1 %vm961_vm2, %v3061_v27 }
 0xc05   : > { %5474 = vmatpush3.xpose.msk.msra.mxu1 %vm961_vm2, %v3061_v27 }
 0xc08   : > { %5476 = vmatmul.mubr.msk.f32.vlgmr.msra.gmra.mxu1 %vm961_vm2, %v3059_v38 }
 0xc8b   : > { %v6322_v43 = vpop.f32.mrf.mxu0 }
 0xc8d   : > { %v6324_v44 = vpop.f32.mrf.mxu0 }
 0xc96   : > { %v5470_v46 = vpop.f32.mrf.mxu0 }
 0xc97   : > { %v3148_v47 = vmul.f32 0.5, %v5470_v46 }
 0xc98   : > { %v3047_v52 = vpop.f32.mrf.mxu0 }
 0xc99   : > { %v3147_v53 = vmul.f32 0.5, %v3047_v52  ;;  %v3154_v54 = vsel %vm1138_vm3, %v3148_v47, -inf }
 0xc9a   : > { %3155 = vmax.xlane.f32.xlu1 %v3154_v54 }
 0xc9b   : > { %v3151_v55 = vsel %vm1138_vm3, %v3147_v53, -inf }
 0xc9c   : > { %3152 = vmax.xlane.f32.xlu0 %v3151_v55 }
 0xcab   : > { %3197 = vrot.lane.b32.xlu1 %v6032_v37, %s5794_s18 }
 0xcaf   : > { %3284 = vrot.lane.b32.xlu1 %v6040_v42, %s5794_s18 }
 0xcb3   : > { %3375 = vrot.lane.b32.xlu1 %v6009_v26, %s5795_s22 }
 0xcb7   : > { %3373 = vrot.lane.b32.xlu1 %v6011_v28, %s5795_s22 }
 0xcbb   : > { %3369 = vrot.lane.b32.xlu1 %v6011_v28, %s5796_s17 }
 0xcc0   : > { %v6338_v56 = vpop.f32.mrf.mxu1 }
 0xcc2   : > { %v6340_v57 = vpop.f32.mrf.mxu1 }
 0xcc8   : > { %v5477_v60 = vpop.f32.mrf.mxu1 }
 0xcc9   : > { %v3150_v1 = vmul.f32 0.5, %v5477_v60 }
 0xcca   : > { %v3138_v61 = vpop.f32.mrf.mxu1 }
 0xccb   : > { %v3149_v0 = vmul.f32 0.5, %v3138_v61  ;;  %v3160_v3 = vsel %vm1138_vm3, %v3150_v1, -inf }
 0xccd   : > { %v3157_v2 = vsel %vm1138_vm3, %v3149_v0, -inf }
 0xcce   : > { %3158 = vmax.xlane.f32.xlu0 %v3157_v2 }
 0xcd2   : > { %3161 = vmax.xlane.f32.xlu0 %v3160_v3 }
 0xce8   : > { %3195 = vrot.lane.b32.xlu0 %v6038_v41, %s5794_s18 }
 0xcec   : > { %3282 = vrot.lane.b32.xlu0 %v6054_v45, %s5794_s18  ;;  %s6681_s18 = scalar_lea.vmem %s6646_s7, %s5899_s23 }
 0xcf0   : > { %3466 = vrot.lane.b32.xlu0 %v6014_v30, %s5795_s22 }
 0xd23   : > { %v3156_v4 = vpop.xlane.xlu1 %3155 }
 0xd24   : > { %v3164_v5 = vsub.f32 %v3148_v47, %v3156_v4 }
 0xd25   : > { %v3153_v8 = vpop.xlane.xlu0 %3152 }
 0xd26   : > { %v3169_v9 = vmul.f32 1.442695, %v3164_v5  ;;  %v3163_v10 = vsub.f32 %v3147_v53, %v3153_v8 }
 0xd27   : > { %v3198_v11 = vpop.permute.xlu1 %3197 }
 0xd28   : > { %5708 = vpow2.f32 %v3169_v9  ;;  %v3167_v12 = vmul.f32 1.442695, %v3163_v10  ;;  %5478 = vmatprep.subr.mxu0 %v3198_v11 }
 0xd29   : > { %5479 = vmatpush3.msra.mxu0 %v3198_v11 }
 0xd2a   : > { %5710 = vpow2.f32 %v3167_v12 }
 0xd2b   : > { %v3285_v13 = vpop.permute.xlu1 %3284 }
 0xd2c   : > { %5485 = vmatprep.subr.mxu1 %v3285_v13 }
 0xd2d   : > { %5486 = vmatpush3.msra.mxu1 %v3285_v13 }
 0xd2f   : > { %v3376_v33 = vpop.permute.xlu1 %3375 }
 0xd33   : > { %v3374_v52 = vpop.permute.xlu1 %3373 }
 0xd35   : > { %v5709_v16 = vpop.eup %5708 }
 0xd36   : > { %v3178_v17 = vsel %vm1138_vm3, %v5709_v16, 0.0 }
 0xd37   : > { %v5711_v18 = vpop.eup %5710  ;;  %3179 = vadd.xlane.f32.xlu0 %v3178_v17  ;;  %v3370_v53 = vpop.permute.xlu1 %3369 }
 0xd38   : > { %v3175_v19 = vsel %vm1138_vm3, %v5711_v18, 0.0 }
 0xd39   : > { %3176 = vadd.xlane.f32.xlu1 %v3175_v19 }
 0xd4a   : > { %3464 = vrot.lane.b32.xlu1 %v6020_v32, %s5795_s22 }
 0xd57   : > { %v3159_v20 = vpop.xlane.xlu0 %3158 }
 0xd58   : > { %v3165_v21 = vsub.f32 %v3149_v0, %v3159_v20 }
 0xd5a   : > { %v3171_v24 = vmul.f32 1.442695, %v3165_v21 }
 0xd5b   : > { %v3162_v25 = vpop.xlane.xlu0 %3161 }
 0xd5c   : > { %v3166_v27 = vsub.f32 %v3150_v1, %v3162_v25  ;;  %5712 = vpow2.f32 %v3171_v24 }
 0xd5e   : > { %v3173_v29 = vmul.f32 1.442695, %v3166_v27 }
 0xd5f   : > { %v3196_v31 = vpop.permute.xlu0 %3195 }
 0xd60   : > { %5714 = vpow2.f32 %v3173_v29  ;;  %5480 = vmatprep.subr.mxu0 %v3196_v31 }
 0xd61   : > { %5481 = vmatpush3.msra.mxu0 %v3196_v31 }
 0xd62   : > { %5492 = vmatprep.subr.msk.mxu0 %vm961_vm2, %v3376_v33 }
 0xd63   : > { %v3283_v34 = vpop.permute.xlu0 %3282 }
 0xd64   : > { %5487 = vmatprep.subr.mxu1 %v3283_v34 }
 0xd65   : > { %5488 = vmatpush3.msra.mxu1 %v3283_v34 }
 0xd67   : > { %v3467_v35 = vpop.permute.xlu0 %3466 }
 0xd68   : > { %5499 = vmatprep.subr.msk.mxu1 %vm961_vm2, %v3467_v35 }
 0xd69   : > { %v5713_v36 = vpop.eup %5712 }
 0xd6a   : > { %v3181_v46 = vsel %vm1138_vm3, %v5713_v36, 0.0 }
 0xd6d   : > { %v5715_v38 = vpop.eup %5714 }
 0xd6e   : > { %3182 = vadd.xlane.f32.xlu1 %v3181_v46  ;;  %v3184_v47 = vsel %vm1138_vm3, %v5715_v38, 0.0 }
 0xd6f   : > { %3185 = vadd.xlane.f32.xlu0 %v3184_v47 }
 0xd7f   : > { %3462 = vrot.lane.b32.xlu1 %v6014_v30, %s5796_s17 }
 0xd85   : > { %3371 = vrot.lane.b32.xlu0 %v6009_v26, %s5796_s17 }
 0xd89   : > { %3460 = vrot.lane.b32.xlu0 %v6020_v32, %s5796_s17 }
 0xdc0   : > { %v3180_v54 = vpop.xlane.xlu0 %3179 }
 0xdc1   : > { %5716 = vrcp.f32 %v3180_v54 }
 0xdc2   : > { %v3177_v55 = vpop.xlane.xlu1 %3176 }
 0xdc3   : > { %5718 = vrcp.f32 %v3177_v55 }
 0xdc6   : > { %v3465_v2 = vpop.permute.xlu1 %3464 }
 0xdce   : > { %v5717_v60 = vpop.eup %5716 }
 0xdcf   : > { %v3190_v1 = vmul.f32 %v5717_v60, %v5709_v16 }
 0xdd0   : > { %v5719_v61 = vpop.eup %5718 }
 0xdd1   : > { %v3188_v0 = vmul.f32 %v5719_v61, %v5711_v18 }
 0xdd3   : > { %5482 = vmatprep.mubr.msk.f32.mxu0 %vm1138_vm3, %v3188_v0 }
 0xdd4   : > { %5483 = vmatmul.mubr.msk.f32.vlgmr.msra.gmra.mxu0 %vm1138_vm3, %v3190_v1 }
 0xdd5   : > { %5493 = vmatpush3.xpose.msk.msra.mxu0 %vm961_vm2, %v3376_v33  ;;  %5496 = vmatprep.mubr.msk.f32.mxu0 %vm961_vm2, %v3370_v53 }
 0xdd6   : > { %5494 = vmatprep.subr.msk.mxu0 %vm961_vm2, %v3374_v52 }
 0xdd9   : > { %5495 = vmatpush3.xpose.msk.msra.mxu0 %vm961_vm2, %v3374_v52 }
 0xdf7   : > { %v3183_v3 = vpop.xlane.xlu1 %3182 }
 0xdf8   : > { %5720 = vrcp.f32 %v3183_v3  ;;  %v3186_v4 = vpop.xlane.xlu0 %3185 }
 0xdf9   : > { %5722 = vrcp.f32 %v3186_v4 }
 0xdfb   : > { %v3463_v13 = vpop.permute.xlu1 %3462 }
 0xdfc   : > { %v3372_v5 = vpop.permute.xlu0 %3371 }
 0xdfd   : > { %5497 = vmatmul.mubr.msk.f32.vlgmr.msra.gmra.mxu0 %vm961_vm2, %v3372_v5 }
 0xe00   : > { %v3461_v12 = vpop.permute.xlu0 %3460 }
 0xe05   : > { %v5721_v8 = vpop.eup %5720 }
 0xe06   : > { %v5723_v9 = vpop.eup %5722  ;;  %v3192_v10 = vmul.f32 %v5721_v8, %v5713_v36 }
 0xe07   : > { %v3194_v11 = vmul.f32 %v5723_v9, %v5715_v38 }
 0xe08   : > { %5489 = vmatprep.mubr.msk.f32.mxu1 %vm1138_vm3, %v3192_v10 }
 0xe09   : > { %5490 = vmatmul.mubr.msk.f32.vlgmr.msra.gmra.mxu1 %vm1138_vm3, %v3194_v11 }
 0xe0a   : > { %5500 = vmatpush3.xpose.msk.msra.mxu1 %vm961_vm2, %v3467_v35  ;;  %5503 = vmatprep.mubr.msk.f32.mxu1 %vm961_vm2, %v3461_v12 }
 0xe0b   : > { %5501 = vmatprep.subr.msk.mxu1 %vm961_vm2, %v3465_v2 }
 0xe0e   : > { %5502 = vmatpush3.xpose.msk.msra.mxu1 %vm961_vm2, %v3465_v2 }
 0xe11   : > { %5504 = vmatmul.mubr.msk.f32.vlgmr.msra.gmra.mxu1 %vm961_vm2, %v3463_v13 }
 0xe94   : > { %v6378_v16 = vpop.f32.mrf.mxu0 }
 0xe96   : > { %v6380_v17 = vpop.f32.mrf.mxu0 }
 0xebd   : > { %v5498_v18 = vpop.f32.mrf.mxu0 }
 0xebe   : > { %v3552_v19 = vmul.f32 0.5, %v5498_v18 }
 0xebf   : > { %v3451_v20 = vpop.f32.mrf.mxu0 }
 0xec0   : > { %v3551_v21 = vmul.f32 0.5, %v3451_v20  ;;  %v3558_v24 = vsel %vm1138_vm3, %v3552_v19, -inf }
 0xec1   : > { %3559 = vmax.xlane.f32.xlu1 %v3558_v24 }
 0xec2   : > { %v3555_v25 = vsel %vm1138_vm3, %v3551_v21, -inf }
 0xec3   : > { %3556 = vmax.xlane.f32.xlu0 %v3555_v25 }
 0xec9   : > { %v6384_v27 = vpop.f32.mrf.mxu1 }
 0xecb   : > { %v6386_v29 = vpop.f32.mrf.mxu1 }
 0xed1   : > { %v5505_v31 = vpop.f32.mrf.mxu1 }
 0xed2   : > { %3601 = vrot.lane.b32.xlu1 %v6032_v37, %s5796_s17  ;;  %v3554_v35 = vmul.f32 0.5, %v5505_v31 }
 0xed3   : > { %v3542_v33 = vpop.f32.mrf.mxu1 }
 0xed4   : > { %v3553_v34 = vmul.f32 0.5, %v3542_v33  ;;  %v3564_v38 = vsel %vm1138_vm3, %v3554_v35, -inf }
 0xed6   : > { %3688 = vrot.lane.b32.xlu1 %v6040_v42, %s5796_s17  ;;  %v3561_v36 = vsel %vm1138_vm3, %v3553_v34, -inf }
 0xed7   : > { %3562 = vmax.xlane.f32.xlu0 %v3561_v36 }
 0xeda   : > { %3779 = vrot.lane.b32.xlu1 %v6009_v26, %s5797_s21 }
 0xedb   : > { %3565 = vmax.xlane.f32.xlu0 %v3564_v38 }
 0xede   : > { %3777 = vrot.lane.b32.xlu1 %v6011_v28, %s5797_s21 }
 0xee2   : > { %3773 = vrot.lane.b32.xlu1 %v6011_v28, %s5798_s6 }
 0xef1   : > { %3599 = vrot.lane.b32.xlu0 %v6038_v41, %s5796_s17 }
 0xef5   : > { %3686 = vrot.lane.b32.xlu0 %v6054_v45, %s5796_s17 }
 0xef9   : > { %3870 = vrot.lane.b32.xlu0 %v6014_v30, %s5797_s21 }
 0xf4a   : > { %v3560_v46 = vpop.xlane.xlu1 %3559 }
 0xf4b   : > { %v3568_v47 = vsub.f32 %v3552_v19, %v3560_v46 }
 0xf4c   : > { %v3557_v52 = vpop.xlane.xlu0 %3556 }
 0xf4d   : > { %v3573_v53 = vmul.f32 1.442695, %v3568_v47  ;;  %v3567_v54 = vsub.f32 %v3551_v21, %v3557_v52 }
 0xf4e   : > { %v3602_v55 = vpop.permute.xlu1 %3601 }
 0xf4f   : > { %5724 = vpow2.f32 %v3573_v53  ;;  %v3571_v60 = vmul.f32 1.442695, %v3567_v54  ;;  %5506 = vmatprep.subr.mxu0 %v3602_v55 }
 0xf50   : > { %5507 = vmatpush3.msra.mxu0 %v3602_v55 }
 0xf51   : > { %5726 = vpow2.f32 %v3571_v60 }
 0xf52   : > { %v3689_v28 = vpop.permute.xlu1 %3688 }
 0xf53   : > { %5513 = vmatprep.subr.mxu1 %v3689_v28 }
 0xf54   : > { %5514 = vmatpush3.msra.mxu1 %v3689_v28 }
 0xf56   : > { %v3780_v10 = vpop.permute.xlu1 %3779 }
 0xf5a   : > { %v3778_v25 = vpop.permute.xlu1 %3777 }
 0xf5c   : > { %v5725_v61 = vpop.eup %5724 }
 0xf5d   : > { %v3582_v0 = vsel %vm1138_vm3, %v5725_v61, 0.0 }
 0xf5e   : > { %v5727_v1 = vpop.eup %5726  ;;  %3583 = vadd.xlane.f32.xlu0 %v3582_v0  ;;  %v3774_v31 = vpop.permute.xlu1 %3773 }
 0xf5f   : > { %v3579_v2 = vsel %vm1138_vm3, %v5727_v1, 0.0 }
 0xf60   : > { %v3563_v3 = vpop.xlane.xlu0 %3562  ;;  %3580 = vadd.xlane.f32.xlu1 %v3579_v2 }
 0xf61   : > { %v3569_v19 = vsub.f32 %v3553_v34, %v3563_v3 }
 0xf63   : > { %v3575_v20 = vmul.f32 1.442695, %v3569_v19 }
 0xf64   : > { %v3566_v4 = vpop.xlane.xlu0 %3565 }
 0xf65   : > { %v3570_v5 = vsub.f32 %v3554_v35, %v3566_v4 }
 0xf67   : > { %v3577_v8 = vmul.f32 1.442695, %v3570_v5 }
 0xf68   : > { %v3600_v9 = vpop.permute.xlu0 %3599 }
 0xf69   : > { %5728 = vpow2.f32 %v3577_v8  ;;  %5508 = vmatprep.subr.mxu0 %v3600_v9 }
 0xf6a   : > { %5509 = vmatpush3.msra.mxu0 %v3600_v9  ;;  %5730 = vpow2.f32 %v3575_v20 }
 0xf6b   : > { %5520 = vmatprep.subr.msk.mxu0 %vm961_vm2, %v3780_v10 }
 0xf6c   : > { %v3687_v11 = vpop.permute.xlu0 %3686 }
 0xf6d   : > { %5515 = vmatprep.subr.mxu1 %v3687_v11 }
 0xf6e   : > { %5516 = vmatpush3.msra.mxu1 %v3687_v11 }
 0xf70   : > { %v3871_v12 = vpop.permute.xlu0 %3870 }
 0xf71   : > { %5527 = vmatprep.subr.msk.mxu1 %vm961_vm2, %v3871_v12  ;;  %3868 = vrot.lane.b32.xlu1 %v6020_v32, %s5797_s21 }
 0xf76   : > { %v5729_v13 = vpop.eup %5728 }
 0xf77   : > { %v3588_v18 = vsel %vm1138_vm3, %v5729_v13, 0.0  ;;  %v5731_v21 = vpop.eup %5730 }
 0xf78   : > { %3589 = vadd.xlane.f32.xlu0 %v3588_v18  ;;  %v3585_v24 = vsel %vm1138_vm3, %v5731_v21, 0.0 }
 0xf8e   : > { %3775 = vrot.lane.b32.xlu0 %v6009_v26, %s5798_s6 }
 0xf92   : > { %3864 = vrot.lane.b32.xlu0 %v6020_v32, %s5798_s6 }
 0xf95   : > { %3586 = vadd.xlane.f32.xlu1 %v3585_v24 }
 0xfa6   : > { %3866 = vrot.lane.b32.xlu1 %v6014_v30, %s5798_s6 }
 0xfe7   : > { %v3584_v33 = vpop.xlane.xlu0 %3583 }
 0xfe8   : > { %5732 = vrcp.f32 %v3584_v33 }
 0xfe9   : > { %v3581_v34 = vpop.xlane.xlu1 %3580 }
 0xfea   : > { %5734 = vrcp.f32 %v3581_v34 }
 0xfed   : > { %v3869_v46 = vpop.permute.xlu1 %3868 }
 0xff5   : > { %v5733_v35 = vpop.eup %5732 }
 0xff6   : > { %v3594_v26 = vmul.f32 %v5733_v35, %v5725_v61 }
 0xff7   : > { %v5735_v36 = vpop.eup %5734 }
 0xff8   : > { %v3592_v38 = vmul.f32 %v5735_v36, %v5727_v1 }
 0xffa   : > { %5510 = vmatprep.mubr.msk.f32.mxu0 %vm1138_vm3, %v3592_v38 }
 0xffb   : > { %5511 = vmatmul.mubr.msk.f32.vlgmr.msra.gmra.mxu0 %vm1138_vm3, %v3594_v26 }
 0xffc   : > { %5521 = vmatpush3.xpose.msk.msra.mxu0 %vm961_vm2, %v3780_v10  ;;  %5524 = vmatprep.mubr.msk.f32.mxu0 %vm961_vm2, %v3774_v31 }
 0xffd   : > { %5522 = vmatprep.subr.msk.mxu0 %vm961_vm2, %v3778_v25 }
0x1000   : > { %5523 = vmatpush3.xpose.msk.msra.mxu0 %vm961_vm2, %v3778_v25 }
0x1001   : > { %v3590_v30 = vpop.xlane.xlu0 %3589 }
0x1002   : > { %5736 = vrcp.f32 %v3590_v30 }
0x1005   : > { %v3776_v32 = vpop.permute.xlu0 %3775 }
0x1006   : > { %5525 = vmatmul.mubr.msk.f32.vlgmr.msra.gmra.mxu0 %vm961_vm2, %v3776_v32 }
0x1009   : > { %v3865_v60 = vpop.permute.xlu0 %3864 }
0x100f   : > { %v5737_v52 = vpop.eup %5736 }
0x1010   : > { %v3598_v55 = vmul.f32 %v5737_v52, %v5729_v13 }
0x101e   : > { %v3587_v47 = vpop.xlane.xlu1 %3586 }
0x101f   : > { %5738 = vrcp.f32 %v3587_v47 }
0x1022   : > { %v3867_v28 = vpop.permute.xlu1 %3866 }
0x102c   : > { %v5739_v53 = vpop.eup %5738 }
0x102d   : > { %v3596_v54 = vmul.f32 %v5739_v53, %v5731_v21 }
0x102f   : > { %5517 = vmatprep.mubr.msk.f32.mxu1 %vm1138_vm3, %v3596_v54 }
0x1030   : > { %5518 = vmatmul.mubr.msk.f32.vlgmr.msra.gmra.mxu1 %vm1138_vm3, %v3598_v55 }
0x1031   : > { %5528 = vmatpush3.xpose.msk.msra.mxu1 %vm961_vm2, %v3871_v12  ;;  %5531 = vmatprep.mubr.msk.f32.mxu1 %vm961_vm2, %v3865_v60 }
0x1032   : > { %5529 = vmatprep.subr.msk.mxu1 %vm961_vm2, %v3869_v46 }
0x1035   : > { %5530 = vmatpush3.xpose.msk.msra.mxu1 %vm961_vm2, %v3869_v46 }
0x1038   : > { %5532 = vmatmul.mubr.msk.f32.vlgmr.msra.gmra.mxu1 %vm961_vm2, %v3867_v28 }
0x10bb   : > { %v6434_v61 = vpop.f32.mrf.mxu0 }
0x10bd   : > { %v6436_v0 = vpop.f32.mrf.mxu0 }
0x10c6   : > { %v5526_v1 = vpop.f32.mrf.mxu0 }
0x10c7   : > { %v3956_v2 = vmul.f32 0.5, %v5526_v1 }
0x10c8   : > { %v3855_v3 = vpop.f32.mrf.mxu0 }
0x10c9   : > { %v3955_v4 = vmul.f32 0.5, %v3855_v3  ;;  %v3962_v5 = vsel %vm1138_vm3, %v3956_v2, -inf }
0x10ca   : > { %3963 = vmax.xlane.f32.xlu1 %v3962_v5 }
0x10cb   : > { %v3959_v8 = vsel %vm1138_vm3, %v3955_v4, -inf }
0x10cc   : > { %3960 = vmax.xlane.f32.xlu0 %v3959_v8 }
0x10db   : > { %4005 = vrot.lane.b32.xlu1 %v6032_v37, %s5798_s6 }
0x10f0   : > { %v6442_v9 = vpop.f32.mrf.mxu1 }
0x10f2   : > { %v6444_v10 = vpop.f32.mrf.mxu1 }
0x10f8   : > { %v5533_v11 = vpop.f32.mrf.mxu1 }
0x10f9   : > { %v3958_v18 = vmul.f32 0.5, %v5533_v11 }
0x10fa   : > { %v3946_v12 = vpop.f32.mrf.mxu1 }
0x10fb   : > { %v3957_v13 = vmul.f32 0.5, %v3946_v12  ;;  %v3968_v20 = vsel %vm1138_vm3, %v3958_v18, -inf }
0x10fd   : > { %v3965_v19 = vsel %vm1138_vm3, %v3957_v13, -inf }
0x10fe   : > { %3966 = vmax.xlane.f32.xlu0 %v3965_v19 }
0x1102   : > { %3969 = vmax.xlane.f32.xlu0 %v3968_v20 }
0x1153   : > { %v3964_v21 = vpop.xlane.xlu1 %3963 }
0x1154   : > { %v3972_v24 = vsub.f32 %v3956_v2, %v3964_v21 }
0x1155   : > { %v3961_v25 = vpop.xlane.xlu0 %3960 }
0x1156   : > { %v3977_v31 = vmul.f32 1.442695, %v3972_v24  ;;  %v3971_v33 = vsub.f32 %v3955_v4, %v3961_v25 }
0x1157   : > { %v4006_v37 = vpop.permute.xlu1 %4005 }
0x1158   : > { %5740 = vpow2.f32 %v3977_v31  ;;  %v3975_v34 = vmul.f32 1.442695, %v3971_v33  ;;  %5534 = vmatprep.subr.mxu0 %v4006_v37 }
0x1159   : > { %5535 = vmatpush3.msra.mxu0 %v4006_v37 }
0x115a   : > { %5742 = vpow2.f32 %v3975_v34 }
0x1165   : > { %v6448_v35 = vpop.eup %5740 }
0x1166   : > { %v3986_v36 = vsel %vm1138_vm3, %v6448_v35, 0.0 }
0x1167   : > { %v5743_v38 = vpop.eup %5742  ;;  %3987 = vadd.xlane.f32.xlu0 %v3986_v36 }
0x1168   : > { %v3983_v26 = vsel %vm1138_vm3, %v5743_v38, 0.0 }
0x1169   : > { %3984 = vadd.xlane.f32.xlu1 %v3983_v26 }
0x117a   : > { %4092 = vrot.lane.b32.xlu1 %v6040_v42, %s5798_s6 }
0x1187   : > { %v3967_v30 = vpop.xlane.xlu0 %3966 }
0x1188   : > { %v3973_v32 = vsub.f32 %v3957_v13, %v3967_v30 }
0x118a   : > { %v3979_v46 = vmul.f32 1.442695, %v3973_v32 }
0x118b   : > { %v3970_v47 = vpop.xlane.xlu0 %3969 }
0x118c   : > { %v3974_v52 = vsub.f32 %v3958_v18, %v3970_v47  ;;  %5744 = vpow2.f32 %v3979_v46 }
0x118e   : > { %v3981_v53 = vmul.f32 1.442695, %v3974_v52 }
0x1190   : > { %5746 = vpow2.f32 %v3981_v53 }
0x1199   : > { %v5745_v54 = vpop.eup %5744 }
0x119a   : > { %v3989_v60 = vsel %vm1138_vm3, %v5745_v54, 0.0 }
0x119d   : > { %v5747_v55 = vpop.eup %5746 }
0x119e   : > { %3990 = vadd.xlane.f32.xlu1 %v3989_v60  ;;  %v3992_v28 = vsel %vm1138_vm3, %v5747_v55, 0.0 }
0x119f   : > { %3993 = vadd.xlane.f32.xlu0 %v3992_v28 }
0x11af   : > { %4090 = vrot.lane.b32.xlu1 %v6054_v45, %s5798_s6 }
0x11b3   : > { %4183 = vrot.lane.b32.xlu1 %v6154_v48, %s5799_s16 }
0x11b5   : > { %4003 = vrot.lane.b32.xlu0 %v6038_v41, %s5798_s6  ;;  %s6682_s6 = sld [smem:[#allocation10_spill]] }
0x11b7   : > { %4199 = vrot.lane.b32.xlu1 %v6210_v62, %s5800_s28 }
0x11b9   : > { %4181 = vrot.lane.b32.xlu0 %v6156_v49, %s5799_s16 }
0x11bb   : > { %4215 = vrot.lane.b32.xlu1 %v6266_v14, %s5801_s26 }
0x11bd   : > { %4197 = vrot.lane.b32.xlu0 %v6212_v63, %s5800_s28 }
0x11bf   : > { %4185 = vrot.lane.b32.xlu1 %v6162_v59, %s5799_s16 }
0x11c1   : > { %4213 = vrot.lane.b32.xlu0 %v6268_v15, %s5801_s26 }
0x11c3   : > { %4245 = vrot.lane.b32.xlu1 %v6380_v17, %s5802_s24 }
0x11c5   : > { %4229 = vrot.lane.b32.xlu0 %v6324_v44, %s5803_s29  ;;  %v4324_v44 = vld [vmem:[%s5923_s15 + $0x10] sm:$0xff] }
0x11c7   : > { %4201 = vrot.lane.b32.xlu1 %v6228_v7, %s5800_s28 }
0x11c9   : > { %4231 = vrot.lane.b32.xlu0 %v6322_v43, %s5803_s29  ;;  %v4325_v43 = vld [vmem:[%s5923_s15 + $0x18] sm:$0xff] }
0x11cb   : > { %4261 = vrot.lane.b32.xlu1 %v6436_v0, %s5804_s30 }
0x11cd   : > { %4187 = vrot.lane.b32.xlu0 %v6160_v58, %s5799_s16  ;;  %s6683_s16 = scalar_lea.vmem %s6682_s6, %s5899_s23 }
0x11cf   : > { %4217 = vrot.lane.b32.xlu1 %v6274_v23, %s5801_s26 }
0x11d1   : > { %4247 = vrot.lane.b32.xlu0 %v6378_v16, %s5802_s24 }
0x11d3   : > { %4233 = vrot.lane.b32.xlu1 %v6340_v57, %s5803_s29  ;;  %v4322_v57 = vld [vmem:[%s5923_s15] sm:$0xff] }
0x11d5   : > { %4203 = vrot.lane.b32.xlu0 %v6226_v6, %s5800_s28 }
0x11d7   : > { %4235 = vrot.lane.b32.xlu1 %v6338_v56, %s5803_s29  ;;  %v4323_v56 = vld [vmem:[%s5923_s15 + $0x8] sm:$0xff] }
0x11d9   : > { %4263 = vrot.lane.b32.xlu0 %v6434_v61, %s5804_s30 }
0x11db   : > { %4251 = vrot.lane.b32.xlu1 %v6384_v27, %s5802_s24 }
0x11dd   : > { %4219 = vrot.lane.b32.xlu0 %v6272_v22, %s5801_s26  ;;  %s6684_s26 = scalar_lea.vmem %s6650_s11, %s5899_s23 }
0x11e1   : > { %4249 = vrot.lane.b32.xlu0 %v6386_v29, %s5802_s24 }
0x11e5   : > { %4265 = vrot.lane.b32.xlu0 %v6444_v10, %s5804_s30 }
0x11f0   : > { %v3988_v49 = vpop.xlane.xlu0 %3987 }
0x11f2   : > { %v3985_v41 = vpop.xlane.xlu1 %3984 }
0x11f3   : > { %5748 = vrcp.f32 %v3985_v41 }
0x11f4   : > { %5750 = vrcp.f32 %v3988_v49 }
0x11f6   : > { %v4093_v42 = vpop.permute.xlu1 %4092 }
0x11f7   : > { %5541 = vmatprep.subr.mxu1 %v4093_v42 }
0x11f8   : > { %5542 = vmatpush3.msra.mxu1 %v4093_v42 }
0x1200   : > { %v5749_v45 = vpop.eup %5748 }
0x1201   : > { %v3996_v48 = vmul.f32 %v5749_v45, %v5743_v38  ;;  %v5751_v62 = vpop.eup %5750 }
0x1202   : > { %v3998_v7 = vmul.f32 %v5751_v62, %v6448_v35 }
0x1203   : > { %5538 = vmatprep.mubr.msk.f32.mxu0 %vm1138_vm3, %v3996_v48 }
0x1227   : > { %v3991_v58 = vpop.xlane.xlu1 %3990 }
0x1228   : > { %5752 = vrcp.f32 %v3991_v58  ;;  %v3994_v59 = vpop.xlane.xlu0 %3993 }
0x1229   : > { %5754 = vrcp.f32 %v3994_v59 }
0x122b   : > { %v4091_v63 = vpop.permute.xlu1 %4090 }
0x122c   : > { %5543 = vmatprep.subr.mxu1 %v4091_v63  ;;  %v4004_v6 = vpop.permute.xlu0 %4003 }
0x122d   : > { %5536 = vmatprep.subr.mxu0 %v4004_v6  ;;  %5544 = vmatpush3.msra.mxu1 %v4091_v63 }
0x122e   : > { %5537 = vmatpush3.msra.mxu0 %v4004_v6 }
0x122f   : > { %5539 = vmatmul.mubr.msk.f32.vlgmr.msra.gmra.mxu0 %vm1138_vm3, %v3998_v7  ;;  %5548 = vmatprep.subr.mxu0 %v4325_v43  ;;  %v4184_v1 = vpop.permute.xlu1 %4183 }
0x1230   : > { %5549 = vmatpush3.msra.mxu0 %v4325_v43  ;;  %v4182_v61 = vpop.permute.xlu0 %4181  ;;  %v4290_v35 = vsel %vm961_vm2, %v6098_v39, %v4184_v1  ;;  %v5098_v43 = vld [vmem:[%s6681_s18] ss:$0 sm:$0xff] }
0x1231   : > { %5550 = vmatprep.subr.mxu0 %v4324_v44  ;;  %v4289_v37 = vsel %vm961_vm2, %v6100_v40, %v4182_v61 }
0x1232   : > { %5551 = vmatpush3.msra.mxu0 %v4324_v44 }
0x1233   : > { %5552 = vmatprep.subr.mxu0 %v4323_v56  ;;  %v4200_v3 = vpop.permute.xlu1 %4199 }
0x1234   : > { %5553 = vmatpush3.msra.mxu0 %v4323_v56  ;;  %v4198_v0 = vpop.permute.xlu0 %4197  ;;  %v4295_v26 = vsel %vm4293_vm4, %v4290_v35, %v4200_v3 }
0x1235   : > { %v5753_v14 = vpop.eup %5752  ;;  %5554 = vmatprep.subr.mxu0 %v4322_v57  ;;  %v4294_v36 = vsel %vm4293_vm4, %v4289_v37, %v4198_v0 }
0x1236   : > { %v5755_v15 = vpop.eup %5754  ;;  %v4000_v22 = vmul.f32 %v5753_v14, %v5745_v54  ;;  %5555 = vmatpush3.msra.mxu0 %v4322_v57 }
0x1237   : > { %v4002_v23 = vmul.f32 %v5755_v15, %v5747_v55  ;;  %v4216_v5 = vpop.permute.xlu1 %4215 }
0x1238   : > { %5545 = vmatprep.mubr.msk.f32.mxu1 %vm1138_vm3, %v4000_v22  ;;  %v4214_v2 = vpop.permute.xlu0 %4213  ;;  %v4300_v32 = vsel %vm4298_vm5, %v4295_v26, %v4216_v5 }
0x1239   : > { %5546 = vmatmul.mubr.msk.f32.vlgmr.msra.gmra.mxu1 %vm1138_vm3, %v4002_v23  ;;  %v4299_v30 = vsel %vm4298_vm5, %v4294_v36, %v4214_v2 }
0x123b   : > { %v4186_v10 = vpop.permute.xlu1 %4185 }
0x123c   : > { %v4230_v4 = vpop.permute.xlu0 %4229  ;;  %v4291_v49 = vsel %vm961_vm2, %v6116_v51, %v4186_v10 }
0x123d   : > { %v4303_v46 = vsel %vm1138_vm3, %v4299_v30, %v4230_v4 }
0x123f   : > { %v4246_v12 = vpop.permute.xlu1 %4245 }
0x1240   : > { %v4232_v8 = vpop.permute.xlu0 %4231  ;;  %v4308_v47 = vsel %vm4307_vm6, %v4303_v46, %v4246_v12 }
0x1241   : > { %v4304_v40 = vsel %vm1138_vm3, %v4300_v32, %v4232_v8  ;;  %v5774_v8 = vld [vmem:[#allocation2 + $0x10] sm:$0xff] }
0x1243   : > { %v4202_v18 = vpop.permute.xlu1 %4201 }
0x1244   : > { %v4188_v11 = vpop.permute.xlu0 %4187  ;;  %v4296_v58 = vsel %vm4293_vm4, %v4291_v49, %v4202_v18 }
0x1245   : > { %v4292_v28 = vsel %vm961_vm2, %v6114_v50, %v4188_v11  ;;  %v5775_v11 = vld [vmem:[#allocation2 + $0x18] sm:$0xff] }
0x1247   : > { %v4262_v20 = vpop.permute.xlu1 %4261 }
0x1248   : > { %v4248_v13 = vpop.permute.xlu0 %4247  ;;  %v4313_v39 = vsel %vm4312_vm7, %v4308_v47, %v4262_v20 }
0x1249   : > { %v4309_v53 = vsel %vm4307_vm6, %v4304_v40, %v4248_v13 }
0x124b   : > { %v4218_v21 = vpop.permute.xlu1 %4217 }
0x124c   : > { %v4204_v19 = vpop.permute.xlu0 %4203  ;;  %v4301_v59 = vsel %vm4298_vm5, %v4296_v58, %v4218_v21 }
0x124d   : > { %v4297_v42 = vsel %vm4293_vm4, %v4292_v28, %v4204_v19  ;;  %v4627_v28 = vld [vmem:[%s5942_s1 + $0x30] sm:$0xff] }
0x124f   : > { %v4234_v25 = vpop.permute.xlu1 %4233 }
0x1250   : > { %v4305_v62 = vsel %vm1138_vm3, %v4301_v59, %v4234_v25 }
0x1253   : > { %v4236_v33 = vpop.permute.xlu1 %4235 }
0x1257   : > { %v4252_v38 = vpop.permute.xlu1 %4251 }
0x12ef   : > { %v5540_v16 = vpop.f32.mrf.mxu0 }
0x12f0   : > { %4279 = vrot.lane.b32.xlu0 %v5540_v16, %s5805_s9  ;;  %v5772_v16 = vld [vmem:[#allocation2 + $0x8] sm:$0xff] }
0x12f1   : > { %v4081_v17 = vpop.f32.mrf.mxu0 }
0x12f2   : > { %4277 = vrot.lane.b32.xlu1 %v4081_v17, %s5805_s9 }
0x12f6   : > { %4267 = vrot.lane.b32.xlu1 %v6442_v9, %s5804_s30  ;;  %v4264_v9 = vpop.permute.xlu0 %4263 }
0x12f7   : > { %v4314_v55 = vsel %vm4312_vm7, %v4309_v53, %v4264_v9  ;;  %v4511_v53 = vld [vmem:[%s5932_s2 + $0x10] sm:$0xff] }
0x12f9   : > { %v5547_v27 = vpop.f32.mrf.mxu1 }
0x12fa   : > { %4283 = vrot.lane.b32.xlu1 %v5547_v27, %s5805_s9  ;;  %v4220_v24 = vpop.permute.xlu0 %4219 }
0x12fb   : > { %v4168_v29 = vpop.f32.mrf.mxu1  ;;  %v4302_v45 = vsel %vm4298_vm5, %v4297_v42, %v4220_v24  ;;  %v4625_v42 = vld [vmem:[%s5942_s1 + $0x20] sm:$0xff] }
0x12fc   : > { %4281 = vrot.lane.b32.xlu0 %v4168_v29, %s5805_s9  ;;  %v4306_v50 = vsel %vm1138_vm3, %v4302_v45, %v4236_v33  ;;  %v5773_v29 = vld [vmem:[#allocation2] sm:$0xff] }
0x12fd   : > { %v4311_v7 = vsel %vm4307_vm6, %v4306_v50, %v4252_v38 }
0x12fe   : > { %v4250_v31 = vpop.permute.xlu0 %4249 }
0x12ff   : > { %v4310_v63 = vsel %vm4307_vm6, %v4305_v62, %v4250_v31 }
0x1302   : > { %v4266_v34 = vpop.permute.xlu0 %4265 }
0x1303   : > { %v4315_v14 = vsel %vm4312_vm7, %v4310_v63, %v4266_v34 }
0x1362   : > { %v4280_v52 = vpop.permute.xlu0 %4279 }
0x1363   : > { %v4319_v41 = vsel %vm4317_vm8, %v4314_v55, %v4280_v52  ;;  %v4509_v55 = vld [vmem:[%s5932_s2] sm:$0xff] }
0x1364   : > { %v4278_v54 = vpop.permute.xlu1 %4277 }
0x1365   : > { %v4318_v60 = vsel %vm4317_vm8, %v4313_v39, %v4278_v54  ;;  %v4512_v39 = vld [vmem:[%s5932_s2 + $0x18] sm:$0xff]  ;;  %v4510_v54 = vld [vmem:[%s5932_s2 + $0x8] sm:$0xff] }
0x1366   : > { %5556 = vmatprep.mubr.msk.f32.mxu0 %vm749_vm1, %v4318_v60  ;;  %5562 = vmatprep.subr.mxu1 %v4512_v39  ;;  %v4628_v60 = vld [vmem:[%s5942_s1 + $0x38] sm:$0xff] }
0x1367   : > { %5557 = vmatmul.mubr.msk.f32.vlgmr.msra.gmra.mxu0 %vm749_vm1, %v4319_v41  ;;  %5563 = vmatpush3.msra.mxu1 %v4512_v39  ;;  %v4626_v41 = vld [vmem:[%s5942_s1 + $0x28] sm:$0xff] }
0x1368   : > { %v4268_v48 = vpop.permute.xlu1 %4267  ;;  %5564 = vmatprep.subr.mxu1 %v4511_v53  ;;  %5576 = vmatprep.subr.mxu0 %v4628_v60 }
0x1369   : > { %v4316_v22 = vsel %vm4312_vm7, %v4311_v7, %v4268_v48  ;;  %5565 = vmatpush3.msra.mxu1 %v4511_v53  ;;  %5577 = vmatpush3.msra.mxu0 %v4628_v60 }
0x136a   : > { %5566 = vmatprep.subr.mxu1 %v4510_v54  ;;  %5578 = vmatprep.subr.mxu0 %v4627_v28 }
0x136b   : > { %5567 = vmatpush3.msra.mxu1 %v4510_v54  ;;  %5579 = vmatpush3.msra.mxu0 %v4627_v28 }
0x136c   : > { %v4284_v6 = vpop.permute.xlu1 %4283  ;;  %5568 = vmatprep.subr.mxu1 %v4509_v55  ;;  %5580 = vmatprep.subr.mxu0 %v4626_v41 }
0x136d   : > { %v4321_v23 = vsel %vm4317_vm8, %v4316_v22, %v4284_v6  ;;  %5569 = vmatpush3.msra.mxu1 %v4509_v55  ;;  %5581 = vmatpush3.msra.mxu0 %v4626_v41 }
0x136e   : > { %v4282_v15 = vpop.permute.xlu0 %4281  ;;  %5582 = vmatprep.subr.mxu0 %v4625_v42 }
0x136f   : > { %v4320_v51 = vsel %vm4317_vm8, %v4315_v14, %v4282_v15  ;;  %5583 = vmatpush3.msra.mxu0 %v4625_v42 }
0x1370   : > { %5559 = vmatprep.mubr.msk.f32.mxu0 %vm749_vm1, %v4320_v51 }
0x1371   : > { %5560 = vmatmul.mubr.msk.f32.gmra.mxu0 %vm749_vm1, %v4321_v23  ;;  %v5103_v23 = vld [vmem:[%s703_s27] ss:$0 sm:$0xff] }
0x1427   : > { %v5558_v44 = vpop.f32.mrf.mxu0 }
0x1428   : > { %v4417_v56 = vadd.f32 %v5558_v44, %v5098_v43 }
0x1429   : > { %v4411_v57 = vpop.f32.mrf.mxu0 }
0x142a   : > { %v4431_v17 = vadd.f32 %v5772_v16, %v4417_v56  ;;  %v4412_v27 = vadd.f32 %v5098_v43, %v4411_v57  ;;  %v5104_v57 = vld [vmem:[%s706_s8] ss:$0 sm:$0xff] }
0x142c   : > { %v4430_v61 = vadd.f32 %v5773_v29, %v4412_v27  ;;  %v4439_v0 = vsel %vm749_vm1, %v4431_v17, 0.0 }
0x142d   : > { %4440 = vadd.xlane.f32.xlu1 %v4439_v0 }
0x142e   : > { %v4436_v1 = vsel %vm749_vm1, %v4430_v61, 0.0 }
0x142f   : > { %4437 = vadd.xlane.f32.xlu0 %v4436_v1 }
0x1431   : > { %v5561_v2 = vpop.f32.mrf.mxu0 }
0x1432   : > { %v4427_v4 = vadd.f32 %v5561_v2, %v5098_v43 }
0x1433   : > { %v4421_v3 = vpop.f32.mrf.mxu0 }
0x1434   : > { %v4422_v5 = vadd.f32 %v5098_v43, %v4421_v3  ;;  %v4433_v12 = vadd.f32 %v5775_v11, %v4427_v4  ;;  %v4622_v11 = vld [vmem:[%s5942_s1 + $0x8] sm:$0xff] }
0x1436   : > { %v4432_v10 = vadd.f32 %v5774_v8, %v4422_v5  ;;  %v4445_v18 = vsel %vm749_vm1, %v4433_v12, 0.0  ;;  %v4624_v8 = vld [vmem:[%s5942_s1 + $0x18] sm:$0xff] }
0x1437   : > { %5584 = vmatprep.subr.mxu0 %v4624_v8 }
0x1438   : > { %v4442_v13 = vsel %vm749_vm1, %v4432_v10, 0.0  ;;  %5585 = vmatpush3.msra.mxu0 %v4624_v8 }
0x1439   : > { %4443 = vadd.xlane.f32.xlu0 %v4442_v13  ;;  %v5105_v13 = vld [vmem:[%s6683_s16] ss:$0 sm:$0xff] }
0x143d   : > { %4446 = vadd.xlane.f32.xlu0 %v4445_v18 }
0x14b6   : > { %v4441_v19 = vpop.xlane.xlu1 %4440 }
0x14b7   : > { %v4450_v20 = vmul.f32 0.03125, %v4441_v19 }
0x14b8   : > { %v4438_v9 = vpop.xlane.xlu0 %4437 }
0x14b9   : > { %v4454_v21 = vsub.f32 %v4431_v17, %v4450_v20  ;;  %v4449_v24 = vmul.f32 0.03125, %v4438_v9 }
0x14bb   : > { %v6543_v25 = vsub.f32 %v4430_v61, %v4449_v24  ;;  %v4458_v31 = vmul.f32 %v4454_v21, %v4454_v21 }
0x14bd   : > { %v4464_v33 = vsel %vm749_vm1, %v4458_v31, 0.0  ;;  %v4457_v37 = vmul.f32 %v6543_v25, %v6543_v25 }
0x14be   : > { %4465 = vadd.xlane.f32.xlu0 %v4464_v33 }
0x14bf   : > { %v4461_v34 = vsel %vm749_vm1, %v4457_v37, 0.0 }
0x14c0   : > { %4462 = vadd.xlane.f32.xlu1 %v4461_v34 }
0x14c2   : > { %v4444_v35 = vpop.xlane.xlu0 %4443 }
0x14c3   : > { %v4451_v36 = vmul.f32 0.03125, %v4444_v35 }
0x14c5   : > { %v6549_v38 = vsub.f32 %v4432_v10, %v4451_v36  ;;  %v4623_v10 = vld [vmem:[%s5942_s1 + $0x10] sm:$0xff]  ;;  %v5110_v36 = vld [vmem:[%s6684_s26] ss:$0 sm:$0xff] }
0x14c6   : > { %v4447_v26 = vpop.xlane.xlu0 %4446  ;;  %5586 = vmatprep.subr.mxu0 %v4623_v10 }
0x14c7   : > { %v4452_v30 = vmul.f32 0.03125, %v4447_v26  ;;  %v4459_v32 = vmul.f32 %v6549_v38, %v6549_v38  ;;  %5587 = vmatpush3.msra.mxu0 %v4623_v10 }
0x14c8   : > { %5588 = vmatprep.subr.mxu0 %v4622_v11 }
0x14c9   : > { %v6553_v46 = vsub.f32 %v4433_v12, %v4452_v30  ;;  %v4467_v47 = vsel %vm749_vm1, %v4459_v32, 0.0  ;;  %5589 = vmatpush3.msra.mxu0 %v4622_v11  ;;  %v4621_v12 = vld [vmem:[%s5942_s1] sm:$0xff] }
0x14ca   : > { %4468 = vadd.xlane.f32.xlu1 %v4467_v47  ;;  %5590 = vmatprep.subr.mxu0 %v4621_v12  ;;  %v5115_v11 = vld [vmem:[%s709_s4] ss:$0 sm:$0xff]  ;;  %s6686_s4 = sld [smem:[#allocation12_spill]] }
0x14cb   : > { %v4460_v40 = vmul.f32 %v6553_v46, %v6553_v46  ;;  %5591 = vmatpush3.msra.mxu0 %v4621_v12 }
0x14cd   : > { %v4470_v52 = vsel %vm749_vm1, %v4460_v40, 0.0 }
0x14ce   : > { %4471 = vadd.xlane.f32.xlu0 %v4470_v52 }
0x1547   : > { %v4466_v45 = vpop.xlane.xlu0 %4465 }
0x1548   : > { %v4474_v48 = vmul.f32 0.03125, %v4466_v45 }
0x1549   : > { %v4463_v49 = vpop.xlane.xlu1 %4462 }
0x154a   : > { %v4478_v58 = vadd.f32 1e-05, %v4474_v48  ;;  %v4473_v59 = vmul.f32 0.03125, %v4463_v49 }
0x154c   : > { %5756 = vrsqrt.f32 %v4478_v58  ;;  %v4477_v50 = vadd.f32 1e-05, %v4473_v59 }
0x154e   : > { %5758 = vrsqrt.f32 %v4477_v50 }
0x1553   : > { %v4469_v62 = vpop.xlane.xlu1 %4468 }
0x1554   : > { %v4475_v63 = vmul.f32 0.03125, %v4469_v62 }
0x1556   : > { %v4479_v6 = vadd.f32 1e-05, %v4475_v63 }
0x1557   : > { %v4472_v7 = vpop.xlane.xlu0 %4471 }
0x1558   : > { %5760 = vrsqrt.f32 %v4479_v6  ;;  %v4476_v14 = vmul.f32 0.03125, %v4472_v7 }
0x1559   : > { %v5757_v15 = vpop.eup %5756 }
0x155a   : > { %v4486_v22 = vmul.f32 %v5757_v15, %v4454_v21  ;;  %v4480_v51 = vadd.f32 1e-05, %v4476_v14 }
0x155b   : > { %v5759_v43 = vpop.eup %5758 }
0x155c   : > { %5762 = vrsqrt.f32 %v4480_v51  ;;  %v4485_v44 = vmul.f32 %v5759_v43, %v6543_v25  ;;  %v4496_v56 = vmul.f32 %v5103_v23, %v4486_v22 }
0x155e   : > { %v4495_v16 = vmul.f32 %v5103_v23, %v4485_v44  ;;  %v4506_v27 = vadd.f32 %v5104_v57, %v4496_v56 }
0x1560   : > { %v4505_v17 = vadd.f32 %v5104_v57, %v4495_v16 }
0x1562   : > { %5570 = vmatprep.mubr.msk.f32.mxu1 %vm749_vm1, %v4505_v17 }
0x1563   : > { %5571 = vmatmul.mubr.msk.f32.vlgmr.msra.gmra.mxu1 %vm749_vm1, %v4506_v27 }
0x1565   : > { %v5761_v29 = vpop.eup %5760 }
0x1566   : > { %v4487_v61 = vmul.f32 %v5761_v29, %v6549_v38 }
0x1568   : > { %v4497_v0 = vmul.f32 %v5103_v23, %v4487_v61 }
0x1569   : > { %v5763_v1 = vpop.eup %5762 }
0x156a   : > { %v4507_v2 = vadd.f32 %v5104_v57, %v4497_v0  ;;  %v4488_v3 = vmul.f32 %v5763_v1, %v6553_v46 }
0x156c   : > { %5573 = vmatprep.mubr.msk.f32.mxu1 %vm749_vm1, %v4507_v2  ;;  %v4498_v4 = vmul.f32 %v5103_v23, %v4488_v3 }
0x156e   : > { %v4508_v5 = vadd.f32 %v5104_v57, %v4498_v4 }
0x1570   : > { %5574 = vmatmul.mubr.msk.f32.gmra.mxu1 %vm749_vm1, %v4508_v5 }
0x1623   : > { %v5572_v18 = vpop.f32.mrf.mxu1 }
0x1624   : > { %v4604_v19 = vadd.f32 %v5572_v18, %v5105_v13 }
0x1625   : > { %v4598_v20 = vpop.f32.mrf.mxu1 }
0x1626   : > { %v4599_v9 = vadd.f32 %v5105_v13, %v4598_v20  ;;  %v4618_v24 = vmax.f32 %v4604_v19, 0.0  ;;  %v5116_v19 = vld [vmem:[%s712_s20] ss:$0 sm:$0xff] }
0x1628   : > { %v4617_v21 = vmax.f32 %v4599_v9, 0.0 }
0x162a   : > { %5592 = vmatprep.mubr.msk.f32.mxu0 %vm4636_vm9, %v4617_v21 }
0x162b   : > { %5593 = vmatmul.mubr.msk.f32.vlgmr.msra.gmra.mxu0 %vm4636_vm9, %v4618_v24 }
0x1630   : > { %v5575_v25 = vpop.f32.mrf.mxu1 }
0x1631   : > { %v4614_v31 = vadd.f32 %v5575_v25, %v5105_v13 }
0x1632   : > { %v4608_v33 = vpop.f32.mrf.mxu1 }
0x1633   : > { %v4609_v37 = vadd.f32 %v5105_v13, %v4608_v33  ;;  %v4620_v35 = vmax.f32 %v4614_v31, 0.0 }
0x1635   : > { %v4619_v34 = vmax.f32 %v4609_v37, 0.0 }
0x1637   : > { %5595 = vmatprep.mubr.msk.f32.mxu0 %vm4636_vm9, %v4619_v34 }
0x1638   : > { %5596 = vmatmul.mubr.msk.f32.gmra.mxu0 %vm4636_vm9, %v4620_v35 }
0x16eb   : > { %v5594_v38 = vpop.f32.mrf.mxu0 }
0x16ec   : > { %v4721_v26 = vadd.f32 %v5594_v38, %v5110_v36 }
0x16ed   : > { %v4715_v30 = vpop.f32.mrf.mxu0 }
0x16ee   : > { %v4735_v32 = vadd.f32 %v4721_v26, %v4506_v27  ;;  %v4716_v46 = vadd.f32 %v5110_v36, %v4715_v30 }
0x16f0   : > { %v4734_v47 = vadd.f32 %v4716_v46, %v4505_v17  ;;  %v4743_v40 = vsel %vm749_vm1, %v4735_v32, 0.0 }
0x16f1   : > { %4744 = vadd.xlane.f32.xlu0 %v4743_v40 }
0x16f2   : > { %v4740_v52 = vsel %vm749_vm1, %v4734_v47, 0.0 }
0x16f3   : > { %4741 = vadd.xlane.f32.xlu1 %v4740_v52 }
0x16f8   : > { %v5597_v39 = vpop.f32.mrf.mxu0 }
0x16f9   : > { %v4731_v53 = vadd.f32 %v5597_v39, %v5110_v36 }
0x16fa   : > { %v4725_v54 = vpop.f32.mrf.mxu0 }
0x16fb   : > { %v4737_v55 = vadd.f32 %v4731_v53, %v4508_v5  ;;  %v4726_v60 = vadd.f32 %v5110_v36, %v4725_v54 }
0x16fd   : > { %v4736_v28 = vadd.f32 %v4726_v60, %v4507_v2  ;;  %v4749_v41 = vsel %vm749_vm1, %v4737_v55, 0.0 }
0x16fe   : > { %4750 = vadd.xlane.f32.xlu0 %v4749_v41 }
0x16ff   : > { %v4746_v42 = vsel %vm749_vm1, %v4736_v28, 0.0 }
0x1700   : > { %4747 = vadd.xlane.f32.xlu1 %v4746_v42 }
0x177a   : > { %v4745_v45 = vpop.xlane.xlu0 %4744 }
0x177b   : > { %v4753_v48 = vmul.f32 0.03125, %v4745_v45 }
0x177c   : > { %v4742_v49 = vpop.xlane.xlu1 %4741 }
0x177d   : > { %v4757_v58 = vsub.f32 %v4735_v32, %v4753_v48  ;;  %v4752_v59 = vmul.f32 0.03125, %v4742_v49 }
0x177f   : > { %v4756_v50 = vsub.f32 %v4734_v47, %v4752_v59  ;;  %v4761_v62 = vmul.f32 %v4757_v58, %v4757_v58 }
0x1781   : > { %v4767_v63 = vsel %vm749_vm1, %v4761_v62, 0.0  ;;  %v4760_v6 = vmul.f32 %v4756_v50, %v4756_v50 }
0x1782   : > { %4768 = vadd.xlane.f32.xlu0 %v4767_v63 }
0x1783   : > { %v4764_v7 = vsel %vm749_vm1, %v4760_v6, 0.0 }
0x1784   : > { %4765 = vadd.xlane.f32.xlu1 %v4764_v7 }
0x1787   : > { %v4751_v14 = vpop.xlane.xlu0 %4750 }
0x1788   : > { %v4755_v15 = vmul.f32 0.03125, %v4751_v14 }
0x1789   : > { %v4748_v22 = vpop.xlane.xlu1 %4747 }
0x178a   : > { %v4759_v51 = vsub.f32 %v4737_v55, %v4755_v15  ;;  %v4754_v23 = vmul.f32 0.03125, %v4748_v22 }
0x178c   : > { %v4758_v43 = vsub.f32 %v4736_v28, %v4754_v23  ;;  %v4763_v44 = vmul.f32 %v4759_v51, %v4759_v51 }
0x178e   : > { %v4773_v56 = vsel %vm749_vm1, %v4763_v44, 0.0  ;;  %v4762_v57 = vmul.f32 %v4758_v43, %v4758_v43 }
0x178f   : > { %4774 = vadd.xlane.f32.xlu0 %v4773_v56 }
0x1790   : > { %v4770_v16 = vsel %vm749_vm1, %v4762_v57, 0.0 }
0x1791   : > { %4771 = vadd.xlane.f32.xlu1 %v4770_v16 }
0x180b   : > { %v4769_v17 = vpop.xlane.xlu0 %4768 }
0x180c   : > { %v4777_v27 = vmul.f32 0.03125, %v4769_v17 }
0x180d   : > { %v4766_v29 = vpop.xlane.xlu1 %4765 }
0x180e   : > { %v4781_v61 = vadd.f32 1e-05, %v4777_v27  ;;  %v4776_v0 = vmul.f32 0.03125, %v4766_v29 }
0x1810   : > { %5764 = vrsqrt.f32 %v4781_v61  ;;  %v4780_v1 = vadd.f32 1e-05, %v4776_v0 }
0x1812   : > { %5766 = vrsqrt.f32 %v4780_v1 }
0x1818   : > { %v4775_v2 = vpop.xlane.xlu0 %4774 }
0x1819   : > { %v4779_v3 = vmul.f32 0.03125, %v4775_v2 }
0x181a   : > { %v4772_v4 = vpop.xlane.xlu1 %4771 }
0x181b   : > { %v4783_v5 = vadd.f32 1e-05, %v4779_v3  ;;  %v4778_v8 = vmul.f32 0.03125, %v4772_v4 }
0x181d   : > { %v5765_v10 = vpop.eup %5764  ;;  %5768 = vrsqrt.f32 %v4783_v5  ;;  %v4782_v12 = vadd.f32 1e-05, %v4778_v8 }
0x181e   : > { %v4789_v13 = vmul.f32 %v5765_v10, %v4757_v58 }
0x181f   : > { %v5767_v18 = vpop.eup %5766  ;;  %5770 = vrsqrt.f32 %v4782_v12 }
0x1820   : > { %v4799_v20 = vmul.f32 %v5115_v11, %v4789_v13  ;;  %v4788_v9 = vmul.f32 %v5767_v18, %v4756_v50 }
0x1822   : > { %v4809_v21 = vadd.f32 %v5116_v19, %v4799_v20  ;;  %v4798_v24 = vmul.f32 %v5115_v11, %v4788_v9 }
0x1824   : > { %4813 = vst.msk [vmem:[#allocation2 + $0x8] sm:$0xff] %vm749_vm1, %v4809_v21  ;;  %4817 = vst.msk [vmem:[%s6686_s4 + $0x8] sm:$0xff] %vm749_vm1, %v4809_v21  ;;  %v4808_v25 = vadd.f32 %v5116_v19, %v4798_v24 }
0x1826   : > { %4812 = vst.msk [vmem:[#allocation2] sm:$0xff] %vm749_vm1, %v4808_v25  ;;  %4816 = vst.msk [vmem:[%s6686_s4] sm:$0xff] %vm749_vm1, %v4808_v25 }
0x182a   : > { %v5769_v31 = vpop.eup %5768 }
0x182b   : > { %v4791_v33 = vmul.f32 %v5769_v31, %v4759_v51 }
0x182c   : > { %v5771_v37 = vpop.eup %5770 }
0x182d   : > { %v4801_v34 = vmul.f32 %v5115_v11, %v4791_v33  ;;  %v4790_v35 = vmul.f32 %v5771_v37, %v4758_v43 }
0x182f   : > { %v4811_v36 = vadd.f32 %v5116_v19, %v4801_v34  ;;  %v4800_v38 = vmul.f32 %v5115_v11, %v4790_v35 }
0x1831   : > { %4815 = vst.msk [vmem:[#allocation2 + $0x18] sm:$0xff] %vm749_vm1, %v4811_v36  ;;  %4819 = vst.msk [vmem:[%s6686_s4 + $0x18] sm:$0xff] %vm749_vm1, %v4811_v36  ;;  %v4810_v26 = vadd.f32 %v5116_v19, %v4800_v38 }
0x1833   : > { %4814 = vst.msk [vmem:[#allocation2 + $0x10] sm:$0xff] %vm749_vm1, %v4810_v26  ;;  %4818 = vst.msk [vmem:[%s6686_s4 + $0x10] sm:$0xff] %vm749_vm1, %v4810_v26 }
0x1834 PF: > { %s6687_s8 = sld [smem:[#allocation3_spill]] }
0x183a   : > { %s26_s21 = sadd.s32 1, %s6687_s8  }
0x183b   : > { %p23_p5 = scmp.ge.s32.totalorder %s26_s21, 8  }
0x183d   :  { %25 = sbr.rel (!%p23_p5) target bundleno = 10 (0xa), region = 153 }

// kernel: detr_forward.6
= control target key start
LH: loop header
LB: loop body
LE: loop exit
PB: predicated region body
PF: predicated region fallthrough
CT: control target
= control target key end

     0   :  { %s10404_s0 = inlined_call_operand.vmem [shape: f32[2,16,32], index: 0, kind: input, shape index: {}]   ;;  %s10405_s1 = inlined_call_operand.vmem [shape: f32[2,16,32], index: 1, kind: input, shape index: {}]   ;;  %s10406_s2 = inlined_call_operand.vmem [shape: f32[2,8,32], index: 2, kind: input, shape index: {}]   ;;  %s10407_s3 = inlined_call_operand.vmem [shape: f32[6,32,64], index: 3, kind: input, shape index: {}]   ;;  %s10408_s4 = inlined_call_operand.vmem [shape: f32[6,1,64], index: 4, kind: input, shape index: {}]   ;;  %s10409_s5 = inlined_call_operand.vmem [shape: f32[6,32,32], index: 5, kind: input, shape index: {}]   ;;  %s10410_s6 = inlined_call_operand.vmem [shape: f32[6,1,32], index: 6, kind: input, shape index: {}]   ;;  %s10411_s7 = inlined_call_operand.vmem [shape: f32[6,32,32], index: 7, kind: input, shape index: {}]   ;;  %s10412_s8 = inlined_call_operand.vmem [shape: f32[6,1,32], index: 8, kind: input, shape index: {}]   ;;  %s10413_s9 = inlined_call_operand.vmem [shape: f32[6,32,32], index: 9, kind: input, shape index: {}]   ;;  %s10414_s10 = inlined_call_operand.vmem [shape: f32[6,1,32], index: 10, kind: input, shape index: {}]   ;;  %s10415_s11 = inlined_call_operand.vmem [shape: f32[6,32,32], index: 11, kind: input, shape index: {}]   ;;  %s10416_s12 = inlined_call_operand.vmem [shape: f32[6,1,32], index: 12, kind: input, shape index: {}]   ;;  %s10417_s13 = inlined_call_operand.vmem [shape: f32[6,32,32], index: 13, kind: input, shape index: {}]   ;;  %s10418_s14 = inlined_call_operand.vmem [shape: f32[6,1,32], index: 14, kind: input, shape index: {}]   ;;  %s10419_s15 = inlined_call_operand.vmem [shape: f32[6,32,32], index: 15, kind: input, shape index: {}]   ;;  %s10420_s16 = inlined_call_operand.vmem [shape: f32[6,1,32], index: 16, kind: input, shape index: {}]   ;;  %s10421_s17 = inlined_call_operand.vmem [shape: f32[6,32,64], index: 17, kind: input, shape index: {}]   ;;  %s10422_s18 = inlined_call_operand.vmem [shape: f32[6,1,64], index: 18, kind: input, shape index: {}]   ;;  %s10423_s19 = inlined_call_operand.vmem [shape: f32[6,64,32], index: 19, kind: input, shape index: {}]   ;;  %s10424_s20 = inlined_call_operand.vmem [shape: f32[6,1,32], index: 20, kind: input, shape index: {}]   ;;  %s10425_s21 = inlined_call_operand.vmem [shape: f32[6,1,32], index: 21, kind: input, shape index: {}]   ;;  %s10426_s22 = inlined_call_operand.vmem [shape: f32[6,1,32], index: 22, kind: input, shape index: {}]   ;;  %s10427_s23 = inlined_call_operand.vmem [shape: f32[6,1,32], index: 23, kind: input, shape index: {}]   ;;  %s10428_s24 = inlined_call_operand.vmem [shape: f32[6,1,32], index: 24, kind: input, shape index: {}]   ;;  %s10429_s25 = inlined_call_operand.vmem [shape: f32[6,1,32], index: 25, kind: input, shape index: {}]   ;;  %s10430_s26 = inlined_call_operand.vmem [shape: f32[6,1,32], index: 26, kind: input, shape index: {}]   ;;  %s10431_s27 = inlined_call_operand.vmem [shape: f32[2,8,32], index: 27, kind: output, shape index: {}]  }
   0x1   :  { %10453 = sst [smem:[#allocation8_spill]] %s10404_s0 }
   0x2   :  { %10454 = sst [smem:[#allocation9_spill]] %s10405_s1 }
   0x3   :  { %10455 = sst [smem:[#allocation10_spill]] %s10406_s2 }
   0x4   :  { %10456 = sst [smem:[#allocation11_spill]] %s10407_s3 }
   0x5   :  { %10457 = sst [smem:[#allocation12_spill]] %s10408_s4 }
   0x6   :  { %10458 = sst [smem:[#allocation13_spill]] %s10409_s5 }
   0x7   :  { %10459 = sst [smem:[#allocation14_spill]] %s10410_s6 }
   0x8   :  { %10460 = sst [smem:[#allocation15_spill]] %s10411_s7  ;;  %s9274_s7 = smov 0  }
   0x9   :  { %10461 = sst [smem:[#allocation16_spill]] %s10412_s8 }
   0xa   :  { %10462 = sst [smem:[#allocation17_spill]] %s10413_s9 }
   0xb   :  { %10463 = sst [smem:[#allocation18_spill]] %s10414_s10 }
   0xc   :  { %10464 = sst [smem:[#allocation19_spill]] %s10415_s11 }
   0xd   :  { %10465 = sst [smem:[#allocation20_spill]] %s10416_s12 }
   0xe   :  { %10466 = sst [smem:[#allocation21_spill]] %s10417_s13 }
   0xf   :  { %10467 = sst [smem:[#allocation22_spill]] %s10419_s15 }
  0x10   :  { %10468 = sst [smem:[#allocation23_spill]] %s10421_s17 }
  0x11   :  { %10469 = sst [smem:[#allocation24_spill]] %s10422_s18 }
  0x12   :  { %10470 = sst [smem:[#allocation25_spill]] %s10423_s19 }
  0x13   :  { %10471 = sst [smem:[#allocation26_spill]] %s10424_s20 }
  0x14   :  { %10472 = sst [smem:[#allocation27_spill]] %s10428_s24 }
  0x15   :  { %10473 = sst [smem:[#allocation28_spill]] %s10429_s25 }
  0x16   :  { %10474 = sst [smem:[#allocation29_spill]] %s10430_s26 }
  0x17   :  { %10475 = sst [smem:[#allocation30_spill]] %s10431_s27 }
  0x18 LB: > { %10476 = sst [smem:[#allocation3_spill]] %s9107_s7  ;;  %s9280_s4 = sadd.s32 4294967295, %s9107_s7   ;;  %s9107_s7 = sphi %s9274_s7, %s37_s7  }
  0x19   : > { %10477 = sst [smem:[#allocation4_spill]] %s9280_s4  ;;  %p8025_p0 = scmp.ge.s32.totalorder %s9107_s7, 1 }
  0x1a   : > { %p932_p1 = scmp.lt.s32.totalorder %s9107_s7, 7 }
  0x1c   : > { %p933_p2 = pnand %p8025_p0, %p932_p1 }
  0x1e   : > { %936 = sbr.rel (%p933_p2) target bundleno = 11139 (0x2b83), region = 128 }
  0x23   : > { %p1084_p3 = scmp.lt.s32.totalorder %s9280_s4, 5  ;;  %s10479_s1 = sld [smem:[#allocation11_spill]] }
  0x24   : > { %s10481_s3 = sld [smem:[#allocation13_spill]] }
  0x25   : > { %s9286_s8 = scalar_select %p1084_p3, %s9280_s4, 5 }
  0x26   : > { %s10483_s5 = sld [smem:[#allocation15_spill]] }
  0x27   : > { %s8196_s30 = sshll.u32 %s9286_s8, 5  ;;  %s10486_s2 = sld [smem:[#allocation17_spill]] }
  0x28   : > { %s10490_s13 = sld [smem:[#allocation21_spill]]  ;;  %s8204_s0 = sshll.u32 %s9286_s8, 6 }
  0x29   : > { %s9296_s6 = scalar_lea.vmem %s10479_s1, %s8196_s30  ;;  %s10491_s15 = sld [smem:[#allocation22_spill]] }
  0x2a   : > { %10480 = sst [smem:[#allocation5_spill]] %s9296_s6  ;;  %s9301_s7 = scalar_lea.vmem %s10481_s3, %s8196_s30 }
  0x2b   : > { %s10492_s17 = sld [smem:[#allocation23_spill]] }
  0x2c   : > { %s9310_s28 = scalar_lea.vmem %s10483_s5, %s8196_s30  ;;  %s10488_s5 = sld [smem:[#allocation19_spill]] }
  0x2d   : > { %10484 = sst [smem:[#allocation6_spill]] %s9310_s28  ;;  %s9319_s3 = scalar_lea.vmem %s10486_s2, %s8196_s30 }
  0x2e   : > { %s9337_s2 = scalar_lea.vmem %s10490_s13, %s8196_s30  ;;  %s10494_s19 = sld [smem:[#allocation25_spill]] }
  0x2f   : > { %s9346_s24 = scalar_lea.vmem %s10491_s15, %s8196_s30  ;;  %s10500_s1 = sld [smem:[#allocation4_spill]] }
  0x31   : > { %s9355_s12 = scalar_lea.vmem %s10492_s17, %s8196_s30  ;;  %s1161_s17 = scalar_lea.vmem %s10426_s22, %s9286_s8 }
  0x32   : > { %s9328_s28 = scalar_lea.vmem %s10488_s5, %s8196_s30 }
  0x34   : > { %s9365_s25 = scalar_lea.vmem %s10494_s19, %s8204_s0 }
  0x35   : > { %10495 = sst [smem:[#allocation7_spill]] %s9365_s25  ;;  %p8044_p4 = scmp.ne.s32.totalorder %s10500_s1, 0 }
  0x37   : > { %1177 = sbr.rel (%p8044_p4) target bundleno = 62 (0x3e), region = 132 }
  0x3c   : > { %vm1178_vm0 = vcmask 261120   ;;  %v9109_v0 = vmov 0.0  }
  0x3d   : > { %1179 = vst.msk [vmem:[#allocation2] sm:$0xff] %vm1178_vm0, %v9109_v0  ;;  %1180 = vst.msk [vmem:[#allocation2 + $0x8] sm:$0xff] %vm1178_vm0, %v9109_v0 }
  0x3e PF: > { %s10501_s30 = sld [smem:[#allocation5_spill]]  ;;  %vm1206_vm1 = vcmask 261120   ;;  %v1291_v11 = vld [vmem:[%s9301_s7 + $0x18] sm:$0xff]  ;;  %v1290_v12 = vld [vmem:[%s9301_s7 + $0x10] sm:$0xff]  ;;  %v9110_v13 = vmov 0.0   ;;  %v1289_v14 = vld [vmem:[%s9301_s7 + $0x8] sm:$0xff] }
  0x3f   : > { %s10502_s20 = sld [smem:[#allocation10_spill]]  ;;  %8449 = vmatprep.subr.mxu0 %v9110_v13  ;;  %v1288_v15 = vld [vmem:[%s9301_s7] sm:$0xff]  ;;  %vm9111_vm2 = vmmov 0   ;;  %s9112_s7 = smov 96   ;;  %vm1383_vm3 = vcmask 31744   ;;  %vm1537_vm4 = vcmask 64512  }
  0x40   : > { %8451 = vmatprep.mubr.msk.f32.mxu0 %vm9111_vm2, %v9110_v13  ;;  %s10503_s6 = sld [smem:[#allocation12_spill]]  ;;  %s9114_s18 = smov 124   ;;  %vm4092_vm5 = vcmask 97280   ;;  %vm4095_vm6 = vcmask 130048   ;;  %vm4098_vm7 = vcmask 162816   ;;  %vm4101_vm8 = vcmask 195584  }
  0x41   : > { %s10505_s15 = sld [smem:[#allocation14_spill]]  ;;  %s9115_s19 = smov 88   ;;  %vm4104_vm9 = vcmask 228352   ;;  %vm7631_vm10 = vcmask 523264  }
  0x42   : > { %s9116_s25 = smov 120   ;;  %s9117_s9 = smov 84  }
  0x43   : > { %s9118_s1 = smov 116   ;;  %s9119_s29 = smov 80  }
  0x44   : > { %v1198_v1 = vld [vmem:[%s10501_s30 + $0x18] sm:$0xff]  ;;  %v1197_v2 = vld [vmem:[%s10501_s30 + $0x10] sm:$0xff]  ;;  %v1181_v3 = vld [vmem:[#allocation2] sm:$0xff]  ;;  %s9123_s4 = smov 72   ;;  %s9124_s0 = smov 104  }
  0x45   : > { %8427 = vmatprep.subr.mxu1 %v1198_v1  ;;  %v1191_v4 = vld [vmem:[%s10502_s20] sm:$0xff]  ;;  %v1196_v5 = vld [vmem:[%s10501_s30 + $0x8] sm:$0xff]  ;;  %s10441_s5 = smov 28   ;;  %s10508_s27 = sld [smem:[#allocation16_spill]] }
  0x46   : > { %8428 = vmatpush3.msra.mxu1 %v1198_v1  ;;  %v1193_v6 = vadd.f32 %v1191_v4, %v1181_v3  ;;  %v1182_v7 = vld [vmem:[#allocation2 + $0x8] sm:$0xff]  ;;  %v1195_v9 = vld [vmem:[%s10501_s30] sm:$0xff]  ;;  %s10504_s11 = scalar_lea.vmem %s10503_s6, %s9286_s8  ;;  %s9113_s30 = smov 92  }
  0x47   : > { %v1192_v8 = vld [vmem:[%s10502_s20 + $0x8] sm:$0xff]  ;;  %8429 = vmatprep.subr.mxu1 %v1197_v2  ;;  %v8045_v17 = vld [vmem:[%s10504_s11] ss:$0 sm:$0xff]  ;;  %s10506_s10 = scalar_lea.vmem %s10505_s15, %s9286_s8  ;;  %s9120_s6 = smov 112  }
  0x48   : > { %8430 = vmatpush3.msra.mxu1 %v1197_v2  ;;  %8435 = vmatprep.mubr.msk.f32.mxu1 %vm1206_vm1, %v1193_v6  ;;  %v1194_v10 = vadd.f32 %v1192_v8, %v1182_v7  ;;  %v8048_v23 = vld [vmem:[%s10506_s10] ss:$0 sm:$0xff]  ;;  %s9121_s11 = smov 76   ;;  %s9125_s15 = smov 68  }
  0x49   : > { %8431 = vmatprep.subr.mxu1 %v1196_v5  ;;  %s9126_s10 = smov 100   ;;  %s10510_s26 = sld [smem:[#allocation8_spill]] }
  0x4a   : > { %8432 = vmatpush3.msra.mxu1 %v1196_v5 }
  0x4b   : > { %8433 = vmatprep.subr.mxu1 %v1195_v9  ;;  %s10509_s13 = scalar_lea.vmem %s10508_s27, %s9286_s8  ;;  %s10515_s27 = sld [smem:[#allocation18_spill]] }
  0x4c   : > { %8434 = vmatpush3.msra.mxu1 %v1195_v9 }
  0x4d   : > { %8436 = vmatmul.mubr.msk.f32.vlgmr.msra.gmra.mxu1 %vm1206_vm1, %v1194_v10  ;;  %8438 = vmatprep.subr.mxu1 %v1291_v11 }
  0x4e   : > { %8446 = vmatprep.mubr.msk.f32.mxu1 %vm1206_vm1, %v1181_v3  ;;  %8439 = vmatpush3.msra.mxu1 %v1291_v11 }
  0x4f   : > { %8440 = vmatprep.subr.mxu1 %v1290_v12 }
  0x50   : > { %8441 = vmatpush3.msra.mxu1 %v1290_v12 }
  0x51   : > { %8442 = vmatprep.subr.mxu1 %v1289_v14 }
  0x52   : > { %8443 = vmatpush3.msra.mxu1 %v1289_v14 }
  0x53   : > { %8444 = vmatprep.subr.mxu1 %v1288_v15 }
  0x54   : > { %8445 = vmatpush3.msra.mxu1 %v1288_v15 }
  0x55   : > { %8447 = vmatmul.mubr.msk.f32.vlgmr.msra.gmra.mxu1 %vm1206_vm1, %v1182_v7  ;;  %8454 = vmatprep.subr.mxu1 %v9110_v13 }
  0x56   : > { %8456 = vmatprep.mubr.msk.f32.mxu1 %vm9111_vm2, %v9110_v13 }
 0x10d   : > { %v8437_v16 = vpop.f32.mrf.mxu1 }
 0x10e   : > { %v9428_v20 = vadd.f32 %v8437_v16, %v8045_v17 }
 0x10f   : > { %v1279_v18 = vpop.f32.mrf.mxu1 }
 0x110   : > { %v9425_v19 = vadd.f32 %v8045_v17, %v1279_v18 }
 0x112   : > { %1381 = vrot.lane.b32.xlu0 %v9425_v19, %s9112_s7 }
 0x115   : > { %v8448_v24 = vpop.f32.mrf.mxu1 }
 0x116   : > { %1459 = vrot.lane.b32.xlu0 %v9428_v20, %s9112_s7  ;;  %v9448_v25 = vadd.f32 %v8448_v24, %v8048_v23  ;;  %s9122_s7 = smov 108  }
 0x117   : > { %v1371_v26 = vpop.f32.mrf.mxu1 }
 0x118   : > { %v9450_v27 = vadd.f32 %v8048_v23, %v1371_v26 }
 0x184   : > { %v1382_v21 = vpop.permute.xlu0 %1381 }
 0x185   : > { %8450 = vmatpush3.xpose.msk.msra.mxu0 %vm1383_vm3, %v1382_v21 }
 0x186   : > { %8459 = vmatprep.subr.mxu0 %v9110_v13 }
 0x188   : > { %8452 = vmatmul.mubr.msk.f32.vlgmr.msra.gmra.mxu0 %vm1383_vm3, %v9425_v19  ;;  %v1460_v22 = vpop.permute.xlu0 %1459 }
 0x189   : > { %8455 = vmatpush3.xpose.msk.msra.mxu1 %vm1383_vm3, %v1460_v22  ;;  %8461 = vmatprep.mubr.msk.f32.mxu0 %vm9111_vm2, %v9110_v13 }
 0x18a   : > { %8464 = vmatprep.subr.mxu1 %v9110_v13  ;;  %8460 = vmatpush3.msra.mxu0 %v9450_v27 }
 0x18b   : > { %8469 = vmatprep.subr.mxu0 %v9110_v13 }
 0x18c   : > { %8457 = vmatmul.mubr.msk.f32.vlgmr.msra.gmra.mxu1 %vm1383_vm3, %v9428_v20 }
 0x18d   : > { %8466 = vmatprep.mubr.msk.f32.mxu1 %vm9111_vm2, %v9110_v13  ;;  %8465 = vmatpush3.msra.mxu1 %v9448_v25 }
 0x18e   : > { %8474 = vmatprep.subr.mxu1 %v9110_v13 }
 0x248   : > { %v1454_v28 = vpop.f32.mrf.mxu0 }
 0x249   : > { %v1535_v29 = vmul.f32 0.5, %v1454_v28 }
 0x24a   : > { %v8453_v30 = vpop.f32.mrf.mxu0 }
 0x24b   : > { %v1538_v31 = vsel %vm1537_vm4, %v1535_v29, -inf }
 0x24c   : > { %1539 = vmax.xlane.f32.xlu1 %v1538_v31  ;;  %v1531_v32 = vpop.f32.mrf.mxu1 }
 0x24d   : > { %v1536_v33 = vmul.f32 0.5, %v1531_v32 }
 0x24e   : > { %v8458_v34 = vpop.f32.mrf.mxu1 }
 0x24f   : > { %v1541_v35 = vsel %vm1537_vm4, %v1536_v33, -inf }
 0x250   : > { %1542 = vmax.xlane.f32.xlu1 %v1541_v35 }
 0x2d5   : > { %v1540_v36 = vpop.xlane.xlu1 %1539 }
 0x2d6   : > { %v1544_v37 = vsub.f32 %v1535_v29, %v1540_v36 }
 0x2d8   : > { %v1546_v38 = vmul.f32 1.442695, %v1544_v37 }
 0x2d9   : > { %v1543_v39 = vpop.xlane.xlu1 %1542 }
 0x2da   : > { %8957 = vpow2.f32 %v1546_v38  ;;  %v1545_v40 = vsub.f32 %v1536_v33, %v1543_v39 }
 0x2dc   : > { %v1548_v41 = vmul.f32 1.442695, %v1545_v40 }
 0x2de   : > { %8959 = vpow2.f32 %v1548_v41 }
 0x2e7   : > { %v8958_v42 = vpop.eup %8957 }
 0x2e8   : > { %v1550_v43 = vsel %vm1537_vm4, %v8958_v42, 0.0 }
 0x2e9   : > { %1551 = vadd.xlane.f32.xlu0 %v1550_v43 }
 0x2eb   : > { %v8960_v44 = vpop.eup %8959 }
 0x2ec   : > { %v1553_v45 = vsel %vm1537_vm4, %v8960_v44, 0.0 }
 0x2ed   : > { %1554 = vadd.xlane.f32.xlu1 %v1553_v45 }
 0x2fe   : > { %1708 = vrot.lane.b32.xlu1 %v9425_v19, %s9113_s30 }
 0x302   : > { %1786 = vrot.lane.b32.xlu1 %v9428_v20, %s9113_s30  ;;  %s9127_s30 = smov 4  }
 0x306   : > { %1706 = vrot.lane.b32.xlu1 %v9425_v19, %s9114_s18 }
 0x30a   : > { %1784 = vrot.lane.b32.xlu1 %v9428_v20, %s9114_s18 }
 0x372   : > { %v1552_v46 = vpop.xlane.xlu0 %1551 }
 0x373   : > { %8961 = vrcp.f32 %v1552_v46 }
 0x376   : > { %v1555_v47 = vpop.xlane.xlu1 %1554 }
 0x377   : > { %8963 = vrcp.f32 %v1555_v47 }
 0x37a   : > { %v1709_v48 = vpop.permute.xlu1 %1708 }
 0x37e   : > { %v1787_v49 = vpop.permute.xlu1 %1786 }
 0x380   : > { %v8962_v50 = vpop.eup %8961 }
 0x381   : > { %v1557_v51 = vmul.f32 %v8962_v50, %v8958_v42 }
 0x382   : > { %v1707_v53 = vpop.permute.xlu1 %1706 }
 0x383   : > { %8462 = vmatmul.mubr.msk.f32.vlgmr.msra.gmra.mxu0 %vm1537_vm4, %v1557_v51 }
 0x384   : > { %v8964_v52 = vpop.eup %8963  ;;  %8470 = vmatpush3.xpose.msk.msra.mxu0 %vm1383_vm3, %v1709_v48  ;;  %8471 = vmatprep.mubr.msk.f32.mxu0 %vm9111_vm2, %v9110_v13 }
 0x385   : > { %v1559_v54 = vmul.f32 %v8964_v52, %v8960_v44  ;;  %8479 = vmatprep.subr.mxu0 %v9110_v13 }
 0x386   : > { %v1785_v55 = vpop.permute.xlu1 %1784 }
 0x387   : > { %8467 = vmatmul.mubr.msk.f32.vlgmr.msra.gmra.mxu1 %vm1537_vm4, %v1559_v54  ;;  %8472 = vmatmul.mubr.msk.f32.vlgmr.msra.gmra.mxu0 %vm1383_vm3, %v1707_v53 }
 0x388   : > { %8475 = vmatpush3.xpose.msk.msra.mxu1 %vm1383_vm3, %v1787_v49  ;;  %8476 = vmatprep.mubr.msk.f32.mxu1 %vm9111_vm2, %v9110_v13 }
 0x389   : > { %8484 = vmatprep.subr.mxu1 %v9110_v13  ;;  %8481 = vmatprep.mubr.msk.f32.mxu0 %vm9111_vm2, %v9110_v13 }
 0x38b   : > { %8477 = vmatmul.mubr.msk.f32.vlgmr.msra.gmra.mxu1 %vm1383_vm3, %v1785_v55 }
 0x38c   : > { %8486 = vmatprep.mubr.msk.f32.mxu1 %vm9111_vm2, %v9110_v13 }
 0x443   : > { %v9482_v56 = vpop.f32.mrf.mxu0 }
 0x445   : > { %v8463_v57 = vpop.f32.mrf.mxu0 }
 0x447   : > { %v9484_v58 = vpop.f32.mrf.mxu1  ;;  %v1780_v59 = vpop.f32.mrf.mxu0 }
 0x448   : > { %v1862_v60 = vmul.f32 0.5, %v1780_v59 }
 0x449   : > { %v8468_v61 = vpop.f32.mrf.mxu1  ;;  %v8473_v62 = vpop.f32.mrf.mxu0 }
 0x44a   : > { %v1864_v63 = vsel %vm1537_vm4, %v1862_v60, -inf }
 0x44b   : > { %v1858_v0 = vpop.f32.mrf.mxu1  ;;  %1865 = vmax.xlane.f32.xlu0 %v1864_v63 }
 0x44c   : > { %v1863_v1 = vmul.f32 0.5, %v1858_v0 }
 0x44d   : > { %v8478_v2 = vpop.f32.mrf.mxu1 }
 0x44e   : > { %v1867_v3 = vsel %vm1537_vm4, %v1863_v1, -inf }
 0x44f   : > { %1868 = vmax.xlane.f32.xlu1 %v1867_v3 }
 0x460   : > { %2120 = vrot.lane.b32.xlu1 %v9428_v20, %s9115_s19 }
 0x461   : > { %1887 = vrot.lane.b32.xlu0 %v9450_v27, %s9114_s18 }
 0x465   : > { %1964 = vrot.lane.b32.xlu0 %v9448_v25, %s9114_s18 }
 0x469   : > { %2042 = vrot.lane.b32.xlu0 %v9425_v19, %s9115_s19  ;;  %s10451_s19 = smov 8  }
 0x4d4   : > { %v1866_v4 = vpop.xlane.xlu0 %1865 }
 0x4d5   : > { %v1870_v5 = vsub.f32 %v1862_v60, %v1866_v4 }
 0x4d7   : > { %v1872_v9 = vmul.f32 1.442695, %v1870_v5 }
 0x4d8   : > { %v1869_v6 = vpop.xlane.xlu1 %1868  ;;  %v1888_v7 = vpop.permute.xlu0 %1887 }
 0x4d9   : > { %v1871_v8 = vsub.f32 %v1863_v1, %v1869_v6  ;;  %8480 = vmatpush3.msra.mxu0 %v1888_v7 }
 0x4da   : > { %8489 = vmatprep.subr.mxu0 %v9110_v13 }
 0x4db   : > { %v1874_v10 = vmul.f32 1.442695, %v1871_v8 }
 0x4dc   : > { %v1965_v11 = vpop.permute.xlu0 %1964  ;;  %v2121_v26 = vpop.permute.xlu1 %2120 }
 0x4dd   : > { %8965 = vpow2.f32 %v1874_v10  ;;  %8485 = vmatpush3.msra.mxu1 %v1965_v11 }
 0x4de   : > { %8494 = vmatprep.subr.mxu1 %v9110_v13  ;;  %8967 = vpow2.f32 %v1872_v9 }
 0x4e0   : > { %v2043_v17 = vpop.permute.xlu0 %2042 }
 0x4ea   : > { %v8966_v12 = vpop.eup %8965 }
 0x4eb   : > { %v1879_v14 = vsel %vm1537_vm4, %v8966_v12, 0.0  ;;  %v8968_v15 = vpop.eup %8967 }
 0x4ec   : > { %1880 = vadd.xlane.f32.xlu0 %v1879_v14  ;;  %v1876_v16 = vsel %vm1537_vm4, %v8968_v15, 0.0 }
 0x4f0   : > { %1877 = vadd.xlane.f32.xlu0 %v1876_v16 }
 0x506   : > { %2040 = vrot.lane.b32.xlu0 %v9425_v19, %s9116_s25 }
 0x50a   : > { %2118 = vrot.lane.b32.xlu0 %v9428_v20, %s9116_s25 }
 0x575   : > { %v1881_v18 = vpop.xlane.xlu0 %1880 }
 0x576   : > { %8969 = vrcp.f32 %v1881_v18 }
 0x579   : > { %v1878_v21 = vpop.xlane.xlu0 %1877 }
 0x57a   : > { %8971 = vrcp.f32 %v1878_v21 }
 0x57d   : > { %v2041_v23 = vpop.permute.xlu0 %2040 }
 0x581   : > { %v2119_v30 = vpop.permute.xlu0 %2118 }
 0x583   : > { %v8970_v22 = vpop.eup %8969 }
 0x584   : > { %v1885_v24 = vmul.f32 %v8970_v22, %v8966_v12 }
 0x586   : > { %8487 = vmatmul.mubr.msk.f32.vlgmr.msra.gmra.mxu1 %vm1537_vm4, %v1885_v24 }
 0x587   : > { %v8972_v28 = vpop.eup %8971  ;;  %8495 = vmatpush3.xpose.msk.msra.mxu1 %vm1383_vm3, %v2121_v26  ;;  %8496 = vmatprep.mubr.msk.f32.mxu1 %vm9111_vm2, %v9110_v13 }
 0x588   : > { %v1883_v29 = vmul.f32 %v8972_v28, %v8968_v15  ;;  %8504 = vmatprep.subr.mxu1 %v9110_v13 }
 0x58a   : > { %8482 = vmatmul.mubr.msk.f32.vlgmr.msra.gmra.mxu0 %vm1537_vm4, %v1883_v29  ;;  %8497 = vmatmul.mubr.msk.f32.vlgmr.msra.gmra.mxu1 %vm1383_vm3, %v2119_v30 }
 0x58b   : > { %8490 = vmatpush3.xpose.msk.msra.mxu0 %vm1383_vm3, %v2043_v17  ;;  %8491 = vmatprep.mubr.msk.f32.mxu0 %vm9111_vm2, %v9110_v13 }
 0x58c   : > { %8499 = vmatprep.subr.mxu0 %v9110_v13  ;;  %8506 = vmatprep.mubr.msk.f32.mxu1 %vm9111_vm2, %v9110_v13 }
 0x58e   : > { %8492 = vmatmul.mubr.msk.f32.vlgmr.msra.gmra.mxu0 %vm1383_vm3, %v2041_v23 }
 0x58f   : > { %8501 = vmatprep.mubr.msk.f32.mxu0 %vm9111_vm2, %v9110_v13 }
 0x646   : > { %v9518_v31 = vpop.f32.mrf.mxu1 }
 0x648   : > { %v8488_v32 = vpop.f32.mrf.mxu1 }
 0x64a   : > { %v9520_v33 = vpop.f32.mrf.mxu0  ;;  %v2192_v34 = vpop.f32.mrf.mxu1 }
 0x64b   : > { %v2197_v35 = vmul.f32 0.5, %v2192_v34 }
 0x64c   : > { %v8483_v36 = vpop.f32.mrf.mxu0  ;;  %v8498_v37 = vpop.f32.mrf.mxu1 }
 0x64d   : > { %v2201_v38 = vsel %vm1537_vm4, %v2197_v35, -inf }
 0x64e   : > { %2202 = vmax.xlane.f32.xlu1 %v2201_v38  ;;  %v2114_v39 = vpop.f32.mrf.mxu0 }
 0x64f   : > { %v2196_v40 = vmul.f32 0.5, %v2114_v39 }
 0x650   : > { %v8493_v41 = vpop.f32.mrf.mxu0 }
 0x651   : > { %v2198_v42 = vsel %vm1537_vm4, %v2196_v40, -inf }
 0x652   : > { %2199 = vmax.xlane.f32.xlu0 %v2198_v42 }
 0x65f   : > { %2296 = vrot.lane.b32.xlu1 %v9448_v25, %s9116_s25 }
 0x663   : > { %2374 = vrot.lane.b32.xlu1 %v9425_v19, %s9117_s9 }
 0x667   : > { %2372 = vrot.lane.b32.xlu1 %v9425_v19, %s9118_s1 }
 0x668   : > { %2220 = vrot.lane.b32.xlu0 %v9450_v27, %s9116_s25 }
 0x6d7   : > { %v2203_v43 = vpop.xlane.xlu1 %2202 }
 0x6d8   : > { %v2205_v44 = vsub.f32 %v2197_v35, %v2203_v43 }
 0x6da   : > { %v2208_v45 = vmul.f32 1.442695, %v2205_v44 }
 0x6db   : > { %v2297_v46 = vpop.permute.xlu1 %2296  ;;  %v2200_v47 = vpop.xlane.xlu0 %2199 }
 0x6dc   : > { %8973 = vpow2.f32 %v2208_v45  ;;  %v2204_v48 = vsub.f32 %v2196_v40, %v2200_v47  ;;  %8505 = vmatpush3.msra.mxu1 %v2297_v46 }
 0x6dd   : > { %8514 = vmatprep.subr.mxu1 %v9110_v13 }
 0x6de   : > { %v2206_v49 = vmul.f32 1.442695, %v2204_v48 }
 0x6df   : > { %v2221_v50 = vpop.permute.xlu0 %2220  ;;  %v2375_v63 = vpop.permute.xlu1 %2374 }
 0x6e0   : > { %8975 = vpow2.f32 %v2206_v49  ;;  %8500 = vmatpush3.msra.mxu0 %v2221_v50 }
 0x6e1   : > { %8509 = vmatprep.subr.mxu0 %v9110_v13 }
 0x6e3   : > { %v2373_v2 = vpop.permute.xlu1 %2372 }
 0x6e9   : > { %v8974_v51 = vpop.eup %8973 }
 0x6ea   : > { %v2213_v52 = vsel %vm1537_vm4, %v8974_v51, 0.0 }
 0x6eb   : > { %2214 = vadd.xlane.f32.xlu0 %v2213_v52 }
 0x6ed   : > { %v8976_v53 = vpop.eup %8975 }
 0x6ee   : > { %v2210_v54 = vsel %vm1537_vm4, %v8976_v53, 0.0 }
 0x6ef   : > { %2211 = vadd.xlane.f32.xlu0 %v2210_v54 }
 0x705   : > { %2452 = vrot.lane.b32.xlu0 %v9428_v20, %s9117_s9  ;;  %s10449_s9 = smov 12  }
 0x709   : > { %2450 = vrot.lane.b32.xlu0 %v9428_v20, %s9118_s1 }
 0x774   : > { %v2215_v55 = vpop.xlane.xlu0 %2214 }
 0x775   : > { %8977 = vrcp.f32 %v2215_v55 }
 0x778   : > { %v2212_v57 = vpop.xlane.xlu0 %2211 }
 0x779   : > { %8979 = vrcp.f32 %v2212_v57 }
 0x77c   : > { %v2453_v60 = vpop.permute.xlu0 %2452 }
 0x780   : > { %v2451_v1 = vpop.permute.xlu0 %2450 }
 0x782   : > { %v8978_v59 = vpop.eup %8977 }
 0x783   : > { %v2219_v61 = vmul.f32 %v8978_v59, %v8974_v51 }
 0x785   : > { %8507 = vmatmul.mubr.msk.f32.vlgmr.msra.gmra.mxu1 %vm1537_vm4, %v2219_v61 }
 0x786   : > { %v8980_v62 = vpop.eup %8979  ;;  %8515 = vmatpush3.xpose.msk.msra.mxu1 %vm1383_vm3, %v2453_v60  ;;  %8516 = vmatprep.mubr.msk.f32.mxu1 %vm9111_vm2, %v9110_v13 }
 0x787   : > { %v2217_v0 = vmul.f32 %v8980_v62, %v8976_v53  ;;  %8524 = vmatprep.subr.mxu1 %v9110_v13 }
 0x789   : > { %8502 = vmatmul.mubr.msk.f32.vlgmr.msra.gmra.mxu0 %vm1537_vm4, %v2217_v0  ;;  %8517 = vmatmul.mubr.msk.f32.vlgmr.msra.gmra.mxu1 %vm1383_vm3, %v2451_v1 }
 0x78a   : > { %8510 = vmatpush3.xpose.msk.msra.mxu0 %vm1383_vm3, %v2375_v63  ;;  %8511 = vmatprep.mubr.msk.f32.mxu0 %vm9111_vm2, %v9110_v13 }
 0x78b   : > { %8519 = vmatprep.subr.mxu0 %v9110_v13  ;;  %8526 = vmatprep.mubr.msk.f32.mxu1 %vm9111_vm2, %v9110_v13 }
 0x78d   : > { %8512 = vmatmul.mubr.msk.f32.vlgmr.msra.gmra.mxu0 %vm1383_vm3, %v2373_v2 }
 0x78e   : > { %8521 = vmatprep.mubr.msk.f32.mxu0 %vm9111_vm2, %v9110_v13 }
 0x845   : > { %v9554_v3 = vpop.f32.mrf.mxu1 }
 0x847   : > { %v8508_v4 = vpop.f32.mrf.mxu1 }
 0x849   : > { %v9556_v5 = vpop.f32.mrf.mxu0  ;;  %v2524_v6 = vpop.f32.mrf.mxu1 }
 0x84a   : > { %v2529_v7 = vmul.f32 0.5, %v2524_v6 }
 0x84b   : > { %v8503_v8 = vpop.f32.mrf.mxu0  ;;  %v8518_v9 = vpop.f32.mrf.mxu1 }
 0x84c   : > { %v2533_v10 = vsel %vm1537_vm4, %v2529_v7, -inf }
 0x84d   : > { %2534 = vmax.xlane.f32.xlu0 %v2533_v10  ;;  %v2446_v11 = vpop.f32.mrf.mxu0 }
 0x84e   : > { %v2528_v12 = vmul.f32 0.5, %v2446_v11 }
 0x84f   : > { %v8513_v14 = vpop.f32.mrf.mxu0 }
 0x850   : > { %v2530_v15 = vsel %vm1537_vm4, %v2528_v12, -inf }
 0x851   : > { %2531 = vmax.xlane.f32.xlu1 %v2530_v15 }
 0x862   : > { %2628 = vrot.lane.b32.xlu1 %v9448_v25, %s9118_s1 }
 0x863   : > { %2552 = vrot.lane.b32.xlu0 %v9450_v27, %s9118_s1 }
 0x866   : > { %2706 = vrot.lane.b32.xlu1 %v9425_v19, %s9119_s29 }
 0x8d6   : > { %v2535_v16 = vpop.xlane.xlu0 %2534 }
 0x8d7   : > { %v2537_v17 = vsub.f32 %v2529_v7, %v2535_v16 }
 0x8d9   : > { %v2540_v18 = vmul.f32 1.442695, %v2537_v17 }
 0x8da   : > { %v2553_v21 = vpop.permute.xlu0 %2552  ;;  %v2532_v22 = vpop.xlane.xlu1 %2531 }
 0x8db   : > { %8981 = vpow2.f32 %v2540_v18  ;;  %v2536_v23 = vsub.f32 %v2528_v12, %v2532_v22  ;;  %8520 = vmatpush3.msra.mxu0 %v2553_v21 }
 0x8dc   : > { %8529 = vmatprep.subr.mxu0 %v9110_v13 }
 0x8dd   : > { %v2538_v24 = vmul.f32 1.442695, %v2536_v23 }
 0x8de   : > { %v2629_v26 = vpop.permute.xlu1 %2628 }
 0x8df   : > { %8983 = vpow2.f32 %v2538_v24  ;;  %8525 = vmatpush3.msra.mxu1 %v2629_v26 }
 0x8e0   : > { %8534 = vmatprep.subr.mxu1 %v9110_v13 }
 0x8e2   : > { %v2707_v34 = vpop.permute.xlu1 %2706 }
 0x8e8   : > { %v8982_v28 = vpop.eup %8981 }
 0x8e9   : > { %v2545_v29 = vsel %vm1537_vm4, %v8982_v28, 0.0 }
 0x8ea   : > { %2546 = vadd.xlane.f32.xlu1 %v2545_v29 }
 0x8ec   : > { %v8984_v30 = vpop.eup %8983 }
 0x8ed   : > { %v2542_v32 = vsel %vm1537_vm4, %v8984_v30, 0.0 }
 0x8ee   : > { %2543 = vadd.xlane.f32.xlu0 %v2542_v32 }
 0x8fb   : > { %2704 = vrot.lane.b32.xlu1 %v9425_v19, %s9120_s6 }
 0x904   : > { %2784 = vrot.lane.b32.xlu0 %v9428_v20, %s9119_s29  ;;  %s10447_s29 = smov 16  }
 0x908   : > { %2782 = vrot.lane.b32.xlu0 %v9428_v20, %s9120_s6 }
 0x973   : > { %v2547_v35 = vpop.xlane.xlu1 %2546 }
 0x974   : > { %8985 = vrcp.f32 %v2547_v35 }
 0x977   : > { %v2544_v36 = vpop.xlane.xlu0 %2543  ;;  %v2705_v43 = vpop.permute.xlu1 %2704 }
 0x978   : > { %8987 = vrcp.f32 %v2544_v36 }
 0x97b   : > { %v2785_v38 = vpop.permute.xlu0 %2784 }
 0x97f   : > { %v2783_v42 = vpop.permute.xlu0 %2782 }
 0x981   : > { %v8986_v37 = vpop.eup %8985 }
 0x982   : > { %v2551_v39 = vmul.f32 %v8986_v37, %v8982_v28 }
 0x984   : > { %8527 = vmatmul.mubr.msk.f32.vlgmr.msra.gmra.mxu1 %vm1537_vm4, %v2551_v39 }
 0x985   : > { %v8988_v40 = vpop.eup %8987  ;;  %8535 = vmatpush3.xpose.msk.msra.mxu1 %vm1383_vm3, %v2785_v38  ;;  %8536 = vmatprep.mubr.msk.f32.mxu1 %vm9111_vm2, %v9110_v13 }
 0x986   : > { %v2549_v41 = vmul.f32 %v8988_v40, %v8984_v30  ;;  %8544 = vmatprep.subr.mxu1 %v9110_v13 }
 0x988   : > { %8522 = vmatmul.mubr.msk.f32.vlgmr.msra.gmra.mxu0 %vm1537_vm4, %v2549_v41  ;;  %8537 = vmatmul.mubr.msk.f32.vlgmr.msra.gmra.mxu1 %vm1383_vm3, %v2783_v42 }
 0x989   : > { %8530 = vmatpush3.xpose.msk.msra.mxu0 %vm1383_vm3, %v2707_v34  ;;  %8531 = vmatprep.mubr.msk.f32.mxu0 %vm9111_vm2, %v9110_v13 }
 0x98a   : > { %8539 = vmatprep.subr.mxu0 %v9110_v13  ;;  %8546 = vmatprep.mubr.msk.f32.mxu1 %vm9111_vm2, %v9110_v13 }
 0x98c   : > { %8532 = vmatmul.mubr.msk.f32.vlgmr.msra.gmra.mxu0 %vm1383_vm3, %v2705_v43 }
 0x98d   : > { %8541 = vmatprep.mubr.msk.f32.mxu0 %vm9111_vm2, %v9110_v13 }
 0xa44   : > { %v9590_v44 = vpop.f32.mrf.mxu1 }
 0xa46   : > { %v8528_v45 = vpop.f32.mrf.mxu1 }
 0xa48   : > { %v9592_v46 = vpop.f32.mrf.mxu0  ;;  %v2856_v47 = vpop.f32.mrf.mxu1 }
 0xa49   : > { %v2861_v48 = vmul.f32 0.5, %v2856_v47 }
 0xa4a   : > { %v8523_v49 = vpop.f32.mrf.mxu0  ;;  %v8538_v50 = vpop.f32.mrf.mxu1 }
 0xa4b   : > { %v2865_v51 = vsel %vm1537_vm4, %v2861_v48, -inf }
 0xa4c   : > { %2866 = vmax.xlane.f32.xlu0 %v2865_v51  ;;  %v2778_v52 = vpop.f32.mrf.mxu0 }
 0xa4d   : > { %v2860_v53 = vmul.f32 0.5, %v2778_v52 }
 0xa4e   : > { %v8533_v54 = vpop.f32.mrf.mxu0 }
 0xa4f   : > { %v2862_v55 = vsel %vm1537_vm4, %v2860_v53, -inf }
 0xa50   : > { %2863 = vmax.xlane.f32.xlu1 %v2862_v55 }
 0xa61   : > { %2960 = vrot.lane.b32.xlu1 %v9448_v25, %s9120_s6 }
 0xa62   : > { %2884 = vrot.lane.b32.xlu0 %v9450_v27, %s9120_s6 }
 0xa65   : > { %3038 = vrot.lane.b32.xlu1 %v9425_v19, %s9121_s11 }
 0xad5   : > { %v2867_v57 = vpop.xlane.xlu0 %2866 }
 0xad6   : > { %v2869_v59 = vsub.f32 %v2861_v48, %v2867_v57 }
 0xad8   : > { %v2872_v60 = vmul.f32 1.442695, %v2869_v59 }
 0xad9   : > { %v2885_v61 = vpop.permute.xlu0 %2884  ;;  %v2864_v62 = vpop.xlane.xlu1 %2863 }
 0xada   : > { %8989 = vpow2.f32 %v2872_v60  ;;  %v2868_v63 = vsub.f32 %v2860_v53, %v2864_v62  ;;  %8540 = vmatpush3.msra.mxu0 %v2885_v61 }
 0xadb   : > { %8549 = vmatprep.subr.mxu0 %v9110_v13 }
 0xadc   : > { %v2870_v0 = vmul.f32 1.442695, %v2868_v63 }
 0xadd   : > { %v2961_v1 = vpop.permute.xlu1 %2960 }
 0xade   : > { %8991 = vpow2.f32 %v2870_v0  ;;  %8545 = vmatpush3.msra.mxu1 %v2961_v1 }
 0xadf   : > { %8554 = vmatprep.subr.mxu1 %v9110_v13 }
 0xae1   : > { %v3039_v8 = vpop.permute.xlu1 %3038 }
 0xae7   : > { %v8990_v2 = vpop.eup %8989 }
 0xae8   : > { %v2877_v4 = vsel %vm1537_vm4, %v8990_v2, 0.0 }
 0xae9   : > { %2878 = vadd.xlane.f32.xlu1 %v2877_v4 }
 0xaeb   : > { %v8992_v6 = vpop.eup %8991 }
 0xaec   : > { %v2874_v7 = vsel %vm1537_vm4, %v8992_v6, 0.0 }
 0xaed   : > { %2875 = vadd.xlane.f32.xlu0 %v2874_v7 }
 0xafa   : > { %3036 = vrot.lane.b32.xlu1 %v9425_v19, %s9122_s7 }
 0xb03   : > { %3116 = vrot.lane.b32.xlu0 %v9428_v20, %s9121_s11  ;;  %s10445_s11 = smov 20  }
 0xb07   : > { %3114 = vrot.lane.b32.xlu0 %v9428_v20, %s9122_s7 }
 0xb72   : > { %v2879_v9 = vpop.xlane.xlu1 %2878 }
 0xb73   : > { %8993 = vrcp.f32 %v2879_v9 }
 0xb76   : > { %v2876_v10 = vpop.xlane.xlu0 %2875  ;;  %v3037_v18 = vpop.permute.xlu1 %3036 }
 0xb77   : > { %8995 = vrcp.f32 %v2876_v10 }
 0xb7a   : > { %v3117_v12 = vpop.permute.xlu0 %3116 }
 0xb7e   : > { %v3115_v17 = vpop.permute.xlu0 %3114 }
 0xb80   : > { %v8994_v11 = vpop.eup %8993 }
 0xb81   : > { %v2883_v14 = vmul.f32 %v8994_v11, %v8990_v2 }
 0xb83   : > { %8547 = vmatmul.mubr.msk.f32.vlgmr.msra.gmra.mxu1 %vm1537_vm4, %v2883_v14 }
 0xb84   : > { %v8996_v15 = vpop.eup %8995  ;;  %8555 = vmatpush3.xpose.msk.msra.mxu1 %vm1383_vm3, %v3117_v12  ;;  %8556 = vmatprep.mubr.msk.f32.mxu1 %vm9111_vm2, %v9110_v13 }
 0xb85   : > { %v2881_v16 = vmul.f32 %v8996_v15, %v8992_v6  ;;  %8564 = vmatprep.subr.mxu1 %v9110_v13 }
 0xb87   : > { %8542 = vmatmul.mubr.msk.f32.vlgmr.msra.gmra.mxu0 %vm1537_vm4, %v2881_v16  ;;  %8557 = vmatmul.mubr.msk.f32.vlgmr.msra.gmra.mxu1 %vm1383_vm3, %v3115_v17 }
 0xb88   : > { %8550 = vmatpush3.xpose.msk.msra.mxu0 %vm1383_vm3, %v3039_v8  ;;  %8551 = vmatprep.mubr.msk.f32.mxu0 %vm9111_vm2, %v9110_v13 }
 0xb89   : > { %8559 = vmatprep.subr.mxu0 %v9110_v13  ;;  %8566 = vmatprep.mubr.msk.f32.mxu1 %vm9111_vm2, %v9110_v13 }
 0xb8b   : > { %8552 = vmatmul.mubr.msk.f32.vlgmr.msra.gmra.mxu0 %vm1383_vm3, %v3037_v18 }
 0xb8c   : > { %8561 = vmatprep.mubr.msk.f32.mxu0 %vm9111_vm2, %v9110_v13 }
 0xc43   : > { %v9626_v21 = vpop.f32.mrf.mxu1 }
 0xc45   : > { %v8548_v22 = vpop.f32.mrf.mxu1 }
 0xc47   : > { %v9628_v23 = vpop.f32.mrf.mxu0  ;;  %v3188_v24 = vpop.f32.mrf.mxu1 }
 0xc48   : > { %v3193_v26 = vmul.f32 0.5, %v3188_v24 }
 0xc49   : > { %v8543_v28 = vpop.f32.mrf.mxu0  ;;  %v8558_v29 = vpop.f32.mrf.mxu1 }
 0xc4a   : > { %v3197_v30 = vsel %vm1537_vm4, %v3193_v26, -inf }
 0xc4b   : > { %3198 = vmax.xlane.f32.xlu0 %v3197_v30  ;;  %v3110_v32 = vpop.f32.mrf.mxu0 }
 0xc4c   : > { %v3192_v34 = vmul.f32 0.5, %v3110_v32 }
 0xc4d   : > { %v8553_v35 = vpop.f32.mrf.mxu0 }
 0xc4e   : > { %v3194_v36 = vsel %vm1537_vm4, %v3192_v34, -inf }
 0xc4f   : > { %3195 = vmax.xlane.f32.xlu1 %v3194_v36 }
 0xc60   : > { %3292 = vrot.lane.b32.xlu1 %v9448_v25, %s9122_s7 }
 0xc61   : > { %3216 = vrot.lane.b32.xlu0 %v9450_v27, %s9122_s7 }
 0xc64   : > { %3370 = vrot.lane.b32.xlu1 %v9425_v19, %s9123_s4 }
 0xcd4   : > { %v3199_v37 = vpop.xlane.xlu0 %3198 }
 0xcd5   : > { %v3201_v38 = vsub.f32 %v3193_v26, %v3199_v37 }
 0xcd7   : > { %v3204_v39 = vmul.f32 1.442695, %v3201_v38 }
 0xcd8   : > { %v3217_v40 = vpop.permute.xlu0 %3216  ;;  %v3196_v41 = vpop.xlane.xlu1 %3195 }
 0xcd9   : > { %8997 = vpow2.f32 %v3204_v39  ;;  %v3200_v42 = vsub.f32 %v3192_v34, %v3196_v41  ;;  %8560 = vmatpush3.msra.mxu0 %v3217_v40 }
 0xcda   : > { %8569 = vmatprep.subr.mxu0 %v9110_v13 }
 0xcdb   : > { %v3202_v43 = vmul.f32 1.442695, %v3200_v42 }
 0xcdc   : > { %v3293_v45 = vpop.permute.xlu1 %3292 }
 0xcdd   : > { %8999 = vpow2.f32 %v3202_v43  ;;  %8565 = vmatpush3.msra.mxu1 %v3293_v45 }
 0xcde   : > { %8574 = vmatprep.subr.mxu1 %v9110_v13 }
 0xce0   : > { %v3371_v51 = vpop.permute.xlu1 %3370 }
 0xce6   : > { %v8998_v47 = vpop.eup %8997 }
 0xce7   : > { %v3209_v48 = vsel %vm1537_vm4, %v8998_v47, 0.0 }
 0xce8   : > { %3210 = vadd.xlane.f32.xlu1 %v3209_v48 }
 0xcea   : > { %v9000_v49 = vpop.eup %8999 }
 0xceb   : > { %v3206_v50 = vsel %vm1537_vm4, %v9000_v49, 0.0 }
 0xcec   : > { %3207 = vadd.xlane.f32.xlu0 %v3206_v50 }
 0xcf9   : > { %3368 = vrot.lane.b32.xlu1 %v9425_v19, %s9124_s0 }
 0xd02   : > { %3448 = vrot.lane.b32.xlu0 %v9428_v20, %s9123_s4  ;;  %s10443_s4 = smov 24  }
 0xd06   : > { %3446 = vrot.lane.b32.xlu0 %v9428_v20, %s9124_s0 }
 0xd71   : > { %v3211_v52 = vpop.xlane.xlu1 %3210 }
 0xd72   : > { %9001 = vrcp.f32 %v3211_v52 }
 0xd75   : > { %v3208_v53 = vpop.xlane.xlu0 %3207  ;;  %v3369_v62 = vpop.permute.xlu1 %3368 }
 0xd76   : > { %9003 = vrcp.f32 %v3208_v53 }
 0xd79   : > { %v3449_v55 = vpop.permute.xlu0 %3448 }
 0xd7d   : > { %v3447_v61 = vpop.permute.xlu0 %3446 }
 0xd7f   : > { %v9002_v54 = vpop.eup %9001 }
 0xd80   : > { %v3215_v57 = vmul.f32 %v9002_v54, %v8998_v47 }
 0xd82   : > { %8567 = vmatmul.mubr.msk.f32.vlgmr.msra.gmra.mxu1 %vm1537_vm4, %v3215_v57 }
 0xd83   : > { %v9004_v59 = vpop.eup %9003  ;;  %8575 = vmatpush3.xpose.msk.msra.mxu1 %vm1383_vm3, %v3449_v55  ;;  %8576 = vmatprep.mubr.msk.f32.mxu1 %vm9111_vm2, %v9110_v13 }
 0xd84   : > { %v3213_v60 = vmul.f32 %v9004_v59, %v9000_v49  ;;  %8584 = vmatprep.subr.mxu1 %v9110_v13 }
 0xd86   : > { %8562 = vmatmul.mubr.msk.f32.vlgmr.msra.gmra.mxu0 %vm1537_vm4, %v3213_v60  ;;  %8577 = vmatmul.mubr.msk.f32.vlgmr.msra.gmra.mxu1 %vm1383_vm3, %v3447_v61 }
 0xd87   : > { %8570 = vmatpush3.xpose.msk.msra.mxu0 %vm1383_vm3, %v3371_v51  ;;  %8571 = vmatprep.mubr.msk.f32.mxu0 %vm9111_vm2, %v9110_v13 }
 0xd88   : > { %8579 = vmatprep.subr.mxu0 %v9110_v13  ;;  %8586 = vmatprep.mubr.msk.f32.mxu1 %vm9111_vm2, %v9110_v13 }
 0xd8a   : > { %8572 = vmatmul.mubr.msk.f32.vlgmr.msra.gmra.mxu0 %vm1383_vm3, %v3369_v62 }
 0xd8b   : > { %8581 = vmatprep.mubr.msk.f32.mxu0 %vm9111_vm2, %v9110_v13 }
 0xe42   : > { %v9662_v63 = vpop.f32.mrf.mxu1 }
 0xe44   : > { %v8568_v0 = vpop.f32.mrf.mxu1 }
 0xe46   : > { %v9664_v1 = vpop.f32.mrf.mxu0  ;;  %v3520_v2 = vpop.f32.mrf.mxu1 }
 0xe47   : > { %v3525_v4 = vmul.f32 0.5, %v3520_v2 }
 0xe48   : > { %v8563_v6 = vpop.f32.mrf.mxu0  ;;  %v8578_v7 = vpop.f32.mrf.mxu1 }
 0xe49   : > { %v3529_v8 = vsel %vm1537_vm4, %v3525_v4, -inf }
 0xe4a   : > { %3530 = vmax.xlane.f32.xlu0 %v3529_v8  ;;  %v3442_v9 = vpop.f32.mrf.mxu0 }
 0xe4b   : > { %v3524_v10 = vmul.f32 0.5, %v3442_v9 }
 0xe4c   : > { %v8573_v11 = vpop.f32.mrf.mxu0 }
 0xe4d   : > { %v3526_v12 = vsel %vm1537_vm4, %v3524_v10, -inf }
 0xe4e   : > { %3527 = vmax.xlane.f32.xlu1 %v3526_v12 }
 0xe5f   : > { %3624 = vrot.lane.b32.xlu1 %v9448_v25, %s9124_s0 }
 0xe60   : > { %3548 = vrot.lane.b32.xlu0 %v9450_v27, %s9124_s0 }
 0xe63   : > { %3702 = vrot.lane.b32.xlu1 %v9425_v19, %s9125_s15 }
 0xed3   : > { %v3531_v14 = vpop.xlane.xlu0 %3530 }
 0xed4   : > { %v3533_v15 = vsub.f32 %v3525_v4, %v3531_v14 }
 0xed6   : > { %v3536_v16 = vmul.f32 1.442695, %v3533_v15 }
 0xed7   : > { %v3549_v17 = vpop.permute.xlu0 %3548  ;;  %v3528_v18 = vpop.xlane.xlu1 %3527 }
 0xed8   : > { %9005 = vpow2.f32 %v3536_v16  ;;  %v3532_v22 = vsub.f32 %v3524_v10, %v3528_v18  ;;  %8580 = vmatpush3.msra.mxu0 %v3549_v17 }
 0xed9   : > { %8589 = vmatprep.subr.mxu0 %v9110_v13 }
 0xeda   : > { %v3534_v24 = vmul.f32 1.442695, %v3532_v22 }
 0xedb   : > { %v3625_v26 = vpop.permute.xlu1 %3624 }
 0xedc   : > { %9007 = vpow2.f32 %v3534_v24  ;;  %8585 = vmatpush3.msra.mxu1 %v3625_v26 }
 0xedd   : > { %8594 = vmatprep.subr.mxu1 %v9110_v13 }
 0xedf   : > { %v3703_v34 = vpop.permute.xlu1 %3702 }
 0xee5   : > { %v9006_v28 = vpop.eup %9005 }
 0xee6   : > { %v3541_v29 = vsel %vm1537_vm4, %v9006_v28, 0.0 }
 0xee7   : > { %3542 = vadd.xlane.f32.xlu1 %v3541_v29 }
 0xee9   : > { %v9008_v30 = vpop.eup %9007 }
 0xeea   : > { %v3538_v32 = vsel %vm1537_vm4, %v9008_v30, 0.0 }
 0xeeb   : > { %3539 = vadd.xlane.f32.xlu0 %v3538_v32 }
 0xef8   : > { %3700 = vrot.lane.b32.xlu1 %v9425_v19, %s9126_s10 }
 0xf01   : > { %3780 = vrot.lane.b32.xlu0 %v9428_v20, %s9125_s15  ;;  %s10507_s15 = sld [smem:[#allocation6_spill]] }
 0xf05   : > { %3778 = vrot.lane.b32.xlu0 %v9428_v20, %s9126_s10 }
 0xf70   : > { %v3543_v35 = vpop.xlane.xlu1 %3542 }
 0xf71   : > { %9009 = vrcp.f32 %v3543_v35 }
 0xf74   : > { %v3540_v36 = vpop.xlane.xlu0 %3539  ;;  %v3701_v41 = vpop.permute.xlu1 %3700 }
 0xf75   : > { %9011 = vrcp.f32 %v3540_v36 }
 0xf78   : > { %v3781_v38 = vpop.permute.xlu0 %3780 }
 0xf7c   : > { %v3779_v20 = vpop.permute.xlu0 %3778 }
 0xf7e   : > { %v9010_v37 = vpop.eup %9009 }
 0xf7f   : > { %v3547_v39 = vmul.f32 %v9010_v37, %v9006_v28 }
 0xf81   : > { %8587 = vmatmul.mubr.msk.f32.vlgmr.msra.gmra.mxu1 %vm1537_vm4, %v3547_v39 }
 0xf82   : > { %v9012_v40 = vpop.eup %9011  ;;  %8595 = vmatpush3.xpose.msk.msra.mxu1 %vm1383_vm3, %v3781_v38  ;;  %8596 = vmatprep.mubr.msk.f32.mxu1 %vm9111_vm2, %v9110_v13 }
 0xf83   : > { %v3545_v19 = vmul.f32 %v9012_v40, %v9008_v30  ;;  %8604 = vmatprep.subr.mxu1 %v9110_v13 }
 0xf85   : > { %8582 = vmatmul.mubr.msk.f32.vlgmr.msra.gmra.mxu0 %vm1537_vm4, %v3545_v19  ;;  %8597 = vmatmul.mubr.msk.f32.vlgmr.msra.gmra.mxu1 %vm1383_vm3, %v3779_v20 }
 0xf86   : > { %8590 = vmatpush3.xpose.msk.msra.mxu0 %vm1383_vm3, %v3703_v34  ;;  %8591 = vmatprep.mubr.msk.f32.mxu0 %vm9111_vm2, %v9110_v13 }
 0xf87   : > { %8599 = vmatprep.subr.mxu0 %v9110_v13  ;;  %8606 = vmatprep.mubr.msk.f32.mxu1 %vm9111_vm2, %v9110_v13 }
 0xf89   : > { %8592 = vmatmul.mubr.msk.f32.vlgmr.msra.gmra.mxu0 %vm1383_vm3, %v3701_v41 }
 0xf8a   : > { %8601 = vmatprep.mubr.msk.f32.mxu0 %vm9111_vm2, %v9110_v13 }
0x1041   : > { %v3696_v42 = vpop.f32.mrf.mxu1 }
0x1043   : > { %v8588_v43 = vpop.f32.mrf.mxu1 }
0x1045   : > { %v3620_v45 = vpop.f32.mrf.mxu0  ;;  %v3852_v47 = vpop.f32.mrf.mxu1 }
0x1046   : > { %v3857_v48 = vmul.f32 0.5, %v3852_v47  ;;  %v8099_v47 = vld [vmem:[%s10509_s13] ss:$0 sm:$0xff]  ;;  %s10512_s13 = scalar_lea.vmem %s10425_s21, %s9286_s8 }
0x1047   : > { %v8583_v49 = vpop.f32.mrf.mxu0  ;;  %v8598_v50 = vpop.f32.mrf.mxu1 }
0x1048   : > { %v3861_v51 = vsel %vm1537_vm4, %v3857_v48, -inf }
0x1049   : > { %3862 = vmax.xlane.f32.xlu0 %v3861_v51  ;;  %v3774_v52 = vpop.f32.mrf.mxu0 }
0x104a   : > { %v3856_v53 = vmul.f32 0.5, %v3774_v52  ;;  %v9097_v52 = vld [vmem:[#allocation2 + $0x8] sm:$0xff] }
0x104b   : > { %v8593_v54 = vpop.f32.mrf.mxu0 }
0x104c   : > { %v3858_v55 = vsel %vm1537_vm4, %v3856_v53, -inf }
0x104d   : > { %3859 = vmax.xlane.f32.xlu1 %v3858_v55  ;;  %v9098_v55 = vld [vmem:[#allocation2] sm:$0xff] }
0x10d2   : > { %v3863_v57 = vpop.xlane.xlu0 %3862 }
0x10d3   : > { %v3865_v59 = vsub.f32 %v3857_v48, %v3863_v57 }
0x10d5   : > { %v3868_v60 = vmul.f32 1.442695, %v3865_v59 }
0x10d6   : > { %v3860_v61 = vpop.xlane.xlu1 %3859 }
0x10d7   : > { %9013 = vpow2.f32 %v3868_v60  ;;  %v3864_v62 = vsub.f32 %v3856_v53, %v3860_v61 }
0x10d9   : > { %v3866_v0 = vmul.f32 1.442695, %v3864_v62 }
0x10db   : > { %9015 = vpow2.f32 %v3866_v0 }
0x10e4   : > { %v9014_v2 = vpop.eup %9013 }
0x10e5   : > { %v3873_v4 = vsel %vm1537_vm4, %v9014_v2, 0.0 }
0x10e6   : > { %3874 = vadd.xlane.f32.xlu1 %v3873_v4 }
0x10e8   : > { %v9016_v6 = vpop.eup %9015 }
0x10e9   : > { %v3870_v7 = vsel %vm1537_vm4, %v9016_v6, 0.0 }
0x10ea   : > { %3871 = vadd.xlane.f32.xlu0 %v3870_v7 }
0x10f7   : > { %3956 = vrot.lane.b32.xlu1 %v9448_v25, %s9126_s10 }
0x10fb   : > { %4034 = vrot.lane.b32.xlu1 %v9520_v33, %s9127_s30 }
0x10ff   : > { %4042 = vrot.lane.b32.xlu1 %v9556_v5, %s10451_s19 }
0x1100   : > { %3880 = vrot.lane.b32.xlu0 %v9450_v27, %s9126_s10 }
0x1103   : > { %4050 = vrot.lane.b32.xlu1 %v9592_v46, %s10449_s9 }
0x1104   : > { %4036 = vrot.lane.b32.xlu0 %v9518_v31, %s9127_s30 }
0x1107   : > { %4058 = vrot.lane.b32.xlu1 %v9628_v23, %s10447_s29  ;;  %v4109_v23 = vld [vmem:[%s10507_s15 + $0x10] sm:$0xff] }
0x1108   : > { %4044 = vrot.lane.b32.xlu0 %v9554_v3, %s10451_s19 }
0x110b   : > { %4066 = vrot.lane.b32.xlu1 %v9664_v1, %s10445_s11  ;;  %v4107_v1 = vld [vmem:[%s10507_s15] sm:$0xff] }
0x110c   : > { %4052 = vrot.lane.b32.xlu0 %v9590_v44, %s10449_s9  ;;  %s10517_s9 = scalar_lea.vmem %s10418_s14, %s9286_s8 }
0x110f   : > { %4074 = vrot.lane.b32.xlu1 %v3620_v45, %s10443_s4 }
0x1110   : > { %4060 = vrot.lane.b32.xlu0 %v9626_v21, %s10447_s29  ;;  %v4110_v21 = vld [vmem:[%s10507_s15 + $0x18] sm:$0xff]  ;;  %s10525_s29 = sld [smem:[#allocation7_spill]] }
0x1114   : > { %4068 = vrot.lane.b32.xlu0 %v9662_v63, %s10445_s11  ;;  %v4108_v63 = vld [vmem:[%s10507_s15 + $0x8] sm:$0xff]  ;;  %s10526_s11 = scalar_lea.vmem %s10427_s23, %s9286_s8  ;;  %s10529_s15 = sld [smem:[#allocation24_spill]] }
0x1118   : > { %4076 = vrot.lane.b32.xlu0 %v3696_v42, %s10443_s4  ;;  %s10511_s4 = sld [smem:[#allocation9_spill]] }
0x111a   : > { %s10530_s19 = scalar_lea.vmem %s10529_s15, %s9286_s8 }
0x116f   : > { %v3875_v25 = vpop.xlane.xlu1 %3874 }
0x1170   : > { %9017 = vrcp.f32 %v3875_v25 }
0x1173   : > { %v3872_v27 = vpop.xlane.xlu0 %3871  ;;  %v3957_v31 = vpop.permute.xlu1 %3956 }
0x1174   : > { %9019 = vrcp.f32 %v3872_v27  ;;  %8605 = vmatpush3.msra.mxu1 %v3957_v31  ;;  %v4347_v31 = vld [vmem:[%s9328_s28 + $0x18] sm:$0xff] }
0x1177   : > { %v3881_v33 = vpop.permute.xlu0 %3880  ;;  %v4035_v14 = vpop.permute.xlu1 %4034 }
0x1178   : > { %8600 = vmatpush3.msra.mxu0 %v3881_v33  ;;  %v4088_v29 = vsel %vm1383_vm3, %v9482_v56, %v4035_v14  ;;  %v4346_v33 = vld [vmem:[%s9328_s28 + $0x10] sm:$0xff]  ;;  %v1186_v14 = vld [vmem:[%s10510_s26 + $0x18] sm:$0xff] }
0x1179   : > { %8609 = vmatprep.subr.mxu0 %v4110_v21 }
0x117b   : > { %v4037_v12 = vpop.permute.xlu0 %4036  ;;  %v4043_v16 = vpop.permute.xlu1 %4042 }
0x117c   : > { %v4089_v32 = vsel %vm1383_vm3, %v9484_v58, %v4037_v12  ;;  %v4090_v34 = vsel %vm1537_vm4, %v4088_v29, %v4043_v16  ;;  %v4249_v16 = vld [vmem:[%s9319_s3 + $0x8] sm:$0xff] }
0x117d   : > { %v9018_v3 = vpop.eup %9017 }
0x117e   : > { %v3879_v5 = vmul.f32 %v9018_v3, %v9014_v2  ;;  %v9776_v3 = vld [vmem:[%s10510_s26] sm:$0xff] }
0x117f   : > { %v4045_v15 = vpop.permute.xlu0 %4044  ;;  %v4051_v18 = vpop.permute.xlu1 %4050 }
0x1180   : > { %8607 = vmatmul.mubr.msk.f32.vlgmr.msra.gmra.mxu1 %vm1537_vm4, %v3879_v5  ;;  %v4091_v36 = vsel %vm1537_vm4, %v4089_v32, %v4045_v15  ;;  %v4093_v37 = vsel %vm4092_vm5, %v4090_v34, %v4051_v18  ;;  %v1187_v5 = vld [vmem:[%s10511_s4] sm:$0xff]  ;;  %v1190_v15 = vld [vmem:[%s10511_s4 + $0x18] sm:$0xff] }
0x1181   : > { %v9020_v44 = vpop.eup %9019  ;;  %v4343_v18 = vadd.f32 %v1190_v15, %v1186_v14 }
0x1182   : > { %v3877_v46 = vmul.f32 %v9020_v44, %v9016_v6  ;;  %v4345_v44 = vld [vmem:[%s9328_s28 + $0x8] sm:$0xff] }
0x1183   : > { %v4053_v17 = vpop.permute.xlu0 %4052  ;;  %v4059_v24 = vpop.permute.xlu1 %4058 }
0x1184   : > { %8602 = vmatmul.mubr.msk.f32.vlgmr.msra.gmra.mxu0 %vm1537_vm4, %v3877_v46  ;;  %v4094_v38 = vsel %vm4092_vm5, %v4091_v36, %v4053_v17  ;;  %v4096_v39 = vsel %vm4095_vm6, %v4093_v37, %v4059_v24  ;;  %v4340_v46 = vadd.f32 %v1187_v5, %v9776_v3  ;;  %v4248_v17 = vld [vmem:[%s9319_s3] sm:$0xff] }
0x1185   : > { %8610 = vmatpush3.msra.mxu0 %v4110_v21  ;;  %v9786_v21 = vld [vmem:[%s10510_s26 + $0x8] sm:$0xff] }
0x1186   : > { %8611 = vmatprep.subr.mxu0 %v4109_v23 }
0x1187   : > { %8612 = vmatpush3.msra.mxu0 %v4109_v23  ;;  %v4061_v22 = vpop.permute.xlu0 %4060  ;;  %v4067_v28 = vpop.permute.xlu1 %4066  ;;  %v1188_v23 = vld [vmem:[%s10511_s4 + $0x8] sm:$0xff] }
0x1188   : > { %8613 = vmatprep.subr.mxu0 %v4108_v63  ;;  %v4097_v56 = vsel %vm4095_vm6, %v4094_v38, %v4061_v22  ;;  %v4099_v40 = vsel %vm4098_vm7, %v4096_v39, %v4067_v28  ;;  %v4455_v22 = vld [vmem:[%s9337_s2 + $0x18] sm:$0xff]  ;;  %v8103_v38 = vld [vmem:[%s1161_s17] ss:$0 sm:$0xff] }
0x1189   : > { %8614 = vmatpush3.msra.mxu0 %v4108_v63  ;;  %v9794_v63 = vld [vmem:[%s10510_s26 + $0x10] sm:$0xff] }
0x118a   : > { %8615 = vmatprep.subr.mxu0 %v4107_v1 }
0x118b   : > { %8616 = vmatpush3.msra.mxu0 %v4107_v1  ;;  %v4069_v26 = vpop.permute.xlu0 %4068  ;;  %v4075_v35 = vpop.permute.xlu1 %4074  ;;  %v1189_v1 = vld [vmem:[%s10511_s4 + $0x10] sm:$0xff] }
0x118c   : > { %v4100_v19 = vsel %vm4098_vm7, %v4097_v56, %v4069_v26  ;;  %v4102_v20 = vsel %vm4101_vm8, %v4099_v40, %v4075_v35  ;;  %8631 = vmatprep.subr.mxu0 %v4347_v31  ;;  %v4342_v12 = vadd.f32 %v1189_v1, %v9794_v63  ;;  %v8102_v35 = vld [vmem:[%s10512_s13] ss:$0 sm:$0xff] }
0x118f   : > { %v4077_v30 = vpop.permute.xlu0 %4076 }
0x1190   : > { %v4103_v42 = vsel %vm4101_vm8, %v4100_v19, %v4077_v30 }
0x1240   : > { %v4028_v8 = vpop.f32.mrf.mxu1 }
0x1241   : > { %4084 = vrot.lane.b32.xlu0 %v4028_v8, %s10441_s5  ;;  %v4251_v8 = vld [vmem:[%s9319_s3 + $0x18] sm:$0xff] }
0x1242   : > { %v8608_v9 = vpop.f32.mrf.mxu1  ;;  %8620 = vmatprep.subr.mxu1 %v4251_v8 }
0x1243   : > { %v4344_v9 = vld [vmem:[%s9328_s28] sm:$0xff]  ;;  %8621 = vmatpush3.msra.mxu1 %v4251_v8 }
0x1244   : > { %v3952_v10 = vpop.f32.mrf.mxu0 }
0x1245   : > { %4082 = vrot.lane.b32.xlu1 %v3952_v10, %s10441_s5  ;;  %v4250_v10 = vld [vmem:[%s9319_s3 + $0x10] sm:$0xff]  ;;  %s10516_s5 = scalar_lea.vmem %s10515_s27, %s9286_s8  ;;  %s10527_s3 = sld [smem:[#allocation27_spill]] }
0x1246   : > { %v8603_v11 = vpop.f32.mrf.mxu0  ;;  %8622 = vmatprep.subr.mxu1 %v4250_v10 }
0x1247   : > { %v4341_v11 = vadd.f32 %v1188_v23, %v9786_v21  ;;  %8623 = vmatpush3.msra.mxu1 %v4250_v10 }
0x1248   : > { %8624 = vmatprep.subr.mxu1 %v4249_v16 }
0x1249   : > { %8625 = vmatpush3.msra.mxu1 %v4249_v16 }
0x124a   : > { %8626 = vmatprep.subr.mxu1 %v4248_v17 }
0x124b   : > { %8627 = vmatpush3.msra.mxu1 %v4248_v17  ;;  %s10528_s13 = scalar_lea.vmem %s10527_s3, %s9286_s8 }
0x124c   : > { %8645 = vmatprep.subr.mxu1 %v4455_v22 }
0x12b3   : > { %v4085_v58 = vpop.permute.xlu0 %4084 }
0x12b4   : > { %v4106_v45 = vsel %vm4104_vm9, %v4103_v42, %v4085_v58  ;;  %v9100_v42 = vld [vmem:[%s10502_s20 + $0x8] sm:$0xff] }
0x12b7   : > { %v4083_v41 = vpop.permute.xlu1 %4082 }
0x12b8   : > { %v4105_v43 = vsel %vm4104_vm9, %v4102_v20, %v4083_v41  ;;  %v9099_v20 = vld [vmem:[%s10502_s20] sm:$0xff] }
0x12b9   : > { %8617 = vmatprep.mubr.msk.f32.mxu0 %vm1206_vm1, %v4105_v43 }
0x12ba   : > { %8618 = vmatmul.mubr.msk.f32.vlgmr.msra.gmra.mxu0 %vm1206_vm1, %v4106_v45  ;;  %v4454_v45 = vld [vmem:[%s9337_s2 + $0x10] sm:$0xff] }
0x12bb   : > { %8632 = vmatpush3.msra.mxu0 %v4347_v31  ;;  %8639 = vmatprep.mubr.msk.f32.mxu0 %vm1206_vm1, %v4340_v46 }
0x12bc   : > { %8633 = vmatprep.subr.mxu0 %v4346_v33 }
0x12bd   : > { %8634 = vmatpush3.msra.mxu0 %v4346_v33 }
0x12be   : > { %8635 = vmatprep.subr.mxu0 %v4345_v44 }
0x12bf   : > { %8636 = vmatpush3.msra.mxu0 %v4345_v44 }
0x12c0   : > { %8637 = vmatprep.subr.mxu0 %v4344_v9 }
0x12c1   : > { %8638 = vmatpush3.msra.mxu0 %v4344_v9 }
0x12c2   : > { %8640 = vmatmul.mubr.msk.f32.vlgmr.msra.gmra.mxu0 %vm1206_vm1, %v4341_v11  ;;  %8659 = vmatprep.subr.mxu0 %v9110_v13 }
0x12c3   : > { %8642 = vmatprep.mubr.msk.f32.mxu0 %vm1206_vm1, %v4342_v12 }
0x12c6   : > { %8643 = vmatmul.mubr.msk.f32.gmra.mxu0 %vm1206_vm1, %v4343_v18 }
0x12c7   : > { %8663 = vmatprep.mubr.msk.f32.mxu0 %vm9111_vm2, %v9110_v13 }
0x137a   : > { %v8619_v48 = vpop.f32.mrf.mxu0 }
0x137b   : > { %v4196_v49 = vadd.f32 %v8619_v48, %v8099_v47  ;;  %v4452_v48 = vld [vmem:[%s9337_s2] sm:$0xff] }
0x137c   : > { %v4190_v50 = vpop.f32.mrf.mxu0 }
0x137d   : > { %v4191_v51 = vadd.f32 %v8099_v47, %v4190_v50  ;;  %v4200_v53 = vadd.f32 %v9097_v52, %v4196_v49  ;;  %v4453_v47 = vld [vmem:[%s9337_s2 + $0x8] sm:$0xff]  ;;  %s10513_s2 = sld [smem:[#allocation20_spill]] }
0x137f   : > { %v4206_v54 = vsel %vm1206_vm1, %v4200_v53, 0.0  ;;  %v4199_v57 = vadd.f32 %v9098_v55, %v4191_v51 }
0x1380   : > { %4207 = vadd.xlane.f32.xlu0 %v4206_v54 }
0x1381   : > { %v4203_v59 = vsel %vm1206_vm1, %v4199_v57, 0.0 }
0x1382   : > { %4204 = vadd.xlane.f32.xlu1 %v4203_v59  ;;  %v8641_v50 = vpop.f32.mrf.mxu0 }
0x1383   : > { %s10514_s28 = scalar_lea.vmem %s10513_s2, %s9286_s8  ;;  %s10537_s2 = sld [smem:[#allocation30_spill]] }
0x1384   : > { %v8107_v49 = vld [vmem:[%s10514_s28] ss:$0 sm:$0xff]  ;;  %v4433_v52 = vpop.f32.mrf.mxu0 }
0x1385   : > { %v9864_v51 = vadd.f32 %v8641_v50, %v8107_v49 }
0x1386   : > { %v8644_v54 = vpop.f32.mrf.mxu0 }
0x1387   : > { %8660 = vmatpush3.xpose.msk.msra.mxu0 %vm1383_vm3, %v9864_v51  ;;  %v9871_v55 = vadd.f32 %v8644_v54, %v8107_v49 }
0x1388   : > { %8661 = vmatprep.subr.mxu0 %v9110_v13 }
0x1409   : > { %v4208_v60 = vpop.xlane.xlu0 %4207 }
0x140a   : > { %v4211_v61 = vmul.f32 0.03125, %v4208_v60  ;;  %v8104_v60 = vld [vmem:[%s10516_s5] ss:$0 sm:$0xff] }
0x140b   : > { %v4205_v62 = vpop.xlane.xlu1 %4204 }
0x140c   : > { %v9761_v0 = vsub.f32 %v4200_v53, %v4211_v61  ;;  %v4210_v2 = vmul.f32 0.03125, %v4205_v62  ;;  %v9866_v53 = vadd.f32 %v8107_v49, %v4433_v52 }
0x140e   : > { %v9763_v4 = vsub.f32 %v4199_v57, %v4210_v2  ;;  %v4215_v6 = vmul.f32 %v9761_v0, %v9761_v0  ;;  %v4443_v57 = vpop.f32.mrf.mxu0  ;;  %8662 = vmatpush3.xpose.msk.msra.mxu0 %vm1383_vm3, %v9866_v53 }
0x140f   : > { %v9877_v59 = vadd.f32 %v8107_v49, %v4443_v57  ;;  %8673 = vmatprep.subr.mxu0 %v9110_v13 }
0x1410   : > { %v4219_v7 = vsel %vm1206_vm1, %v4215_v6, 0.0  ;;  %v4214_v25 = vmul.f32 %v9763_v4, %v9763_v4 }
0x1411   : > { %4220 = vadd.xlane.f32.xlu1 %v4219_v7 }
0x1412   : > { %v4216_v27 = vsel %vm1206_vm1, %v4214_v25, 0.0 }
0x1413   : > { %4217 = vadd.xlane.f32.xlu0 %v4216_v27 }
0x149a   : > { %v4221_v24 = vpop.xlane.xlu1 %4220 }
0x149b   : > { %v4223_v26 = vmul.f32 0.03125, %v4221_v24 }
0x149c   : > { %v4218_v28 = vpop.xlane.xlu0 %4217 }
0x149d   : > { %v4225_v29 = vadd.f32 1e-05, %v4223_v26  ;;  %v4222_v30 = vmul.f32 0.03125, %v4218_v28 }
0x149f   : > { %9021 = vrsqrt.f32 %v4225_v29  ;;  %v4224_v32 = vadd.f32 1e-05, %v4222_v30 }
0x14a1   : > { %9023 = vrsqrt.f32 %v4224_v32 }
0x14ac   : > { %v9022_v34 = vpop.eup %9021 }
0x14ad   : > { %v4229_v36 = vmul.f32 %v9022_v34, %v9761_v0 }
0x14ae   : > { %v9024_v37 = vpop.eup %9023 }
0x14af   : > { %v4228_v39 = vmul.f32 %v9024_v37, %v9763_v4  ;;  %v4237_v56 = vmul.f32 %v8102_v35, %v4229_v36  ;;  %v8112_v4 = vld [vmem:[%s10517_s9] ss:$0 sm:$0xff] }
0x14b1   : > { %v4236_v40 = vmul.f32 %v8102_v35, %v4228_v39  ;;  %v9832_v58 = vadd.f32 %v8103_v38, %v4237_v56 }
0x14b3   : > { %v9834_v19 = vadd.f32 %v8103_v38, %v4236_v40  ;;  %v4247_v43 = vadd.f32 %v9100_v42, %v9832_v58 }
0x14b5   : > { %v4246_v41 = vadd.f32 %v9099_v20, %v9834_v19 }
0x14b7   : > { %8628 = vmatprep.mubr.msk.f32.mxu1 %vm1206_vm1, %v4246_v41 }
0x14b8   : > { %8629 = vmatmul.mubr.msk.f32.vlgmr.msra.gmra.mxu1 %vm1206_vm1, %v4247_v43 }
0x14b9   : > { %8646 = vmatpush3.msra.mxu1 %v4455_v22  ;;  %8653 = vmatprep.mubr.msk.f32.mxu1 %vm1206_vm1, %v9776_v3 }
0x14ba   : > { %8647 = vmatprep.subr.mxu1 %v4454_v45 }
0x14bb   : > { %8648 = vmatpush3.msra.mxu1 %v4454_v45 }
0x14bc   : > { %8649 = vmatprep.subr.mxu1 %v4453_v47 }
0x14bd   : > { %8650 = vmatpush3.msra.mxu1 %v4453_v47 }
0x14be   : > { %8651 = vmatprep.subr.mxu1 %v4452_v48 }
0x14bf   : > { %8652 = vmatpush3.msra.mxu1 %v4452_v48 }
0x14c0   : > { %8666 = vmatprep.subr.mxu1 %v9110_v13  ;;  %8654 = vmatmul.mubr.msk.f32.vlgmr.msra.gmra.mxu1 %vm1206_vm1, %v9786_v21 }
0x14c1   : > { %8656 = vmatprep.mubr.msk.f32.mxu1 %vm1206_vm1, %v9794_v63  ;;  %8667 = vmatpush3.xpose.msk.msra.mxu1 %vm1383_vm3, %v9871_v55 }
0x14c2   : > { %8668 = vmatprep.subr.mxu1 %v9110_v13 }
0x14c4   : > { %8657 = vmatmul.mubr.msk.f32.gmra.mxu1 %vm1206_vm1, %v1186_v14 }
0x14c5   : > { %8670 = vmatprep.mubr.msk.f32.mxu1 %vm9111_vm2, %v9110_v13  ;;  %8669 = vmatpush3.xpose.msk.msra.mxu1 %vm1383_vm3, %v9877_v59 }
0x14c6   : > { %8680 = vmatprep.subr.mxu1 %v9110_v13 }
0x1578   : > { %v8630_v61 = vpop.f32.mrf.mxu1 }
0x1579   : > { %v9889_v62 = vadd.f32 %v8630_v61, %v8104_v60 }
0x157a   : > { %v4331_v0 = vpop.f32.mrf.mxu1 }
0x157b   : > { %v9891_v2 = vadd.f32 %v8104_v60, %v4331_v0  ;;  %8671 = vmatmul.mubr.msk.f32.vlgmr.msra.gmra.mxu1 %vm1383_vm3, %v9889_v62 }
0x157c   : > { %8684 = vmatprep.mubr.msk.f32.mxu1 %vm9111_vm2, %v9110_v13 }
0x157d   : > { %8664 = vmatmul.mubr.msk.f32.vlgmr.msra.gmra.mxu0 %vm1383_vm3, %v9891_v2 }
0x157e   : > { %8677 = vmatprep.mubr.msk.f32.mxu0 %vm9111_vm2, %v9110_v13 }
0x1580   : > { %v8655_v6 = vpop.f32.mrf.mxu1 }
0x1581   : > { %v9906_v7 = vadd.f32 %v8655_v6, %v8112_v4 }
0x1582   : > { %v4541_v25 = vpop.f32.mrf.mxu1 }
0x1583   : > { %v9908_v27 = vadd.f32 %v8112_v4, %v4541_v25  ;;  %8674 = vmatpush3.msra.mxu0 %v9906_v7 }
0x1584   : > { %v8658_v31 = vpop.f32.mrf.mxu1  ;;  %8675 = vmatprep.subr.mxu0 %v9110_v13 }
0x1585   : > { %v9912_v33 = vadd.f32 %v8658_v31, %v8112_v4  ;;  %8676 = vmatpush3.msra.mxu0 %v9908_v27 }
0x1586   : > { %v4551_v3 = vpop.f32.mrf.mxu1  ;;  %8687 = vmatprep.subr.mxu0 %v9110_v13 }
0x1587   : > { %v9916_v5 = vadd.f32 %v8112_v4, %v4551_v3  ;;  %8681 = vmatpush3.msra.mxu1 %v9912_v33 }
0x1588   : > { %8682 = vmatprep.subr.mxu1 %v9110_v13 }
0x1589   : > { %8683 = vmatpush3.msra.mxu1 %v9916_v5 }
0x158a   : > { %8694 = vmatprep.subr.mxu1 %v9110_v13 }
0x163b   : > { %v4714_v44 = vpop.f32.mrf.mxu1 }
0x163c   : > { %v4719_v46 = vmul.f32 0.5, %v4714_v44 }
0x163d   : > { %v4635_v21 = vpop.f32.mrf.mxu0  ;;  %v8672_v23 = vpop.f32.mrf.mxu1 }
0x163e   : > { %v4718_v63 = vmul.f32 0.5, %v4635_v21  ;;  %v4723_v1 = vsel %vm4095_vm6, %v4719_v46, -inf }
0x163f   : > { %4724 = vmax.xlane.f32.xlu1 %v4723_v1  ;;  %v8665_v8 = vpop.f32.mrf.mxu0 }
0x1640   : > { %v4720_v9 = vsel %vm4095_vm6, %v4718_v63, -inf }
0x1641   : > { %4721 = vmax.xlane.f32.xlu0 %v4720_v9 }
0x16c8   : > { %v4725_v10 = vpop.xlane.xlu1 %4724 }
0x16c9   : > { %v4727_v11 = vsub.f32 %v4719_v46, %v4725_v10 }
0x16ca   : > { %v4722_v12 = vpop.xlane.xlu0 %4721 }
0x16cb   : > { %v4730_v14 = vmul.f32 1.442695, %v4727_v11  ;;  %v4726_v15 = vsub.f32 %v4718_v63, %v4722_v12 }
0x16cd   : > { %9025 = vpow2.f32 %v4730_v14  ;;  %v4728_v16 = vmul.f32 1.442695, %v4726_v15 }
0x16cf   : > { %9027 = vpow2.f32 %v4728_v16 }
0x16da   : > { %v9026_v17 = vpop.eup %9025 }
0x16db   : > { %v4735_v18 = vsel %vm4095_vm6, %v9026_v17, 0.0 }
0x16dc   : > { %v9028_v22 = vpop.eup %9027  ;;  %4736 = vadd.xlane.f32.xlu1 %v4735_v18 }
0x16dd   : > { %v4732_v24 = vsel %vm4095_vm6, %v9028_v22, 0.0 }
0x16de   : > { %4733 = vadd.xlane.f32.xlu0 %v4732_v24 }
0x16ed   : > { %4974 = vrot.lane.b32.xlu1 %v9871_v55, %s9114_s18 }
0x16f1   : > { %4890 = vrot.lane.b32.xlu1 %v9866_v53, %s9114_s18 }
0x16f4   : > { %4892 = vrot.lane.b32.xlu0 %v9864_v51, %s9114_s18 }
0x16f5   : > { %4888 = vrot.lane.b32.xlu1 %v9891_v2, %s9114_s18 }
0x16f8   : > { %4972 = vrot.lane.b32.xlu0 %v9877_v59, %s9114_s18 }
0x16fc   : > { %4970 = vrot.lane.b32.xlu0 %v9889_v62, %s9114_s18 }
0x1765   : > { %v4737_v26 = vpop.xlane.xlu1 %4736 }
0x1766   : > { %9029 = vrcp.f32 %v4737_v26 }
0x1767   : > { %v4734_v28 = vpop.xlane.xlu0 %4733 }
0x1768   : > { %9031 = vrcp.f32 %v4734_v28 }
0x1769   : > { %v4975_v32 = vpop.permute.xlu1 %4974 }
0x176b   : > { %v4893_v29 = vpop.permute.xlu0 %4892 }
0x176d   : > { %v4891_v38 = vpop.permute.xlu1 %4890 }
0x176f   : > { %v4973_v37 = vpop.permute.xlu0 %4972 }
0x1771   : > { %v4889_v56 = vpop.permute.xlu1 %4888 }
0x1773   : > { %v9030_v30 = vpop.eup %9029  ;;  %v4971_v39 = vpop.permute.xlu0 %4970 }
0x1774   : > { %v4741_v34 = vmul.f32 %v9030_v30, %v9026_v17 }
0x1775   : > { %v9032_v35 = vpop.eup %9031 }
0x1776   : > { %8685 = vmatmul.mubr.msk.f32.vlgmr.msra.gmra.mxu1 %vm4095_vm6, %v4741_v34  ;;  %v4739_v36 = vmul.f32 %v9032_v35, %v9028_v22 }
0x1777   : > { %8695 = vmatpush3.xpose.msk.msra.mxu1 %vm1383_vm3, %v4975_v32  ;;  %8698 = vmatprep.mubr.msk.f32.mxu1 %vm9111_vm2, %v9110_v13 }
0x1778   : > { %8678 = vmatmul.mubr.msk.f32.vlgmr.msra.gmra.mxu0 %vm4095_vm6, %v4739_v36  ;;  %8696 = vmatprep.subr.mxu1 %v9110_v13 }
0x1779   : > { %8688 = vmatpush3.xpose.msk.msra.mxu0 %vm1383_vm3, %v4893_v29  ;;  %8691 = vmatprep.mubr.msk.f32.mxu0 %vm9111_vm2, %v9110_v13 }
0x177a   : > { %8689 = vmatprep.subr.mxu0 %v9110_v13 }
0x177b   : > { %8697 = vmatpush3.xpose.msk.msra.mxu1 %vm1383_vm3, %v4973_v37 }
0x177c   : > { %8708 = vmatprep.subr.mxu1 %v9110_v13 }
0x177d   : > { %8690 = vmatpush3.xpose.msk.msra.mxu0 %vm1383_vm3, %v4891_v38 }
0x177e   : > { %8699 = vmatmul.mubr.msk.f32.vlgmr.msra.gmra.mxu1 %vm1383_vm3, %v4971_v39  ;;  %8701 = vmatprep.subr.mxu0 %v9110_v13 }
0x177f   : > { %8712 = vmatprep.mubr.msk.f32.mxu1 %vm9111_vm2, %v9110_v13 }
0x1780   : > { %8692 = vmatmul.mubr.msk.f32.vlgmr.msra.gmra.mxu0 %vm1383_vm3, %v4889_v56 }
0x1781   : > { %8705 = vmatprep.mubr.msk.f32.mxu0 %vm9111_vm2, %v9110_v13 }
0x1836   : > { %v9958_v40 = vpop.f32.mrf.mxu1 }
0x1838   : > { %v9960_v20 = vpop.f32.mrf.mxu0  ;;  %v8686_v41 = vpop.f32.mrf.mxu1 }
0x183a   : > { %v8679_v42 = vpop.f32.mrf.mxu0 }
0x183e   : > { %v5048_v43 = vpop.f32.mrf.mxu1 }
0x183f   : > { %v5053_v45 = vmul.f32 0.5, %v5048_v43 }
0x1840   : > { %v4966_v47 = vpop.f32.mrf.mxu0  ;;  %v8700_v48 = vpop.f32.mrf.mxu1 }
0x1841   : > { %v5052_v49 = vmul.f32 0.5, %v4966_v47  ;;  %v5057_v50 = vsel %vm4095_vm6, %v5053_v45, -inf }
0x1842   : > { %5058 = vmax.xlane.f32.xlu0 %v5057_v50  ;;  %v8693_v52 = vpop.f32.mrf.mxu0 }
0x1843   : > { %v5054_v54 = vsel %vm4095_vm6, %v5052_v49, -inf }
0x1844   : > { %5055 = vmax.xlane.f32.xlu1 %v5054_v54 }
0x1855   : > { %5161 = vrot.lane.b32.xlu1 %v9912_v33, %s9114_s18 }
0x1858   : > { %5080 = vrot.lane.b32.xlu0 %v9906_v7, %s9114_s18 }
0x1859   : > { %5078 = vrot.lane.b32.xlu1 %v9908_v27, %s9114_s18 }
0x185c   : > { %5159 = vrot.lane.b32.xlu0 %v9916_v5, %s9114_s18  ;;  %s10518_s18 = smov 8  }
0x185d   : > { %5242 = vrot.lane.b32.xlu1 %v9864_v51, %s9116_s25 }
0x18cb   : > { %v5059_v57 = vpop.xlane.xlu0 %5058 }
0x18cc   : > { %v5061_v60 = vsub.f32 %v5053_v45, %v5059_v57 }
0x18cd   : > { %v5056_v61 = vpop.xlane.xlu1 %5055 }
0x18ce   : > { %v5064_v0 = vmul.f32 1.442695, %v5061_v60  ;;  %v5060_v4 = vsub.f32 %v5052_v49, %v5056_v61 }
0x18cf   : > { %v5081_v6 = vpop.permute.xlu0 %5080 }
0x18d0   : > { %9033 = vpow2.f32 %v5064_v0  ;;  %v5062_v25 = vmul.f32 1.442695, %v5060_v4  ;;  %8702 = vmatpush3.msra.mxu0 %v5081_v6 }
0x18d1   : > { %v5162_v31 = vpop.permute.xlu1 %5161  ;;  %8703 = vmatprep.subr.mxu0 %v9110_v13 }
0x18d2   : > { %9035 = vpow2.f32 %v5062_v25  ;;  %8709 = vmatpush3.msra.mxu1 %v5162_v31 }
0x18d3   : > { %v5160_v3 = vpop.permute.xlu0 %5159  ;;  %8710 = vmatprep.subr.mxu1 %v9110_v13 }
0x18d4   : > { %8711 = vmatpush3.msra.mxu1 %v5160_v3 }
0x18d5   : > { %v5079_v44 = vpop.permute.xlu1 %5078  ;;  %8722 = vmatprep.subr.mxu1 %v9110_v13 }
0x18d6   : > { %8704 = vmatpush3.msra.mxu0 %v5079_v44 }
0x18d7   : > { %8715 = vmatprep.subr.mxu0 %v9110_v13 }
0x18d9   : > { %v5243_v1 = vpop.permute.xlu1 %5242 }
0x18dd   : > { %v9034_v46 = vpop.eup %9033 }
0x18de   : > { %v5069_v21 = vsel %vm4095_vm6, %v9034_v46, 0.0 }
0x18df   : > { %v9036_v23 = vpop.eup %9035  ;;  %5070 = vadd.xlane.f32.xlu1 %v5069_v21 }
0x18e0   : > { %v5066_v63 = vsel %vm4095_vm6, %v9036_v23, 0.0 }
0x18e1   : > { %5067 = vadd.xlane.f32.xlu0 %v5066_v63 }
0x18f0   : > { %5240 = vrot.lane.b32.xlu1 %v9866_v53, %s9116_s25 }
0x18f4   : > { %5238 = vrot.lane.b32.xlu1 %v9891_v2, %s9116_s25 }
0x18f7   : > { %5324 = vrot.lane.b32.xlu0 %v9871_v55, %s9116_s25 }
0x18fb   : > { %5322 = vrot.lane.b32.xlu0 %v9877_v59, %s9116_s25 }
0x18ff   : > { %5320 = vrot.lane.b32.xlu0 %v9889_v62, %s9116_s25 }
0x1968   : > { %v5071_v8 = vpop.xlane.xlu1 %5070 }
0x1969   : > { %9037 = vrcp.f32 %v5071_v8 }
0x196a   : > { %v5068_v9 = vpop.xlane.xlu0 %5067 }
0x196b   : > { %9039 = vrcp.f32 %v5068_v9 }
0x196c   : > { %v5241_v17 = vpop.permute.xlu1 %5240 }
0x196e   : > { %v5325_v10 = vpop.permute.xlu0 %5324 }
0x1970   : > { %v5239_v22 = vpop.permute.xlu1 %5238 }
0x1972   : > { %v5323_v16 = vpop.permute.xlu0 %5322 }
0x1976   : > { %v9038_v11 = vpop.eup %9037  ;;  %v5321_v18 = vpop.permute.xlu0 %5320 }
0x1977   : > { %v5075_v12 = vmul.f32 %v9038_v11, %v9034_v46 }
0x1978   : > { %v9040_v14 = vpop.eup %9039 }
0x1979   : > { %8713 = vmatmul.mubr.msk.f32.vlgmr.msra.gmra.mxu1 %vm4095_vm6, %v5075_v12  ;;  %v5073_v15 = vmul.f32 %v9040_v14, %v9036_v23 }
0x197a   : > { %8723 = vmatpush3.xpose.msk.msra.mxu1 %vm1383_vm3, %v5325_v10  ;;  %8726 = vmatprep.mubr.msk.f32.mxu1 %vm9111_vm2, %v9110_v13 }
0x197b   : > { %8706 = vmatmul.mubr.msk.f32.vlgmr.msra.gmra.mxu0 %vm4095_vm6, %v5073_v15  ;;  %8724 = vmatprep.subr.mxu1 %v9110_v13 }
0x197c   : > { %8716 = vmatpush3.xpose.msk.msra.mxu0 %vm1383_vm3, %v5243_v1  ;;  %8719 = vmatprep.mubr.msk.f32.mxu0 %vm9111_vm2, %v9110_v13 }
0x197d   : > { %8717 = vmatprep.subr.mxu0 %v9110_v13 }
0x197e   : > { %8725 = vmatpush3.xpose.msk.msra.mxu1 %vm1383_vm3, %v5323_v16 }
0x197f   : > { %8736 = vmatprep.subr.mxu1 %v9110_v13 }
0x1980   : > { %8718 = vmatpush3.xpose.msk.msra.mxu0 %vm1383_vm3, %v5241_v17 }
0x1981   : > { %8727 = vmatmul.mubr.msk.f32.vlgmr.msra.gmra.mxu1 %vm1383_vm3, %v5321_v18  ;;  %8729 = vmatprep.subr.mxu0 %v9110_v13 }
0x1982   : > { %8740 = vmatprep.mubr.msk.f32.mxu1 %vm9111_vm2, %v9110_v13 }
0x1983   : > { %8720 = vmatmul.mubr.msk.f32.vlgmr.msra.gmra.mxu0 %vm1383_vm3, %v5239_v22 }
0x1984   : > { %8733 = vmatprep.mubr.msk.f32.mxu0 %vm9111_vm2, %v9110_v13 }
0x1a39   : > { %v10010_v24 = vpop.f32.mrf.mxu1 }
0x1a3b   : > { %v10012_v26 = vpop.f32.mrf.mxu0  ;;  %v8714_v28 = vpop.f32.mrf.mxu1 }
0x1a3d   : > { %v8707_v29 = vpop.f32.mrf.mxu0 }
0x1a41   : > { %v5398_v30 = vpop.f32.mrf.mxu1 }
0x1a42   : > { %v5403_v32 = vmul.f32 0.5, %v5398_v30 }
0x1a43   : > { %v5316_v34 = vpop.f32.mrf.mxu0  ;;  %v8728_v35 = vpop.f32.mrf.mxu1 }
0x1a44   : > { %v5402_v36 = vmul.f32 0.5, %v5316_v34  ;;  %v5407_v37 = vsel %vm4095_vm6, %v5403_v32, -inf }
0x1a45   : > { %5408 = vmax.xlane.f32.xlu0 %v5407_v37  ;;  %v8721_v38 = vpop.f32.mrf.mxu0 }
0x1a46   : > { %v5404_v39 = vsel %vm4095_vm6, %v5402_v36, -inf }
0x1a47   : > { %5405 = vmax.xlane.f32.xlu1 %v5404_v39 }
0x1a58   : > { %5507 = vrot.lane.b32.xlu1 %v9912_v33, %s9116_s25 }
0x1a5b   : > { %5428 = vrot.lane.b32.xlu0 %v9906_v7, %s9116_s25 }
0x1a5c   : > { %5426 = vrot.lane.b32.xlu1 %v9908_v27, %s9116_s25 }
0x1a5f   : > { %5505 = vrot.lane.b32.xlu0 %v9916_v5, %s9116_s25  ;;  %s10519_s25 = smov 12  }
0x1a60   : > { %5588 = vrot.lane.b32.xlu1 %v9864_v51, %s9118_s1 }
0x1ace   : > { %v5409_v56 = vpop.xlane.xlu0 %5408 }
0x1acf   : > { %v5411_v41 = vsub.f32 %v5403_v32, %v5409_v56 }
0x1ad0   : > { %v5406_v42 = vpop.xlane.xlu1 %5405 }
0x1ad1   : > { %v5414_v43 = vmul.f32 1.442695, %v5411_v41  ;;  %v5410_v45 = vsub.f32 %v5402_v36, %v5406_v42 }
0x1ad2   : > { %v5429_v47 = vpop.permute.xlu0 %5428 }
0x1ad3   : > { %9041 = vpow2.f32 %v5414_v43  ;;  %v5412_v48 = vmul.f32 1.442695, %v5410_v45  ;;  %8730 = vmatpush3.msra.mxu0 %v5429_v47 }
0x1ad4   : > { %v5508_v49 = vpop.permute.xlu1 %5507  ;;  %8731 = vmatprep.subr.mxu0 %v9110_v13 }
0x1ad5   : > { %9043 = vpow2.f32 %v5412_v48  ;;  %8737 = vmatpush3.msra.mxu1 %v5508_v49 }
0x1ad6   : > { %v5506_v50 = vpop.permute.xlu0 %5505  ;;  %8738 = vmatprep.subr.mxu1 %v9110_v13 }
0x1ad7   : > { %8739 = vmatpush3.msra.mxu1 %v5506_v50 }
0x1ad8   : > { %v5427_v52 = vpop.permute.xlu1 %5426  ;;  %8750 = vmatprep.subr.mxu1 %v9110_v13 }
0x1ad9   : > { %8732 = vmatpush3.msra.mxu0 %v5427_v52 }
0x1ada   : > { %8743 = vmatprep.subr.mxu0 %v9110_v13 }
0x1adc   : > { %v5589_v0 = vpop.permute.xlu1 %5588 }
0x1ae0   : > { %v9042_v54 = vpop.eup %9041 }
0x1ae1   : > { %v5419_v57 = vsel %vm4095_vm6, %v9042_v54, 0.0 }
0x1ae2   : > { %v9044_v60 = vpop.eup %9043  ;;  %5420 = vadd.xlane.f32.xlu1 %v5419_v57 }
0x1ae3   : > { %v5416_v61 = vsel %vm4095_vm6, %v9044_v60, 0.0 }
0x1ae4   : > { %5417 = vadd.xlane.f32.xlu0 %v5416_v61 }
0x1af3   : > { %5586 = vrot.lane.b32.xlu1 %v9866_v53, %s9118_s1 }
0x1af7   : > { %5584 = vrot.lane.b32.xlu1 %v9891_v2, %s9118_s1 }
0x1afa   : > { %5670 = vrot.lane.b32.xlu0 %v9871_v55, %s9118_s1 }
0x1afe   : > { %5668 = vrot.lane.b32.xlu0 %v9877_v59, %s9118_s1 }
0x1b02   : > { %5666 = vrot.lane.b32.xlu0 %v9889_v62, %s9118_s1 }
0x1b6b   : > { %v5421_v4 = vpop.xlane.xlu1 %5420 }
0x1b6c   : > { %9045 = vrcp.f32 %v5421_v4 }
0x1b6d   : > { %v5418_v6 = vpop.xlane.xlu0 %5417 }
0x1b6e   : > { %9047 = vrcp.f32 %v5418_v6 }
0x1b6f   : > { %v5587_v23 = vpop.permute.xlu1 %5586 }
0x1b71   : > { %v5671_v25 = vpop.permute.xlu0 %5670 }
0x1b73   : > { %v5585_v1 = vpop.permute.xlu1 %5584 }
0x1b75   : > { %v5669_v21 = vpop.permute.xlu0 %5668 }
0x1b79   : > { %v9046_v31 = vpop.eup %9045  ;;  %v5667_v63 = vpop.permute.xlu0 %5666 }
0x1b7a   : > { %v5425_v3 = vmul.f32 %v9046_v31, %v9042_v54 }
0x1b7b   : > { %v9048_v44 = vpop.eup %9047 }
0x1b7c   : > { %8741 = vmatmul.mubr.msk.f32.vlgmr.msra.gmra.mxu1 %vm4095_vm6, %v5425_v3  ;;  %v5423_v46 = vmul.f32 %v9048_v44, %v9044_v60 }
0x1b7d   : > { %8751 = vmatpush3.xpose.msk.msra.mxu1 %vm1383_vm3, %v5671_v25  ;;  %8754 = vmatprep.mubr.msk.f32.mxu1 %vm9111_vm2, %v9110_v13 }
0x1b7e   : > { %8734 = vmatmul.mubr.msk.f32.vlgmr.msra.gmra.mxu0 %vm4095_vm6, %v5423_v46  ;;  %8752 = vmatprep.subr.mxu1 %v9110_v13 }
0x1b7f   : > { %8744 = vmatpush3.xpose.msk.msra.mxu0 %vm1383_vm3, %v5589_v0  ;;  %8747 = vmatprep.mubr.msk.f32.mxu0 %vm9111_vm2, %v9110_v13 }
0x1b80   : > { %8745 = vmatprep.subr.mxu0 %v9110_v13 }
0x1b81   : > { %8753 = vmatpush3.xpose.msk.msra.mxu1 %vm1383_vm3, %v5669_v21 }
0x1b82   : > { %8764 = vmatprep.subr.mxu1 %v9110_v13 }
0x1b83   : > { %8746 = vmatpush3.xpose.msk.msra.mxu0 %vm1383_vm3, %v5587_v23 }
0x1b84   : > { %8755 = vmatmul.mubr.msk.f32.vlgmr.msra.gmra.mxu1 %vm1383_vm3, %v5667_v63  ;;  %8757 = vmatprep.subr.mxu0 %v9110_v13 }
0x1b85   : > { %8768 = vmatprep.mubr.msk.f32.mxu1 %vm9111_vm2, %v9110_v13 }
0x1b86   : > { %8748 = vmatmul.mubr.msk.f32.vlgmr.msra.gmra.mxu0 %vm1383_vm3, %v5585_v1 }
0x1b87   : > { %8761 = vmatprep.mubr.msk.f32.mxu0 %vm9111_vm2, %v9110_v13 }
0x1c3c   : > { %v10062_v8 = vpop.f32.mrf.mxu1 }
0x1c3e   : > { %v10064_v9 = vpop.f32.mrf.mxu0  ;;  %v8742_v10 = vpop.f32.mrf.mxu1 }
0x1c40   : > { %v8735_v11 = vpop.f32.mrf.mxu0 }
0x1c44   : > { %v5744_v12 = vpop.f32.mrf.mxu1 }
0x1c45   : > { %v5749_v14 = vmul.f32 0.5, %v5744_v12 }
0x1c46   : > { %v5662_v15 = vpop.f32.mrf.mxu0  ;;  %v8756_v16 = vpop.f32.mrf.mxu1 }
0x1c47   : > { %v5748_v17 = vmul.f32 0.5, %v5662_v15  ;;  %v5753_v18 = vsel %vm4095_vm6, %v5749_v14, -inf }
0x1c48   : > { %5754 = vmax.xlane.f32.xlu0 %v5753_v18  ;;  %v8749_v22 = vpop.f32.mrf.mxu0 }
0x1c49   : > { %v5750_v28 = vsel %vm4095_vm6, %v5748_v17, -inf }
0x1c4a   : > { %5751 = vmax.xlane.f32.xlu1 %v5750_v28 }
0x1c5b   : > { %5853 = vrot.lane.b32.xlu1 %v9912_v33, %s9118_s1 }
0x1c5e   : > { %5774 = vrot.lane.b32.xlu0 %v9906_v7, %s9118_s1 }
0x1c5f   : > { %5772 = vrot.lane.b32.xlu1 %v9908_v27, %s9118_s1 }
0x1c62   : > { %5851 = vrot.lane.b32.xlu0 %v9916_v5, %s9118_s1  ;;  %s10520_s1 = smov 16  }
0x1c63   : > { %5934 = vrot.lane.b32.xlu1 %v9864_v51, %s9120_s6 }
0x1cd1   : > { %v5755_v29 = vpop.xlane.xlu0 %5754 }
0x1cd2   : > { %v5757_v30 = vsub.f32 %v5749_v14, %v5755_v29 }
0x1cd3   : > { %v5752_v32 = vpop.xlane.xlu1 %5751 }
0x1cd4   : > { %v5760_v34 = vmul.f32 1.442695, %v5757_v30  ;;  %v5756_v35 = vsub.f32 %v5748_v17, %v5752_v32 }
0x1cd5   : > { %v5775_v36 = vpop.permute.xlu0 %5774 }
0x1cd6   : > { %9049 = vpow2.f32 %v5760_v34  ;;  %v5758_v37 = vmul.f32 1.442695, %v5756_v35  ;;  %8758 = vmatpush3.msra.mxu0 %v5775_v36 }
0x1cd7   : > { %v5854_v38 = vpop.permute.xlu1 %5853  ;;  %8759 = vmatprep.subr.mxu0 %v9110_v13 }
0x1cd8   : > { %9051 = vpow2.f32 %v5758_v37  ;;  %8765 = vmatpush3.msra.mxu1 %v5854_v38 }
0x1cd9   : > { %v5852_v39 = vpop.permute.xlu0 %5851  ;;  %8766 = vmatprep.subr.mxu1 %v9110_v13 }
0x1cda   : > { %8767 = vmatpush3.msra.mxu1 %v5852_v39 }
0x1cdb   : > { %v5773_v56 = vpop.permute.xlu1 %5772  ;;  %8778 = vmatprep.subr.mxu1 %v9110_v13 }
0x1cdc   : > { %8760 = vmatpush3.msra.mxu0 %v5773_v56 }
0x1cdd   : > { %8771 = vmatprep.subr.mxu0 %v9110_v13 }
0x1cdf   : > { %v5935_v47 = vpop.permute.xlu1 %5934 }
0x1ce3   : > { %v9050_v41 = vpop.eup %9049 }
0x1ce4   : > { %v5765_v42 = vsel %vm4095_vm6, %v9050_v41, 0.0 }
0x1ce5   : > { %v9052_v43 = vpop.eup %9051  ;;  %5766 = vadd.xlane.f32.xlu1 %v5765_v42 }
0x1ce6   : > { %v5762_v45 = vsel %vm4095_vm6, %v9052_v43, 0.0 }
0x1ce7   : > { %5763 = vadd.xlane.f32.xlu0 %v5762_v45 }
0x1cf6   : > { %5932 = vrot.lane.b32.xlu1 %v9866_v53, %s9120_s6 }
0x1cfa   : > { %5930 = vrot.lane.b32.xlu1 %v9891_v2, %s9120_s6 }
0x1cfd   : > { %6016 = vrot.lane.b32.xlu0 %v9871_v55, %s9120_s6 }
0x1d01   : > { %6014 = vrot.lane.b32.xlu0 %v9877_v59, %s9120_s6 }
0x1d05   : > { %6012 = vrot.lane.b32.xlu0 %v9889_v62, %s9120_s6 }
0x1d6e   : > { %v5767_v48 = vpop.xlane.xlu1 %5766 }
0x1d6f   : > { %9053 = vrcp.f32 %v5767_v48 }
0x1d70   : > { %v5764_v49 = vpop.xlane.xlu0 %5763 }
0x1d71   : > { %9055 = vrcp.f32 %v5764_v49 }
0x1d72   : > { %v5933_v0 = vpop.permute.xlu1 %5932 }
0x1d74   : > { %v6017_v50 = vpop.permute.xlu0 %6016 }
0x1d76   : > { %v5931_v6 = vpop.permute.xlu1 %5930 }
0x1d78   : > { %v6015_v61 = vpop.permute.xlu0 %6014 }
0x1d7c   : > { %v9054_v52 = vpop.eup %9053  ;;  %v6013_v4 = vpop.permute.xlu0 %6012 }
0x1d7d   : > { %v5771_v54 = vmul.f32 %v9054_v52, %v9050_v41 }
0x1d7e   : > { %v9056_v57 = vpop.eup %9055 }
0x1d7f   : > { %8769 = vmatmul.mubr.msk.f32.vlgmr.msra.gmra.mxu1 %vm4095_vm6, %v5771_v54  ;;  %v5769_v60 = vmul.f32 %v9056_v57, %v9052_v43 }
0x1d80   : > { %8779 = vmatpush3.xpose.msk.msra.mxu1 %vm1383_vm3, %v6017_v50  ;;  %8782 = vmatprep.mubr.msk.f32.mxu1 %vm9111_vm2, %v9110_v13 }
0x1d81   : > { %8762 = vmatmul.mubr.msk.f32.vlgmr.msra.gmra.mxu0 %vm4095_vm6, %v5769_v60  ;;  %8780 = vmatprep.subr.mxu1 %v9110_v13 }
0x1d82   : > { %8772 = vmatpush3.xpose.msk.msra.mxu0 %vm1383_vm3, %v5935_v47  ;;  %8775 = vmatprep.mubr.msk.f32.mxu0 %vm9111_vm2, %v9110_v13 }
0x1d83   : > { %8773 = vmatprep.subr.mxu0 %v9110_v13 }
0x1d84   : > { %8781 = vmatpush3.xpose.msk.msra.mxu1 %vm1383_vm3, %v6015_v61 }
0x1d85   : > { %8792 = vmatprep.subr.mxu1 %v9110_v13 }
0x1d86   : > { %8774 = vmatpush3.xpose.msk.msra.mxu0 %vm1383_vm3, %v5933_v0 }
0x1d87   : > { %8783 = vmatmul.mubr.msk.f32.vlgmr.msra.gmra.mxu1 %vm1383_vm3, %v6013_v4  ;;  %8785 = vmatprep.subr.mxu0 %v9110_v13 }
0x1d88   : > { %8796 = vmatprep.mubr.msk.f32.mxu1 %vm9111_vm2, %v9110_v13 }
0x1d89   : > { %8776 = vmatmul.mubr.msk.f32.vlgmr.msra.gmra.mxu0 %vm1383_vm3, %v5931_v6 }
0x1d8a   : > { %8789 = vmatprep.mubr.msk.f32.mxu0 %vm9111_vm2, %v9110_v13 }
0x1e3f   : > { %v10114_v25 = vpop.f32.mrf.mxu1 }
0x1e41   : > { %v10116_v31 = vpop.f32.mrf.mxu0  ;;  %v8770_v3 = vpop.f32.mrf.mxu1 }
0x1e43   : > { %v8763_v44 = vpop.f32.mrf.mxu0 }
0x1e47   : > { %v6090_v46 = vpop.f32.mrf.mxu1 }
0x1e48   : > { %v6095_v21 = vmul.f32 0.5, %v6090_v46 }
0x1e49   : > { %v6008_v23 = vpop.f32.mrf.mxu0  ;;  %v8784_v63 = vpop.f32.mrf.mxu1 }
0x1e4a   : > { %v6094_v1 = vmul.f32 0.5, %v6008_v23  ;;  %v6099_v10 = vsel %vm4095_vm6, %v6095_v21, -inf }
0x1e4b   : > { %6100 = vmax.xlane.f32.xlu0 %v6099_v10  ;;  %v8777_v11 = vpop.f32.mrf.mxu0 }
0x1e4c   : > { %v6096_v12 = vsel %vm4095_vm6, %v6094_v1, -inf }
0x1e4d   : > { %6097 = vmax.xlane.f32.xlu1 %v6096_v12 }
0x1e5e   : > { %6199 = vrot.lane.b32.xlu1 %v9912_v33, %s9120_s6 }
0x1e61   : > { %6120 = vrot.lane.b32.xlu0 %v9906_v7, %s9120_s6 }
0x1e62   : > { %6118 = vrot.lane.b32.xlu1 %v9908_v27, %s9120_s6 }
0x1e65   : > { %6197 = vrot.lane.b32.xlu0 %v9916_v5, %s9120_s6  ;;  %s10521_s6 = smov 20  }
0x1e66   : > { %6280 = vrot.lane.b32.xlu1 %v9864_v51, %s9122_s7 }
0x1ed4   : > { %v6101_v14 = vpop.xlane.xlu0 %6100 }
0x1ed5   : > { %v6103_v15 = vsub.f32 %v6095_v21, %v6101_v14 }
0x1ed6   : > { %v6098_v16 = vpop.xlane.xlu1 %6097 }
0x1ed7   : > { %v6106_v17 = vmul.f32 1.442695, %v6103_v15  ;;  %v6102_v18 = vsub.f32 %v6094_v1, %v6098_v16 }
0x1ed8   : > { %v6121_v22 = vpop.permute.xlu0 %6120 }
0x1ed9   : > { %9057 = vpow2.f32 %v6106_v17  ;;  %v6104_v28 = vmul.f32 1.442695, %v6102_v18  ;;  %8786 = vmatpush3.msra.mxu0 %v6121_v22 }
0x1eda   : > { %v6200_v29 = vpop.permute.xlu1 %6199  ;;  %8787 = vmatprep.subr.mxu0 %v9110_v13 }
0x1edb   : > { %9059 = vpow2.f32 %v6104_v28  ;;  %8793 = vmatpush3.msra.mxu1 %v6200_v29 }
0x1edc   : > { %v6198_v30 = vpop.permute.xlu0 %6197  ;;  %8794 = vmatprep.subr.mxu1 %v9110_v13 }
0x1edd   : > { %8795 = vmatpush3.msra.mxu1 %v6198_v30 }
0x1ede   : > { %v6119_v32 = vpop.permute.xlu1 %6118  ;;  %8806 = vmatprep.subr.mxu1 %v9110_v13 }
0x1edf   : > { %8788 = vmatpush3.msra.mxu0 %v6119_v32 }
0x1ee0   : > { %8799 = vmatprep.subr.mxu0 %v9110_v13 }
0x1ee2   : > { %v6281_v38 = vpop.permute.xlu1 %6280 }
0x1ee6   : > { %v9058_v34 = vpop.eup %9057 }
0x1ee7   : > { %v6111_v35 = vsel %vm4095_vm6, %v9058_v34, 0.0 }
0x1ee8   : > { %v9060_v36 = vpop.eup %9059  ;;  %6112 = vadd.xlane.f32.xlu1 %v6111_v35 }
0x1ee9   : > { %v6108_v37 = vsel %vm4095_vm6, %v9060_v36, 0.0 }
0x1eea   : > { %6109 = vadd.xlane.f32.xlu0 %v6108_v37 }
0x1ef9   : > { %6278 = vrot.lane.b32.xlu1 %v9866_v53, %s9122_s7 }
0x1efd   : > { %6276 = vrot.lane.b32.xlu1 %v9891_v2, %s9122_s7 }
0x1f00   : > { %6362 = vrot.lane.b32.xlu0 %v9871_v55, %s9122_s7 }
0x1f04   : > { %6360 = vrot.lane.b32.xlu0 %v9877_v59, %s9122_s7 }
0x1f08   : > { %6358 = vrot.lane.b32.xlu0 %v9889_v62, %s9122_s7 }
0x1f71   : > { %v6113_v39 = vpop.xlane.xlu1 %6112 }
0x1f72   : > { %9061 = vrcp.f32 %v6113_v39 }
0x1f73   : > { %v6110_v56 = vpop.xlane.xlu0 %6109 }
0x1f74   : > { %9063 = vrcp.f32 %v6110_v56 }
0x1f75   : > { %v6279_v49 = vpop.permute.xlu1 %6278 }
0x1f77   : > { %v6363_v41 = vpop.permute.xlu0 %6362 }
0x1f79   : > { %v6277_v52 = vpop.permute.xlu1 %6276 }
0x1f7b   : > { %v6361_v48 = vpop.permute.xlu0 %6360 }
0x1f7f   : > { %v9062_v42 = vpop.eup %9061  ;;  %v6359_v50 = vpop.permute.xlu0 %6358 }
0x1f80   : > { %v6117_v43 = vmul.f32 %v9062_v42, %v9058_v34 }
0x1f81   : > { %v9064_v45 = vpop.eup %9063 }
0x1f82   : > { %8797 = vmatmul.mubr.msk.f32.vlgmr.msra.gmra.mxu1 %vm4095_vm6, %v6117_v43  ;;  %v6115_v47 = vmul.f32 %v9064_v45, %v9060_v36 }
0x1f83   : > { %8807 = vmatpush3.xpose.msk.msra.mxu1 %vm1383_vm3, %v6363_v41  ;;  %8810 = vmatprep.mubr.msk.f32.mxu1 %vm9111_vm2, %v9110_v13 }
0x1f84   : > { %8790 = vmatmul.mubr.msk.f32.vlgmr.msra.gmra.mxu0 %vm4095_vm6, %v6115_v47  ;;  %8808 = vmatprep.subr.mxu1 %v9110_v13 }
0x1f85   : > { %8800 = vmatpush3.xpose.msk.msra.mxu0 %vm1383_vm3, %v6281_v38  ;;  %8803 = vmatprep.mubr.msk.f32.mxu0 %vm9111_vm2, %v9110_v13 }
0x1f86   : > { %8801 = vmatprep.subr.mxu0 %v9110_v13 }
0x1f87   : > { %8809 = vmatpush3.xpose.msk.msra.mxu1 %vm1383_vm3, %v6361_v48 }
0x1f88   : > { %8820 = vmatprep.subr.mxu1 %v9110_v13 }
0x1f89   : > { %8802 = vmatpush3.xpose.msk.msra.mxu0 %vm1383_vm3, %v6279_v49 }
0x1f8a   : > { %8811 = vmatmul.mubr.msk.f32.vlgmr.msra.gmra.mxu1 %vm1383_vm3, %v6359_v50  ;;  %8813 = vmatprep.subr.mxu0 %v9110_v13 }
0x1f8b   : > { %8824 = vmatprep.mubr.msk.f32.mxu1 %vm9111_vm2, %v9110_v13 }
0x1f8c   : > { %8804 = vmatmul.mubr.msk.f32.vlgmr.msra.gmra.mxu0 %vm1383_vm3, %v6277_v52 }
0x1f8d   : > { %8817 = vmatprep.mubr.msk.f32.mxu0 %vm9111_vm2, %v9110_v13 }
0x2042   : > { %v10166_v54 = vpop.f32.mrf.mxu1 }
0x2044   : > { %v10168_v57 = vpop.f32.mrf.mxu0  ;;  %v8798_v60 = vpop.f32.mrf.mxu1 }
0x2046   : > { %v8791_v61 = vpop.f32.mrf.mxu0 }
0x204a   : > { %v6436_v0 = vpop.f32.mrf.mxu1 }
0x204b   : > { %v6441_v4 = vmul.f32 0.5, %v6436_v0 }
0x204c   : > { %v6354_v6 = vpop.f32.mrf.mxu0  ;;  %v8812_v3 = vpop.f32.mrf.mxu1 }
0x204d   : > { %v6440_v44 = vmul.f32 0.5, %v6354_v6  ;;  %v6445_v46 = vsel %vm4095_vm6, %v6441_v4, -inf }
0x204e   : > { %6446 = vmax.xlane.f32.xlu0 %v6445_v46  ;;  %v8805_v21 = vpop.f32.mrf.mxu0 }
0x204f   : > { %v6442_v23 = vsel %vm4095_vm6, %v6440_v44, -inf }
0x2050   : > { %6443 = vmax.xlane.f32.xlu1 %v6442_v23 }
0x2061   : > { %6545 = vrot.lane.b32.xlu1 %v9912_v33, %s9122_s7 }
0x2064   : > { %6466 = vrot.lane.b32.xlu0 %v9906_v7, %s9122_s7 }
0x2065   : > { %6464 = vrot.lane.b32.xlu1 %v9908_v27, %s9122_s7 }
0x2068   : > { %6543 = vrot.lane.b32.xlu0 %v9916_v5, %s9122_s7  ;;  %s10522_s7 = smov 24  }
0x2069   : > { %6626 = vrot.lane.b32.xlu1 %v9864_v51, %s9124_s0 }
0x20d7   : > { %v6447_v63 = vpop.xlane.xlu0 %6446 }
0x20d8   : > { %v6449_v1 = vsub.f32 %v6441_v4, %v6447_v63 }
0x20d9   : > { %v6444_v10 = vpop.xlane.xlu1 %6443 }
0x20da   : > { %v6452_v11 = vmul.f32 1.442695, %v6449_v1  ;;  %v6448_v12 = vsub.f32 %v6440_v44, %v6444_v10 }
0x20db   : > { %v6467_v14 = vpop.permute.xlu0 %6466 }
0x20dc   : > { %9065 = vpow2.f32 %v6452_v11  ;;  %v6450_v15 = vmul.f32 1.442695, %v6448_v12  ;;  %8814 = vmatpush3.msra.mxu0 %v6467_v14 }
0x20dd   : > { %v6546_v16 = vpop.permute.xlu1 %6545  ;;  %8815 = vmatprep.subr.mxu0 %v9110_v13 }
0x20de   : > { %9067 = vpow2.f32 %v6450_v15  ;;  %8821 = vmatpush3.msra.mxu1 %v6546_v16 }
0x20df   : > { %v6544_v17 = vpop.permute.xlu0 %6543  ;;  %8822 = vmatprep.subr.mxu1 %v9110_v13 }
0x20e0   : > { %8823 = vmatpush3.msra.mxu1 %v6544_v17 }
0x20e1   : > { %v6465_v18 = vpop.permute.xlu1 %6464  ;;  %8834 = vmatprep.subr.mxu1 %v9110_v13 }
0x20e2   : > { %8816 = vmatpush3.msra.mxu0 %v6465_v18 }
0x20e3   : > { %8827 = vmatprep.subr.mxu0 %v9110_v13 }
0x20e5   : > { %v6627_v32 = vpop.permute.xlu1 %6626 }
0x20e9   : > { %v9066_v22 = vpop.eup %9065 }
0x20ea   : > { %v6457_v28 = vsel %vm4095_vm6, %v9066_v22, 0.0 }
0x20eb   : > { %v9068_v29 = vpop.eup %9067  ;;  %6458 = vadd.xlane.f32.xlu1 %v6457_v28 }
0x20ec   : > { %v6454_v30 = vsel %vm4095_vm6, %v9068_v29, 0.0 }
0x20ed   : > { %6455 = vadd.xlane.f32.xlu0 %v6454_v30 }
0x20fc   : > { %6624 = vrot.lane.b32.xlu1 %v9866_v53, %s9124_s0 }
0x2100   : > { %6622 = vrot.lane.b32.xlu1 %v9891_v2, %s9124_s0 }
0x2103   : > { %6708 = vrot.lane.b32.xlu0 %v9871_v55, %s9124_s0 }
0x2107   : > { %6706 = vrot.lane.b32.xlu0 %v9877_v59, %s9124_s0 }
0x210b   : > { %6704 = vrot.lane.b32.xlu0 %v9889_v62, %s9124_s0 }
0x2174   : > { %v6459_v34 = vpop.xlane.xlu1 %6458 }
0x2175   : > { %9069 = vrcp.f32 %v6459_v34 }
0x2176   : > { %v6456_v35 = vpop.xlane.xlu0 %6455 }
0x2177   : > { %9071 = vrcp.f32 %v6456_v35 }
0x2178   : > { %v6625_v42 = vpop.permute.xlu1 %6624 }
0x217a   : > { %v6709_v36 = vpop.permute.xlu0 %6708 }
0x217c   : > { %v6623_v45 = vpop.permute.xlu1 %6622 }
0x217e   : > { %v6707_v41 = vpop.permute.xlu0 %6706 }
0x2182   : > { %v9070_v37 = vpop.eup %9069  ;;  %v6705_v43 = vpop.permute.xlu0 %6704 }
0x2183   : > { %v6463_v38 = vmul.f32 %v9070_v37, %v9066_v22 }
0x2184   : > { %v9072_v39 = vpop.eup %9071 }
0x2185   : > { %8825 = vmatmul.mubr.msk.f32.vlgmr.msra.gmra.mxu1 %vm4095_vm6, %v6463_v38  ;;  %v6461_v56 = vmul.f32 %v9072_v39, %v9068_v29 }
0x2186   : > { %8835 = vmatpush3.xpose.msk.msra.mxu1 %vm1383_vm3, %v6709_v36  ;;  %8838 = vmatprep.mubr.msk.f32.mxu1 %vm9111_vm2, %v9110_v13 }
0x2187   : > { %8818 = vmatmul.mubr.msk.f32.vlgmr.msra.gmra.mxu0 %vm4095_vm6, %v6461_v56  ;;  %8836 = vmatprep.subr.mxu1 %v9110_v13 }
0x2188   : > { %8828 = vmatpush3.xpose.msk.msra.mxu0 %vm1383_vm3, %v6627_v32  ;;  %8831 = vmatprep.mubr.msk.f32.mxu0 %vm9111_vm2, %v9110_v13 }
0x2189   : > { %8829 = vmatprep.subr.mxu0 %v9110_v13 }
0x218a   : > { %8837 = vmatpush3.xpose.msk.msra.mxu1 %vm1383_vm3, %v6707_v41 }
0x218b   : > { %8848 = vmatprep.subr.mxu1 %v9110_v13 }
0x218c   : > { %8830 = vmatpush3.xpose.msk.msra.mxu0 %vm1383_vm3, %v6625_v42 }
0x218d   : > { %8839 = vmatmul.mubr.msk.f32.vlgmr.msra.gmra.mxu1 %vm1383_vm3, %v6705_v43  ;;  %8841 = vmatprep.subr.mxu0 %v9110_v13 }
0x218e   : > { %8852 = vmatprep.mubr.msk.f32.mxu1 %vm9111_vm2, %v9110_v13 }
0x218f   : > { %8832 = vmatmul.mubr.msk.f32.vlgmr.msra.gmra.mxu0 %vm1383_vm3, %v6623_v45 }
0x2190   : > { %8845 = vmatprep.mubr.msk.f32.mxu0 %vm9111_vm2, %v9110_v13 }
0x2245   : > { %v10218_v47 = vpop.f32.mrf.mxu1 }
0x2247   : > { %v10220_v48 = vpop.f32.mrf.mxu0  ;;  %v8826_v49 = vpop.f32.mrf.mxu1 }
0x2249   : > { %v8819_v50 = vpop.f32.mrf.mxu0 }
0x224d   : > { %v6782_v52 = vpop.f32.mrf.mxu1 }
0x224e   : > { %v6787_v60 = vmul.f32 0.5, %v6782_v52 }
0x224f   : > { %v6700_v61 = vpop.f32.mrf.mxu0  ;;  %v8840_v0 = vpop.f32.mrf.mxu1 }
0x2250   : > { %v6786_v4 = vmul.f32 0.5, %v6700_v61  ;;  %v6791_v6 = vsel %vm4095_vm6, %v6787_v60, -inf }
0x2251   : > { %6792 = vmax.xlane.f32.xlu0 %v6791_v6  ;;  %v8833_v3 = vpop.f32.mrf.mxu0 }
0x2252   : > { %v6788_v44 = vsel %vm4095_vm6, %v6786_v4, -inf }
0x2253   : > { %6789 = vmax.xlane.f32.xlu1 %v6788_v44 }
0x2264   : > { %6891 = vrot.lane.b32.xlu1 %v9912_v33, %s9124_s0 }
0x2267   : > { %6812 = vrot.lane.b32.xlu0 %v9906_v7, %s9124_s0 }
0x2268   : > { %6810 = vrot.lane.b32.xlu1 %v9908_v27, %s9124_s0 }
0x226b   : > { %6889 = vrot.lane.b32.xlu0 %v9916_v5, %s9124_s0  ;;  %s10523_s0 = smov 28  }
0x226c   : > { %6972 = vrot.lane.b32.xlu1 %v9864_v51, %s9126_s10 }
0x22da   : > { %v6793_v46 = vpop.xlane.xlu0 %6792 }
0x22db   : > { %v6795_v21 = vsub.f32 %v6787_v60, %v6793_v46 }
0x22dc   : > { %v6790_v23 = vpop.xlane.xlu1 %6789 }
0x22dd   : > { %v6798_v63 = vmul.f32 1.442695, %v6795_v21  ;;  %v6794_v1 = vsub.f32 %v6786_v4, %v6790_v23 }
0x22de   : > { %v6813_v10 = vpop.permute.xlu0 %6812 }
0x22df   : > { %9073 = vpow2.f32 %v6798_v63  ;;  %v6796_v11 = vmul.f32 1.442695, %v6794_v1  ;;  %8842 = vmatpush3.msra.mxu0 %v6813_v10 }
0x22e0   : > { %v6892_v12 = vpop.permute.xlu1 %6891  ;;  %8843 = vmatprep.subr.mxu0 %v9110_v13 }
0x22e1   : > { %9075 = vpow2.f32 %v6796_v11  ;;  %8849 = vmatpush3.msra.mxu1 %v6892_v12 }
0x22e2   : > { %v6890_v14 = vpop.permute.xlu0 %6889  ;;  %8850 = vmatprep.subr.mxu1 %v9110_v13 }
0x22e3   : > { %8851 = vmatpush3.msra.mxu1 %v6890_v14 }
0x22e4   : > { %v6811_v15 = vpop.permute.xlu1 %6810  ;;  %8862 = vmatprep.subr.mxu1 %v9110_v13 }
0x22e5   : > { %8844 = vmatpush3.msra.mxu0 %v6811_v15 }
0x22e6   : > { %8855 = vmatprep.subr.mxu0 %v9110_v13 }
0x22e8   : > { %v6973_v22 = vpop.permute.xlu1 %6972 }
0x22ec   : > { %v9074_v51 = vpop.eup %9073 }
0x22ed   : > { %v6803_v16 = vsel %vm4095_vm6, %v9074_v51, 0.0 }
0x22ee   : > { %v9076_v17 = vpop.eup %9075  ;;  %6804 = vadd.xlane.f32.xlu1 %v6803_v16 }
0x22ef   : > { %v6800_v18 = vsel %vm4095_vm6, %v9076_v17, 0.0 }
0x22f0   : > { %6801 = vadd.xlane.f32.xlu0 %v6800_v18 }
0x22ff   : > { %6970 = vrot.lane.b32.xlu1 %v9866_v53, %s9126_s10 }
0x2303   : > { %6968 = vrot.lane.b32.xlu1 %v9891_v2, %s9126_s10 }
0x2306   : > { %7054 = vrot.lane.b32.xlu0 %v9871_v55, %s9126_s10 }
0x230a   : > { %7052 = vrot.lane.b32.xlu0 %v9877_v59, %s9126_s10 }
0x230e   : > { %7050 = vrot.lane.b32.xlu0 %v9889_v62, %s9126_s10 }
0x2377   : > { %v6805_v28 = vpop.xlane.xlu1 %6804 }
0x2378   : > { %9077 = vrcp.f32 %v6805_v28 }
0x2379   : > { %v6802_v29 = vpop.xlane.xlu0 %6801 }
0x237a   : > { %9079 = vrcp.f32 %v6802_v29 }
0x237b   : > { %v6971_v55 = vpop.permute.xlu1 %6970 }
0x237d   : > { %v7055_v30 = vpop.permute.xlu0 %7054 }
0x237f   : > { %v6969_v62 = vpop.permute.xlu1 %6968 }
0x2381   : > { %v7053_v35 = vpop.permute.xlu0 %7052 }
0x2385   : > { %v9078_v32 = vpop.eup %9077  ;;  %v7051_v59 = vpop.permute.xlu0 %7050 }
0x2386   : > { %v6809_v53 = vmul.f32 %v9078_v32, %v9074_v51 }
0x2387   : > { %v9080_v34 = vpop.eup %9079 }
0x2388   : > { %8853 = vmatmul.mubr.msk.f32.vlgmr.msra.gmra.mxu1 %vm4095_vm6, %v6809_v53  ;;  %v6807_v2 = vmul.f32 %v9080_v34, %v9076_v17 }
0x2389   : > { %8863 = vmatpush3.xpose.msk.msra.mxu1 %vm1383_vm3, %v7055_v30  ;;  %8866 = vmatprep.mubr.msk.f32.mxu1 %vm9111_vm2, %v9110_v13 }
0x238a   : > { %8846 = vmatmul.mubr.msk.f32.vlgmr.msra.gmra.mxu0 %vm4095_vm6, %v6807_v2  ;;  %8864 = vmatprep.subr.mxu1 %v9110_v13 }
0x238b   : > { %8856 = vmatpush3.xpose.msk.msra.mxu0 %vm1383_vm3, %v6973_v22  ;;  %8859 = vmatprep.mubr.msk.f32.mxu0 %vm9111_vm2, %v9110_v13 }
0x238c   : > { %8857 = vmatprep.subr.mxu0 %v9110_v13 }
0x238d   : > { %8865 = vmatpush3.xpose.msk.msra.mxu1 %vm1383_vm3, %v7053_v35 }
0x238e   : > { %8876 = vmatprep.subr.mxu1 %v9110_v13 }
0x238f   : > { %8858 = vmatpush3.xpose.msk.msra.mxu0 %vm1383_vm3, %v6971_v55 }
0x2390   : > { %8867 = vmatmul.mubr.msk.f32.vlgmr.msra.gmra.mxu1 %vm1383_vm3, %v7051_v59  ;;  %8869 = vmatprep.subr.mxu0 %v9110_v13 }
0x2391   : > { %8880 = vmatprep.mubr.msk.f32.mxu1 %vm9111_vm2, %v9110_v13 }
0x2392   : > { %8860 = vmatmul.mubr.msk.f32.vlgmr.msra.gmra.mxu0 %vm1383_vm3, %v6969_v62 }
0x2393   : > { %8873 = vmatprep.mubr.msk.f32.mxu0 %vm9111_vm2, %v9110_v13 }
0x2448   : > { %v6964_v36 = vpop.f32.mrf.mxu1 }
0x244a   : > { %v6885_v37 = vpop.f32.mrf.mxu0  ;;  %v8854_v38 = vpop.f32.mrf.mxu1 }
0x244c   : > { %v8847_v39 = vpop.f32.mrf.mxu0 }
0x2450   : > { %v7128_v56 = vpop.f32.mrf.mxu1 }
0x2451   : > { %v7133_v41 = vmul.f32 0.5, %v7128_v56 }
0x2452   : > { %v7046_v42 = vpop.f32.mrf.mxu0  ;;  %v8868_v43 = vpop.f32.mrf.mxu1 }
0x2453   : > { %v7132_v45 = vmul.f32 0.5, %v7046_v42  ;;  %v7137_v49 = vsel %vm4095_vm6, %v7133_v41, -inf }
0x2454   : > { %7138 = vmax.xlane.f32.xlu0 %v7137_v49  ;;  %v8861_v50 = vpop.f32.mrf.mxu0 }
0x2455   : > { %v7134_v52 = vsel %vm4095_vm6, %v7132_v45, -inf }
0x2456   : > { %7135 = vmax.xlane.f32.xlu1 %v7134_v52 }
0x2467   : > { %7237 = vrot.lane.b32.xlu1 %v9912_v33, %s9126_s10 }
0x246a   : > { %7158 = vrot.lane.b32.xlu0 %v9906_v7, %s9126_s10 }
0x24dd   : > { %v7139_v60 = vpop.xlane.xlu0 %7138 }
0x24de   : > { %v7141_v61 = vsub.f32 %v7133_v41, %v7139_v60 }
0x24df   : > { %v7136_v0 = vpop.xlane.xlu1 %7135 }
0x24e0   : > { %v7144_v4 = vmul.f32 1.442695, %v7141_v61  ;;  %v7140_v6 = vsub.f32 %v7132_v45, %v7136_v0 }
0x24e1   : > { %v7159_v3 = vpop.permute.xlu0 %7158 }
0x24e2   : > { %9081 = vpow2.f32 %v7144_v4  ;;  %v7142_v44 = vmul.f32 1.442695, %v7140_v6  ;;  %8870 = vmatpush3.msra.mxu0 %v7159_v3 }
0x24e3   : > { %v7238_v46 = vpop.permute.xlu1 %7237  ;;  %8871 = vmatprep.subr.mxu0 %v9110_v13 }
0x24e4   : > { %9083 = vpow2.f32 %v7142_v44  ;;  %8877 = vmatpush3.msra.mxu1 %v7238_v46 }
0x24e5   : > { %8878 = vmatprep.subr.mxu1 %v9110_v13 }
0x24ef   : > { %v9082_v33 = vpop.eup %9081 }
0x24f0   : > { %v7149_v21 = vsel %vm4095_vm6, %v9082_v33, 0.0 }
0x24f1   : > { %v9084_v7 = vpop.eup %9083  ;;  %7150 = vadd.xlane.f32.xlu1 %v7149_v21 }
0x24f2   : > { %v7146_v23 = vsel %vm4095_vm6, %v9084_v7, 0.0 }
0x24f3   : > { %7147 = vadd.xlane.f32.xlu0 %v7146_v23  ;;  %v7525_v23 = vld [vmem:[%s9355_s12 + $0x18] sm:$0xff] }
0x2502   : > { %7156 = vrot.lane.b32.xlu1 %v9908_v27, %s9126_s10 }
0x2506   : > { %7316 = vrot.lane.b32.xlu1 %v10012_v26, %s9127_s30 }
0x2509   : > { %7235 = vrot.lane.b32.xlu0 %v9916_v5, %s9126_s10 }
0x250a   : > { %7324 = vrot.lane.b32.xlu1 %v10064_v9, %s10518_s18 }
0x250d   : > { %7318 = vrot.lane.b32.xlu0 %v10010_v24, %s9127_s30  ;;  %s10524_s30 = scalar_lea.vmem %s10420_s16, %s9286_s8 }
0x250e   : > { %7332 = vrot.lane.b32.xlu1 %v10116_v31, %s10519_s25  ;;  %v7387_v31 = vld [vmem:[%s9346_s24 + $0x18] sm:$0xff]  ;;  %v8181_v42 = vld [vmem:[%s10524_s30] ss:$0 sm:$0xff] }
0x2511   : > { %7326 = vrot.lane.b32.xlu0 %v10062_v8, %s10518_s18 }
0x2512   : > { %7340 = vrot.lane.b32.xlu1 %v10168_v57, %s10520_s1  ;;  %v7385_v57 = vld [vmem:[%s9346_s24 + $0x8] sm:$0xff] }
0x2515   : > { %7334 = vrot.lane.b32.xlu0 %v10114_v25, %s10519_s25  ;;  %s10531_s25 = sld [smem:[#allocation26_spill]] }
0x2516   : > { %7348 = vrot.lane.b32.xlu1 %v10220_v48, %s10521_s6 }
0x2519   : > { %7342 = vrot.lane.b32.xlu0 %v10166_v54, %s10520_s1  ;;  %v7386_v54 = vld [vmem:[%s9346_s24 + $0x10] sm:$0xff] }
0x251a   : > { %7356 = vrot.lane.b32.xlu1 %v6885_v37, %s10522_s7 }
0x251b   : > { %s10532_s1 = scalar_lea.vmem %s10531_s25, %s9286_s8 }
0x251d   : > { %7350 = vrot.lane.b32.xlu0 %v10218_v47, %s10521_s6  ;;  %v7384_v47 = vld [vmem:[%s9346_s24] sm:$0xff] }
0x2521   : > { %7358 = vrot.lane.b32.xlu0 %v6964_v36, %s10522_s7 }
0x257a   : > { %v7151_v13 = vpop.xlane.xlu1 %7150 }
0x257b   : > { %9085 = vrcp.f32 %v7151_v13  ;;  %v7524_v13 = vld [vmem:[%s9355_s12 + $0x10] sm:$0xff] }
0x257c   : > { %v7148_v27 = vpop.xlane.xlu0 %7147 }
0x257d   : > { %9087 = vrcp.f32 %v7148_v27  ;;  %v7523_v27 = vld [vmem:[%s9355_s12 + $0x8] sm:$0xff] }
0x257e   : > { %v7157_v5 = vpop.permute.xlu1 %7156 }
0x257f   : > { %8872 = vmatpush3.msra.mxu0 %v7157_v5  ;;  %v7522_v5 = vld [vmem:[%s9355_s12] sm:$0xff] }
0x2580   : > { %v7236_v24 = vpop.permute.xlu0 %7235  ;;  %8883 = vmatprep.subr.mxu0 %v7387_v31 }
0x2581   : > { %8879 = vmatpush3.msra.mxu1 %v7236_v24  ;;  %v7623_v24 = vld [vmem:[%s10525_s29 + $0x38] sm:$0xff] }
0x2582   : > { %v7317_v12 = vpop.permute.xlu1 %7316  ;;  %8894 = vmatprep.subr.mxu1 %v7525_v23 }
0x2583   : > { %v7370_v29 = vsel %vm1383_vm3, %v9960_v20, %v7317_v12 }
0x2584   : > { %v7319_v11 = vpop.permute.xlu0 %7318 }
0x2585   : > { %v7371_v32 = vsel %vm1383_vm3, %v9958_v40, %v7319_v11 }
0x2586   : > { %v7325_v15 = vpop.permute.xlu1 %7324 }
0x2587   : > { %v7372_v53 = vsel %vm1537_vm4, %v7370_v29, %v7325_v15  ;;  %v8185_v15 = vld [vmem:[%s10528_s13] ss:$0 sm:$0xff] }
0x2588   : > { %v9086_v26 = vpop.eup %9085  ;;  %v7327_v14 = vpop.permute.xlu0 %7326  ;;  %v7616_v29 = vld [vmem:[%s10525_s29] sm:$0xff] }
0x2589   : > { %v7155_v8 = vmul.f32 %v9086_v26, %v9082_v33  ;;  %v7373_v2 = vsel %vm1537_vm4, %v7371_v32, %v7327_v14  ;;  %v7622_v26 = vld [vmem:[%s10525_s29 + $0x30] sm:$0xff] }
0x258a   : > { %v9088_v9 = vpop.eup %9087  ;;  %v7333_v16 = vpop.permute.xlu1 %7332 }
0x258b   : > { %8881 = vmatmul.mubr.msk.f32.vlgmr.msra.gmra.mxu1 %vm4095_vm6, %v7155_v8  ;;  %v7153_v25 = vmul.f32 %v9088_v9, %v9084_v7  ;;  %v7374_v35 = vsel %vm4092_vm5, %v7372_v53, %v7333_v16  ;;  %v7621_v8 = vld [vmem:[%s10525_s29 + $0x28] sm:$0xff]  ;;  %v7620_v9 = vld [vmem:[%s10525_s29 + $0x20] sm:$0xff] }
0x258c   : > { %v7335_v51 = vpop.permute.xlu0 %7334  ;;  %8895 = vmatpush3.msra.mxu1 %v7525_v23 }
0x258d   : > { %8874 = vmatmul.mubr.msk.f32.vlgmr.msra.gmra.mxu0 %vm4095_vm6, %v7153_v25  ;;  %v7375_v55 = vsel %vm4092_vm5, %v7373_v2, %v7335_v51  ;;  %8896 = vmatprep.subr.mxu1 %v7524_v13 }
0x258e   : > { %8884 = vmatpush3.msra.mxu0 %v7387_v31  ;;  %v7341_v18 = vpop.permute.xlu1 %7340  ;;  %8897 = vmatpush3.msra.mxu1 %v7524_v13 }
0x258f   : > { %8885 = vmatprep.subr.mxu0 %v7386_v54  ;;  %v7376_v59 = vsel %vm4095_vm6, %v7374_v35, %v7341_v18  ;;  %8898 = vmatprep.subr.mxu1 %v7523_v27  ;;  %v7619_v18 = vld [vmem:[%s10525_s29 + $0x18] sm:$0xff] }
0x2590   : > { %8886 = vmatpush3.msra.mxu0 %v7386_v54  ;;  %v7343_v17 = vpop.permute.xlu0 %7342  ;;  %8899 = vmatpush3.msra.mxu1 %v7523_v27 }
0x2591   : > { %8887 = vmatprep.subr.mxu0 %v7385_v57  ;;  %v7377_v62 = vsel %vm4095_vm6, %v7375_v55, %v7343_v17  ;;  %8900 = vmatprep.subr.mxu1 %v7522_v5 }
0x2592   : > { %8888 = vmatpush3.msra.mxu0 %v7385_v57  ;;  %v7349_v28 = vpop.permute.xlu1 %7348  ;;  %8901 = vmatpush3.msra.mxu1 %v7522_v5 }
0x2593   : > { %8889 = vmatprep.subr.mxu0 %v7384_v47  ;;  %v7378_v20 = vsel %vm4098_vm7, %v7376_v59, %v7349_v28  ;;  %v7617_v28 = vld [vmem:[%s10525_s29 + $0x8] sm:$0xff]  ;;  %v8189_v59 = vld [vmem:[%s10532_s1] ss:$0 sm:$0xff] }
0x2594   : > { %8890 = vmatpush3.msra.mxu0 %v7384_v47  ;;  %v7351_v22 = vpop.permute.xlu0 %7350 }
0x2595   : > { %v7379_v37 = vsel %vm4098_vm7, %v7377_v62, %v7351_v22  ;;  %8905 = vmatprep.subr.mxu0 %v7623_v24  ;;  %v7618_v22 = vld [vmem:[%s10525_s29 + $0x10] sm:$0xff]  ;;  %s10535_s29 = sld [smem:[#allocation29_spill]] }
0x2596   : > { %v7357_v34 = vpop.permute.xlu1 %7356 }
0x2597   : > { %v7380_v40 = vsel %vm4101_vm8, %v7378_v20, %v7357_v34 }
0x2598   : > { %v7359_v30 = vpop.permute.xlu0 %7358 }
0x2599   : > { %v7381_v39 = vsel %vm4101_vm8, %v7379_v37, %v7359_v30  ;;  %v8186_v30 = vld [vmem:[%s10530_s19] ss:$0 sm:$0xff] }
0x259b   : > { %s10536_s12 = scalar_lea.vmem %s10535_s29, %s9286_s8 }
0x259c   : > { %v8193_v23 = vld [vmem:[%s10536_s12] ss:$0 sm:$0xff] }
0x264b   : > { %v7310_v48 = vpop.f32.mrf.mxu1 }
0x264c   : > { %7366 = vrot.lane.b32.xlu0 %v7310_v48, %s10523_s0 }
0x264d   : > { %v7231_v63 = vpop.f32.mrf.mxu0  ;;  %v8882_v1 = vpop.f32.mrf.mxu1 }
0x264e   : > { %7364 = vrot.lane.b32.xlu1 %v7231_v63, %s10523_s0  ;;  %v8184_v1 = vld [vmem:[%s10526_s11] ss:$0 sm:$0xff]  ;;  %s10533_s0 = sld [smem:[#allocation28_spill]] }
0x264f   : > { %v8875_v10 = vpop.f32.mrf.mxu0 }
0x2654   : > { %s10534_s24 = scalar_lea.vmem %s10533_s0, %s9286_s8 }
0x26be   : > { %v7367_v36 = vpop.permute.xlu0 %7366 }
0x26bf   : > { %v7383_v41 = vsel %vm4104_vm9, %v7381_v39, %v7367_v36 }
0x26c0   : > { %v7365_v38 = vpop.permute.xlu1 %7364 }
0x26c1   : > { %v7382_v56 = vsel %vm4104_vm9, %v7380_v40, %v7365_v38 }
0x26c2   : > { %8891 = vmatprep.mubr.msk.f32.mxu0 %vm1206_vm1, %v7382_v56 }
0x26c3   : > { %8892 = vmatmul.mubr.msk.f32.vlgmr.msra.gmra.mxu0 %vm1206_vm1, %v7383_v41 }
0x26c4   : > { %8906 = vmatpush3.msra.mxu0 %v7623_v24 }
0x26c5   : > { %8907 = vmatprep.subr.mxu0 %v7622_v26 }
0x26c6   : > { %8908 = vmatpush3.msra.mxu0 %v7622_v26 }
0x26c7   : > { %8909 = vmatprep.subr.mxu0 %v7621_v8 }
0x26c8   : > { %8910 = vmatpush3.msra.mxu0 %v7621_v8 }
0x26c9   : > { %8911 = vmatprep.subr.mxu0 %v7620_v9 }
0x26ca   : > { %8912 = vmatpush3.msra.mxu0 %v7620_v9 }
0x26cb   : > { %8913 = vmatprep.subr.mxu0 %v7619_v18 }
0x26cc   : > { %8914 = vmatpush3.msra.mxu0 %v7619_v18 }
0x26cd   : > { %8915 = vmatprep.subr.mxu0 %v7618_v22 }
0x26ce   : > { %8916 = vmatpush3.msra.mxu0 %v7618_v22 }
0x26cf   : > { %8917 = vmatprep.subr.mxu0 %v7617_v28 }
0x26d0   : > { %8918 = vmatpush3.msra.mxu0 %v7617_v28 }
0x26d1   : > { %8919 = vmatprep.subr.mxu0 %v7616_v29 }
0x26d2   : > { %8920 = vmatpush3.msra.mxu0 %v7616_v29 }
0x2783   : > { %v8893_v43 = vpop.f32.mrf.mxu0 }
0x2784   : > { %v7473_v45 = vadd.f32 %v8893_v43, %v8181_v42 }
0x2785   : > { %v7467_v49 = vpop.f32.mrf.mxu0 }
0x2786   : > { %v7477_v50 = vadd.f32 %v7473_v45, %v9832_v58  ;;  %v7468_v52 = vadd.f32 %v8181_v42, %v7467_v49 }
0x2788   : > { %v7476_v60 = vadd.f32 %v7468_v52, %v9834_v19  ;;  %v7483_v61 = vsel %vm1206_vm1, %v7477_v50, 0.0 }
0x2789   : > { %7484 = vadd.xlane.f32.xlu0 %v7483_v61 }
0x278a   : > { %v7480_v0 = vsel %vm1206_vm1, %v7476_v60, 0.0 }
0x278b   : > { %7481 = vadd.xlane.f32.xlu1 %v7480_v0 }
0x2812   : > { %v7485_v4 = vpop.xlane.xlu0 %7484 }
0x2813   : > { %v7487_v6 = vmul.f32 0.03125, %v7485_v4 }
0x2814   : > { %v7482_v3 = vpop.xlane.xlu1 %7481 }
0x2815   : > { %v7489_v44 = vsub.f32 %v7477_v50, %v7487_v6  ;;  %v7486_v46 = vmul.f32 0.03125, %v7482_v3 }
0x2817   : > { %v7488_v33 = vsub.f32 %v7476_v60, %v7486_v46  ;;  %v7491_v58 = vmul.f32 %v7489_v44, %v7489_v44 }
0x2819   : > { %v7495_v21 = vsel %vm1206_vm1, %v7491_v58, 0.0  ;;  %v7490_v19 = vmul.f32 %v7488_v33, %v7488_v33 }
0x281a   : > { %7496 = vadd.xlane.f32.xlu1 %v7495_v21  ;;  %v8192_v21 = vld [vmem:[%s10534_s24] ss:$0 sm:$0xff] }
0x281b   : > { %v7492_v7 = vsel %vm1206_vm1, %v7490_v19, 0.0 }
0x281c   : > { %7493 = vadd.xlane.f32.xlu0 %v7492_v7 }
0x28a3   : > { %v7497_v25 = vpop.xlane.xlu1 %7496 }
0x28a4   : > { %v7499_v31 = vmul.f32 0.03125, %v7497_v25 }
0x28a5   : > { %v7494_v54 = vpop.xlane.xlu0 %7493 }
0x28a6   : > { %v7501_v57 = vadd.f32 1e-05, %v7499_v31  ;;  %v7498_v47 = vmul.f32 0.03125, %v7494_v54 }
0x28a8   : > { %9089 = vrsqrt.f32 %v7501_v57  ;;  %v7500_v48 = vadd.f32 1e-05, %v7498_v47 }
0x28aa   : > { %9091 = vrsqrt.f32 %v7500_v48 }
0x28b5   : > { %v9090_v63 = vpop.eup %9089 }
0x28b6   : > { %v7505_v10 = vmul.f32 %v9090_v63, %v7489_v44 }
0x28b7   : > { %v9092_v11 = vpop.eup %9091 }
0x28b8   : > { %v7504_v12 = vmul.f32 %v9092_v11, %v7488_v33  ;;  %v7513_v14 = vmul.f32 %v8184_v1, %v7505_v10 }
0x28ba   : > { %v7512_v51 = vmul.f32 %v8184_v1, %v7504_v12  ;;  %v7521_v17 = vadd.f32 %v8185_v15, %v7513_v14 }
0x28bc   : > { %v7520_v16 = vadd.f32 %v8185_v15, %v7512_v51 }
0x28be   : > { %8902 = vmatprep.mubr.msk.f32.mxu1 %vm1206_vm1, %v7520_v16 }
0x28bf   : > { %8903 = vmatmul.mubr.msk.f32.vlgmr.msra.gmra.mxu1 %vm1206_vm1, %v7521_v17 }
0x297f   : > { %v8904_v32 = vpop.f32.mrf.mxu1 }
0x2980   : > { %v7611_v53 = vadd.f32 %v8904_v32, %v8186_v30 }
0x2981   : > { %v7605_v34 = vpop.f32.mrf.mxu1 }
0x2982   : > { %v7606_v2 = vadd.f32 %v8186_v30, %v7605_v34  ;;  %v7615_v55 = vmax.f32 %v7611_v53, 0.0 }
0x2984   : > { %v7614_v35 = vmax.f32 %v7606_v2, 0.0 }
0x2986   : > { %8921 = vmatprep.mubr.msk.f32.mxu0 %vm7631_vm10, %v7614_v35 }
0x2987   : > { %8922 = vmatmul.mubr.msk.f32.vlgmr.msra.gmra.mxu0 %vm7631_vm10, %v7615_v55 }
0x2a47   : > { %v8923_v62 = vpop.f32.mrf.mxu0 }
0x2a48   : > { %v7710_v20 = vadd.f32 %v8923_v62, %v8189_v59 }
0x2a49   : > { %v7704_v36 = vpop.f32.mrf.mxu0 }
0x2a4a   : > { %v7714_v37 = vadd.f32 %v7710_v20, %v7521_v17  ;;  %v7705_v40 = vadd.f32 %v8189_v59, %v7704_v36 }
0x2a4c   : > { %v7713_v38 = vadd.f32 %v7705_v40, %v7520_v16  ;;  %v7720_v39 = vsel %vm1206_vm1, %v7714_v37, 0.0 }
0x2a4d   : > { %7721 = vadd.xlane.f32.xlu1 %v7720_v39 }
0x2a4e   : > { %v7717_v56 = vsel %vm1206_vm1, %v7713_v38, 0.0 }
0x2a4f   : > { %7718 = vadd.xlane.f32.xlu0 %v7717_v56 }
0x2ad6   : > { %v7722_v41 = vpop.xlane.xlu1 %7721 }
0x2ad7   : > { %v7724_v42 = vmul.f32 0.03125, %v7722_v41 }
0x2ad8   : > { %v7719_v43 = vpop.xlane.xlu0 %7718 }
0x2ad9   : > { %v7726_v45 = vsub.f32 %v7714_v37, %v7724_v42  ;;  %v7723_v49 = vmul.f32 0.03125, %v7719_v43 }
0x2adb   : > { %v7725_v50 = vsub.f32 %v7713_v38, %v7723_v49  ;;  %v7728_v52 = vmul.f32 %v7726_v45, %v7726_v45 }
0x2add   : > { %v7732_v60 = vsel %vm1206_vm1, %v7728_v52, 0.0  ;;  %v7727_v61 = vmul.f32 %v7725_v50, %v7725_v50 }
0x2ade   : > { %7733 = vadd.xlane.f32.xlu1 %v7732_v60 }
0x2adf   : > { %v7729_v0 = vsel %vm1206_vm1, %v7727_v61, 0.0 }
0x2ae0   : > { %7730 = vadd.xlane.f32.xlu0 %v7729_v0 }
0x2b67   : > { %v7734_v4 = vpop.xlane.xlu1 %7733 }
0x2b68   : > { %v7736_v6 = vmul.f32 0.03125, %v7734_v4 }
0x2b69   : > { %v7731_v3 = vpop.xlane.xlu0 %7730 }
0x2b6a   : > { %v7738_v44 = vadd.f32 1e-05, %v7736_v6  ;;  %v7735_v46 = vmul.f32 0.03125, %v7731_v3 }
0x2b6c   : > { %9093 = vrsqrt.f32 %v7738_v44  ;;  %v7737_v33 = vadd.f32 1e-05, %v7735_v46 }
0x2b6e   : > { %9095 = vrsqrt.f32 %v7737_v33 }
0x2b79   : > { %v9094_v58 = vpop.eup %9093 }
0x2b7a   : > { %v7742_v19 = vmul.f32 %v9094_v58, %v7726_v45 }
0x2b7b   : > { %v9096_v7 = vpop.eup %9095 }
0x2b7c   : > { %v7750_v13 = vmul.f32 %v8192_v21, %v7742_v19  ;;  %v7741_v27 = vmul.f32 %v9096_v7, %v7725_v50 }
0x2b7e   : > { %v7758_v5 = vadd.f32 %v8193_v23, %v7750_v13  ;;  %v7749_v24 = vmul.f32 %v8192_v21, %v7741_v27 }
0x2b80   : > { %7760 = vst.msk [vmem:[#allocation2 + $0x8] sm:$0xff] %vm1206_vm1, %v7758_v5  ;;  %7762 = vst.msk [vmem:[%s10537_s2 + $0x8] sm:$0xff] %vm1206_vm1, %v7758_v5  ;;  %v7757_v26 = vadd.f32 %v8193_v23, %v7749_v24 }
0x2b82   : > { %7759 = vst.msk [vmem:[#allocation2] sm:$0xff] %vm1206_vm1, %v7757_v26  ;;  %7761 = vst.msk [vmem:[%s10537_s2] sm:$0xff] %vm1206_vm1, %v7757_v26 }
0x2b83 PF: > { %s10538_s8 = sld [smem:[#allocation3_spill]] }
0x2b89   : > { %s37_s7 = sadd.s32 1, %s10538_s8  }
0x2b8a   : > { %p34_p5 = scmp.ge.s32.totalorder %s37_s7, 8  }
0x2b8c   :  { %36 = sbr.rel (!%p34_p5) target bundleno = 24 (0x18), region = 227 }

</bundles_post_ra>
